<compile_context>
chip_gen: v5e
topology: v5e:2x2
jax: 0.10.0
libtpu: 0.0.40
codegen_flags: <defaults>
</compile_context>

<pallas_src>
import math
import jax
import jax.numpy as jnp
from jax.experimental import pallas as pl
from jax.experimental.pallas import tpu as pltpu

# ----------------------------- configuration ------------------------------------
BS = 2          # batch size
RS = 8          # reference-set size (x)
CS = 8          # style-set size (s)
C_IN = 3        # image channels
IMG = 16        # image H = W
Z_DIM = 32      # style z dim
LATENT = 32     # opts.latent == w_dim == style_dim
N_STYLES = 4    # decoder.num_ws
N_HEADS = 4     # opts.n_heads
ATTN_LAYERS = 2 # opts.attn_layers
CONV_F = 32     # encoder stem channels
LRELU_SLOPE = 0.01
MEAN_CENTER = True

K_RAW = C_IN * 9          # 27 (Cin * kh * kw)
K_PAD = 32                # lane-friendly padded contraction dim
TN_ENC = 8                # images per encoder grid step
ENC_CHUNKS = 4            # inner fori_loop chunks per encoder grid step


# ----------------------------- fused encoder kernel -----------------------------
def make_encoder_kernel(n_chunks, chunk_rows):
    """conv(im2col matmul) + LeakyReLU + global-avg-pool + head linear + centering."""

    def kernel(p_ref, pool_ref, convw_ref, convb_ref, headw_ref, headb_ref,
               avg_ref, o_ref):
        tn = o_ref.shape[0]
        f = convw_ref.shape[1]

        def body(c, acc):
            off = pl.multiple_of(c * chunk_rows, chunk_rows)
            rows = p_ref[pl.ds(off, chunk_rows), :]                       # (chunk, K_PAD)
            feat = jnp.dot(rows, convw_ref[...],
                           preferred_element_type=jnp.float32) + convb_ref[...]
            feat = jnp.where(feat > 0, feat, LRELU_SLOPE * feat)          # LeakyReLU
            # block-diagonal mean-pool matrix -> per-image pooled contribution
            return acc + jnp.dot(pool_ref[c], feat,
                                 preferred_element_type=jnp.float32)      # (tn, F)

        pooled = jax.lax.fori_loop(0, n_chunks, body,
                                   jnp.zeros((tn, f), jnp.float32))
        codes = jnp.dot(pooled, headw_ref[...],
                        preferred_element_type=jnp.float32) + headb_ref[...]
        o_ref[...] = codes - avg_ref[...]                                  # mean-center

    return kernel


def encoder_forward(params, x_imgs, avg_vec):
    """x_imgs: (N, C, H, W) NCHW -> (N, n_styles*latent), mean-centered."""
    N, C, Hh, Ww = x_imgs.shape
    HW = Hh * Ww
    # im2col (3x3, pad=1, stride=1) with PyTorch (Cin, kh, kw) flattening order
    xp = jnp.pad(x_imgs, ((0, 0), (0, 0), (1, 1), (1, 1)))
    cols = [xp[:, :, r:r + Hh, c:c + Ww] for r in range(3) for c in range(3)]
    patches = jnp.stack(cols, axis=2)                                  # (N, C, 9, H, W)
    patches = patches.transpose(0, 3, 4, 1, 2).reshape(N * HW, C * 9)
    patches = jnp.pad(patches, ((0, 0), (0, K_PAD - C * 9)))           # lane-pad 27->32

    assert N % TN_ENC == 0
    rows_per_step = TN_ENC * HW
    chunk = rows_per_step // ENC_CHUNKS
    out_dim = N_STYLES * LATENT

    # block-diagonal mean-pool matrix, pre-split into per-chunk slabs
    pool = jnp.kron(jnp.eye(TN_ENC, dtype=jnp.float32),
                    jnp.full((1, HW), 1.0 / HW, jnp.float32))          # (TN, TN*HW)
    pool = pool.reshape(TN_ENC, ENC_CHUNKS, chunk).transpose(1, 0, 2)  # (chunks, TN, chunk)
    avg_rep = jnp.tile(avg_vec, (N_STYLES,)).reshape(1, out_dim)

    kernel = make_encoder_kernel(ENC_CHUNKS, chunk)
    return pl.pallas_call(
        kernel,
        out_shape=jax.ShapeDtypeStruct((N, out_dim), jnp.float32),
        grid=(N // TN_ENC,),
        in_specs=[
            pl.BlockSpec((rows_per_step, K_PAD), lambda i: (i, 0)),
            pl.BlockSpec((ENC_CHUNKS, TN_ENC, chunk), lambda i: (0, 0, 0)),
            pl.BlockSpec((K_PAD, CONV_F), lambda i: (0, 0)),
            pl.BlockSpec((1, CONV_F), lambda i: (0, 0)),
            pl.BlockSpec((CONV_F, out_dim), lambda i: (0, 0)),
            pl.BlockSpec((1, out_dim), lambda i: (0, 0)),
            pl.BlockSpec((1, out_dim), lambda i: (0, 0)),
        ],
        out_specs=pl.BlockSpec((TN_ENC, out_dim), lambda i: (i, 0)),
        compiler_params=pltpu.CompilerParams(dimension_semantics=("parallel",)),
    )(patches, pool, params["conv_w"], params["conv_b"],
      params["head_w"], params["head_b"], avg_rep)


# ----------------------------- fused mapping kernel ------------------------------
def map_kernel(z_ref, w1_ref, b1_ref, w2_ref, b2_ref, avg_ref, o_ref):
    h = jnp.dot(z_ref[...], w1_ref[...], preferred_element_type=jnp.float32) + b1_ref[...]
    h = jnp.where(h > 0, h, LRELU_SLOPE * h)
    w = jnp.dot(h, w2_ref[...], preferred_element_type=jnp.float32) + b2_ref[...]
    o_ref[...] = w - avg_ref[...]


def mapping_forward(params, z2d, avg_vec):
    """z2d: (M, z_dim) -> mean-centered W latents (M, latent).  (Broadcast over
       n_styles is implicit: every style sees the same mapped latent.)"""
    M = z2d.shape[0]
    return pl.pallas_call(
        map_kernel,
        out_shape=jax.ShapeDtypeStruct((M, LATENT), jnp.float32),
        grid=(1,),
        in_specs=[
            pl.BlockSpec((M, Z_DIM), lambda i: (0, 0)),
            pl.BlockSpec((Z_DIM, LATENT), lambda i: (0, 0)),
            pl.BlockSpec((1, LATENT), lambda i: (0, 0)),
            pl.BlockSpec((LATENT, LATENT), lambda i: (0, 0)),
            pl.BlockSpec((1, LATENT), lambda i: (0, 0)),
            pl.BlockSpec((1, LATENT), lambda i: (0, 0)),
        ],
        out_specs=pl.BlockSpec((M, LATENT), lambda i: (0, 0)),
        compiler_params=pltpu.CompilerParams(dimension_semantics=("arbitrary",)),
    )(z2d, params["map_w1"], params["map_b1"], params["map_w2"], params["map_b2"],
      avg_vec.reshape(1, LATENT))


# ----------------------------- StyleAttention Pallas kernel ---------------------
def make_style_attn_kernel(L, bs, cs, rs, d, n_heads):
    dh = d // n_heads
    scale = 1.0 / math.sqrt(dh)

    def kernel(sq_ref, z_ref, wqkv_s_ref, wo_s_ref, wq_c_ref, wkv_c_ref, wo_c_ref,
               wff1_ref, bff1_ref, wff2_ref, bff2_ref, ln_ref, temp_ref,
               wsca_ref, wscb_ref, bsc_ref, avg_ref, o_ref):
        q0 = sq_ref[...]                         # (bs*cs, d) centered style latents
        kv = z_ref[0]                            # (bs*rs, d) centered encoder codes
        temp = temp_ref[...][0, 0, 0]

        def layernorm(x, g, b):
            mu = jnp.mean(x, axis=-1, keepdims=True)
            var = jnp.mean((x - mu) ** 2, axis=-1, keepdims=True)
            return (x - mu) * jax.lax.rsqrt(var + 1e-5) * g + b

        def split_heads(x2d, seq, lane_off):
            # (bs*seq, *) -> (bs*n_heads, seq, dh); batch-major, head-minor
            parts = []
            for bb in range(bs):
                rows = x2d[bb * seq:(bb + 1) * seq]
                for hh in range(n_heads):
                    lo = lane_off + hh * dh
                    parts.append(rows[:, lo:lo + dh])
            return jnp.stack(parts, axis=0)

        def attend(Qh, Kh, Vh, wo_heads):
            # Qh: (bs*H, cs, dh); Kh/Vh: (bs*H, Sk, dh); wo_heads: (H, dh, d)
            logits = jax.lax.dot_general(
                Qh, Kh, (((2,), (2,)), ((0,), (0,))),
                preferred_element_type=jnp.float32) * (scale * temp)
            m = jnp.max(logits, axis=-1, keepdims=True)
            e = jnp.exp(logits - m)
            attn = e / jnp.sum(e, axis=-1, keepdims=True)
            ctx = jax.lax.dot_general(
                attn, Vh, (((2,), (1,)), ((0,), (0,))),
                preferred_element_type=jnp.float32)                 # (bs*H, cs, dh)
            wo_b = jnp.concatenate([wo_heads] * bs, axis=0)         # (bs*H, dh, d)
            part = jax.lax.dot_general(
                ctx, wo_b, (((2,), (1,)), ((0,), (0,))),
                preferred_element_type=jnp.float32)                 # (bs*H, cs, d)
            part = part.reshape(bs, n_heads, cs, d)
            merged = part[:, 0]
            for hh in range(1, n_heads):                            # sum head contributions
                merged = merged + part[:, hh]
            return merged.reshape(bs * cs, d)

        h = q0
        for l in range(L):
            g = ln_ref[0, l]                                        # (6, d) LN params
            # --- self-attention over the style query set (fused QKV projection) ---
            qkv = jnp.dot(h, wqkv_s_ref[0, l], preferred_element_type=jnp.float32)
            h = layernorm(h + attend(split_heads(qkv, cs, 0),
                                     split_heads(qkv, cs, d),
                                     split_heads(qkv, cs, 2 * d),
                                     wo_s_ref[0, l]), g[0], g[1])
            # --- cross-attention: queries attend to the encoded reference set ---
            qc = jnp.dot(h, wq_c_ref[0, l], preferred_element_type=jnp.float32)
            kvc = jnp.dot(kv, wkv_c_ref[0, l], preferred_element_type=jnp.float32)
            h = layernorm(h + attend(split_heads(qc, cs, 0),
                                     split_heads(kvc, rs, 0),
                                     split_heads(kvc, rs, d),
                                     wo_c_ref[0, l]), g[2], g[3])
            # --- feed-forward (hidden = 2*latent, LeakyReLU) ---
            f = jnp.dot(h, wff1_ref[0, l], preferred_element_type=jnp.float32) + bff1_ref[0, l]
            f = jnp.where(f > 0, f, LRELU_SLOPE * f)
            f = jnp.dot(f, wff2_ref[0, l], preferred_element_type=jnp.float32) + bff2_ref[0, l]
            h = layernorm(h + f, g[4], g[5])

        # style_concat: FC(cat([codes_i, s_i])) == h @ Wa + s @ Wb + b, plus +latent_avg
        out = (jnp.dot(h, wsca_ref[0], preferred_element_type=jnp.float32)
               + jnp.dot(q0, wscb_ref[0], preferred_element_type=jnp.float32)
               + bsc_ref[0] + avg_ref[...])
        o_ref[...] = out[None, :, :]

    return kernel


def style_attention(params, codes, sq2d, avg_vec):
    """codes: (bs, rs, n_styles, d) centered; sq2d: (bs*cs, d) centered mapped latents.
       returns transformed codes (bs, cs, n_styles, d) with latent_avg added back."""
    bs, rs, ns, d = codes.shape
    cs = sq2d.shape[0] // bs
    L, H = ATTN_LAYERS, N_HEADS
    dh = d // H
    z = jnp.transpose(codes, (2, 0, 1, 3)).reshape(ns, bs * rs, d)

    kernel = make_style_attn_kernel(L, bs, cs, rs, d, H)
    out = pl.pallas_call(
        kernel,
        out_shape=jax.ShapeDtypeStruct((ns, bs * cs, d), jnp.float32),
        grid=(ns,),
        in_specs=[
            pl.BlockSpec((bs * cs, d), lambda i: (0, 0)),
            pl.BlockSpec((1, bs * rs, d), lambda i: (i, 0, 0)),
            pl.BlockSpec((1, L, d, 3 * d), lambda i: (i, 0, 0, 0)),
            pl.BlockSpec((1, L, H, dh, d), lambda i: (i, 0, 0, 0, 0)),
            pl.BlockSpec((1, L, d, d), lambda i: (i, 0, 0, 0)),
            pl.BlockSpec((1, L, d, 2 * d), lambda i: (i, 0, 0, 0)),
            pl.BlockSpec((1, L, H, dh, d), lambda i: (i, 0, 0, 0, 0)),
            pl.BlockSpec((1, L, d, 2 * d), lambda i: (i, 0, 0, 0)),
            pl.BlockSpec((1, L, 1, 2 * d), lambda i: (i, 0, 0, 0)),
            pl.BlockSpec((1, L, 2 * d, d), lambda i: (i, 0, 0, 0)),
            pl.BlockSpec((1, L, 1, d), lambda i: (i, 0, 0, 0)),
            pl.BlockSpec((1, L, 6, d), lambda i: (i, 0, 0, 0)),
            pl.BlockSpec((1, 1, 1), lambda i: (i, 0, 0)),
            pl.BlockSpec((1, d, d), lambda i: (i, 0, 0)),
            pl.BlockSpec((1, d, d), lambda i: (i, 0, 0)),
            pl.BlockSpec((1, 1, d), lambda i: (i, 0, 0)),
            pl.BlockSpec((1, d), lambda i: (0, 0)),
        ],
        out_specs=pl.BlockSpec((1, bs * cs, d), lambda i: (i, 0, 0)),
        compiler_params=pltpu.CompilerParams(dimension_semantics=("parallel",)),
    )(sq2d, z, params["w_qkv_self"], params["w_o_self"], params["w_q_cross"],
      params["w_kv_cross"], params["w_o_cross"], params["w_ff1"], params["b_ff1"],
      params["w_ff2"], params["b_ff2"], params["ln"], params["temp"],
      params["w_sc_a"], params["w_sc_b"], params["b_sc"], avg_vec.reshape(1, d))
    out = out.reshape(ns, bs, cs, d)
    return jnp.transpose(out, (1, 2, 0, 3))          # (bs, cs, n_styles, d)


# ----------------------------- synthesis ------------------------------------------
def syn_kernel(x_ref, w_ref, b_ref, o_ref):
    o_ref[...] = (jnp.dot(x_ref[...], w_ref[...], preferred_element_type=jnp.float32)
                  + b_ref[...])


def synthesis_forward(params, w_plus_flat):
    """w_plus_flat: (M, n_styles*latent) -> (M, 3*IMG*IMG)."""
    M, kin = w_plus_flat.shape
    nout = 3 * IMG * IMG
    tm = 8 if (M % 8 == 0 and M > 8) else M
    return pl.pallas_call(
        syn_kernel,
        out_shape=jax.ShapeDtypeStruct((M, nout), jnp.float32),
        grid=(M // tm,),
        in_specs=[
            pl.BlockSpec((tm, kin), lambda i: (i, 0)),
            pl.BlockSpec((kin, nout), lambda i: (0, 0)),
            pl.BlockSpec((1, nout), lambda i: (0, 0)),
        ],
        out_specs=pl.BlockSpec((tm, nout), lambda i: (i, 0)),
        compiler_params=pltpu.CompilerParams(dimension_semantics=("parallel",)),
    )(w_plus_flat, params["syn_w"], params["syn_b"])


# ----------------------------- SetGAN forward ------------------------------------
def setgan_forward(params, x, s, return_latents=False):
    bs, rs = x.shape[:2]
    cs = s.shape[1]
    avg_vec = params["latent_avg"] if MEAN_CENTER else jnp.zeros_like(params["latent_avg"])

    # codes = encoder(to_images(x)) - latent_avg   (single fused kernel)
    x_flat = x.reshape(bs * rs, *x.shape[2:])
    codes = encoder_forward(params, x_flat, avg_vec)             # (bs*rs, n_styles*latent)
    codes = codes.reshape(bs, rs, N_STYLES, LATENT)

    # style_latents = decoder.mapping(s) - latent_avg   (single fused kernel)
    style_lat = mapping_forward(params, s.reshape(bs * cs, s.shape[-1]), avg_vec)

    # transformed_codes = style_attn(codes, style_latents) + latent_avg (fused)
    transformed = style_attention(params, codes, style_lat, avg_vec)  # (bs, cs, ns, d)

    # images = decoder.synthesis(transformed.view(-1, n_styles, latent))
    dec_in = transformed.reshape(bs * cs, N_STYLES * LATENT)
    images = synthesis_forward(params, dec_in).reshape(bs, cs, 3, IMG, IMG)
    if return_latents:
        return images, transformed
    return images


# ----------------------------- deterministic parameter init ----------------------
def init_params(key):
    ks = jax.random.split(key, 16)
    d, L, H = LATENT, ATTN_LAYERS, N_HEADS
    dh = d // H
    p = {}
    # encoder (conv weight zero-padded along the lane-padded contraction dim)
    conv_w = jax.random.normal(ks[0], (K_RAW, CONV_F), jnp.float32) / math.sqrt(K_RAW)
    p["conv_w"] = jnp.zeros((K_PAD, CONV_F), jnp.float32).at[:K_RAW].set(conv_w)
    p["conv_b"] = jnp.zeros((1, CONV_F), jnp.float32)
    p["head_w"] = jax.random.normal(ks[1], (CONV_F, N_STYLES * d), jnp.float32) / math.sqrt(CONV_F)
    p["head_b"] = jnp.zeros((1, N_STYLES * d), jnp.float32)
    # mapping
    p["map_w1"] = jax.random.normal(ks[2], (Z_DIM, d), jnp.float32) / math.sqrt(Z_DIM)
    p["map_b1"] = jnp.zeros((1, d), jnp.float32)
    p["map_w2"] = jax.random.normal(ks[3], (d, d), jnp.float32) / math.sqrt(d)
    p["map_b2"] = jnp.zeros((1, d), jnp.float32)
    # style attention (per-style SetTransformerDecoder weights, QKV pre-fused)
    p["w_qkv_self"] = jax.random.normal(ks[4], (N_STYLES, L, d, 3 * d), jnp.float32) / math.sqrt(d)
    p["w_o_self"] = jax.random.normal(ks[5], (N_STYLES, L, H, dh, d), jnp.float32) / math.sqrt(d)
    p["w_q_cross"] = jax.random.normal(ks[6], (N_STYLES, L, d, d), jnp.float32) / math.sqrt(d)
    p["w_kv_cross"] = jax.random.normal(ks[7], (N_STYLES, L, d, 2 * d), jnp.float32) / math.sqrt(d)
    p["w_o_cross"] = jax.random.normal(ks[8], (N_STYLES, L, H, dh, d), jnp.float32) / math.sqrt(d)
    p["w_ff1"] = jax.random.normal(ks[9], (N_STYLES, L, d, 2 * d), jnp.float32) / math.sqrt(d)
    p["b_ff1"] = jnp.zeros((N_STYLES, L, 1, 2 * d), jnp.float32)
    p["w_ff2"] = jax.random.normal(ks[10], (N_STYLES, L, 2 * d, d), jnp.float32) / math.sqrt(2 * d)
    p["b_ff2"] = jnp.zeros((N_STYLES, L, 1, d), jnp.float32)
    ln = jnp.zeros((N_STYLES, L, 6, d), jnp.float32)
    ln = ln.at[:, :, 0].set(1.0).at[:, :, 2].set(1.0).at[:, :, 4].set(1.0)  # gammas=1
    p["ln"] = ln
    p["temp"] = jnp.ones((N_STYLES, 1, 1), jnp.float32)
    # style_concats: weight[:, :style_dim] ~ N(0, 0.2); weight[:, style_dim:] = I
    p["w_sc_a"] = jax.random.normal(ks[11], (N_STYLES, d, d), jnp.float32) * 0.2
    p["w_sc_b"] = jnp.tile(jnp.eye(d, dtype=jnp.float32)[None], (N_STYLES, 1, 1))
    p["b_sc"] = jnp.zeros((N_STYLES, 1, d), jnp.float32)
    # synthesis + latent average
    p["syn_w"] = jax.random.normal(ks[12], (N_STYLES * d, 3 * IMG * IMG), jnp.float32) / math.sqrt(N_STYLES * d)
    p["syn_b"] = jnp.zeros((1, 3 * IMG * IMG), jnp.float32)
    p["latent_avg"] = 0.01 * jnp.arange(d, dtype=jnp.float32)
    return p


# ----------------------------- main ----------------------------------------------
if __name__ == "__main__":
    key = jax.random.PRNGKey(0)
    kx, ks_, kp = jax.random.split(key, 3)
    params = init_params(kp)
    x = jax.random.normal(kx, (BS, RS, C_IN, IMG, IMG), jnp.float32)  # reference images
    s = jax.random.normal(ks_, (BS, CS, Z_DIM), jnp.float32)          # style z codes

    fwd = jax.jit(setgan_forward)
    images = fwd(params, x, s)
    jax.block_until_ready(images)
    assert images.shape == (BS, CS, 3, IMG, IMG)
    assert bool(jnp.all(jnp.isfinite(images)))
    print("KERNEL_OK")
</pallas_src>

<mosaic_0001>
module attributes {stable_mosaic.version = 11 : i64} {
  func.func @kernel(%arg0: i32, %arg1: memref<2048x32xf32, #tpu.memory_space<vmem>>, %arg2: memref<4x8x512xf32, #tpu.memory_space<vmem>>, %arg3: memref<32x32xf32, #tpu.memory_space<vmem>>, %arg4: memref<1x32xf32, #tpu.memory_space<vmem>>, %arg5: memref<32x128xf32, #tpu.memory_space<vmem>>, %arg6: memref<1x128xf32, #tpu.memory_space<vmem>>, %arg7: memref<1x128xf32, #tpu.memory_space<vmem>>, %arg8: memref<8x128xf32, #tpu.memory_space<vmem>>) attributes {dimension_semantics = [#tpu.dimension_semantics<parallel>], iteration_bounds = array<i64: 2>, scalar_prefetch = 0 : i64, scratch_operands = 0 : i64, tpu.core_type = #tpu.core_type<tc>, window_params = [{transform_indices = @transform_0, window_bounds = array<i64: 2048, 32>}, {pipeline_mode = #tpu.pipeline_mode<synchronous>, transform_indices = @transform_1, window_bounds = array<i64: 4, 8, 512>}, {pipeline_mode = #tpu.pipeline_mode<synchronous>, transform_indices = @transform_2, window_bounds = array<i64: 32, 32>}, {pipeline_mode = #tpu.pipeline_mode<synchronous>, transform_indices = @transform_3, window_bounds = array<i64: 1, 32>}, {pipeline_mode = #tpu.pipeline_mode<synchronous>, transform_indices = @transform_4, window_bounds = array<i64: 32, 128>}, {pipeline_mode = #tpu.pipeline_mode<synchronous>, transform_indices = @transform_5, window_bounds = array<i64: 1, 128>}, {pipeline_mode = #tpu.pipeline_mode<synchronous>, transform_indices = @transform_6, window_bounds = array<i64: 1, 128>}, {transform_indices = @transform_7, window_bounds = array<i64: 8, 128>}]} {
    %cst = arith.constant 0.000000e+00 : f32
    %0 = vector.broadcast %cst : f32 to vector<8x32xf32>
    %c0_i32 = arith.constant 0 : i32
    %c4_i32 = arith.constant 4 : i32
    %1 = arith.addi %c0_i32, %c4_i32 : i32
    %c1_i32 = arith.constant 1 : i32
    %2 = scf.for %arg9 = %c0_i32 to %1 step %c1_i32 iter_args(%arg10 = %0) -> (vector<8x32xf32>)  : i32 {
      %c512_i32 = arith.constant 512 : i32
      %12 = arith.muli %arg9, %c512_i32 : i32
      %13 = tpu.assume_multiple %12, 512 : i32
      %14 = arith.index_cast %13 : i32 to index
      %c0_9 = arith.constant 0 : index
      %15 = vector.load %arg1[%14, %c0_9] : memref<2048x32xf32, #tpu.memory_space<vmem>>, vector<512x32xf32>
      %c0_10 = arith.constant 0 : index
      %c0_11 = arith.constant 0 : index
      %16 = vector.load %arg3[%c0_10, %c0_11] : memref<32x32xf32, #tpu.memory_space<vmem>>, vector<32x32xf32>
      %cst_12 = arith.constant dense<0.000000e+00> : vector<512x32xf32>
      %17 = tpu.matmul %15, %16, %cst_12 {dimension_numbers = #tpu.dot_dimension_numbers<[1], [0], [0], [1], [0, 0, 1, 1], [], []>} : vector<512x32xf32>, vector<32x32xf32>, vector<512x32xf32> -> vector<512x32xf32>
      %c0_13 = arith.constant 0 : index
      %c0_14 = arith.constant 0 : index
      %18 = vector.load %arg4[%c0_13, %c0_14] : memref<1x32xf32, #tpu.memory_space<vmem>>, vector<1x32xf32>
      %19 = vector.broadcast %18 : vector<1x32xf32> to vector<512x32xf32>
      %20 = arith.addf %17, %19 : vector<512x32xf32>
      %cst_15 = arith.constant 0.000000e+00 : f32
      %21 = vector.broadcast %cst_15 : f32 to vector<512x32xf32>
      %22 = arith.cmpf ogt, %20, %21 : vector<512x32xf32>
      %cst_16 = arith.constant 0.00999999977 : f32
      %23 = vector.broadcast %cst_16 : f32 to vector<512x32xf32>
      %24 = arith.mulf %23, %20 : vector<512x32xf32>
      %25 = arith.select %22, %20, %24 : vector<512x32xi1>, vector<512x32xf32>
      %26 = arith.index_cast %arg9 : i32 to index
      %c0_17 = arith.constant 0 : index
      %c0_18 = arith.constant 0 : index
      %27 = vector.load %arg2[%26, %c0_17, %c0_18] : memref<4x8x512xf32, #tpu.memory_space<vmem>>, vector<1x8x512xf32>
      %28 = vector.shape_cast %27 : vector<1x8x512xf32> to vector<8x512xf32>
      %cst_19 = arith.constant dense<0.000000e+00> : vector<8x32xf32>
      %29 = tpu.matmul %28, %25, %cst_19 {dimension_numbers = #tpu.dot_dimension_numbers<[1], [0], [0], [1], [0, 0, 1, 1], [], []>} : vector<8x512xf32>, vector<512x32xf32>, vector<8x32xf32> -> vector<8x32xf32>
      %30 = arith.addf %arg10, %29 : vector<8x32xf32>
      scf.yield %30 : vector<8x32xf32>
    }
    %c4_i32_0 = arith.constant 4 : i32
    %c0 = arith.constant 0 : index
    %c0_1 = arith.constant 0 : index
    %3 = vector.load %arg5[%c0, %c0_1] : memref<32x128xf32, #tpu.memory_space<vmem>>, vector<32x128xf32>
    %cst_2 = arith.constant dense<0.000000e+00> : vector<8x128xf32>
    %4 = tpu.matmul %2, %3, %cst_2 {dimension_numbers = #tpu.dot_dimension_numbers<[1], [0], [0], [1], [0, 0, 1, 1], [], []>} : vector<8x32xf32>, vector<32x128xf32>, vector<8x128xf32> -> vector<8x128xf32>
    %c0_3 = arith.constant 0 : index
    %c0_4 = arith.constant 0 : index
    %5 = vector.load %arg6[%c0_3, %c0_4] : memref<1x128xf32, #tpu.memory_space<vmem>>, vector<1x128xf32>
    %6 = vector.broadcast %5 : vector<1x128xf32> to vector<8x128xf32>
    %7 = arith.addf %4, %6 : vector<8x128xf32>
    %c0_5 = arith.constant 0 : index
    %c0_6 = arith.constant 0 : index
    %8 = vector.load %arg7[%c0_5, %c0_6] : memref<1x128xf32, #tpu.memory_space<vmem>>, vector<1x128xf32>
    %9 = vector.broadcast %8 : vector<1x128xf32> to vector<8x128xf32>
    %10 = arith.subf %7, %9 : vector<8x128xf32>
    %c0_7 = arith.constant 0 : index
    %c0_8 = arith.constant 0 : index
    %11 = vector.load %arg8[%c0_7, %c0_8] : memref<8x128xf32, #tpu.memory_space<vmem>>, vector<8x128xf32>
    tpu.vector_store %arg8[%c0_7, %c0_8], %10 {strides = array<i32>} : memref<8x128xf32, #tpu.memory_space<vmem>>, vector<8x128xf32>,
    return
  }
  func.func @transform_0(%arg0: i32) -> (i32, i32) {
    %c0_i32 = arith.constant 0 : i32
    %c0_i32_0 = arith.constant 0 : i32
    return %arg0, %c0_i32 : i32, i32
  }
  func.func @transform_1(%arg0: i32) -> (i32, i32, i32) {
    %c0_i32 = arith.constant 0 : i32
    %c0_i32_0 = arith.constant 0 : i32
    %c0_i32_1 = arith.constant 0 : i32
    %c0_i32_2 = arith.constant 0 : i32
    return %c0_i32, %c0_i32_0, %c0_i32_1 : i32, i32, i32
  }
  func.func @transform_2(%arg0: i32) -> (i32, i32) {
    %c0_i32 = arith.constant 0 : i32
    %c0_i32_0 = arith.constant 0 : i32
    %c0_i32_1 = arith.constant 0 : i32
    return %c0_i32, %c0_i32_0 : i32, i32
  }
  func.func @transform_3(%arg0: i32) -> (i32, i32) {
    %c0_i32 = arith.constant 0 : i32
    %c0_i32_0 = arith.constant 0 : i32
    %c0_i32_1 = arith.constant 0 : i32
    return %c0_i32, %c0_i32_0 : i32, i32
  }
  func.func @transform_4(%arg0: i32) -> (i32, i32) {
    %c0_i32 = arith.constant 0 : i32
    %c0_i32_0 = arith.constant 0 : i32
    %c0_i32_1 = arith.constant 0 : i32
    return %c0_i32, %c0_i32_0 : i32, i32
  }
  func.func @transform_5(%arg0: i32) -> (i32, i32) {
    %c0_i32 = arith.constant 0 : i32
    %c0_i32_0 = arith.constant 0 : i32
    %c0_i32_1 = arith.constant 0 : i32
    return %c0_i32, %c0_i32_0 : i32, i32
  }
  func.func @transform_6(%arg0: i32) -> (i32, i32) {
    %c0_i32 = arith.constant 0 : i32
    %c0_i32_0 = arith.constant 0 : i32
    %c0_i32_1 = arith.constant 0 : i32
    return %c0_i32, %c0_i32_0 : i32, i32
  }
  func.func @transform_7(%arg0: i32) -> (i32, i32) {
    %c0_i32 = arith.constant 0 : i32
    %c0_i32_0 = arith.constant 0 : i32
    return %arg0, %c0_i32 : i32, i32
  }
}

module attributes {stable_mosaic.version = 11 : i64} {
  func.func @map_kernel(%arg0: i32, %arg1: memref<16x32xf32, #tpu.memory_space<vmem>>, %arg2: memref<32x32xf32, #tpu.memory_space<vmem>>, %arg3: memref<1x32xf32, #tpu.memory_space<vmem>>, %arg4: memref<32x32xf32, #tpu.memory_space<vmem>>, %arg5: memref<1x32xf32, #tpu.memory_space<vmem>>, %arg6: memref<1x32xf32, #tpu.memory_space<vmem>>, %arg7: memref<16x32xf32, #tpu.memory_space<vmem>>) attributes {dimension_semantics = [#tpu.dimension_semantics<arbitrary>], iteration_bounds = array<i64: 1>, scalar_prefetch = 0 : i64, scratch_operands = 0 : i64, tpu.core_type = #tpu.core_type<tc>, window_params = [{pipeline_mode = #tpu.pipeline_mode<synchronous>, transform_indices = @transform_0, window_bounds = array<i64: 16, 32>}, {pipeline_mode = #tpu.pipeline_mode<synchronous>, transform_indices = @transform_1, window_bounds = array<i64: 32, 32>}, {pipeline_mode = #tpu.pipeline_mode<synchronous>, transform_indices = @transform_2, window_bounds = array<i64: 1, 32>}, {pipeline_mode = #tpu.pipeline_mode<synchronous>, transform_indices = @transform_3, window_bounds = array<i64: 32, 32>}, {pipeline_mode = #tpu.pipeline_mode<synchronous>, transform_indices = @transform_4, window_bounds = array<i64: 1, 32>}, {pipeline_mode = #tpu.pipeline_mode<synchronous>, transform_indices = @transform_5, window_bounds = array<i64: 1, 32>}, {pipeline_mode = #tpu.pipeline_mode<synchronous>, transform_indices = @transform_6, window_bounds = array<i64: 16, 32>}]} {
    %c0 = arith.constant 0 : index
    %c0_0 = arith.constant 0 : index
    %0 = vector.load %arg1[%c0, %c0_0] : memref<16x32xf32, #tpu.memory_space<vmem>>, vector<16x32xf32>
    %c0_1 = arith.constant 0 : index
    %c0_2 = arith.constant 0 : index
    %1 = vector.load %arg2[%c0_1, %c0_2] : memref<32x32xf32, #tpu.memory_space<vmem>>, vector<32x32xf32>
    %cst = arith.constant dense<0.000000e+00> : vector<16x32xf32>
    %2 = tpu.matmul %0, %1, %cst {dimension_numbers = #tpu.dot_dimension_numbers<[1], [0], [0], [1], [0, 0, 1, 1], [], []>} : vector<16x32xf32>, vector<32x32xf32>, vector<16x32xf32> -> vector<16x32xf32>
    %c0_3 = arith.constant 0 : index
    %c0_4 = arith.constant 0 : index
    %3 = vector.load %arg3[%c0_3, %c0_4] : memref<1x32xf32, #tpu.memory_space<vmem>>, vector<1x32xf32>
    %4 = vector.broadcast %3 : vector<1x32xf32> to vector<16x32xf32>
    %5 = arith.addf %2, %4 : vector<16x32xf32>
    %cst_5 = arith.constant 0.000000e+00 : f32
    %6 = vector.broadcast %cst_5 : f32 to vector<16x32xf32>
    %7 = arith.cmpf ogt, %5, %6 : vector<16x32xf32>
    %cst_6 = arith.constant 0.00999999977 : f32
    %8 = vector.broadcast %cst_6 : f32 to vector<16x32xf32>
    %9 = arith.mulf %8, %5 : vector<16x32xf32>
    %10 = arith.select %7, %5, %9 : vector<16x32xi1>, vector<16x32xf32>
    %c0_7 = arith.constant 0 : index
    %c0_8 = arith.constant 0 : index
    %11 = vector.load %arg4[%c0_7, %c0_8] : memref<32x32xf32, #tpu.memory_space<vmem>>, vector<32x32xf32>
    %cst_9 = arith.constant dense<0.000000e+00> : vector<16x32xf32>
    %12 = tpu.matmul %10, %11, %cst_9 {dimension_numbers = #tpu.dot_dimension_numbers<[1], [0], [0], [1], [0, 0, 1, 1], [], []>} : vector<16x32xf32>, vector<32x32xf32>, vector<16x32xf32> -> vector<16x32xf32>
    %c0_10 = arith.constant 0 : index
    %c0_11 = arith.constant 0 : index
    %13 = vector.load %arg5[%c0_10, %c0_11] : memref<1x32xf32, #tpu.memory_space<vmem>>, vector<1x32xf32>
    %14 = vector.broadcast %13 : vector<1x32xf32> to vector<16x32xf32>
    %15 = arith.addf %12, %14 : vector<16x32xf32>
    %c0_12 = arith.constant 0 : index
    %c0_13 = arith.constant 0 : index
    %16 = vector.load %arg6[%c0_12, %c0_13] : memref<1x32xf32, #tpu.memory_space<vmem>>, vector<1x32xf32>
    %17 = vector.broadcast %16 : vector<1x32xf32> to vector<16x32xf32>
    %18 = arith.subf %15, %17 : vector<16x32xf32>
    %c0_14 = arith.constant 0 : index
    %c0_15 = arith.constant 0 : index
    %19 = vector.load %arg7[%c0_14, %c0_15] : memref<16x32xf32, #tpu.memory_space<vmem>>, vector<16x32xf32>
    tpu.vector_store %arg7[%c0_14, %c0_15], %18 {strides = array<i32>} : memref<16x32xf32, #tpu.memory_space<vmem>>, vector<16x32xf32>,
    return
  }
  func.func @transform_0(%arg0: i32) -> (i32, i32) {
    %c0_i32 = arith.constant 0 : i32
    %c0_i32_0 = arith.constant 0 : i32
    %c0_i32_1 = arith.constant 0 : i32
    return %c0_i32, %c0_i32_0 : i32, i32
  }
  func.func @transform_1(%arg0: i32) -> (i32, i32) {
    %c0_i32 = arith.constant 0 : i32
    %c0_i32_0 = arith.constant 0 : i32
    %c0_i32_1 = arith.constant 0 : i32
    return %c0_i32, %c0_i32_0 : i32, i32
  }
  func.func @transform_2(%arg0: i32) -> (i32, i32) {
    %c0_i32 = arith.constant 0 : i32
    %c0_i32_0 = arith.constant 0 : i32
    %c0_i32_1 = arith.constant 0 : i32
    return %c0_i32, %c0_i32_0 : i32, i32
  }
  func.func @transform_3(%arg0: i32) -> (i32, i32) {
    %c0_i32 = arith.constant 0 : i32
    %c0_i32_0 = arith.constant 0 : i32
    %c0_i32_1 = arith.constant 0 : i32
    return %c0_i32, %c0_i32_0 : i32, i32
  }
  func.func @transform_4(%arg0: i32) -> (i32, i32) {
    %c0_i32 = arith.constant 0 : i32
    %c0_i32_0 = arith.constant 0 : i32
    %c0_i32_1 = arith.constant 0 : i32
    return %c0_i32, %c0_i32_0 : i32, i32
  }
  func.func @transform_5(%arg0: i32) -> (i32, i32) {
    %c0_i32 = arith.constant 0 : i32
    %c0_i32_0 = arith.constant 0 : i32
    %c0_i32_1 = arith.constant 0 : i32
    return %c0_i32, %c0_i32_0 : i32, i32
  }
  func.func @transform_6(%arg0: i32) -> (i32, i32) {
    %c0_i32 = arith.constant 0 : i32
    %c0_i32_0 = arith.constant 0 : i32
    %c0_i32_1 = arith.constant 0 : i32
    return %c0_i32, %c0_i32_0 : i32, i32
  }
}

module attributes {stable_mosaic.version = 11 : i64} {
  func.func @kernel(%arg0: i32, %arg1: memref<16x32xf32, #tpu.memory_space<vmem>>, %arg2: memref<1x16x32xf32, #tpu.memory_space<vmem>>, %arg3: memref<1x2x32x96xf32, #tpu.memory_space<vmem>>, %arg4: memref<1x2x4x8x32xf32, #tpu.memory_space<vmem>>, %arg5: memref<1x2x32x32xf32, #tpu.memory_space<vmem>>, %arg6: memref<1x2x32x64xf32, #tpu.memory_space<vmem>>, %arg7: memref<1x2x4x8x32xf32, #tpu.memory_space<vmem>>, %arg8: memref<1x2x32x64xf32, #tpu.memory_space<vmem>>, %arg9: memref<1x2x1x64xf32, #tpu.memory_space<vmem>>, %arg10: memref<1x2x64x32xf32, #tpu.memory_space<vmem>>, %arg11: memref<1x2x1x32xf32, #tpu.memory_space<vmem>>, %arg12: memref<1x2x6x32xf32, #tpu.memory_space<vmem>>, %arg13: memref<1x1x1xf32, #tpu.memory_space<vmem>>, %arg14: memref<1x32x32xf32, #tpu.memory_space<vmem>>, %arg15: memref<1x32x32xf32, #tpu.memory_space<vmem>>, %arg16: memref<1x1x32xf32, #tpu.memory_space<vmem>>, %arg17: memref<1x32xf32, #tpu.memory_space<vmem>>, %arg18: memref<1x16x32xf32, #tpu.memory_space<vmem>>) attributes {dimension_semantics = [#tpu.dimension_semantics<parallel>], iteration_bounds = array<i64: 4>, scalar_prefetch = 0 : i64, scratch_operands = 0 : i64, tpu.core_type = #tpu.core_type<tc>, window_params = [{pipeline_mode = #tpu.pipeline_mode<synchronous>, transform_indices = @transform_0, window_bounds = array<i64: 16, 32>}, {transform_indices = @transform_1, window_bounds = array<i64: 1, 16, 32>}, {transform_indices = @transform_2, window_bounds = array<i64: 1, 2, 32, 96>}, {transform_indices = @transform_3, window_bounds = array<i64: 1, 2, 4, 8, 32>}, {transform_indices = @transform_4, window_bounds = array<i64: 1, 2, 32, 32>}, {transform_indices = @transform_5, window_bounds = array<i64: 1, 2, 32, 64>}, {transform_indices = @transform_6, window_bounds = array<i64: 1, 2, 4, 8, 32>}, {transform_indices = @transform_7, window_bounds = array<i64: 1, 2, 32, 64>}, {transform_indices = @transform_8, window_bounds = array<i64: 1, 2, 1, 64>}, {transform_indices = @transform_9, window_bounds = array<i64: 1, 2, 64, 32>}, {transform_indices = @transform_10, window_bounds = array<i64: 1, 2, 1, 32>}, {transform_indices = @transform_11, window_bounds = array<i64: 1, 2, 6, 32>}, {transform_indices = @transform_12, window_bounds = array<i64: 1, 1, 1>}, {transform_indices = @transform_13, window_bounds = array<i64: 1, 32, 32>}, {transform_indices = @transform_14, window_bounds = array<i64: 1, 32, 32>}, {transform_indices = @transform_15, window_bounds = array<i64: 1, 1, 32>}, {pipeline_mode = #tpu.pipeline_mode<synchronous>, transform_indices = @transform_16, window_bounds = array<i64: 1, 32>}, {transform_indices = @transform_17, window_bounds = array<i64: 1, 16, 32>}]} {
    %c0 = arith.constant 0 : index
    %c0_0 = arith.constant 0 : index
    %0 = vector.load %arg1[%c0, %c0_0] : memref<16x32xf32, #tpu.memory_space<vmem>>, vector<16x32xf32>
    %c0_1 = arith.constant 0 : index
    %c0_2 = arith.constant 0 : index
    %c0_3 = arith.constant 0 : index
    %1 = vector.load %arg2[%c0_1, %c0_2, %c0_3] : memref<1x16x32xf32, #tpu.memory_space<vmem>>, vector<1x16x32xf32>
    %2 = vector.shape_cast %1 : vector<1x16x32xf32> to vector<16x32xf32>
    %c0_4 = arith.constant 0 : index
    %c0_5 = arith.constant 0 : index
    %c0_6 = arith.constant 0 : index
    %3 = vector.load %arg13[%c0_4, %c0_5, %c0_6] : memref<1x1x1xf32, #tpu.memory_space<vmem>>, vector<1x1x1xf32>
    %4 = vector.extract %3[0, 0, 0] : f32 from vector<1x1x1xf32>
    %c0_7 = arith.constant 0 : index
    %c0_8 = arith.constant 0 : index
    %c0_9 = arith.constant 0 : index
    %c0_10 = arith.constant 0 : index
    %5 = vector.load %arg12[%c0_7, %c0_8, %c0_9, %c0_10] : memref<1x2x6x32xf32, #tpu.memory_space<vmem>>, vector<1x1x6x32xf32>
    %6 = vector.shape_cast %5 : vector<1x1x6x32xf32> to vector<6x32xf32>
    %c0_11 = arith.constant 0 : index
    %c0_12 = arith.constant 0 : index
    %c0_13 = arith.constant 0 : index
    %c0_14 = arith.constant 0 : index
    %7 = vector.load %arg3[%c0_11, %c0_12, %c0_13, %c0_14] : memref<1x2x32x96xf32, #tpu.memory_space<vmem>>, vector<1x1x32x96xf32>
    %8 = vector.shape_cast %7 : vector<1x1x32x96xf32> to vector<32x96xf32>
    %cst = arith.constant dense<0.000000e+00> : vector<16x96xf32>
    %9 = tpu.matmul %0, %8, %cst {dimension_numbers = #tpu.dot_dimension_numbers<[1], [0], [0], [1], [0, 0, 1, 1], [], []>} : vector<16x32xf32>, vector<32x96xf32>, vector<16x96xf32> -> vector<16x96xf32>
    %10 = vector.extract_strided_slice %9 {offsets = [0, 0], sizes = [8, 96], strides = [1, 1]} : vector<16x96xf32> to vector<8x96xf32>
    %11 = vector.extract_strided_slice %10 {offsets = [0, 0], sizes = [8, 8], strides = [1, 1]} : vector<8x96xf32> to vector<8x8xf32>
    %12 = vector.extract_strided_slice %10 {offsets = [0, 8], sizes = [8, 8], strides = [1, 1]} : vector<8x96xf32> to vector<8x8xf32>
    %13 = vector.extract_strided_slice %10 {offsets = [0, 16], sizes = [8, 8], strides = [1, 1]} : vector<8x96xf32> to vector<8x8xf32>
    %14 = vector.extract_strided_slice %10 {offsets = [0, 24], sizes = [8, 8], strides = [1, 1]} : vector<8x96xf32> to vector<8x8xf32>
    %15 = vector.extract_strided_slice %9 {offsets = [8, 0], sizes = [8, 96], strides = [1, 1]} : vector<16x96xf32> to vector<8x96xf32>
    %16 = vector.extract_strided_slice %15 {offsets = [0, 0], sizes = [8, 8], strides = [1, 1]} : vector<8x96xf32> to vector<8x8xf32>
    %17 = vector.extract_strided_slice %15 {offsets = [0, 8], sizes = [8, 8], strides = [1, 1]} : vector<8x96xf32> to vector<8x8xf32>
    %18 = vector.extract_strided_slice %15 {offsets = [0, 16], sizes = [8, 8], strides = [1, 1]} : vector<8x96xf32> to vector<8x8xf32>
    %19 = vector.extract_strided_slice %15 {offsets = [0, 24], sizes = [8, 8], strides = [1, 1]} : vector<8x96xf32> to vector<8x8xf32>
    %20 = vector.shape_cast %11 : vector<8x8xf32> to vector<1x8x8xf32>
    %21 = vector.shape_cast %12 : vector<8x8xf32> to vector<1x8x8xf32>
    %22 = vector.shape_cast %13 : vector<8x8xf32> to vector<1x8x8xf32>
    %23 = vector.shape_cast %14 : vector<8x8xf32> to vector<1x8x8xf32>
    %24 = vector.shape_cast %16 : vector<8x8xf32> to vector<1x8x8xf32>
    %25 = vector.shape_cast %17 : vector<8x8xf32> to vector<1x8x8xf32>
    %26 = vector.shape_cast %18 : vector<8x8xf32> to vector<1x8x8xf32>
    %27 = vector.shape_cast %19 : vector<8x8xf32> to vector<1x8x8xf32>
    %28 = tpu.concatenate %20, %21, %22, %23, %24, %25, %26, %27 in 0 : vector<1x8x8xf32>, vector<1x8x8xf32>, vector<1x8x8xf32>, vector<1x8x8xf32>, vector<1x8x8xf32>, vector<1x8x8xf32>, vector<1x8x8xf32>, vector<1x8x8xf32> -> vector<8x8x8xf32>
    %29 = vector.extract_strided_slice %9 {offsets = [0, 0], sizes = [8, 96], strides = [1, 1]} : vector<16x96xf32> to vector<8x96xf32>
    %30 = vector.extract_strided_slice %29 {offsets = [0, 32], sizes = [8, 8], strides = [1, 1]} : vector<8x96xf32> to vector<8x8xf32>
    %31 = vector.extract_strided_slice %29 {offsets = [0, 40], sizes = [8, 8], strides = [1, 1]} : vector<8x96xf32> to vector<8x8xf32>
    %32 = vector.extract_strided_slice %29 {offsets = [0, 48], sizes = [8, 8], strides = [1, 1]} : vector<8x96xf32> to vector<8x8xf32>
    %33 = vector.extract_strided_slice %29 {offsets = [0, 56], sizes = [8, 8], strides = [1, 1]} : vector<8x96xf32> to vector<8x8xf32>
    %34 = vector.extract_strided_slice %9 {offsets = [8, 0], sizes = [8, 96], strides = [1, 1]} : vector<16x96xf32> to vector<8x96xf32>
    %35 = vector.extract_strided_slice %34 {offsets = [0, 32], sizes = [8, 8], strides = [1, 1]} : vector<8x96xf32> to vector<8x8xf32>
    %36 = vector.extract_strided_slice %34 {offsets = [0, 40], sizes = [8, 8], strides = [1, 1]} : vector<8x96xf32> to vector<8x8xf32>
    %37 = vector.extract_strided_slice %34 {offsets = [0, 48], sizes = [8, 8], strides = [1, 1]} : vector<8x96xf32> to vector<8x8xf32>
    %38 = vector.extract_strided_slice %34 {offsets = [0, 56], sizes = [8, 8], strides = [1, 1]} : vector<8x96xf32> to vector<8x8xf32>
    %39 = vector.shape_cast %30 : vector<8x8xf32> to vector<1x8x8xf32>
    %40 = vector.shape_cast %31 : vector<8x8xf32> to vector<1x8x8xf32>
    %41 = vector.shape_cast %32 : vector<8x8xf32> to vector<1x8x8xf32>
    %42 = vector.shape_cast %33 : vector<8x8xf32> to vector<1x8x8xf32>
    %43 = vector.shape_cast %35 : vector<8x8xf32> to vector<1x8x8xf32>
    %44 = vector.shape_cast %36 : vector<8x8xf32> to vector<1x8x8xf32>
    %45 = vector.shape_cast %37 : vector<8x8xf32> to vector<1x8x8xf32>
    %46 = vector.shape_cast %38 : vector<8x8xf32> to vector<1x8x8xf32>
    %47 = tpu.concatenate %39, %40, %41, %42, %43, %44, %45, %46 in 0 : vector<1x8x8xf32>, vector<1x8x8xf32>, vector<1x8x8xf32>, vector<1x8x8xf32>, vector<1x8x8xf32>, vector<1x8x8xf32>, vector<1x8x8xf32>, vector<1x8x8xf32> -> vector<8x8x8xf32>
    %48 = vector.extract_strided_slice %9 {offsets = [0, 0], sizes = [8, 96], strides = [1, 1]} : vector<16x96xf32> to vector<8x96xf32>
    %49 = vector.extract_strided_slice %48 {offsets = [0, 64], sizes = [8, 8], strides = [1, 1]} : vector<8x96xf32> to vector<8x8xf32>
    %50 = vector.extract_strided_slice %48 {offsets = [0, 72], sizes = [8, 8], strides = [1, 1]} : vector<8x96xf32> to vector<8x8xf32>
    %51 = vector.extract_strided_slice %48 {offsets = [0, 80], sizes = [8, 8], strides = [1, 1]} : vector<8x96xf32> to vector<8x8xf32>
    %52 = vector.extract_strided_slice %48 {offsets = [0, 88], sizes = [8, 8], strides = [1, 1]} : vector<8x96xf32> to vector<8x8xf32>
    %53 = vector.extract_strided_slice %9 {offsets = [8, 0], sizes = [8, 96], strides = [1, 1]} : vector<16x96xf32> to vector<8x96xf32>
    %54 = vector.extract_strided_slice %53 {offsets = [0, 64], sizes = [8, 8], strides = [1, 1]} : vector<8x96xf32> to vector<8x8xf32>
    %55 = vector.extract_strided_slice %53 {offsets = [0, 72], sizes = [8, 8], strides = [1, 1]} : vector<8x96xf32> to vector<8x8xf32>
    %56 = vector.extract_strided_slice %53 {offsets = [0, 80], sizes = [8, 8], strides = [1, 1]} : vector<8x96xf32> to vector<8x8xf32>
    %57 = vector.extract_strided_slice %53 {offsets = [0, 88], sizes = [8, 8], strides = [1, 1]} : vector<8x96xf32> to vector<8x8xf32>
    %58 = vector.shape_cast %49 : vector<8x8xf32> to vector<1x8x8xf32>
    %59 = vector.shape_cast %50 : vector<8x8xf32> to vector<1x8x8xf32>
    %60 = vector.shape_cast %51 : vector<8x8xf32> to vector<1x8x8xf32>
    %61 = vector.shape_cast %52 : vector<8x8xf32> to vector<1x8x8xf32>
    %62 = vector.shape_cast %54 : vector<8x8xf32> to vector<1x8x8xf32>
    %63 = vector.shape_cast %55 : vector<8x8xf32> to vector<1x8x8xf32>
    %64 = vector.shape_cast %56 : vector<8x8xf32> to vector<1x8x8xf32>
    %65 = vector.shape_cast %57 : vector<8x8xf32> to vector<1x8x8xf32>
    %66 = tpu.concatenate %58, %59, %60, %61, %62, %63, %64, %65 in 0 : vector<1x8x8xf32>, vector<1x8x8xf32>, vector<1x8x8xf32>, vector<1x8x8xf32>, vector<1x8x8xf32>, vector<1x8x8xf32>, vector<1x8x8xf32>, vector<1x8x8xf32> -> vector<8x8x8xf32>
    %c0_15 = arith.constant 0 : index
    %c0_16 = arith.constant 0 : index
    %c0_17 = arith.constant 0 : index
    %c0_18 = arith.constant 0 : index
    %c0_19 = arith.constant 0 : index
    %67 = vector.load %arg4[%c0_15, %c0_16, %c0_17, %c0_18, %c0_19] : memref<1x2x4x8x32xf32, #tpu.memory_space<vmem>>, vector<1x1x4x8x32xf32>
    %68 = vector.shape_cast %67 : vector<1x1x4x8x32xf32> to vector<4x8x32xf32>
    %cst_20 = arith.constant dense<0.000000e+00> : vector<8x8x8xf32>
    %69 = tpu.matmul %28, %47, %cst_20 {dimension_numbers = #tpu.dot_dimension_numbers<[2], [2], [1], [1], [0, 0, 0, 1, 1, 1], [0], [0]>} : vector<8x8x8xf32>, vector<8x8x8xf32>, vector<8x8x8xf32> -> vector<8x8x8xf32>
    %cst_21 = arith.constant 0.353553385 : f32
    %70 = arith.mulf %cst_21, %4 : f32
    %71 = vector.broadcast %70 : f32 to vector<8x8x8xf32>
    %72 = arith.mulf %69, %71 : vector<8x8x8xf32>
    %cst_22 = arith.constant dense<0xFF800000> : vector<8x8xf32>
    %73 = vector.multi_reduction <maximumf>, %72, %cst_22 [2] : vector<8x8x8xf32> to vector<8x8xf32>
    %74 = vector.shape_cast %73 : vector<8x8xf32> to vector<8x8x1xf32>
    %75 = vector.broadcast %74 : vector<8x8x1xf32> to vector<8x8x8xf32>
    %76 = arith.subf %72, %75 : vector<8x8x8xf32>
    %77 = math.exp %76 : vector<8x8x8xf32>
    %cst_23 = arith.constant dense<0.000000e+00> : vector<8x8xf32>
    %78 = vector.multi_reduction <add>, %77, %cst_23 [2] : vector<8x8x8xf32> to vector<8x8xf32>
    %79 = vector.shape_cast %78 : vector<8x8xf32> to vector<8x8x1xf32>
    %80 = vector.broadcast %79 : vector<8x8x1xf32> to vector<8x8x8xf32>
    %81 = arith.divf %77, %80 : vector<8x8x8xf32>
    %cst_24 = arith.constant dense<0.000000e+00> : vector<8x8x8xf32>
    %82 = tpu.matmul %81, %66, %cst_24 {dimension_numbers = #tpu.dot_dimension_numbers<[2], [1], [1], [2], [0, 0, 0, 1, 1, 2], [0], [0]>} : vector<8x8x8xf32>, vector<8x8x8xf32>, vector<8x8x8xf32> -> vector<8x8x8xf32>
    %83 = tpu.concatenate %68, %68 in 0 : vector<4x8x32xf32>, vector<4x8x32xf32> -> vector<8x8x32xf32>
    %cst_25 = arith.constant dense<0.000000e+00> : vector<8x8x32xf32>
    %84 = tpu.matmul %82, %83, %cst_25 {dimension_numbers = #tpu.dot_dimension_numbers<[2], [1], [1], [2], [0, 0, 0, 1, 1, 2], [0], [0]>} : vector<8x8x8xf32>, vector<8x8x32xf32>, vector<8x8x32xf32> -> vector<8x8x32xf32>
    %85 = vector.shape_cast %84 : vector<8x8x32xf32> to vector<2x4x8x32xf32>
    %86 = vector.extract_strided_slice %85 {offsets = [0, 0, 0, 0], sizes = [2, 1, 8, 32], strides = [1, 1, 1, 1]} : vector<2x4x8x32xf32> to vector<2x1x8x32xf32>
    %87 = vector.shape_cast %86 : vector<2x1x8x32xf32> to vector<2x8x32xf32>
    %88 = vector.extract_strided_slice %85 {offsets = [0, 1, 0, 0], sizes = [2, 1, 8, 32], strides = [1, 1, 1, 1]} : vector<2x4x8x32xf32> to vector<2x1x8x32xf32>
    %89 = vector.shape_cast %88 : vector<2x1x8x32xf32> to vector<2x8x32xf32>
    %90 = arith.addf %87, %89 : vector<2x8x32xf32>
    %91 = vector.extract_strided_slice %85 {offsets = [0, 2, 0, 0], sizes = [2, 1, 8, 32], strides = [1, 1, 1, 1]} : vector<2x4x8x32xf32> to vector<2x1x8x32xf32>
    %92 = vector.shape_cast %91 : vector<2x1x8x32xf32> to vector<2x8x32xf32>
    %93 = arith.addf %90, %92 : vector<2x8x32xf32>
    %94 = vector.extract_strided_slice %85 {offsets = [0, 3, 0, 0], sizes = [2, 1, 8, 32], strides = [1, 1, 1, 1]} : vector<2x4x8x32xf32> to vector<2x1x8x32xf32>
    %95 = vector.shape_cast %94 : vector<2x1x8x32xf32> to vector<2x8x32xf32>
    %96 = arith.addf %93, %95 : vector<2x8x32xf32>
    %97 = vector.shape_cast %96 : vector<2x8x32xf32> to vector<16x32xf32>
    %98 = arith.addf %0, %97 : vector<16x32xf32>
    %99 = vector.extract_strided_slice %6 {offsets = [0, 0], sizes = [1, 32], strides = [1, 1]} : vector<6x32xf32> to vector<1x32xf32>
    %100 = vector.shape_cast %99 : vector<1x32xf32> to vector<32xf32>
    %101 = vector.extract_strided_slice %6 {offsets = [1, 0], sizes = [1, 32], strides = [1, 1]} : vector<6x32xf32> to vector<1x32xf32>
    %102 = vector.shape_cast %101 : vector<1x32xf32> to vector<32xf32>
    %cst_26 = arith.constant dense<0.000000e+00> : vector<16xf32>
    %103 = vector.multi_reduction <add>, %98, %cst_26 [1] : vector<16x32xf32> to vector<16xf32>
    %104 = vector.shape_cast %103 : vector<16xf32> to vector<16x1xf32>
    %cst_27 = arith.constant 3.200000e+01 : f32
    %105 = vector.broadcast %cst_27 : f32 to vector<16x1xf32>
    %106 = arith.divf %104, %105 : vector<16x1xf32>
    %107 = vector.broadcast %106 : vector<16x1xf32> to vector<16x32xf32>
    %108 = arith.subf %98, %107 : vector<16x32xf32>
    %109 = arith.mulf %108, %108 : vector<16x32xf32>
    %cst_28 = arith.constant dense<0.000000e+00> : vector<16xf32>
    %110 = vector.multi_reduction <add>, %109, %cst_28 [1] : vector<16x32xf32> to vector<16xf32>
    %111 = vector.shape_cast %110 : vector<16xf32> to vector<16x1xf32>
    %cst_29 = arith.constant 3.200000e+01 : f32
    %112 = vector.broadcast %cst_29 : f32 to vector<16x1xf32>
    %113 = arith.divf %111, %112 : vector<16x1xf32>
    %114 = vector.broadcast %106 : vector<16x1xf32> to vector<16x32xf32>
    %115 = arith.subf %98, %114 : vector<16x32xf32>
    %cst_30 = arith.constant 9.99999974E-6 : f32
    %116 = vector.broadcast %cst_30 : f32 to vector<16x1xf32>
    %117 = arith.addf %113, %116 : vector<16x1xf32>
    %118 = math.rsqrt %117 : vector<16x1xf32>
    %119 = vector.broadcast %118 : vector<16x1xf32> to vector<16x32xf32>
    %120 = arith.mulf %115, %119 : vector<16x32xf32>
    %121 = vector.shape_cast %100 : vector<32xf32> to vector<1x32xf32>
    %122 = vector.broadcast %121 : vector<1x32xf32> to vector<16x32xf32>
    %123 = arith.mulf %120, %122 : vector<16x32xf32>
    %124 = vector.shape_cast %102 : vector<32xf32> to vector<1x32xf32>
    %125 = vector.broadcast %124 : vector<1x32xf32> to vector<16x32xf32>
    %126 = arith.addf %123, %125 : vector<16x32xf32>
    %c0_31 = arith.constant 0 : index
    %c0_32 = arith.constant 0 : index
    %c0_33 = arith.constant 0 : index
    %c0_34 = arith.constant 0 : index
    %127 = vector.load %arg5[%c0_31, %c0_32, %c0_33, %c0_34] : memref<1x2x32x32xf32, #tpu.memory_space<vmem>>, vector<1x1x32x32xf32>
    %128 = vector.shape_cast %127 : vector<1x1x32x32xf32> to vector<32x32xf32>
    %cst_35 = arith.constant dense<0.000000e+00> : vector<16x32xf32>
    %129 = tpu.matmul %126, %128, %cst_35 {dimension_numbers = #tpu.dot_dimension_numbers<[1], [0], [0], [1], [0, 0, 1, 1], [], []>} : vector<16x32xf32>, vector<32x32xf32>, vector<16x32xf32> -> vector<16x32xf32>
    %c0_36 = arith.constant 0 : index
    %c0_37 = arith.constant 0 : index
    %c0_38 = arith.constant 0 : index
    %c0_39 = arith.constant 0 : index
    %130 = vector.load %arg6[%c0_36, %c0_37, %c0_38, %c0_39] : memref<1x2x32x64xf32, #tpu.memory_space<vmem>>, vector<1x1x32x64xf32>
    %131 = vector.shape_cast %130 : vector<1x1x32x64xf32> to vector<32x64xf32>
    %cst_40 = arith.constant dense<0.000000e+00> : vector<16x64xf32>
    %132 = tpu.matmul %2, %131, %cst_40 {dimension_numbers = #tpu.dot_dimension_numbers<[1], [0], [0], [1], [0, 0, 1, 1], [], []>} : vector<16x32xf32>, vector<32x64xf32>, vector<16x64xf32> -> vector<16x64xf32>
    %133 = vector.extract_strided_slice %129 {offsets = [0, 0], sizes = [8, 32], strides = [1, 1]} : vector<16x32xf32> to vector<8x32xf32>
    %134 = vector.extract_strided_slice %133 {offsets = [0, 0], sizes = [8, 8], strides = [1, 1]} : vector<8x32xf32> to vector<8x8xf32>
    %135 = vector.extract_strided_slice %133 {offsets = [0, 8], sizes = [8, 8], strides = [1, 1]} : vector<8x32xf32> to vector<8x8xf32>
    %136 = vector.extract_strided_slice %133 {offsets = [0, 16], sizes = [8, 8], strides = [1, 1]} : vector<8x32xf32> to vector<8x8xf32>
    %137 = vector.extract_strided_slice %133 {offsets = [0, 24], sizes = [8, 8], strides = [1, 1]} : vector<8x32xf32> to vector<8x8xf32>
    %138 = vector.extract_strided_slice %129 {offsets = [8, 0], sizes = [8, 32], strides = [1, 1]} : vector<16x32xf32> to vector<8x32xf32>
    %139 = vector.extract_strided_slice %138 {offsets = [0, 0], sizes = [8, 8], strides = [1, 1]} : vector<8x32xf32> to vector<8x8xf32>
    %140 = vector.extract_strided_slice %138 {offsets = [0, 8], sizes = [8, 8], strides = [1, 1]} : vector<8x32xf32> to vector<8x8xf32>
    %141 = vector.extract_strided_slice %138 {offsets = [0, 16], sizes = [8, 8], strides = [1, 1]} : vector<8x32xf32> to vector<8x8xf32>
    %142 = vector.extract_strided_slice %138 {offsets = [0, 24], sizes = [8, 8], strides = [1, 1]} : vector<8x32xf32> to vector<8x8xf32>
    %143 = vector.shape_cast %134 : vector<8x8xf32> to vector<1x8x8xf32>
    %144 = vector.shape_cast %135 : vector<8x8xf32> to vector<1x8x8xf32>
    %145 = vector.shape_cast %136 : vector<8x8xf32> to vector<1x8x8xf32>
    %146 = vector.shape_cast %137 : vector<8x8xf32> to vector<1x8x8xf32>
    %147 = vector.shape_cast %139 : vector<8x8xf32> to vector<1x8x8xf32>
    %148 = vector.shape_cast %140 : vector<8x8xf32> to vector<1x8x8xf32>
    %149 = vector.shape_cast %141 : vector<8x8xf32> to vector<1x8x8xf32>
    %150 = vector.shape_cast %142 : vector<8x8xf32> to vector<1x8x8xf32>
    %151 = tpu.concatenate %143, %144, %145, %146, %147, %148, %149, %150 in 0 : vector<1x8x8xf32>, vector<1x8x8xf32>, vector<1x8x8xf32>, vector<1x8x8xf32>, vector<1x8x8xf32>, vector<1x8x8xf32>, vector<1x8x8xf32>, vector<1x8x8xf32> -> vector<8x8x8xf32>
    %152 = vector.extract_strided_slice %132 {offsets = [0, 0], sizes = [8, 64], strides = [1, 1]} : vector<16x64xf32> to vector<8x64xf32>
    %153 = vector.extract_strided_slice %152 {offsets = [0, 0], sizes = [8, 8], strides = [1, 1]} : vector<8x64xf32> to vector<8x8xf32>
    %154 = vector.extract_strided_slice %152 {offsets = [0, 8], sizes = [8, 8], strides = [1, 1]} : vector<8x64xf32> to vector<8x8xf32>
    %155 = vector.extract_strided_slice %152 {offsets = [0, 16], sizes = [8, 8], strides = [1, 1]} : vector<8x64xf32> to vector<8x8xf32>
    %156 = vector.extract_strided_slice %152 {offsets = [0, 24], sizes = [8, 8], strides = [1, 1]} : vector<8x64xf32> to vector<8x8xf32>
    %157 = vector.extract_strided_slice %132 {offsets = [8, 0], sizes = [8, 64], strides = [1, 1]} : vector<16x64xf32> to vector<8x64xf32>
    %158 = vector.extract_strided_slice %157 {offsets = [0, 0], sizes = [8, 8], strides = [1, 1]} : vector<8x64xf32> to vector<8x8xf32>
    %159 = vector.extract_strided_slice %157 {offsets = [0, 8], sizes = [8, 8], strides = [1, 1]} : vector<8x64xf32> to vector<8x8xf32>
    %160 = vector.extract_strided_slice %157 {offsets = [0, 16], sizes = [8, 8], strides = [1, 1]} : vector<8x64xf32> to vector<8x8xf32>
    %161 = vector.extract_strided_slice %157 {offsets = [0, 24], sizes = [8, 8], strides = [1, 1]} : vector<8x64xf32> to vector<8x8xf32>
    %162 = vector.shape_cast %153 : vector<8x8xf32> to vector<1x8x8xf32>
    %163 = vector.shape_cast %154 : vector<8x8xf32> to vector<1x8x8xf32>
    %164 = vector.shape_cast %155 : vector<8x8xf32> to vector<1x8x8xf32>
    %165 = vector.shape_cast %156 : vector<8x8xf32> to vector<1x8x8xf32>
    %166 = vector.shape_cast %158 : vector<8x8xf32> to vector<1x8x8xf32>
    %167 = vector.shape_cast %159 : vector<8x8xf32> to vector<1x8x8xf32>
    %168 = vector.shape_cast %160 : vector<8x8xf32> to vector<1x8x8xf32>
    %169 = vector.shape_cast %161 : vector<8x8xf32> to vector<1x8x8xf32>
    %170 = tpu.concatenate %162, %163, %164, %165, %166, %167, %168, %169 in 0 : vector<1x8x8xf32>, vector<1x8x8xf32>, vector<1x8x8xf32>, vector<1x8x8xf32>, vector<1x8x8xf32>, vector<1x8x8xf32>, vector<1x8x8xf32>, vector<1x8x8xf32> -> vector<8x8x8xf32>
    %171 = vector.extract_strided_slice %132 {offsets = [0, 0], sizes = [8, 64], strides = [1, 1]} : vector<16x64xf32> to vector<8x64xf32>
    %172 = vector.extract_strided_slice %171 {offsets = [0, 32], sizes = [8, 8], strides = [1, 1]} : vector<8x64xf32> to vector<8x8xf32>
    %173 = vector.extract_strided_slice %171 {offsets = [0, 40], sizes = [8, 8], strides = [1, 1]} : vector<8x64xf32> to vector<8x8xf32>
    %174 = vector.extract_strided_slice %171 {offsets = [0, 48], sizes = [8, 8], strides = [1, 1]} : vector<8x64xf32> to vector<8x8xf32>
    %175 = vector.extract_strided_slice %171 {offsets = [0, 56], sizes = [8, 8], strides = [1, 1]} : vector<8x64xf32> to vector<8x8xf32>
    %176 = vector.extract_strided_slice %132 {offsets = [8, 0], sizes = [8, 64], strides = [1, 1]} : vector<16x64xf32> to vector<8x64xf32>
    %177 = vector.extract_strided_slice %176 {offsets = [0, 32], sizes = [8, 8], strides = [1, 1]} : vector<8x64xf32> to vector<8x8xf32>
    %178 = vector.extract_strided_slice %176 {offsets = [0, 40], sizes = [8, 8], strides = [1, 1]} : vector<8x64xf32> to vector<8x8xf32>
    %179 = vector.extract_strided_slice %176 {offsets = [0, 48], sizes = [8, 8], strides = [1, 1]} : vector<8x64xf32> to vector<8x8xf32>
    %180 = vector.extract_strided_slice %176 {offsets = [0, 56], sizes = [8, 8], strides = [1, 1]} : vector<8x64xf32> to vector<8x8xf32>
    %181 = vector.shape_cast %172 : vector<8x8xf32> to vector<1x8x8xf32>
    %182 = vector.shape_cast %173 : vector<8x8xf32> to vector<1x8x8xf32>
    %183 = vector.shape_cast %174 : vector<8x8xf32> to vector<1x8x8xf32>
    %184 = vector.shape_cast %175 : vector<8x8xf32> to vector<1x8x8xf32>
    %185 = vector.shape_cast %177 : vector<8x8xf32> to vector<1x8x8xf32>
    %186 = vector.shape_cast %178 : vector<8x8xf32> to vector<1x8x8xf32>
    %187 = vector.shape_cast %179 : vector<8x8xf32> to vector<1x8x8xf32>
    %188 = vector.shape_cast %180 : vector<8x8xf32> to vector<1x8x8xf32>
    %189 = tpu.concatenate %181, %182, %183, %184, %185, %186, %187, %188 in 0 : vector<1x8x8xf32>, vector<1x8x8xf32>, vector<1x8x8xf32>, vector<1x8x8xf32>, vector<1x8x8xf32>, vector<1x8x8xf32>, vector<1x8x8xf32>, vector<1x8x8xf32> -> vector<8x8x8xf32>
    %c0_41 = arith.constant 0 : index
    %c0_42 = arith.constant 0 : index
    %c0_43 = arith.constant 0 : index
    %c0_44 = arith.constant 0 : index
    %c0_45 = arith.constant 0 : index
    %190 = vector.load %arg7[%c0_41, %c0_42, %c0_43, %c0_44, %c0_45] : memref<1x2x4x8x32xf32, #tpu.memory_space<vmem>>, vector<1x1x4x8x32xf32>
    %191 = vector.shape_cast %190 : vector<1x1x4x8x32xf32> to vector<4x8x32xf32>
    %cst_46 = arith.constant dense<0.000000e+00> : vector<8x8x8xf32>
    %192 = tpu.matmul %151, %170, %cst_46 {dimension_numbers = #tpu.dot_dimension_numbers<[2], [2], [1], [1], [0, 0, 0, 1, 1, 1], [0], [0]>} : vector<8x8x8xf32>, vector<8x8x8xf32>, vector<8x8x8xf32> -> vector<8x8x8xf32>
    %cst_47 = arith.constant 0.353553385 : f32
    %193 = arith.mulf %cst_47, %4 : f32
    %194 = vector.broadcast %193 : f32 to vector<8x8x8xf32>
    %195 = arith.mulf %192, %194 : vector<8x8x8xf32>
    %cst_48 = arith.constant dense<0xFF800000> : vector<8x8xf32>
    %196 = vector.multi_reduction <maximumf>, %195, %cst_48 [2] : vector<8x8x8xf32> to vector<8x8xf32>
    %197 = vector.shape_cast %196 : vector<8x8xf32> to vector<8x8x1xf32>
    %198 = vector.broadcast %197 : vector<8x8x1xf32> to vector<8x8x8xf32>
    %199 = arith.subf %195, %198 : vector<8x8x8xf32>
    %200 = math.exp %199 : vector<8x8x8xf32>
    %cst_49 = arith.constant dense<0.000000e+00> : vector<8x8xf32>
    %201 = vector.multi_reduction <add>, %200, %cst_49 [2] : vector<8x8x8xf32> to vector<8x8xf32>
    %202 = vector.shape_cast %201 : vector<8x8xf32> to vector<8x8x1xf32>
    %203 = vector.broadcast %202 : vector<8x8x1xf32> to vector<8x8x8xf32>
    %204 = arith.divf %200, %203 : vector<8x8x8xf32>
    %cst_50 = arith.constant dense<0.000000e+00> : vector<8x8x8xf32>
    %205 = tpu.matmul %204, %189, %cst_50 {dimension_numbers = #tpu.dot_dimension_numbers<[2], [1], [1], [2], [0, 0, 0, 1, 1, 2], [0], [0]>} : vector<8x8x8xf32>, vector<8x8x8xf32>, vector<8x8x8xf32> -> vector<8x8x8xf32>
    %206 = tpu.concatenate %191, %191 in 0 : vector<4x8x32xf32>, vector<4x8x32xf32> -> vector<8x8x32xf32>
    %cst_51 = arith.constant dense<0.000000e+00> : vector<8x8x32xf32>
    %207 = tpu.matmul %205, %206, %cst_51 {dimension_numbers = #tpu.dot_dimension_numbers<[2], [1], [1], [2], [0, 0, 0, 1, 1, 2], [0], [0]>} : vector<8x8x8xf32>, vector<8x8x32xf32>, vector<8x8x32xf32> -> vector<8x8x32xf32>
    %208 = vector.shape_cast %207 : vector<8x8x32xf32> to vector<2x4x8x32xf32>
    %209 = vector.extract_strided_slice %208 {offsets = [0, 0, 0, 0], sizes = [2, 1, 8, 32], strides = [1, 1, 1, 1]} : vector<2x4x8x32xf32> to vector<2x1x8x32xf32>
    %210 = vector.shape_cast %209 : vector<2x1x8x32xf32> to vector<2x8x32xf32>
    %211 = vector.extract_strided_slice %208 {offsets = [0, 1, 0, 0], sizes = [2, 1, 8, 32], strides = [1, 1, 1, 1]} : vector<2x4x8x32xf32> to vector<2x1x8x32xf32>
    %212 = vector.shape_cast %211 : vector<2x1x8x32xf32> to vector<2x8x32xf32>
    %213 = arith.addf %210, %212 : vector<2x8x32xf32>
    %214 = vector.extract_strided_slice %208 {offsets = [0, 2, 0, 0], sizes = [2, 1, 8, 32], strides = [1, 1, 1, 1]} : vector<2x4x8x32xf32> to vector<2x1x8x32xf32>
    %215 = vector.shape_cast %214 : vector<2x1x8x32xf32> to vector<2x8x32xf32>
    %216 = arith.addf %213, %215 : vector<2x8x32xf32>
    %217 = vector.extract_strided_slice %208 {offsets = [0, 3, 0, 0], sizes = [2, 1, 8, 32], strides = [1, 1, 1, 1]} : vector<2x4x8x32xf32> to vector<2x1x8x32xf32>
    %218 = vector.shape_cast %217 : vector<2x1x8x32xf32> to vector<2x8x32xf32>
    %219 = arith.addf %216, %218 : vector<2x8x32xf32>
    %220 = vector.shape_cast %219 : vector<2x8x32xf32> to vector<16x32xf32>
    %221 = arith.addf %126, %220 : vector<16x32xf32>
    %222 = vector.extract_strided_slice %6 {offsets = [2, 0], sizes = [1, 32], strides = [1, 1]} : vector<6x32xf32> to vector<1x32xf32>
    %223 = vector.shape_cast %222 : vector<1x32xf32> to vector<32xf32>
    %224 = vector.extract_strided_slice %6 {offsets = [3, 0], sizes = [1, 32], strides = [1, 1]} : vector<6x32xf32> to vector<1x32xf32>
    %225 = vector.shape_cast %224 : vector<1x32xf32> to vector<32xf32>
    %cst_52 = arith.constant dense<0.000000e+00> : vector<16xf32>
    %226 = vector.multi_reduction <add>, %221, %cst_52 [1] : vector<16x32xf32> to vector<16xf32>
    %227 = vector.shape_cast %226 : vector<16xf32> to vector<16x1xf32>
    %cst_53 = arith.constant 3.200000e+01 : f32
    %228 = vector.broadcast %cst_53 : f32 to vector<16x1xf32>
    %229 = arith.divf %227, %228 : vector<16x1xf32>
    %230 = vector.broadcast %229 : vector<16x1xf32> to vector<16x32xf32>
    %231 = arith.subf %221, %230 : vector<16x32xf32>
    %232 = arith.mulf %231, %231 : vector<16x32xf32>
    %cst_54 = arith.constant dense<0.000000e+00> : vector<16xf32>
    %233 = vector.multi_reduction <add>, %232, %cst_54 [1] : vector<16x32xf32> to vector<16xf32>
    %234 = vector.shape_cast %233 : vector<16xf32> to vector<16x1xf32>
    %cst_55 = arith.constant 3.200000e+01 : f32
    %235 = vector.broadcast %cst_55 : f32 to vector<16x1xf32>
    %236 = arith.divf %234, %235 : vector<16x1xf32>
    %237 = vector.broadcast %229 : vector<16x1xf32> to vector<16x32xf32>
    %238 = arith.subf %221, %237 : vector<16x32xf32>
    %cst_56 = arith.constant 9.99999974E-6 : f32
    %239 = vector.broadcast %cst_56 : f32 to vector<16x1xf32>
    %240 = arith.addf %236, %239 : vector<16x1xf32>
    %241 = math.rsqrt %240 : vector<16x1xf32>
    %242 = vector.broadcast %241 : vector<16x1xf32> to vector<16x32xf32>
    %243 = arith.mulf %238, %242 : vector<16x32xf32>
    %244 = vector.shape_cast %223 : vector<32xf32> to vector<1x32xf32>
    %245 = vector.broadcast %244 : vector<1x32xf32> to vector<16x32xf32>
    %246 = arith.mulf %243, %245 : vector<16x32xf32>
    %247 = vector.shape_cast %225 : vector<32xf32> to vector<1x32xf32>
    %248 = vector.broadcast %247 : vector<1x32xf32> to vector<16x32xf32>
    %249 = arith.addf %246, %248 : vector<16x32xf32>
    %c0_57 = arith.constant 0 : index
    %c0_58 = arith.constant 0 : index
    %c0_59 = arith.constant 0 : index
    %c0_60 = arith.constant 0 : index
    %250 = vector.load %arg8[%c0_57, %c0_58, %c0_59, %c0_60] : memref<1x2x32x64xf32, #tpu.memory_space<vmem>>, vector<1x1x32x64xf32>
    %251 = vector.shape_cast %250 : vector<1x1x32x64xf32> to vector<32x64xf32>
    %cst_61 = arith.constant dense<0.000000e+00> : vector<16x64xf32>
    %252 = tpu.matmul %249, %251, %cst_61 {dimension_numbers = #tpu.dot_dimension_numbers<[1], [0], [0], [1], [0, 0, 1, 1], [], []>} : vector<16x32xf32>, vector<32x64xf32>, vector<16x64xf32> -> vector<16x64xf32>
    %c0_62 = arith.constant 0 : index
    %c0_63 = arith.constant 0 : index
    %c0_64 = arith.constant 0 : index
    %c0_65 = arith.constant 0 : index
    %253 = vector.load %arg9[%c0_62, %c0_63, %c0_64, %c0_65] : memref<1x2x1x64xf32, #tpu.memory_space<vmem>>, vector<1x1x1x64xf32>
    %254 = vector.shape_cast %253 : vector<1x1x1x64xf32> to vector<1x64xf32>
    %255 = vector.broadcast %254 : vector<1x64xf32> to vector<16x64xf32>
    %256 = arith.addf %252, %255 : vector<16x64xf32>
    %cst_66 = arith.constant 0.000000e+00 : f32
    %257 = vector.broadcast %cst_66 : f32 to vector<16x64xf32>
    %258 = arith.cmpf ogt, %256, %257 : vector<16x64xf32>
    %cst_67 = arith.constant 0.00999999977 : f32
    %259 = vector.broadcast %cst_67 : f32 to vector<16x64xf32>
    %260 = arith.mulf %259, %256 : vector<16x64xf32>
    %261 = arith.select %258, %256, %260 : vector<16x64xi1>, vector<16x64xf32>
    %c0_68 = arith.constant 0 : index
    %c0_69 = arith.constant 0 : index
    %c0_70 = arith.constant 0 : index
    %c0_71 = arith.constant 0 : index
    %262 = vector.load %arg10[%c0_68, %c0_69, %c0_70, %c0_71] : memref<1x2x64x32xf32, #tpu.memory_space<vmem>>, vector<1x1x64x32xf32>
    %263 = vector.shape_cast %262 : vector<1x1x64x32xf32> to vector<64x32xf32>
    %cst_72 = arith.constant dense<0.000000e+00> : vector<16x32xf32>
    %264 = tpu.matmul %261, %263, %cst_72 {dimension_numbers = #tpu.dot_dimension_numbers<[1], [0], [0], [1], [0, 0, 1, 1], [], []>} : vector<16x64xf32>, vector<64x32xf32>, vector<16x32xf32> -> vector<16x32xf32>
    %c0_73 = arith.constant 0 : index
    %c0_74 = arith.constant 0 : index
    %c0_75 = arith.constant 0 : index
    %c0_76 = arith.constant 0 : index
    %265 = vector.load %arg11[%c0_73, %c0_74, %c0_75, %c0_76] : memref<1x2x1x32xf32, #tpu.memory_space<vmem>>, vector<1x1x1x32xf32>
    %266 = vector.shape_cast %265 : vector<1x1x1x32xf32> to vector<1x32xf32>
    %267 = vector.broadcast %266 : vector<1x32xf32> to vector<16x32xf32>
    %268 = arith.addf %264, %267 : vector<16x32xf32>
    %269 = arith.addf %249, %268 : vector<16x32xf32>
    %270 = vector.extract_strided_slice %6 {offsets = [4, 0], sizes = [1, 32], strides = [1, 1]} : vector<6x32xf32> to vector<1x32xf32>
    %271 = vector.shape_cast %270 : vector<1x32xf32> to vector<32xf32>
    %272 = vector.extract_strided_slice %6 {offsets = [5, 0], sizes = [1, 32], strides = [1, 1]} : vector<6x32xf32> to vector<1x32xf32>
    %273 = vector.shape_cast %272 : vector<1x32xf32> to vector<32xf32>
    %cst_77 = arith.constant dense<0.000000e+00> : vector<16xf32>
    %274 = vector.multi_reduction <add>, %269, %cst_77 [1] : vector<16x32xf32> to vector<16xf32>
    %275 = vector.shape_cast %274 : vector<16xf32> to vector<16x1xf32>
    %cst_78 = arith.constant 3.200000e+01 : f32
    %276 = vector.broadcast %cst_78 : f32 to vector<16x1xf32>
    %277 = arith.divf %275, %276 : vector<16x1xf32>
    %278 = vector.broadcast %277 : vector<16x1xf32> to vector<16x32xf32>
    %279 = arith.subf %269, %278 : vector<16x32xf32>
    %280 = arith.mulf %279, %279 : vector<16x32xf32>
    %cst_79 = arith.constant dense<0.000000e+00> : vector<16xf32>
    %281 = vector.multi_reduction <add>, %280, %cst_79 [1] : vector<16x32xf32> to vector<16xf32>
    %282 = vector.shape_cast %281 : vector<16xf32> to vector<16x1xf32>
    %cst_80 = arith.constant 3.200000e+01 : f32
    %283 = vector.broadcast %cst_80 : f32 to vector<16x1xf32>
    %284 = arith.divf %282, %283 : vector<16x1xf32>
    %285 = vector.broadcast %277 : vector<16x1xf32> to vector<16x32xf32>
    %286 = arith.subf %269, %285 : vector<16x32xf32>
    %cst_81 = arith.constant 9.99999974E-6 : f32
    %287 = vector.broadcast %cst_81 : f32 to vector<16x1xf32>
    %288 = arith.addf %284, %287 : vector<16x1xf32>
    %289 = math.rsqrt %288 : vector<16x1xf32>
    %290 = vector.broadcast %289 : vector<16x1xf32> to vector<16x32xf32>
    %291 = arith.mulf %286, %290 : vector<16x32xf32>
    %292 = vector.shape_cast %271 : vector<32xf32> to vector<1x32xf32>
    %293 = vector.broadcast %292 : vector<1x32xf32> to vector<16x32xf32>
    %294 = arith.mulf %291, %293 : vector<16x32xf32>
    %295 = vector.shape_cast %273 : vector<32xf32> to vector<1x32xf32>
    %296 = vector.broadcast %295 : vector<1x32xf32> to vector<16x32xf32>
    %297 = arith.addf %294, %296 : vector<16x32xf32>
    %c0_82 = arith.constant 0 : index
    %c1 = arith.constant 1 : index
    %c0_83 = arith.constant 0 : index
    %c0_84 = arith.constant 0 : index
    %298 = vector.load %arg12[%c0_82, %c1, %c0_83, %c0_84] : memref<1x2x6x32xf32, #tpu.memory_space<vmem>>, vector<1x1x6x32xf32>
    %299 = vector.shape_cast %298 : vector<1x1x6x32xf32> to vector<6x32xf32>
    %c0_85 = arith.constant 0 : index
    %c1_86 = arith.constant 1 : index
    %c0_87 = arith.constant 0 : index
    %c0_88 = arith.constant 0 : index
    %300 = vector.load %arg3[%c0_85, %c1_86, %c0_87, %c0_88] : memref<1x2x32x96xf32, #tpu.memory_space<vmem>>, vector<1x1x32x96xf32>
    %301 = vector.shape_cast %300 : vector<1x1x32x96xf32> to vector<32x96xf32>
    %cst_89 = arith.constant dense<0.000000e+00> : vector<16x96xf32>
    %302 = tpu.matmul %297, %301, %cst_89 {dimension_numbers = #tpu.dot_dimension_numbers<[1], [0], [0], [1], [0, 0, 1, 1], [], []>} : vector<16x32xf32>, vector<32x96xf32>, vector<16x96xf32> -> vector<16x96xf32>
    %303 = vector.extract_strided_slice %302 {offsets = [0, 0], sizes = [8, 96], strides = [1, 1]} : vector<16x96xf32> to vector<8x96xf32>
    %304 = vector.extract_strided_slice %303 {offsets = [0, 0], sizes = [8, 8], strides = [1, 1]} : vector<8x96xf32> to vector<8x8xf32>
    %305 = vector.extract_strided_slice %303 {offsets = [0, 8], sizes = [8, 8], strides = [1, 1]} : vector<8x96xf32> to vector<8x8xf32>
    %306 = vector.extract_strided_slice %303 {offsets = [0, 16], sizes = [8, 8], strides = [1, 1]} : vector<8x96xf32> to vector<8x8xf32>
    %307 = vector.extract_strided_slice %303 {offsets = [0, 24], sizes = [8, 8], strides = [1, 1]} : vector<8x96xf32> to vector<8x8xf32>
    %308 = vector.extract_strided_slice %302 {offsets = [8, 0], sizes = [8, 96], strides = [1, 1]} : vector<16x96xf32> to vector<8x96xf32>
    %309 = vector.extract_strided_slice %308 {offsets = [0, 0], sizes = [8, 8], strides = [1, 1]} : vector<8x96xf32> to vector<8x8xf32>
    %310 = vector.extract_strided_slice %308 {offsets = [0, 8], sizes = [8, 8], strides = [1, 1]} : vector<8x96xf32> to vector<8x8xf32>
    %311 = vector.extract_strided_slice %308 {offsets = [0, 16], sizes = [8, 8], strides = [1, 1]} : vector<8x96xf32> to vector<8x8xf32>
    %312 = vector.extract_strided_slice %308 {offsets = [0, 24], sizes = [8, 8], strides = [1, 1]} : vector<8x96xf32> to vector<8x8xf32>
    %313 = vector.shape_cast %304 : vector<8x8xf32> to vector<1x8x8xf32>
    %314 = vector.shape_cast %305 : vector<8x8xf32> to vector<1x8x8xf32>
    %315 = vector.shape_cast %306 : vector<8x8xf32> to vector<1x8x8xf32>
    %316 = vector.shape_cast %307 : vector<8x8xf32> to vector<1x8x8xf32>
    %317 = vector.shape_cast %309 : vector<8x8xf32> to vector<1x8x8xf32>
    %318 = vector.shape_cast %310 : vector<8x8xf32> to vector<1x8x8xf32>
    %319 = vector.shape_cast %311 : vector<8x8xf32> to vector<1x8x8xf32>
    %320 = vector.shape_cast %312 : vector<8x8xf32> to vector<1x8x8xf32>
    %321 = tpu.concatenate %313, %314, %315, %316, %317, %318, %319, %320 in 0 : vector<1x8x8xf32>, vector<1x8x8xf32>, vector<1x8x8xf32>, vector<1x8x8xf32>, vector<1x8x8xf32>, vector<1x8x8xf32>, vector<1x8x8xf32>, vector<1x8x8xf32> -> vector<8x8x8xf32>
    %322 = vector.extract_strided_slice %302 {offsets = [0, 0], sizes = [8, 96], strides = [1, 1]} : vector<16x96xf32> to vector<8x96xf32>
    %323 = vector.extract_strided_slice %322 {offsets = [0, 32], sizes = [8, 8], strides = [1, 1]} : vector<8x96xf32> to vector<8x8xf32>
    %324 = vector.extract_strided_slice %322 {offsets = [0, 40], sizes = [8, 8], strides = [1, 1]} : vector<8x96xf32> to vector<8x8xf32>
    %325 = vector.extract_strided_slice %322 {offsets = [0, 48], sizes = [8, 8], strides = [1, 1]} : vector<8x96xf32> to vector<8x8xf32>
    %326 = vector.extract_strided_slice %322 {offsets = [0, 56], sizes = [8, 8], strides = [1, 1]} : vector<8x96xf32> to vector<8x8xf32>
    %327 = vector.extract_strided_slice %302 {offsets = [8, 0], sizes = [8, 96], strides = [1, 1]} : vector<16x96xf32> to vector<8x96xf32>
    %328 = vector.extract_strided_slice %327 {offsets = [0, 32], sizes = [8, 8], strides = [1, 1]} : vector<8x96xf32> to vector<8x8xf32>
    %329 = vector.extract_strided_slice %327 {offsets = [0, 40], sizes = [8, 8], strides = [1, 1]} : vector<8x96xf32> to vector<8x8xf32>
    %330 = vector.extract_strided_slice %327 {offsets = [0, 48], sizes = [8, 8], strides = [1, 1]} : vector<8x96xf32> to vector<8x8xf32>
    %331 = vector.extract_strided_slice %327 {offsets = [0, 56], sizes = [8, 8], strides = [1, 1]} : vector<8x96xf32> to vector<8x8xf32>
    %332 = vector.shape_cast %323 : vector<8x8xf32> to vector<1x8x8xf32>
    %333 = vector.shape_cast %324 : vector<8x8xf32> to vector<1x8x8xf32>
    %334 = vector.shape_cast %325 : vector<8x8xf32> to vector<1x8x8xf32>
    %335 = vector.shape_cast %326 : vector<8x8xf32> to vector<1x8x8xf32>
    %336 = vector.shape_cast %328 : vector<8x8xf32> to vector<1x8x8xf32>
    %337 = vector.shape_cast %329 : vector<8x8xf32> to vector<1x8x8xf32>
    %338 = vector.shape_cast %330 : vector<8x8xf32> to vector<1x8x8xf32>
    %339 = vector.shape_cast %331 : vector<8x8xf32> to vector<1x8x8xf32>
    %340 = tpu.concatenate %332, %333, %334, %335, %336, %337, %338, %339 in 0 : vector<1x8x8xf32>, vector<1x8x8xf32>, vector<1x8x8xf32>, vector<1x8x8xf32>, vector<1x8x8xf32>, vector<1x8x8xf32>, vector<1x8x8xf32>, vector<1x8x8xf32> -> vector<8x8x8xf32>
    %341 = vector.extract_strided_slice %302 {offsets = [0, 0], sizes = [8, 96], strides = [1, 1]} : vector<16x96xf32> to vector<8x96xf32>
    %342 = vector.extract_strided_slice %341 {offsets = [0, 64], sizes = [8, 8], strides = [1, 1]} : vector<8x96xf32> to vector<8x8xf32>
    %343 = vector.extract_strided_slice %341 {offsets = [0, 72], sizes = [8, 8], strides = [1, 1]} : vector<8x96xf32> to vector<8x8xf32>
    %344 = vector.extract_strided_slice %341 {offsets = [0, 80], sizes = [8, 8], strides = [1, 1]} : vector<8x96xf32> to vector<8x8xf32>
    %345 = vector.extract_strided_slice %341 {offsets = [0, 88], sizes = [8, 8], strides = [1, 1]} : vector<8x96xf32> to vector<8x8xf32>
    %346 = vector.extract_strided_slice %302 {offsets = [8, 0], sizes = [8, 96], strides = [1, 1]} : vector<16x96xf32> to vector<8x96xf32>
    %347 = vector.extract_strided_slice %346 {offsets = [0, 64], sizes = [8, 8], strides = [1, 1]} : vector<8x96xf32> to vector<8x8xf32>
    %348 = vector.extract_strided_slice %346 {offsets = [0, 72], sizes = [8, 8], strides = [1, 1]} : vector<8x96xf32> to vector<8x8xf32>
    %349 = vector.extract_strided_slice %346 {offsets = [0, 80], sizes = [8, 8], strides = [1, 1]} : vector<8x96xf32> to vector<8x8xf32>
    %350 = vector.extract_strided_slice %346 {offsets = [0, 88], sizes = [8, 8], strides = [1, 1]} : vector<8x96xf32> to vector<8x8xf32>
    %351 = vector.shape_cast %342 : vector<8x8xf32> to vector<1x8x8xf32>
    %352 = vector.shape_cast %343 : vector<8x8xf32> to vector<1x8x8xf32>
    %353 = vector.shape_cast %344 : vector<8x8xf32> to vector<1x8x8xf32>
    %354 = vector.shape_cast %345 : vector<8x8xf32> to vector<1x8x8xf32>
    %355 = vector.shape_cast %347 : vector<8x8xf32> to vector<1x8x8xf32>
    %356 = vector.shape_cast %348 : vector<8x8xf32> to vector<1x8x8xf32>
    %357 = vector.shape_cast %349 : vector<8x8xf32> to vector<1x8x8xf32>
    %358 = vector.shape_cast %350 : vector<8x8xf32> to vector<1x8x8xf32>
    %359 = tpu.concatenate %351, %352, %353, %354, %355, %356, %357, %358 in 0 : vector<1x8x8xf32>, vector<1x8x8xf32>, vector<1x8x8xf32>, vector<1x8x8xf32>, vector<1x8x8xf32>, vector<1x8x8xf32>, vector<1x8x8xf32>, vector<1x8x8xf32> -> vector<8x8x8xf32>
    %c0_90 = arith.constant 0 : index
    %c1_91 = arith.constant 1 : index
    %c0_92 = arith.constant 0 : index
    %c0_93 = arith.constant 0 : index
    %c0_94 = arith.constant 0 : index
    %360 = vector.load %arg4[%c0_90, %c1_91, %c0_92, %c0_93, %c0_94] : memref<1x2x4x8x32xf32, #tpu.memory_space<vmem>>, vector<1x1x4x8x32xf32>
    %361 = vector.shape_cast %360 : vector<1x1x4x8x32xf32> to vector<4x8x32xf32>
    %cst_95 = arith.constant dense<0.000000e+00> : vector<8x8x8xf32>
    %362 = tpu.matmul %321, %340, %cst_95 {dimension_numbers = #tpu.dot_dimension_numbers<[2], [2], [1], [1], [0, 0, 0, 1, 1, 1], [0], [0]>} : vector<8x8x8xf32>, vector<8x8x8xf32>, vector<8x8x8xf32> -> vector<8x8x8xf32>
    %cst_96 = arith.constant 0.353553385 : f32
    %363 = arith.mulf %cst_96, %4 : f32
    %364 = vector.broadcast %363 : f32 to vector<8x8x8xf32>
    %365 = arith.mulf %362, %364 : vector<8x8x8xf32>
    %cst_97 = arith.constant dense<0xFF800000> : vector<8x8xf32>
    %366 = vector.multi_reduction <maximumf>, %365, %cst_97 [2] : vector<8x8x8xf32> to vector<8x8xf32>
    %367 = vector.shape_cast %366 : vector<8x8xf32> to vector<8x8x1xf32>
    %368 = vector.broadcast %367 : vector<8x8x1xf32> to vector<8x8x8xf32>
    %369 = arith.subf %365, %368 : vector<8x8x8xf32>
    %370 = math.exp %369 : vector<8x8x8xf32>
    %cst_98 = arith.constant dense<0.000000e+00> : vector<8x8xf32>
    %371 = vector.multi_reduction <add>, %370, %cst_98 [2] : vector<8x8x8xf32> to vector<8x8xf32>
    %372 = vector.shape_cast %371 : vector<8x8xf32> to vector<8x8x1xf32>
    %373 = vector.broadcast %372 : vector<8x8x1xf32> to vector<8x8x8xf32>
    %374 = arith.divf %370, %373 : vector<8x8x8xf32>
    %cst_99 = arith.constant dense<0.000000e+00> : vector<8x8x8xf32>
    %375 = tpu.matmul %374, %359, %cst_99 {dimension_numbers = #tpu.dot_dimension_numbers<[2], [1], [1], [2], [0, 0, 0, 1, 1, 2], [0], [0]>} : vector<8x8x8xf32>, vector<8x8x8xf32>, vector<8x8x8xf32> -> vector<8x8x8xf32>
    %376 = tpu.concatenate %361, %361 in 0 : vector<4x8x32xf32>, vector<4x8x32xf32> -> vector<8x8x32xf32>
    %cst_100 = arith.constant dense<0.000000e+00> : vector<8x8x32xf32>
    %377 = tpu.matmul %375, %376, %cst_100 {dimension_numbers = #tpu.dot_dimension_numbers<[2], [1], [1], [2], [0, 0, 0, 1, 1, 2], [0], [0]>} : vector<8x8x8xf32>, vector<8x8x32xf32>, vector<8x8x32xf32> -> vector<8x8x32xf32>
    %378 = vector.shape_cast %377 : vector<8x8x32xf32> to vector<2x4x8x32xf32>
    %379 = vector.extract_strided_slice %378 {offsets = [0, 0, 0, 0], sizes = [2, 1, 8, 32], strides = [1, 1, 1, 1]} : vector<2x4x8x32xf32> to vector<2x1x8x32xf32>
    %380 = vector.shape_cast %379 : vector<2x1x8x32xf32> to vector<2x8x32xf32>
    %381 = vector.extract_strided_slice %378 {offsets = [0, 1, 0, 0], sizes = [2, 1, 8, 32], strides = [1, 1, 1, 1]} : vector<2x4x8x32xf32> to vector<2x1x8x32xf32>
    %382 = vector.shape_cast %381 : vector<2x1x8x32xf32> to vector<2x8x32xf32>
    %383 = arith.addf %380, %382 : vector<2x8x32xf32>
    %384 = vector.extract_strided_slice %378 {offsets = [0, 2, 0, 0], sizes = [2, 1, 8, 32], strides = [1, 1, 1, 1]} : vector<2x4x8x32xf32> to vector<2x1x8x32xf32>
    %385 = vector.shape_cast %384 : vector<2x1x8x32xf32> to vector<2x8x32xf32>
    %386 = arith.addf %383, %385 : vector<2x8x32xf32>
    %387 = vector.extract_strided_slice %378 {offsets = [0, 3, 0, 0], sizes = [2, 1, 8, 32], strides = [1, 1, 1, 1]} : vector<2x4x8x32xf32> to vector<2x1x8x32xf32>
    %388 = vector.shape_cast %387 : vector<2x1x8x32xf32> to vector<2x8x32xf32>
    %389 = arith.addf %386, %388 : vector<2x8x32xf32>
    %390 = vector.shape_cast %389 : vector<2x8x32xf32> to vector<16x32xf32>
    %391 = arith.addf %297, %390 : vector<16x32xf32>
    %392 = vector.extract_strided_slice %299 {offsets = [0, 0], sizes = [1, 32], strides = [1, 1]} : vector<6x32xf32> to vector<1x32xf32>
    %393 = vector.shape_cast %392 : vector<1x32xf32> to vector<32xf32>
    %394 = vector.extract_strided_slice %299 {offsets = [1, 0], sizes = [1, 32], strides = [1, 1]} : vector<6x32xf32> to vector<1x32xf32>
    %395 = vector.shape_cast %394 : vector<1x32xf32> to vector<32xf32>
    %cst_101 = arith.constant dense<0.000000e+00> : vector<16xf32>
    %396 = vector.multi_reduction <add>, %391, %cst_101 [1] : vector<16x32xf32> to vector<16xf32>
    %397 = vector.shape_cast %396 : vector<16xf32> to vector<16x1xf32>
    %cst_102 = arith.constant 3.200000e+01 : f32
    %398 = vector.broadcast %cst_102 : f32 to vector<16x1xf32>
    %399 = arith.divf %397, %398 : vector<16x1xf32>
    %400 = vector.broadcast %399 : vector<16x1xf32> to vector<16x32xf32>
    %401 = arith.subf %391, %400 : vector<16x32xf32>
    %402 = arith.mulf %401, %401 : vector<16x32xf32>
    %cst_103 = arith.constant dense<0.000000e+00> : vector<16xf32>
    %403 = vector.multi_reduction <add>, %402, %cst_103 [1] : vector<16x32xf32> to vector<16xf32>
    %404 = vector.shape_cast %403 : vector<16xf32> to vector<16x1xf32>
    %cst_104 = arith.constant 3.200000e+01 : f32
    %405 = vector.broadcast %cst_104 : f32 to vector<16x1xf32>
    %406 = arith.divf %404, %405 : vector<16x1xf32>
    %407 = vector.broadcast %399 : vector<16x1xf32> to vector<16x32xf32>
    %408 = arith.subf %391, %407 : vector<16x32xf32>
    %cst_105 = arith.constant 9.99999974E-6 : f32
    %409 = vector.broadcast %cst_105 : f32 to vector<16x1xf32>
    %410 = arith.addf %406, %409 : vector<16x1xf32>
    %411 = math.rsqrt %410 : vector<16x1xf32>
    %412 = vector.broadcast %411 : vector<16x1xf32> to vector<16x32xf32>
    %413 = arith.mulf %408, %412 : vector<16x32xf32>
    %414 = vector.shape_cast %393 : vector<32xf32> to vector<1x32xf32>
    %415 = vector.broadcast %414 : vector<1x32xf32> to vector<16x32xf32>
    %416 = arith.mulf %413, %415 : vector<16x32xf32>
    %417 = vector.shape_cast %395 : vector<32xf32> to vector<1x32xf32>
    %418 = vector.broadcast %417 : vector<1x32xf32> to vector<16x32xf32>
    %419 = arith.addf %416, %418 : vector<16x32xf32>
    %c0_106 = arith.constant 0 : index
    %c1_107 = arith.constant 1 : index
    %c0_108 = arith.constant 0 : index
    %c0_109 = arith.constant 0 : index
    %420 = vector.load %arg5[%c0_106, %c1_107, %c0_108, %c0_109] : memref<1x2x32x32xf32, #tpu.memory_space<vmem>>, vector<1x1x32x32xf32>
    %421 = vector.shape_cast %420 : vector<1x1x32x32xf32> to vector<32x32xf32>
    %cst_110 = arith.constant dense<0.000000e+00> : vector<16x32xf32>
    %422 = tpu.matmul %419, %421, %cst_110 {dimension_numbers = #tpu.dot_dimension_numbers<[1], [0], [0], [1], [0, 0, 1, 1], [], []>} : vector<16x32xf32>, vector<32x32xf32>, vector<16x32xf32> -> vector<16x32xf32>
    %c0_111 = arith.constant 0 : index
    %c1_112 = arith.constant 1 : index
    %c0_113 = arith.constant 0 : index
    %c0_114 = arith.constant 0 : index
    %423 = vector.load %arg6[%c0_111, %c1_112, %c0_113, %c0_114] : memref<1x2x32x64xf32, #tpu.memory_space<vmem>>, vector<1x1x32x64xf32>
    %424 = vector.shape_cast %423 : vector<1x1x32x64xf32> to vector<32x64xf32>
    %cst_115 = arith.constant dense<0.000000e+00> : vector<16x64xf32>
    %425 = tpu.matmul %2, %424, %cst_115 {dimension_numbers = #tpu.dot_dimension_numbers<[1], [0], [0], [1], [0, 0, 1, 1], [], []>} : vector<16x32xf32>, vector<32x64xf32>, vector<16x64xf32> -> vector<16x64xf32>
    %426 = vector.extract_strided_slice %422 {offsets = [0, 0], sizes = [8, 32], strides = [1, 1]} : vector<16x32xf32> to vector<8x32xf32>
    %427 = vector.extract_strided_slice %426 {offsets = [0, 0], sizes = [8, 8], strides = [1, 1]} : vector<8x32xf32> to vector<8x8xf32>
    %428 = vector.extract_strided_slice %426 {offsets = [0, 8], sizes = [8, 8], strides = [1, 1]} : vector<8x32xf32> to vector<8x8xf32>
    %429 = vector.extract_strided_slice %426 {offsets = [0, 16], sizes = [8, 8], strides = [1, 1]} : vector<8x32xf32> to vector<8x8xf32>
    %430 = vector.extract_strided_slice %426 {offsets = [0, 24], sizes = [8, 8], strides = [1, 1]} : vector<8x32xf32> to vector<8x8xf32>
    %431 = vector.extract_strided_slice %422 {offsets = [8, 0], sizes = [8, 32], strides = [1, 1]} : vector<16x32xf32> to vector<8x32xf32>
    %432 = vector.extract_strided_slice %431 {offsets = [0, 0], sizes = [8, 8], strides = [1, 1]} : vector<8x32xf32> to vector<8x8xf32>
    %433 = vector.extract_strided_slice %431 {offsets = [0, 8], sizes = [8, 8], strides = [1, 1]} : vector<8x32xf32> to vector<8x8xf32>
    %434 = vector.extract_strided_slice %431 {offsets = [0, 16], sizes = [8, 8], strides = [1, 1]} : vector<8x32xf32> to vector<8x8xf32>
    %435 = vector.extract_strided_slice %431 {offsets = [0, 24], sizes = [8, 8], strides = [1, 1]} : vector<8x32xf32> to vector<8x8xf32>
    %436 = vector.shape_cast %427 : vector<8x8xf32> to vector<1x8x8xf32>
    %437 = vector.shape_cast %428 : vector<8x8xf32> to vector<1x8x8xf32>
    %438 = vector.shape_cast %429 : vector<8x8xf32> to vector<1x8x8xf32>
    %439 = vector.shape_cast %430 : vector<8x8xf32> to vector<1x8x8xf32>
    %440 = vector.shape_cast %432 : vector<8x8xf32> to vector<1x8x8xf32>
    %441 = vector.shape_cast %433 : vector<8x8xf32> to vector<1x8x8xf32>
    %442 = vector.shape_cast %434 : vector<8x8xf32> to vector<1x8x8xf32>
    %443 = vector.shape_cast %435 : vector<8x8xf32> to vector<1x8x8xf32>
    %444 = tpu.concatenate %436, %437, %438, %439, %440, %441, %442, %443 in 0 : vector<1x8x8xf32>, vector<1x8x8xf32>, vector<1x8x8xf32>, vector<1x8x8xf32>, vector<1x8x8xf32>, vector<1x8x8xf32>, vector<1x8x8xf32>, vector<1x8x8xf32> -> vector<8x8x8xf32>
    %445 = vector.extract_strided_slice %425 {offsets = [0, 0], sizes = [8, 64], strides = [1, 1]} : vector<16x64xf32> to vector<8x64xf32>
    %446 = vector.extract_strided_slice %445 {offsets = [0, 0], sizes = [8, 8], strides = [1, 1]} : vector<8x64xf32> to vector<8x8xf32>
    %447 = vector.extract_strided_slice %445 {offsets = [0, 8], sizes = [8, 8], strides = [1, 1]} : vector<8x64xf32> to vector<8x8xf32>
    %448 = vector.extract_strided_slice %445 {offsets = [0, 16], sizes = [8, 8], strides = [1, 1]} : vector<8x64xf32> to vector<8x8xf32>
    %449 = vector.extract_strided_slice %445 {offsets = [0, 24], sizes = [8, 8], strides = [1, 1]} : vector<8x64xf32> to vector<8x8xf32>
    %450 = vector.extract_strided_slice %425 {offsets = [8, 0], sizes = [8, 64], strides = [1, 1]} : vector<16x64xf32> to vector<8x64xf32>
    %451 = vector.extract_strided_slice %450 {offsets = [0, 0], sizes = [8, 8], strides = [1, 1]} : vector<8x64xf32> to vector<8x8xf32>
    %452 = vector.extract_strided_slice %450 {offsets = [0, 8], sizes = [8, 8], strides = [1, 1]} : vector<8x64xf32> to vector<8x8xf32>
    %453 = vector.extract_strided_slice %450 {offsets = [0, 16], sizes = [8, 8], strides = [1, 1]} : vector<8x64xf32> to vector<8x8xf32>
    %454 = vector.extract_strided_slice %450 {offsets = [0, 24], sizes = [8, 8], strides = [1, 1]} : vector<8x64xf32> to vector<8x8xf32>
    %455 = vector.shape_cast %446 : vector<8x8xf32> to vector<1x8x8xf32>
    %456 = vector.shape_cast %447 : vector<8x8xf32> to vector<1x8x8xf32>
    %457 = vector.shape_cast %448 : vector<8x8xf32> to vector<1x8x8xf32>
    %458 = vector.shape_cast %449 : vector<8x8xf32> to vector<1x8x8xf32>
    %459 = vector.shape_cast %451 : vector<8x8xf32> to vector<1x8x8xf32>
    %460 = vector.shape_cast %452 : vector<8x8xf32> to vector<1x8x8xf32>
    %461 = vector.shape_cast %453 : vector<8x8xf32> to vector<1x8x8xf32>
    %462 = vector.shape_cast %454 : vector<8x8xf32> to vector<1x8x8xf32>
    %463 = tpu.concatenate %455, %456, %457, %458, %459, %460, %461, %462 in 0 : vector<1x8x8xf32>, vector<1x8x8xf32>, vector<1x8x8xf32>, vector<1x8x8xf32>, vector<1x8x8xf32>, vector<1x8x8xf32>, vector<1x8x8xf32>, vector<1x8x8xf32> -> vector<8x8x8xf32>
    %464 = vector.extract_strided_slice %425 {offsets = [0, 0], sizes = [8, 64], strides = [1, 1]} : vector<16x64xf32> to vector<8x64xf32>
    %465 = vector.extract_strided_slice %464 {offsets = [0, 32], sizes = [8, 8], strides = [1, 1]} : vector<8x64xf32> to vector<8x8xf32>
    %466 = vector.extract_strided_slice %464 {offsets = [0, 40], sizes = [8, 8], strides = [1, 1]} : vector<8x64xf32> to vector<8x8xf32>
    %467 = vector.extract_strided_slice %464 {offsets = [0, 48], sizes = [8, 8], strides = [1, 1]} : vector<8x64xf32> to vector<8x8xf32>
    %468 = vector.extract_strided_slice %464 {offsets = [0, 56], sizes = [8, 8], strides = [1, 1]} : vector<8x64xf32> to vector<8x8xf32>
    %469 = vector.extract_strided_slice %425 {offsets = [8, 0], sizes = [8, 64], strides = [1, 1]} : vector<16x64xf32> to vector<8x64xf32>
    %470 = vector.extract_strided_slice %469 {offsets = [0, 32], sizes = [8, 8], strides = [1, 1]} : vector<8x64xf32> to vector<8x8xf32>
    %471 = vector.extract_strided_slice %469 {offsets = [0, 40], sizes = [8, 8], strides = [1, 1]} : vector<8x64xf32> to vector<8x8xf32>
    %472 = vector.extract_strided_slice %469 {offsets = [0, 48], sizes = [8, 8], strides = [1, 1]} : vector<8x64xf32> to vector<8x8xf32>
    %473 = vector.extract_strided_slice %469 {offsets = [0, 56], sizes = [8, 8], strides = [1, 1]} : vector<8x64xf32> to vector<8x8xf32>
    %474 = vector.shape_cast %465 : vector<8x8xf32> to vector<1x8x8xf32>
    %475 = vector.shape_cast %466 : vector<8x8xf32> to vector<1x8x8xf32>
    %476 = vector.shape_cast %467 : vector<8x8xf32> to vector<1x8x8xf32>
    %477 = vector.shape_cast %468 : vector<8x8xf32> to vector<1x8x8xf32>
    %478 = vector.shape_cast %470 : vector<8x8xf32> to vector<1x8x8xf32>
    %479 = vector.shape_cast %471 : vector<8x8xf32> to vector<1x8x8xf32>
    %480 = vector.shape_cast %472 : vector<8x8xf32> to vector<1x8x8xf32>
    %481 = vector.shape_cast %473 : vector<8x8xf32> to vector<1x8x8xf32>
    %482 = tpu.concatenate %474, %475, %476, %477, %478, %479, %480, %481 in 0 : vector<1x8x8xf32>, vector<1x8x8xf32>, vector<1x8x8xf32>, vector<1x8x8xf32>, vector<1x8x8xf32>, vector<1x8x8xf32>, vector<1x8x8xf32>, vector<1x8x8xf32> -> vector<8x8x8xf32>
    %c0_116 = arith.constant 0 : index
    %c1_117 = arith.constant 1 : index
    %c0_118 = arith.constant 0 : index
    %c0_119 = arith.constant 0 : index
    %c0_120 = arith.constant 0 : index
    %483 = vector.load %arg7[%c0_116, %c1_117, %c0_118, %c0_119, %c0_120] : memref<1x2x4x8x32xf32, #tpu.memory_space<vmem>>, vector<1x1x4x8x32xf32>
    %484 = vector.shape_cast %483 : vector<1x1x4x8x32xf32> to vector<4x8x32xf32>
    %cst_121 = arith.constant dense<0.000000e+00> : vector<8x8x8xf32>
    %485 = tpu.matmul %444, %463, %cst_121 {dimension_numbers = #tpu.dot_dimension_numbers<[2], [2], [1], [1], [0, 0, 0, 1, 1, 1], [0], [0]>} : vector<8x8x8xf32>, vector<8x8x8xf32>, vector<8x8x8xf32> -> vector<8x8x8xf32>
    %cst_122 = arith.constant 0.353553385 : f32
    %486 = arith.mulf %cst_122, %4 : f32
    %487 = vector.broadcast %486 : f32 to vector<8x8x8xf32>
    %488 = arith.mulf %485, %487 : vector<8x8x8xf32>
    %cst_123 = arith.constant dense<0xFF800000> : vector<8x8xf32>
    %489 = vector.multi_reduction <maximumf>, %488, %cst_123 [2] : vector<8x8x8xf32> to vector<8x8xf32>
    %490 = vector.shape_cast %489 : vector<8x8xf32> to vector<8x8x1xf32>
    %491 = vector.broadcast %490 : vector<8x8x1xf32> to vector<8x8x8xf32>
    %492 = arith.subf %488, %491 : vector<8x8x8xf32>
    %493 = math.exp %492 : vector<8x8x8xf32>
    %cst_124 = arith.constant dense<0.000000e+00> : vector<8x8xf32>
    %494 = vector.multi_reduction <add>, %493, %cst_124 [2] : vector<8x8x8xf32> to vector<8x8xf32>
    %495 = vector.shape_cast %494 : vector<8x8xf32> to vector<8x8x1xf32>
    %496 = vector.broadcast %495 : vector<8x8x1xf32> to vector<8x8x8xf32>
    %497 = arith.divf %493, %496 : vector<8x8x8xf32>
    %cst_125 = arith.constant dense<0.000000e+00> : vector<8x8x8xf32>
    %498 = tpu.matmul %497, %482, %cst_125 {dimension_numbers = #tpu.dot_dimension_numbers<[2], [1], [1], [2], [0, 0, 0, 1, 1, 2], [0], [0]>} : vector<8x8x8xf32>, vector<8x8x8xf32>, vector<8x8x8xf32> -> vector<8x8x8xf32>
    %499 = tpu.concatenate %484, %484 in 0 : vector<4x8x32xf32>, vector<4x8x32xf32> -> vector<8x8x32xf32>
    %cst_126 = arith.constant dense<0.000000e+00> : vector<8x8x32xf32>
    %500 = tpu.matmul %498, %499, %cst_126 {dimension_numbers = #tpu.dot_dimension_numbers<[2], [1], [1], [2], [0, 0, 0, 1, 1, 2], [0], [0]>} : vector<8x8x8xf32>, vector<8x8x32xf32>, vector<8x8x32xf32> -> vector<8x8x32xf32>
    %501 = vector.shape_cast %500 : vector<8x8x32xf32> to vector<2x4x8x32xf32>
    %502 = vector.extract_strided_slice %501 {offsets = [0, 0, 0, 0], sizes = [2, 1, 8, 32], strides = [1, 1, 1, 1]} : vector<2x4x8x32xf32> to vector<2x1x8x32xf32>
    %503 = vector.shape_cast %502 : vector<2x1x8x32xf32> to vector<2x8x32xf32>
    %504 = vector.extract_strided_slice %501 {offsets = [0, 1, 0, 0], sizes = [2, 1, 8, 32], strides = [1, 1, 1, 1]} : vector<2x4x8x32xf32> to vector<2x1x8x32xf32>
    %505 = vector.shape_cast %504 : vector<2x1x8x32xf32> to vector<2x8x32xf32>
    %506 = arith.addf %503, %505 : vector<2x8x32xf32>
    %507 = vector.extract_strided_slice %501 {offsets = [0, 2, 0, 0], sizes = [2, 1, 8, 32], strides = [1, 1, 1, 1]} : vector<2x4x8x32xf32> to vector<2x1x8x32xf32>
    %508 = vector.shape_cast %507 : vector<2x1x8x32xf32> to vector<2x8x32xf32>
    %509 = arith.addf %506, %508 : vector<2x8x32xf32>
    %510 = vector.extract_strided_slice %501 {offsets = [0, 3, 0, 0], sizes = [2, 1, 8, 32], strides = [1, 1, 1, 1]} : vector<2x4x8x32xf32> to vector<2x1x8x32xf32>
    %511 = vector.shape_cast %510 : vector<2x1x8x32xf32> to vector<2x8x32xf32>
    %512 = arith.addf %509, %511 : vector<2x8x32xf32>
    %513 = vector.shape_cast %512 : vector<2x8x32xf32> to vector<16x32xf32>
    %514 = arith.addf %419, %513 : vector<16x32xf32>
    %515 = vector.extract_strided_slice %299 {offsets = [2, 0], sizes = [1, 32], strides = [1, 1]} : vector<6x32xf32> to vector<1x32xf32>
    %516 = vector.shape_cast %515 : vector<1x32xf32> to vector<32xf32>
    %517 = vector.extract_strided_slice %299 {offsets = [3, 0], sizes = [1, 32], strides = [1, 1]} : vector<6x32xf32> to vector<1x32xf32>
    %518 = vector.shape_cast %517 : vector<1x32xf32> to vector<32xf32>
    %cst_127 = arith.constant dense<0.000000e+00> : vector<16xf32>
    %519 = vector.multi_reduction <add>, %514, %cst_127 [1] : vector<16x32xf32> to vector<16xf32>
    %520 = vector.shape_cast %519 : vector<16xf32> to vector<16x1xf32>
    %cst_128 = arith.constant 3.200000e+01 : f32
    %521 = vector.broadcast %cst_128 : f32 to vector<16x1xf32>
    %522 = arith.divf %520, %521 : vector<16x1xf32>
    %523 = vector.broadcast %522 : vector<16x1xf32> to vector<16x32xf32>
    %524 = arith.subf %514, %523 : vector<16x32xf32>
    %525 = arith.mulf %524, %524 : vector<16x32xf32>
    %cst_129 = arith.constant dense<0.000000e+00> : vector<16xf32>
    %526 = vector.multi_reduction <add>, %525, %cst_129 [1] : vector<16x32xf32> to vector<16xf32>
    %527 = vector.shape_cast %526 : vector<16xf32> to vector<16x1xf32>
    %cst_130 = arith.constant 3.200000e+01 : f32
    %528 = vector.broadcast %cst_130 : f32 to vector<16x1xf32>
    %529 = arith.divf %527, %528 : vector<16x1xf32>
    %530 = vector.broadcast %522 : vector<16x1xf32> to vector<16x32xf32>
    %531 = arith.subf %514, %530 : vector<16x32xf32>
    %cst_131 = arith.constant 9.99999974E-6 : f32
    %532 = vector.broadcast %cst_131 : f32 to vector<16x1xf32>
    %533 = arith.addf %529, %532 : vector<16x1xf32>
    %534 = math.rsqrt %533 : vector<16x1xf32>
    %535 = vector.broadcast %534 : vector<16x1xf32> to vector<16x32xf32>
    %536 = arith.mulf %531, %535 : vector<16x32xf32>
    %537 = vector.shape_cast %516 : vector<32xf32> to vector<1x32xf32>
    %538 = vector.broadcast %537 : vector<1x32xf32> to vector<16x32xf32>
    %539 = arith.mulf %536, %538 : vector<16x32xf32>
    %540 = vector.shape_cast %518 : vector<32xf32> to vector<1x32xf32>
    %541 = vector.broadcast %540 : vector<1x32xf32> to vector<16x32xf32>
    %542 = arith.addf %539, %541 : vector<16x32xf32>
    %c0_132 = arith.constant 0 : index
    %c1_133 = arith.constant 1 : index
    %c0_134 = arith.constant 0 : index
    %c0_135 = arith.constant 0 : index
    %543 = vector.load %arg8[%c0_132, %c1_133, %c0_134, %c0_135] : memref<1x2x32x64xf32, #tpu.memory_space<vmem>>, vector<1x1x32x64xf32>
    %544 = vector.shape_cast %543 : vector<1x1x32x64xf32> to vector<32x64xf32>
    %cst_136 = arith.constant dense<0.000000e+00> : vector<16x64xf32>
    %545 = tpu.matmul %542, %544, %cst_136 {dimension_numbers = #tpu.dot_dimension_numbers<[1], [0], [0], [1], [0, 0, 1, 1], [], []>} : vector<16x32xf32>, vector<32x64xf32>, vector<16x64xf32> -> vector<16x64xf32>
    %c0_137 = arith.constant 0 : index
    %c1_138 = arith.constant 1 : index
    %c0_139 = arith.constant 0 : index
    %c0_140 = arith.constant 0 : index
    %546 = vector.load %arg9[%c0_137, %c1_138, %c0_139, %c0_140] : memref<1x2x1x64xf32, #tpu.memory_space<vmem>>, vector<1x1x1x64xf32>
    %547 = vector.shape_cast %546 : vector<1x1x1x64xf32> to vector<1x64xf32>
    %548 = vector.broadcast %547 : vector<1x64xf32> to vector<16x64xf32>
    %549 = arith.addf %545, %548 : vector<16x64xf32>
    %cst_141 = arith.constant 0.000000e+00 : f32
    %550 = vector.broadcast %cst_141 : f32 to vector<16x64xf32>
    %551 = arith.cmpf ogt, %549, %550 : vector<16x64xf32>
    %cst_142 = arith.constant 0.00999999977 : f32
    %552 = vector.broadcast %cst_142 : f32 to vector<16x64xf32>
    %553 = arith.mulf %552, %549 : vector<16x64xf32>
    %554 = arith.select %551, %549, %553 : vector<16x64xi1>, vector<16x64xf32>
    %c0_143 = arith.constant 0 : index
    %c1_144 = arith.constant 1 : index
    %c0_145 = arith.constant 0 : index
    %c0_146 = arith.constant 0 : index
    %555 = vector.load %arg10[%c0_143, %c1_144, %c0_145, %c0_146] : memref<1x2x64x32xf32, #tpu.memory_space<vmem>>, vector<1x1x64x32xf32>
    %556 = vector.shape_cast %555 : vector<1x1x64x32xf32> to vector<64x32xf32>
    %cst_147 = arith.constant dense<0.000000e+00> : vector<16x32xf32>
    %557 = tpu.matmul %554, %556, %cst_147 {dimension_numbers = #tpu.dot_dimension_numbers<[1], [0], [0], [1], [0, 0, 1, 1], [], []>} : vector<16x64xf32>, vector<64x32xf32>, vector<16x32xf32> -> vector<16x32xf32>
    %c0_148 = arith.constant 0 : index
    %c1_149 = arith.constant 1 : index
    %c0_150 = arith.constant 0 : index
    %c0_151 = arith.constant 0 : index
    %558 = vector.load %arg11[%c0_148, %c1_149, %c0_150, %c0_151] : memref<1x2x1x32xf32, #tpu.memory_space<vmem>>, vector<1x1x1x32xf32>
    %559 = vector.shape_cast %558 : vector<1x1x1x32xf32> to vector<1x32xf32>
    %560 = vector.broadcast %559 : vector<1x32xf32> to vector<16x32xf32>
    %561 = arith.addf %557, %560 : vector<16x32xf32>
    %562 = arith.addf %542, %561 : vector<16x32xf32>
    %563 = vector.extract_strided_slice %299 {offsets = [4, 0], sizes = [1, 32], strides = [1, 1]} : vector<6x32xf32> to vector<1x32xf32>
    %564 = vector.shape_cast %563 : vector<1x32xf32> to vector<32xf32>
    %565 = vector.extract_strided_slice %299 {offsets = [5, 0], sizes = [1, 32], strides = [1, 1]} : vector<6x32xf32> to vector<1x32xf32>
    %566 = vector.shape_cast %565 : vector<1x32xf32> to vector<32xf32>
    %cst_152 = arith.constant dense<0.000000e+00> : vector<16xf32>
    %567 = vector.multi_reduction <add>, %562, %cst_152 [1] : vector<16x32xf32> to vector<16xf32>
    %568 = vector.shape_cast %567 : vector<16xf32> to vector<16x1xf32>
    %cst_153 = arith.constant 3.200000e+01 : f32
    %569 = vector.broadcast %cst_153 : f32 to vector<16x1xf32>
    %570 = arith.divf %568, %569 : vector<16x1xf32>
    %571 = vector.broadcast %570 : vector<16x1xf32> to vector<16x32xf32>
    %572 = arith.subf %562, %571 : vector<16x32xf32>
    %573 = arith.mulf %572, %572 : vector<16x32xf32>
    %cst_154 = arith.constant dense<0.000000e+00> : vector<16xf32>
    %574 = vector.multi_reduction <add>, %573, %cst_154 [1] : vector<16x32xf32> to vector<16xf32>
    %575 = vector.shape_cast %574 : vector<16xf32> to vector<16x1xf32>
    %cst_155 = arith.constant 3.200000e+01 : f32
    %576 = vector.broadcast %cst_155 : f32 to vector<16x1xf32>
    %577 = arith.divf %575, %576 : vector<16x1xf32>
    %578 = vector.broadcast %570 : vector<16x1xf32> to vector<16x32xf32>
    %579 = arith.subf %562, %578 : vector<16x32xf32>
    %cst_156 = arith.constant 9.99999974E-6 : f32
    %580 = vector.broadcast %cst_156 : f32 to vector<16x1xf32>
    %581 = arith.addf %577, %580 : vector<16x1xf32>
    %582 = math.rsqrt %581 : vector<16x1xf32>
    %583 = vector.broadcast %582 : vector<16x1xf32> to vector<16x32xf32>
    %584 = arith.mulf %579, %583 : vector<16x32xf32>
    %585 = vector.shape_cast %564 : vector<32xf32> to vector<1x32xf32>
    %586 = vector.broadcast %585 : vector<1x32xf32> to vector<16x32xf32>
    %587 = arith.mulf %584, %586 : vector<16x32xf32>
    %588 = vector.shape_cast %566 : vector<32xf32> to vector<1x32xf32>
    %589 = vector.broadcast %588 : vector<1x32xf32> to vector<16x32xf32>
    %590 = arith.addf %587, %589 : vector<16x32xf32>
    %c0_157 = arith.constant 0 : index
    %c0_158 = arith.constant 0 : index
    %c0_159 = arith.constant 0 : index
    %591 = vector.load %arg14[%c0_157, %c0_158, %c0_159] : memref<1x32x32xf32, #tpu.memory_space<vmem>>, vector<1x32x32xf32>
    %592 = vector.shape_cast %591 : vector<1x32x32xf32> to vector<32x32xf32>
    %cst_160 = arith.constant dense<0.000000e+00> : vector<16x32xf32>
    %593 = tpu.matmul %590, %592, %cst_160 {dimension_numbers = #tpu.dot_dimension_numbers<[1], [0], [0], [1], [0, 0, 1, 1], [], []>} : vector<16x32xf32>, vector<32x32xf32>, vector<16x32xf32> -> vector<16x32xf32>
    %c0_161 = arith.constant 0 : index
    %c0_162 = arith.constant 0 : index
    %c0_163 = arith.constant 0 : index
    %594 = vector.load %arg15[%c0_161, %c0_162, %c0_163] : memref<1x32x32xf32, #tpu.memory_space<vmem>>, vector<1x32x32xf32>
    %595 = vector.shape_cast %594 : vector<1x32x32xf32> to vector<32x32xf32>
    %cst_164 = arith.constant dense<0.000000e+00> : vector<16x32xf32>
    %596 = tpu.matmul %0, %595, %cst_164 {dimension_numbers = #tpu.dot_dimension_numbers<[1], [0], [0], [1], [0, 0, 1, 1], [], []>} : vector<16x32xf32>, vector<32x32xf32>, vector<16x32xf32> -> vector<16x32xf32>
    %597 = arith.addf %593, %596 : vector<16x32xf32>
    %c0_165 = arith.constant 0 : index
    %c0_166 = arith.constant 0 : index
    %c0_167 = arith.constant 0 : index
    %598 = vector.load %arg16[%c0_165, %c0_166, %c0_167] : memref<1x1x32xf32, #tpu.memory_space<vmem>>, vector<1x1x32xf32>
    %599 = vector.shape_cast %598 : vector<1x1x32xf32> to vector<1x32xf32>
    %600 = vector.broadcast %599 : vector<1x32xf32> to vector<16x32xf32>
    %601 = arith.addf %597, %600 : vector<16x32xf32>
    %c0_168 = arith.constant 0 : index
    %c0_169 = arith.constant 0 : index
    %602 = vector.load %arg17[%c0_168, %c0_169] : memref<1x32xf32, #tpu.memory_space<vmem>>, vector<1x32xf32>
    %603 = vector.broadcast %602 : vector<1x32xf32> to vector<16x32xf32>
    %604 = arith.addf %601, %603 : vector<16x32xf32>
    %605 = vector.shape_cast %604 : vector<16x32xf32> to vector<1x16x32xf32>
    %c0_170 = arith.constant 0 : index
    %c0_171 = arith.constant 0 : index
    %c0_172 = arith.constant 0 : index
    %606 = vector.load %arg18[%c0_170, %c0_171, %c0_172] : memref<1x16x32xf32, #tpu.memory_space<vmem>>, vector<1x16x32xf32>
    tpu.vector_store %arg18[%c0_170, %c0_171, %c0_172], %605 {strides = array<i32>} : memref<1x16x32xf32, #tpu.memory_space<vmem>>, vector<1x16x32xf32>,
    return
  }
  func.func @transform_0(%arg0: i32) -> (i32, i32) {
    %c0_i32 = arith.constant 0 : i32
    %c0_i32_0 = arith.constant 0 : i32
    %c0_i32_1 = arith.constant 0 : i32
    return %c0_i32, %c0_i32_0 : i32, i32
  }
  func.func @transform_1(%arg0: i32) -> (i32, i32, i32) {
    %c0_i32 = arith.constant 0 : i32
    %c0_i32_0 = arith.constant 0 : i32
    %c0_i32_1 = arith.constant 0 : i32
    return %arg0, %c0_i32, %c0_i32_0 : i32, i32, i32
  }
  func.func @transform_2(%arg0: i32) -> (i32, i32, i32, i32) {
    %c0_i32 = arith.constant 0 : i32
    %c0_i32_0 = arith.constant 0 : i32
    %c0_i32_1 = arith.constant 0 : i32
    %c0_i32_2 = arith.constant 0 : i32
    return %arg0, %c0_i32, %c0_i32_0, %c0_i32_1 : i32, i32, i32, i32
  }
  func.func @transform_3(%arg0: i32) -> (i32, i32, i32, i32, i32) {
    %c0_i32 = arith.constant 0 : i32
    %c0_i32_0 = arith.constant 0 : i32
    %c0_i32_1 = arith.constant 0 : i32
    %c0_i32_2 = arith.constant 0 : i32
    %c0_i32_3 = arith.constant 0 : i32
    return %arg0, %c0_i32, %c0_i32_0, %c0_i32_1, %c0_i32_2 : i32, i32, i32, i32, i32
  }
  func.func @transform_4(%arg0: i32) -> (i32, i32, i32, i32) {
    %c0_i32 = arith.constant 0 : i32
    %c0_i32_0 = arith.constant 0 : i32
    %c0_i32_1 = arith.constant 0 : i32
    %c0_i32_2 = arith.constant 0 : i32
    return %arg0, %c0_i32, %c0_i32_0, %c0_i32_1 : i32, i32, i32, i32
  }
  func.func @transform_5(%arg0: i32) -> (i32, i32, i32, i32) {
    %c0_i32 = arith.constant 0 : i32
    %c0_i32_0 = arith.constant 0 : i32
    %c0_i32_1 = arith.constant 0 : i32
    %c0_i32_2 = arith.constant 0 : i32
    return %arg0, %c0_i32, %c0_i32_0, %c0_i32_1 : i32, i32, i32, i32
  }
  func.func @transform_6(%arg0: i32) -> (i32, i32, i32, i32, i32) {
    %c0_i32 = arith.constant 0 : i32
    %c0_i32_0 = arith.constant 0 : i32
    %c0_i32_1 = arith.constant 0 : i32
    %c0_i32_2 = arith.constant 0 : i32
    %c0_i32_3 = arith.constant 0 : i32
    return %arg0, %c0_i32, %c0_i32_0, %c0_i32_1, %c0_i32_2 : i32, i32, i32, i32, i32
  }
  func.func @transform_7(%arg0: i32) -> (i32, i32, i32, i32) {
    %c0_i32 = arith.constant 0 : i32
    %c0_i32_0 = arith.constant 0 : i32
    %c0_i32_1 = arith.constant 0 : i32
    %c0_i32_2 = arith.constant 0 : i32
    return %arg0, %c0_i32, %c0_i32_0, %c0_i32_1 : i32, i32, i32, i32
  }
  func.func @transform_8(%arg0: i32) -> (i32, i32, i32, i32) {
    %c0_i32 = arith.constant 0 : i32
    %c0_i32_0 = arith.constant 0 : i32
    %c0_i32_1 = arith.constant 0 : i32
    %c0_i32_2 = arith.constant 0 : i32
    return %arg0, %c0_i32, %c0_i32_0, %c0_i32_1 : i32, i32, i32, i32
  }
  func.func @transform_9(%arg0: i32) -> (i32, i32, i32, i32) {
    %c0_i32 = arith.constant 0 : i32
    %c0_i32_0 = arith.constant 0 : i32
    %c0_i32_1 = arith.constant 0 : i32
    %c0_i32_2 = arith.constant 0 : i32
    return %arg0, %c0_i32, %c0_i32_0, %c0_i32_1 : i32, i32, i32, i32
  }
  func.func @transform_10(%arg0: i32) -> (i32, i32, i32, i32) {
    %c0_i32 = arith.constant 0 : i32
    %c0_i32_0 = arith.constant 0 : i32
    %c0_i32_1 = arith.constant 0 : i32
    %c0_i32_2 = arith.constant 0 : i32
    return %arg0, %c0_i32, %c0_i32_0, %c0_i32_1 : i32, i32, i32, i32
  }
  func.func @transform_11(%arg0: i32) -> (i32, i32, i32, i32) {
    %c0_i32 = arith.constant 0 : i32
    %c0_i32_0 = arith.constant 0 : i32
    %c0_i32_1 = arith.constant 0 : i32
    %c0_i32_2 = arith.constant 0 : i32
    return %arg0, %c0_i32, %c0_i32_0, %c0_i32_1 : i32, i32, i32, i32
  }
  func.func @transform_12(%arg0: i32) -> (i32, i32, i32) {
    %c0_i32 = arith.constant 0 : i32
    %c0_i32_0 = arith.constant 0 : i32
    %c0_i32_1 = arith.constant 0 : i32
    return %arg0, %c0_i32, %c0_i32_0 : i32, i32, i32
  }
  func.func @transform_13(%arg0: i32) -> (i32, i32, i32) {
    %c0_i32 = arith.constant 0 : i32
    %c0_i32_0 = arith.constant 0 : i32
    %c0_i32_1 = arith.constant 0 : i32
    return %arg0, %c0_i32, %c0_i32_0 : i32, i32, i32
  }
  func.func @transform_14(%arg0: i32) -> (i32, i32, i32) {
    %c0_i32 = arith.constant 0 : i32
    %c0_i32_0 = arith.constant 0 : i32
    %c0_i32_1 = arith.constant 0 : i32
    return %arg0, %c0_i32, %c0_i32_0 : i32, i32, i32
  }
  func.func @transform_15(%arg0: i32) -> (i32, i32, i32) {
    %c0_i32 = arith.constant 0 : i32
    %c0_i32_0 = arith.constant 0 : i32
    %c0_i32_1 = arith.constant 0 : i32
    return %arg0, %c0_i32, %c0_i32_0 : i32, i32, i32
  }
  func.func @transform_16(%arg0: i32) -> (i32, i32) {
    %c0_i32 = arith.constant 0 : i32
    %c0_i32_0 = arith.constant 0 : i32
    %c0_i32_1 = arith.constant 0 : i32
    return %c0_i32, %c0_i32_0 : i32, i32
  }
  func.func @transform_17(%arg0: i32) -> (i32, i32, i32) {
    %c0_i32 = arith.constant 0 : i32
    %c0_i32_0 = arith.constant 0 : i32
    %c0_i32_1 = arith.constant 0 : i32
    return %arg0, %c0_i32, %c0_i32_0 : i32, i32, i32
  }
}

module attributes {stable_mosaic.version = 11 : i64} {
  func.func @syn_kernel(%arg0: i32, %arg1: memref<8x128xf32, #tpu.memory_space<vmem>>, %arg2: memref<128x768xf32, #tpu.memory_space<vmem>>, %arg3: memref<1x768xf32, #tpu.memory_space<vmem>>, %arg4: memref<8x768xf32, #tpu.memory_space<vmem>>) attributes {dimension_semantics = [#tpu.dimension_semantics<parallel>], iteration_bounds = array<i64: 2>, scalar_prefetch = 0 : i64, scratch_operands = 0 : i64, tpu.core_type = #tpu.core_type<tc>, window_params = [{transform_indices = @transform_0, window_bounds = array<i64: 8, 128>}, {pipeline_mode = #tpu.pipeline_mode<synchronous>, transform_indices = @transform_1, window_bounds = array<i64: 128, 768>}, {pipeline_mode = #tpu.pipeline_mode<synchronous>, transform_indices = @transform_2, window_bounds = array<i64: 1, 768>}, {transform_indices = @transform_3, window_bounds = array<i64: 8, 768>}]} {
    %c0 = arith.constant 0 : index
    %c0_0 = arith.constant 0 : index
    %0 = vector.load %arg1[%c0, %c0_0] : memref<8x128xf32, #tpu.memory_space<vmem>>, vector<8x128xf32>
    %c0_1 = arith.constant 0 : index
    %c0_2 = arith.constant 0 : index
    %1 = vector.load %arg2[%c0_1, %c0_2] : memref<128x768xf32, #tpu.memory_space<vmem>>, vector<128x768xf32>
    %cst = arith.constant dense<0.000000e+00> : vector<8x768xf32>
    %2 = tpu.matmul %0, %1, %cst {dimension_numbers = #tpu.dot_dimension_numbers<[1], [0], [0], [1], [0, 0, 1, 1], [], []>} : vector<8x128xf32>, vector<128x768xf32>, vector<8x768xf32> -> vector<8x768xf32>
    %c0_3 = arith.constant 0 : index
    %c0_4 = arith.constant 0 : index
    %3 = vector.load %arg3[%c0_3, %c0_4] : memref<1x768xf32, #tpu.memory_space<vmem>>, vector<1x768xf32>
    %4 = vector.broadcast %3 : vector<1x768xf32> to vector<8x768xf32>
    %5 = arith.addf %2, %4 : vector<8x768xf32>
    %c0_5 = arith.constant 0 : index
    %c0_6 = arith.constant 0 : index
    %6 = vector.load %arg4[%c0_5, %c0_6] : memref<8x768xf32, #tpu.memory_space<vmem>>, vector<8x768xf32>
    tpu.vector_store %arg4[%c0_5, %c0_6], %5 {strides = array<i32>} : memref<8x768xf32, #tpu.memory_space<vmem>>, vector<8x768xf32>,
    return
  }
  func.func @transform_0(%arg0: i32) -> (i32, i32) {
    %c0_i32 = arith.constant 0 : i32
    %c0_i32_0 = arith.constant 0 : i32
    return %arg0, %c0_i32 : i32, i32
  }
  func.func @transform_1(%arg0: i32) -> (i32, i32) {
    %c0_i32 = arith.constant 0 : i32
    %c0_i32_0 = arith.constant 0 : i32
    %c0_i32_1 = arith.constant 0 : i32
    return %c0_i32, %c0_i32_0 : i32, i32
  }
  func.func @transform_2(%arg0: i32) -> (i32, i32) {
    %c0_i32 = arith.constant 0 : i32
    %c0_i32_0 = arith.constant 0 : i32
    %c0_i32_1 = arith.constant 0 : i32
    return %c0_i32, %c0_i32_0 : i32, i32
  }
  func.func @transform_3(%arg0: i32) -> (i32, i32) {
    %c0_i32 = arith.constant 0 : i32
    %c0_i32_0 = arith.constant 0 : i32
    return %arg0, %c0_i32 : i32, i32
  }
}

</mosaic_0001>

<bundles_post_ra>
// kernel: tile.8
= control target key start
LH: loop header
LB: loop body
LE: loop exit
PB: predicated region body
PF: predicated region fallthrough
CT: control target
= control target key end

     0   :  { %s22_s0 = inlined_call_operand.vmem [shape: f32[32], index: 0, kind: input, shape index: {}]   ;;  %s23_s1 = inlined_call_operand.vmem [shape: f32[4,32], index: 1, kind: output, shape index: {}]  }
   0x1   :  { %v4_v0 = vld [vmem:[%s22_s0] ss:$0 sm:$0xff] }
   0x2   :  { %5 = vst [vmem:[%s23_s1] sm:$0xf] %v4_v0 }

// kernel: tile.9
= control target key start
LH: loop header
LB: loop body
LE: loop exit
PB: predicated region body
PF: predicated region fallthrough
CT: control target
= control target key end

     0   :  { %s37_s8 = smov 32   ;;  %s38_s9 = smov 64   ;;  %vm7_vm0 = vcmask 261120   ;;  %vm13_vm1 = vcmask 1048320   ;;  %vm19_vm2 = vcmask 785920   ;;  %vm25_vm3 = vcmask 523520   ;;  %s55_s0 = inlined_call_operand.vmem [shape: f32[4,32], index: 0, kind: input, shape index: {}]   ;;  %s56_s1 = inlined_call_operand.vmem [shape: f32[1,128], index: 1, kind: output, shape index: {}]  }
   0x1   :  { %v4_v0 = vld [vmem:[%s55_s0] sm:$0xf]  ;;  %s36_s0 = smov 96  }
   0x2   :  { %5 = vst [vmem:[#allocation1] sm:$0xf] %v4_v0 }
   0x9   :  { %v10_v1 = vld [vmem:[#allocation1 + $0x3] sm:$0x1]   ;;  %v22_v2 = vld [vmem:[#allocation1 + $0x1] sm:$0x1]   ;;  %v16_v3 = vld [vmem:[#allocation1 + $0x2] sm:$0x1]  }
   0xa   :  { %11 = vrot.lane.b32.xlu0 %v10_v1, %s36_s0  ;;  %23 = vrot.lane.b32.xlu1 %v22_v2, %s37_s8  ;;  %v6_v4 = vld [vmem:[#allocation1] sm:$0x1]  }
   0xb   :  { %8 = vst.msk [vmem:[#allocation0] sm:$0x1] %vm7_vm0, %v6_v4  }
  0x12   :  { %17 = vrot.lane.b32.xlu0 %v16_v3, %s38_s9 }
  0x7c   :  { %v12_v5 = vpop.permute.xlu0 %11   ;;  %v24_v6 = vpop.permute.xlu1 %23  }
  0x7d   :  { %14 = vst.msk [vmem:[#allocation0] sm:$0x1] %vm13_vm1, %v12_v5  }
  0x84   :  { %v18_v7 = vpop.permute.xlu0 %17  }
  0x85   :  { %20 = vst.msk [vmem:[#allocation0] sm:$0x1] %vm19_vm2, %v18_v7  }
  0x86   :  { %26 = vst.msk [vmem:[#allocation0] sm:$0x1] %vm25_vm3, %v24_v6  }
  0x8d   :  { %v29_v8 = vld [vmem:[#allocation0] sm:$0x1] }
  0x8e   :  { %32 = vst [vmem:[%s56_s1] sm:$0x1] %v29_v8 }

// kernel: setgan_forward.5
= control target key start
LH: loop header
LB: loop body
LE: loop exit
PB: predicated region body
PF: predicated region fallthrough
CT: control target
= control target key end

     0   :  { %vm33_vm0 = vcmask 261120   ;;  %s219_s1 = inlined_call_operand.vmem [shape: f32[32,32], index: 1, kind: input, shape index: {}]   ;;  %s220_s3 = inlined_call_operand.vmem [shape: f32[32,32], index: 3, kind: input, shape index: {}]   ;;  %s221_s2 = inlined_call_operand.vmem [shape: f32[1,32], index: 2, kind: input, shape index: {}]   ;;  %s222_s0 = inlined_call_operand.vmem [shape: f32[16,32], index: 0, kind: input, shape index: {}]   ;;  %s223_s4 = inlined_call_operand.vmem [shape: f32[1,32], index: 4, kind: input, shape index: {}]   ;;  %s224_s5 = inlined_call_operand.vmem [shape: f32[1,32], index: 5, kind: input, shape index: {}]   ;;  %s225_s6 = inlined_call_operand.vmem [shape: f32[16,32], index: 6, kind: output, shape index: {}]  }
   0x1   :  { %v28_v0 = vld [vmem:[%s219_s1 + $0x18] sm:$0xff]  ;;  %v27_v1 = vld [vmem:[%s219_s1 + $0x10] sm:$0xff]  ;;  %v26_v2 = vld [vmem:[%s219_s1 + $0x8] sm:$0xff] }
   0x2   :  { %122 = vmatpush.msra.mxu2 %v28_v0  ;;  %52 = vmatpush.msra.mxu0 %v28_v0  ;;  %v72_v3 = vld [vmem:[%s220_s3 + $0x18] sm:$0xff]  ;;  %v25_v4 = vld [vmem:[%s219_s1] sm:$0xff]  ;;  %v24_v5 = vld [vmem:[%s222_s0 + $0x8] sm:$0xff] }
   0x3   :  { %126 = vmatpush.msra.mxu3 %v72_v3  ;;  %95 = vmatpush.msra.mxu1 %v72_v3  ;;  %v23_v6 = vld [vmem:[%s222_s0] sm:$0xff]  ;;  %v71_v7 = vld [vmem:[%s220_s3 + $0x10] sm:$0xff]  ;;  %v70_v8 = vld [vmem:[%s220_s3 + $0x8] sm:$0xff] }
   0x4   :  { %123 = vmatpush.msra.mxu2 %v27_v1  ;;  %53 = vmatpush.msra.mxu0 %v27_v1  ;;  %v69_v9 = vld [vmem:[%s220_s3] sm:$0xff] }
   0x5   :  { %127 = vmatpush.msra.mxu3 %v71_v7  ;;  %96 = vmatpush.msra.mxu1 %v71_v7  ;;  %v130_v10 = vld [vmem:[%s221_s2] ss:$0 sm:$0xff] }
   0x6   :  { %124 = vmatpush.msra.mxu2 %v26_v2  ;;  %54 = vmatpush.msra.mxu0 %v26_v2  ;;  %v131_v19 = vld [vmem:[%s223_s4] ss:$0 sm:$0xff] }
   0x7   :  { %128 = vmatpush.msra.mxu3 %v70_v8  ;;  %97 = vmatpush.msra.mxu1 %v70_v8  ;;  %v132_v20 = vld [vmem:[%s224_s5] ss:$0 sm:$0xff] }
   0x8   :  { %125 = vmatpush.msra.mxu2 %v25_v4  ;;  %55 = vmatpush.msra.mxu0 %v25_v4 }
   0x9   :  { %119 = vmatmul.msk.f32.vlgmr.msra.gmra.mxu2 %vm33_vm0, %v24_v5  ;;  %118 = vmatmul.msk.f32.vlgmr.msra.gmra.mxu0 %vm33_vm0, %v23_v6 }
   0xa   :  { %129 = vmatpush.msra.mxu3 %v69_v9  ;;  %98 = vmatpush.msra.mxu1 %v69_v9 }
  0x86   :  { %v57_v11 = vpop.f32.mrf.mxu0 }
  0x87   :  { %v58_v12 = vadd.f32 %v130_v10, %v57_v11 }
  0x89   :  { %v65_v13 = vmul.f32 0.01, %v58_v12  ;;  %vm63_vm1 = vcmp.gt.f32.partialorder %v58_v12, 0.0 }
  0x8b   :  { %v67_v14 = vsel %vm63_vm1, %v58_v12, %v65_v13 }
  0x8c   :  { %v60_v15 = vpop.f32.mrf.mxu2  ;;  %120 = vmatmul.msk.f32.vlgmr.msra.gmra.mxu1 %vm33_vm0, %v67_v14 }
  0x8d   :  { %v61_v16 = vadd.f32 %v130_v10, %v60_v15 }
  0x8f   :  { %v66_v17 = vmul.f32 0.01, %v61_v16  ;;  %vm64_vm2 = vcmp.gt.f32.partialorder %v61_v16, 0.0 }
  0x91   :  { %v68_v18 = vsel %vm64_vm2, %v61_v16, %v66_v17 }
  0x92   :  { %121 = vmatmul.msk.f32.vlgmr.msra.gmra.mxu3 %vm33_vm0, %v68_v18 }
 0x109   :  { %v100_v21 = vpop.f32.mrf.mxu1 }
 0x10a   :  { %v101_v22 = vadd.f32 %v131_v19, %v100_v21 }
 0x10c   :  { %v110_v23 = vsub.f32 %v101_v22, %v132_v20 }
 0x10e   :  { %112 = vst.msk [vmem:[%s225_s6] sm:$0xff] %vm33_vm0, %v110_v23 }
 0x115   :  { %v103_v24 = vpop.f32.mrf.mxu3 }
 0x116   :  { %v104_v25 = vadd.f32 %v131_v19, %v103_v24 }
 0x118   :  { %v111_v26 = vsub.f32 %v104_v25, %v132_v20 }
 0x11a   :  { %113 = vst.msk [vmem:[%s225_s6 + $0x8] sm:$0xff] %vm33_vm0, %v111_v26 }

// kernel: setgan_forward.4
= control target key start
LH: loop header
LB: loop body
LE: loop exit
PB: predicated region body
PF: predicated region fallthrough
CT: control target
= control target key end

     0   :  { %s1327_s24 = smov 0   ;;  %s1798_s0 = inlined_call_operand.vmem [shape: f32[4096,32], index: 0, kind: input, shape index: {}]   ;;  %s1799_s1 = inlined_call_operand.vmem [shape: f32[4,8,512], index: 1, kind: input, shape index: {}]   ;;  %s1800_s2 = inlined_call_operand.vmem [shape: f32[32,32], index: 2, kind: input, shape index: {}]   ;;  %s1801_s3 = inlined_call_operand.vmem [shape: f32[1,32], index: 3, kind: input, shape index: {}]   ;;  %s1802_s4 = inlined_call_operand.vmem [shape: f32[32,128], index: 4, kind: input, shape index: {}]   ;;  %s1803_s5 = inlined_call_operand.vmem [shape: f32[1,128], index: 5, kind: input, shape index: {}]   ;;  %s1804_s6 = inlined_call_operand.vmem [shape: f32[1,128], index: 6, kind: input, shape index: {}]   ;;  %s1805_s7 = inlined_call_operand.vmem [shape: f32[16,128], index: 7, kind: output, shape index: {}]  }
   0x1 LB: > { %s1145_s25 = sadd.s32 4294967295, %s1277_s24   ;;  %p1149_p0 = scmp.ge.s32.totalorder %s1277_s24, 1  ;;  %s1277_s24 = sphi %s1327_s24, %s17_s24  }
   0x2   : > { %p238_p1 = scmp.lt.s32.totalorder %s1277_s24, 3 }
   0x4   : > { %p239_p2 = pnand %p1149_p0, %p238_p1 }
   0x5   : > { %s1150_s26 = sshll.u32 (!%p239_p2), %s1145_s25, 8  ;;  %p275_p3 = scmp.lt.s32.totalorder (!%p239_p2), %s1145_s25, 1 }
   0x6   : > { %242 = sbr.rel (%p239_p2) target bundleno = 602 (0x25a), region = 48  ;;  %p270_p4 = scmp.lt.s32.totalorder (!%p239_p2), %s1150_s26, 511 }
   0x7   : > { %s1347_s12 = smov (!%p239_p2), 0  }
   0xb   : > { %s1808_s25 = smov (!%p275_p3, %s1145_s25), 1  ;;  %s1810_s26 = smov (!%p270_p4, %s1150_s26), 511  ;;  %v1345_v0 = vmov 0.0  }
   0xc   : > { %s1152_s27 = sshll.u32 %s1808_s25, 3  ;;  %s1151_s28 = sshll.u32 %s1810_s26, 3 }
   0xd   : > { %s1338_s8 = scalar_lea.vmem %s1805_s7, %s1152_s27  ;;  %s1343_s11 = scalar_lea.vmem %s1798_s0, %s1151_s28 }
   0xe LB: >> { %v355_v1 = vld [vmem:[%s1800_s2 + $0x18] sm:$0xff]  ;;  %v354_v2 = vld [vmem:[%s1800_s2 + $0x10] sm:$0xff]  ;;  %v353_v3 = vld [vmem:[%s1800_s2 + $0x8] sm:$0xff]  ;;  %s1153_s19 = sshll.u32 %s1285_s12, 9  ;;  %vm360_vm0 = vcmask 261120   ;;  %s1223_s26 = sshll.u32 %s1285_s12, 5  ;;  %s1285_s12 = sphi %s1347_s12, %s284_s12   ;;  %v1281_v0 = vphi %v1345_v0, %v1806_v0  }
   0xf   : >> { %565 = vmatpush.msra.mxu0 %v355_v1  ;;  %1225 = vmatpush.msra.mxu2 %v355_v1  ;;  %s1366_s20 = scalar_lea.vmem %s1343_s11, %s1153_s19  ;;  %v352_v4 = vld [vmem:[%s1800_s2] sm:$0xff]  ;;  %s1710_s29 = scalar_lea.vmem %s1799_s1, %s1223_s26 }
  0x10   : >> { %1224 = vmatpush.msra.mxu1 %v355_v1  ;;  %1226 = vmatpush.msra.mxu3 %v355_v1  ;;  %v288_v5 = vld [vmem:[%s1366_s20] sm:$0xff]  ;;  %v317_v6 = vld [vmem:[%s1366_s20 + $0xe8] sm:$0xff]  ;;  %v335_v8 = vld [vmem:[%s1366_s20 + $0x178] sm:$0xff]  ;;  %s284_s12 = sadd.s32 1, %s1285_s12  }
  0x11   : >> { %566 = vmatpush.msra.mxu0 %v354_v2  ;;  %1228 = vmatpush.msra.mxu2 %v354_v2  ;;  %v308_v7 = vld [vmem:[%s1366_s20 + $0xa0] sm:$0xff]  ;;  %v289_v9 = vld [vmem:[%s1366_s20 + $0x8] sm:$0xff]  ;;  %v318_v10 = vld [vmem:[%s1366_s20 + $0xf0] sm:$0xff]  ;;  %p281_p5 = scmp.ge.s32.totalorder %s284_s12, 4  }
  0x12   : >> { %1227 = vmatpush.msra.mxu1 %v354_v2  ;;  %1229 = vmatpush.msra.mxu3 %v354_v2  ;;  %v309_v11 = vld [vmem:[%s1366_s20 + $0xa8] sm:$0xff]  ;;  %v336_v12 = vld [vmem:[%s1366_s20 + $0x180] sm:$0xff]  ;;  %v290_v13 = vld [vmem:[%s1366_s20 + $0x10] sm:$0xff] }
  0x13   : >> { %567 = vmatpush.msra.mxu0 %v353_v3  ;;  %1231 = vmatpush.msra.mxu2 %v353_v3  ;;  %v319_v14 = vld [vmem:[%s1366_s20 + $0xf8] sm:$0xff]  ;;  %v310_v15 = vld [vmem:[%s1366_s20 + $0xb0] sm:$0xff]  ;;  %v337_v16 = vld [vmem:[%s1366_s20 + $0x188] sm:$0xff] }
  0x14   : >> { %1230 = vmatpush.msra.mxu1 %v353_v3  ;;  %1232 = vmatpush.msra.mxu3 %v353_v3  ;;  %v291_v17 = vld [vmem:[%s1366_s20 + $0x18] sm:$0xff]  ;;  %v320_v18 = vld [vmem:[%s1366_s20 + $0x100] sm:$0xff]  ;;  %v338_v20 = vld [vmem:[%s1366_s20 + $0x190] sm:$0xff] }
  0x15   : >> { %568 = vmatpush.msra.mxu0 %v352_v4  ;;  %1234 = vmatpush.msra.mxu2 %v352_v4  ;;  %v311_v19 = vld [vmem:[%s1366_s20 + $0xb8] sm:$0xff]  ;;  %v292_v21 = vld [vmem:[%s1366_s20 + $0x20] sm:$0xff]  ;;  %v321_v22 = vld [vmem:[%s1366_s20 + $0x108] sm:$0xff] }
  0x16   : >> { %1154 = vmatmul.msk.f32.vlgmr.msra.gmra.mxu0 %vm360_vm0, %v288_v5  ;;  %1183 = vmatmul.msk.f32.vlgmr.msra.gmra.mxu2 %vm360_vm0, %v317_v6  ;;  %v312_v23 = vld [vmem:[%s1366_s20 + $0xc0] sm:$0xff]  ;;  %v339_v24 = vld [vmem:[%s1366_s20 + $0x198] sm:$0xff]  ;;  %v293_v25 = vld [vmem:[%s1366_s20 + $0x28] sm:$0xff] }
  0x17   : >> { %1233 = vmatpush.msra.mxu1 %v352_v4  ;;  %1235 = vmatpush.msra.mxu3 %v352_v4  ;;  %v322_v26 = vld [vmem:[%s1366_s20 + $0x110] sm:$0xff]  ;;  %v313_v27 = vld [vmem:[%s1366_s20 + $0xc8] sm:$0xff]  ;;  %v340_v28 = vld [vmem:[%s1366_s20 + $0x1a0] sm:$0xff] }
  0x18   : >> { %1174 = vmatmul.msk.f32.vlgmr.msra.gmra.mxu1 %vm360_vm0, %v308_v7  ;;  %1201 = vmatmul.msk.f32.vlgmr.msra.gmra.mxu3 %vm360_vm0, %v335_v8  ;;  %v294_v29 = vld [vmem:[%s1366_s20 + $0x30] sm:$0xff]  ;;  %v323_v30 = vld [vmem:[%s1366_s20 + $0x118] sm:$0xff]  ;;  %v341_v32 = vld [vmem:[%s1366_s20 + $0x1a8] sm:$0xff] }
  0x19   : >> { %v314_v31 = vld [vmem:[%s1366_s20 + $0xd0] sm:$0xff]  ;;  %v295_v33 = vld [vmem:[%s1366_s20 + $0x38] sm:$0xff]  ;;  %v324_v34 = vld [vmem:[%s1366_s20 + $0x120] sm:$0xff] }
  0x1a   : >> { %v315_v35 = vld [vmem:[%s1366_s20 + $0xd8] sm:$0xff]  ;;  %v342_v36 = vld [vmem:[%s1366_s20 + $0x1b0] sm:$0xff]  ;;  %v296_v37 = vld [vmem:[%s1366_s20 + $0x40] sm:$0xff] }
  0x1b   : >> { %v325_v38 = vld [vmem:[%s1366_s20 + $0x128] sm:$0xff]  ;;  %v316_v39 = vld [vmem:[%s1366_s20 + $0xe0] sm:$0xff]  ;;  %v343_v40 = vld [vmem:[%s1366_s20 + $0x1b8] sm:$0xff] }
  0x1c   : >> { %v297_v41 = vld [vmem:[%s1366_s20 + $0x48] sm:$0xff]  ;;  %v326_v42 = vld [vmem:[%s1366_s20 + $0x130] sm:$0xff]  ;;  %v344_v43 = vld [vmem:[%s1366_s20 + $0x1c0] sm:$0xff] }
  0x1d   : >> { %v298_v44 = vld [vmem:[%s1366_s20 + $0x50] sm:$0xff]  ;;  %v327_v45 = vld [vmem:[%s1366_s20 + $0x138] sm:$0xff]  ;;  %v345_v46 = vld [vmem:[%s1366_s20 + $0x1c8] sm:$0xff] }
  0x1e   : >> { %1155 = vmatmul.msk.f32.gmra.mxu0 %vm360_vm0, %v289_v9  ;;  %1184 = vmatmul.msk.f32.gmra.mxu2 %vm360_vm0, %v318_v10  ;;  %v299_v47 = vld [vmem:[%s1366_s20 + $0x58] sm:$0xff]  ;;  %v328_v48 = vld [vmem:[%s1366_s20 + $0x140] sm:$0xff]  ;;  %v346_v49 = vld [vmem:[%s1366_s20 + $0x1d0] sm:$0xff] }
  0x1f   : >> { %v300_v50 = vld [vmem:[%s1366_s20 + $0x60] sm:$0xff]  ;;  %v329_v51 = vld [vmem:[%s1366_s20 + $0x148] sm:$0xff]  ;;  %v347_v52 = vld [vmem:[%s1366_s20 + $0x1d8] sm:$0xff] }
  0x20   : >> { %1175 = vmatmul.msk.f32.gmra.mxu1 %vm360_vm0, %v309_v11  ;;  %1202 = vmatmul.msk.f32.gmra.mxu3 %vm360_vm0, %v336_v12  ;;  %v301_v53 = vld [vmem:[%s1366_s20 + $0x68] sm:$0xff]  ;;  %v330_v54 = vld [vmem:[%s1366_s20 + $0x150] sm:$0xff]  ;;  %v348_v55 = vld [vmem:[%s1366_s20 + $0x1e0] sm:$0xff] }
  0x21   : >> { %v302_v56 = vld [vmem:[%s1366_s20 + $0x70] sm:$0xff]  ;;  %v331_v57 = vld [vmem:[%s1366_s20 + $0x158] sm:$0xff]  ;;  %v349_v58 = vld [vmem:[%s1366_s20 + $0x1e8] sm:$0xff] }
  0x22   : >> { %v303_v59 = vld [vmem:[%s1366_s20 + $0x78] sm:$0xff]  ;;  %v332_v60 = vld [vmem:[%s1366_s20 + $0x160] sm:$0xff]  ;;  %v350_v61 = vld [vmem:[%s1366_s20 + $0x1f0] sm:$0xff] }
  0x23   : >> { %v333_v63 = vld [vmem:[%s1366_s20 + $0x168] sm:$0xff]  ;;  %v304_v1 = vld [vmem:[%s1366_s20 + $0x80] sm:$0xff]  ;;  %v351_v3 = vld [vmem:[%s1366_s20 + $0x1f8] sm:$0xff] }
  0x24   : >> { %v1498_v5 = vld [vmem:[%s1801_s3] ss:$0 sm:$0xff]  ;;  %v334_v7 = vld [vmem:[%s1366_s20 + $0x170] sm:$0xff]  ;;  %v305_v9 = vld [vmem:[%s1366_s20 + $0x88] sm:$0xff] }
  0x26   : >> { %1156 = vmatmul.msk.f32.gmra.mxu0 %vm360_vm0, %v290_v13  ;;  %1185 = vmatmul.msk.f32.gmra.mxu2 %vm360_vm0, %v319_v14 }
  0x28   : >> { %1176 = vmatmul.msk.f32.gmra.mxu1 %vm360_vm0, %v310_v15  ;;  %1203 = vmatmul.msk.f32.gmra.mxu3 %vm360_vm0, %v337_v16 }
  0x2e   : >> { %1157 = vmatmul.msk.f32.gmra.mxu0 %vm360_vm0, %v291_v17  ;;  %1186 = vmatmul.msk.f32.gmra.mxu2 %vm360_vm0, %v320_v18  ;;  %v306_v17 = vld [vmem:[%s1366_s20 + $0x90] sm:$0xff] }
  0x30   : >> { %1177 = vmatmul.msk.f32.gmra.mxu1 %vm360_vm0, %v311_v19  ;;  %1204 = vmatmul.msk.f32.gmra.mxu3 %vm360_vm0, %v338_v20 }
  0x36   : >> { %1158 = vmatmul.msk.f32.gmra.mxu0 %vm360_vm0, %v292_v21  ;;  %1187 = vmatmul.msk.f32.gmra.mxu2 %vm360_vm0, %v321_v22 }
  0x38   : >> { %1178 = vmatmul.msk.f32.gmra.mxu1 %vm360_vm0, %v312_v23  ;;  %1205 = vmatmul.msk.f32.gmra.mxu3 %vm360_vm0, %v339_v24 }
  0x3e   : >> { %1159 = vmatmul.msk.f32.gmra.mxu0 %vm360_vm0, %v293_v25  ;;  %1188 = vmatmul.msk.f32.gmra.mxu2 %vm360_vm0, %v322_v26  ;;  %v307_v25 = vld [vmem:[%s1366_s20 + $0x98] sm:$0xff] }
  0x40   : >> { %1179 = vmatmul.msk.f32.gmra.mxu1 %vm360_vm0, %v313_v27  ;;  %1206 = vmatmul.msk.f32.gmra.mxu3 %vm360_vm0, %v340_v28 }
  0x46   : >> { %1160 = vmatmul.msk.f32.gmra.mxu0 %vm360_vm0, %v294_v29  ;;  %1189 = vmatmul.msk.f32.gmra.mxu2 %vm360_vm0, %v323_v30 }
  0x48   : >> { %1180 = vmatmul.msk.f32.gmra.mxu1 %vm360_vm0, %v314_v31  ;;  %1207 = vmatmul.msk.f32.gmra.mxu3 %vm360_vm0, %v341_v32 }
  0x4e   : >> { %1161 = vmatmul.msk.f32.gmra.mxu0 %vm360_vm0, %v295_v33  ;;  %1190 = vmatmul.msk.f32.gmra.mxu2 %vm360_vm0, %v324_v34 }
  0x50   : >> { %1181 = vmatmul.msk.f32.gmra.mxu1 %vm360_vm0, %v315_v35  ;;  %1208 = vmatmul.msk.f32.gmra.mxu3 %vm360_vm0, %v342_v36 }
  0x56   : >> { %1162 = vmatmul.msk.f32.gmra.mxu0 %vm360_vm0, %v296_v37  ;;  %1191 = vmatmul.msk.f32.gmra.mxu2 %vm360_vm0, %v325_v38 }
  0x58   : >> { %1182 = vmatmul.msk.f32.gmra.mxu1 %vm360_vm0, %v316_v39  ;;  %1209 = vmatmul.msk.f32.gmra.mxu3 %vm360_vm0, %v343_v40 }
  0x5e   : >> { %1163 = vmatmul.msk.f32.gmra.mxu0 %vm360_vm0, %v297_v41  ;;  %1192 = vmatmul.msk.f32.gmra.mxu2 %vm360_vm0, %v326_v42 }
  0x60   : >> { %1210 = vmatmul.msk.f32.gmra.mxu3 %vm360_vm0, %v344_v43 }
  0x66   : >> { %1164 = vmatmul.msk.f32.gmra.mxu0 %vm360_vm0, %v298_v44  ;;  %1193 = vmatmul.msk.f32.gmra.mxu2 %vm360_vm0, %v327_v45 }
  0x68   : >> { %1211 = vmatmul.msk.f32.gmra.mxu3 %vm360_vm0, %v345_v46 }
  0x6e   : >> { %1165 = vmatmul.msk.f32.gmra.mxu0 %vm360_vm0, %v299_v47  ;;  %1194 = vmatmul.msk.f32.gmra.mxu2 %vm360_vm0, %v328_v48 }
  0x70   : >> { %1212 = vmatmul.msk.f32.gmra.mxu3 %vm360_vm0, %v346_v49 }
  0x76   : >> { %1166 = vmatmul.msk.f32.gmra.mxu0 %vm360_vm0, %v300_v50  ;;  %1195 = vmatmul.msk.f32.gmra.mxu2 %vm360_vm0, %v329_v51 }
  0x78   : >> { %1213 = vmatmul.msk.f32.gmra.mxu3 %vm360_vm0, %v347_v52 }
  0x7e   : >> { %1167 = vmatmul.msk.f32.gmra.mxu0 %vm360_vm0, %v301_v53  ;;  %1196 = vmatmul.msk.f32.gmra.mxu2 %vm360_vm0, %v330_v54 }
  0x80   : >> { %1214 = vmatmul.msk.f32.gmra.mxu3 %vm360_vm0, %v348_v55 }
  0x86   : >> { %1168 = vmatmul.msk.f32.gmra.mxu0 %vm360_vm0, %v302_v56  ;;  %1197 = vmatmul.msk.f32.gmra.mxu2 %vm360_vm0, %v331_v57 }
  0x88   : >> { %1215 = vmatmul.msk.f32.gmra.mxu3 %vm360_vm0, %v349_v58 }
  0x8e   : >> { %1169 = vmatmul.msk.f32.gmra.mxu0 %vm360_vm0, %v303_v59  ;;  %1198 = vmatmul.msk.f32.gmra.mxu2 %vm360_vm0, %v332_v60 }
  0x90   : >> { %1216 = vmatmul.msk.f32.gmra.mxu3 %vm360_vm0, %v350_v61 }
  0x93   : >> { %v1485_v62 = vpop.f32.mrf.mxu0 }
  0x95   : >> { %v1489_v2 = vpop.f32.mrf.mxu1 }
  0x96   : >> { %1199 = vmatmul.msk.f32.gmra.mxu2 %vm360_vm0, %v333_v63  ;;  %1170 = vmatmul.msk.f32.gmra.mxu0 %vm360_vm0, %v304_v1 }
  0x98   : >> { %1217 = vmatmul.msk.f32.gmra.mxu3 %vm360_vm0, %v351_v3 }
  0x99   : >> { %v657_v4 = vpop.f32.mrf.mxu2 }
  0x9a   : >> { %v658_v21 = vadd.f32 %v1498_v5, %v657_v4 }
  0x9b   : >> { %v1500_v6 = vpop.f32.mrf.mxu0  ;;  %v711_v8 = vpop.f32.mrf.mxu3 }
  0x9c   : >> { %v712_v10 = vadd.f32 %v1498_v5, %v711_v8  ;;  %v855_v30 = vmul.f32 0.01, %v658_v21  ;;  %vm791_vm4 = vcmp.gt.f32.partialorder %v658_v21, 0.0 }
  0x9d   : >> { %v1505_v11 = vpop.f32.mrf.mxu1 }
  0x9e   : >> { %1200 = vmatmul.msk.f32.gmra.mxu2 %vm360_vm0, %v334_v7  ;;  %1171 = vmatmul.msk.f32.gmra.mxu0 %vm360_vm0, %v305_v9  ;;  %vm809_vm1 = vcmp.gt.f32.partialorder %v712_v10, 0.0  ;;  %v873_v12 = vmul.f32 0.01, %v712_v10  ;;  %v919_v33 = vsel %vm791_vm4, %v658_v21, %v855_v30 }
  0xa0   : >> { %v937_v13 = vsel %vm809_vm1, %v712_v10, %v873_v12 }
  0xa1   : >> { %v660_v14 = vpop.f32.mrf.mxu2  ;;  %1001 = vmatpush.msrb.mxu3 %v937_v13  ;;  %v634_v13 = vadd.f32 %v1498_v5, %v1505_v11 }
  0xa2   : >> { %v661_v19 = vadd.f32 %v1498_v5, %v660_v14 }
  0xa3   : >> { %v1509_v15 = vpop.f32.mrf.mxu0  ;;  %v1511_v16 = vpop.f32.mrf.mxu3  ;;  %vm783_vm12 = vcmp.gt.f32.partialorder %v634_v13, 0.0 }
  0xa4   : >> { %v856_v27 = vmul.f32 0.01, %v661_v19  ;;  %vm792_vm3 = vcmp.gt.f32.partialorder %v661_v19, 0.0 }
  0xa5   : >> { %v1514_v18 = vpop.f32.mrf.mxu1 }
  0xa6   : >> { %1172 = vmatmul.msk.f32.gmra.mxu0 %vm360_vm0, %v306_v17  ;;  %v920_v31 = vsel %vm792_vm3, %v661_v19, %v856_v27  ;;  %v637_v9 = vadd.f32 %v1498_v5, %v1514_v18  ;;  %v631_v19 = vadd.f32 %v1498_v5, %v1489_v2 }
  0xa8   : >> { %v848_v21 = vmul.f32 0.01, %v637_v9  ;;  %vm784_vm11 = vcmp.gt.f32.partialorder %v637_v9, 0.0  ;;  %vm782_vm13 = vcmp.gt.f32.partialorder %v631_v19, 0.0 }
  0xa9   : >> { %v663_v20 = vpop.f32.mrf.mxu2 }
  0xaa   : >> { %v664_v22 = vadd.f32 %v1498_v5, %v663_v20  ;;  %v912_v11 = vsel %vm784_vm11, %v637_v9, %v848_v21 }
  0xab   : >> { %v1520_v23 = vpop.f32.mrf.mxu0  ;;  %v1522_v24 = vpop.f32.mrf.mxu3 }
  0xac   : >> { %vm793_vm2 = vcmp.gt.f32.partialorder %v664_v22, 0.0  ;;  %v857_v26 = vmul.f32 0.01, %v664_v22 }
  0xad   : >> { %v639_v28 = vpop.f32.mrf.mxu1 }
  0xae   : >> { %v921_v29 = vsel %vm793_vm2, %v664_v22, %v857_v26  ;;  %1173 = vmatmul.msk.f32.gmra.mxu0 %vm360_vm0, %v307_v25  ;;  %v640_v63 = vadd.f32 %v1498_v5, %v639_v28  ;;  %v847_v25 = vmul.f32 0.01, %v634_v13  ;;  %v846_v28 = vmul.f32 0.01, %v631_v19 }
  0xaf   : >> { %981 = vmatpush.msrb.mxu2 %v921_v29 }
  0xb0   : >> { %v849_v17 = vmul.f32 0.01, %v640_v63  ;;  %vm785_vm10 = vcmp.gt.f32.partialorder %v640_v63, 0.0  ;;  %v911_v29 = vsel %vm783_vm12, %v634_v13, %v847_v25  ;;  %v910_v2 = vsel %vm782_vm13, %v631_v19, %v846_v28 }
  0xb1   : >> { %v1526_v32 = vpop.f32.mrf.mxu2  ;;  %982 = vmatpush.msrb.mxu2 %v920_v31 }
  0xb2   : >> { %v913_v18 = vsel %vm785_vm10, %v640_v63, %v849_v17 }
  0xb3   : >> { %v1528_v34 = vpop.f32.mrf.mxu0  ;;  %983 = vmatpush.msrb.mxu2 %v919_v33  ;;  %v1530_v35 = vpop.f32.mrf.mxu3 }
  0xb5   : >> { %v642_v36 = vpop.f32.mrf.mxu1 }
  0xb6   : >> { %v643_v58 = vadd.f32 %v1498_v5, %v642_v36 }
  0xb8   : >> { %v850_v12 = vmul.f32 0.01, %v643_v58  ;;  %vm786_vm9 = vcmp.gt.f32.partialorder %v643_v58, 0.0 }
  0xb9   : >> { %v1532_v37 = vpop.f32.mrf.mxu2 }
  0xba   : >> { %v914_v20 = vsel %vm786_vm9, %v643_v58, %v850_v12 }
  0xbb   : >> { %v1534_v38 = vpop.f32.mrf.mxu0  ;;  %v1536_v39 = vpop.f32.mrf.mxu3 }
  0xbd   : >> { %v645_v40 = vpop.f32.mrf.mxu1 }
  0xbe   : >> { %v646_v55 = vadd.f32 %v1498_v5, %v645_v40 }
  0xc0   : >> { %v851_v4 = vmul.f32 0.01, %v646_v55  ;;  %vm787_vm8 = vcmp.gt.f32.partialorder %v646_v55, 0.0 }
  0xc1   : >> { %v1538_v41 = vpop.f32.mrf.mxu2 }
  0xc2   : >> { %v915_v14 = vsel %vm787_vm8, %v646_v55, %v851_v4 }
  0xc3   : >> { %v1540_v42 = vpop.f32.mrf.mxu0  ;;  %v1542_v43 = vpop.f32.mrf.mxu3 }
  0xc5   : >> { %v648_v44 = vpop.f32.mrf.mxu1 }
  0xc6   : >> { %v649_v53 = vadd.f32 %v1498_v5, %v648_v44 }
  0xc8   : >> { %v852_v60 = vmul.f32 0.01, %v649_v53  ;;  %vm788_vm7 = vcmp.gt.f32.partialorder %v649_v53, 0.0 }
  0xc9   : >> { %v1544_v45 = vpop.f32.mrf.mxu2 }
  0xca   : >> { %v916_v10 = vsel %vm788_vm7, %v649_v53, %v852_v60 }
  0xcb   : >> { %v1546_v46 = vpop.f32.mrf.mxu0  ;;  %v1548_v47 = vpop.f32.mrf.mxu3 }
  0xcd   : >> { %v651_v48 = vpop.f32.mrf.mxu1 }
  0xce   : >> { %v652_v50 = vadd.f32 %v1498_v5, %v651_v48 }
  0xd0   : >> { %v853_v57 = vmul.f32 0.01, %v652_v50  ;;  %vm789_vm5 = vcmp.gt.f32.partialorder %v652_v50, 0.0 }
  0xd1   : >> { %v1550_v49 = vpop.f32.mrf.mxu2 }
  0xd2   : >> { %v917_v3 = vsel %vm789_vm5, %v652_v50, %v853_v57 }
  0xd3   : >> { %v1553_v51 = vpop.f32.mrf.mxu0  ;;  %v1555_v52 = vpop.f32.mrf.mxu3 }
  0xd4   : >> { %v595_v28 = vadd.f32 %v1498_v5, %v1553_v51  ;;  %v580_v51 = vadd.f32 %v1498_v5, %v1520_v23 }
  0xd5   : >> { %v654_v54 = vpop.f32.mrf.mxu1 }
  0xd6   : >> { %v655_v56 = vadd.f32 %v1498_v5, %v654_v54  ;;  %vm765_vm12 = vcmp.gt.f32.partialorder %v580_v51, 0.0 }
  0xd8   : >> { %vm790_vm6 = vcmp.gt.f32.partialorder %v655_v56, 0.0  ;;  %v854_v59 = vmul.f32 0.01, %v655_v56 }
  0xd9   : >> { %v1561_v61 = vpop.f32.mrf.mxu2 }
  0xda   : >> { %v918_v1 = vsel %vm790_vm6, %v655_v56, %v854_v59  ;;  %vm770_vm6 = vcmp.gt.f32.partialorder %v595_v28, 0.0 }
  0xdb   : >> { %v1564_v7 = vpop.f32.mrf.mxu0  ;;  %984 = vmatpush.msrb.mxu2 %v918_v1  ;;  %v1566_v8 = vpop.f32.mrf.mxu3 }
  0xdd   : >> { %985 = vmatpush.msrb.mxu2 %v917_v3 }
  0xdf   : >> { %986 = vmatpush.msrb.mxu2 %v916_v10 }
  0xe1   : >> { %v1574_v22 = vpop.f32.mrf.mxu2  ;;  %987 = vmatpush.msrb.mxu2 %v915_v14 }
  0xe3   : >> { %v600_v26 = vpop.f32.mrf.mxu0  ;;  %988 = vmatpush.msrb.mxu2 %v914_v20  ;;  %v1576_v27 = vpop.f32.mrf.mxu3 }
  0xe4   : >> { %v601_v17 = vadd.f32 %v1498_v5, %v600_v26  ;;  %v571_v26 = vadd.f32 %v1498_v5, %v1485_v62  ;;  %v589_v62 = vadd.f32 %v1498_v5, %v1540_v42 }
  0xe5   : >> { %989 = vmatpush.msrb.mxu2 %v913_v18  ;;  %v598_v18 = vadd.f32 %v1498_v5, %v1564_v7  ;;  %v574_v7 = vadd.f32 %v1498_v5, %v1500_v6  ;;  %v586_v6 = vadd.f32 %v1498_v5, %v1534_v38 }
  0xe6   : >> { %vm772_vm4 = vcmp.gt.f32.partialorder %v601_v17, 0.0  ;;  %vm762_vm7 = vcmp.gt.f32.partialorder %v571_v26, 0.0  ;;  %v826_v23 = vmul.f32 0.01, %v571_v26  ;;  %vm768_vm11 = vcmp.gt.f32.partialorder %v589_v62, 0.0 }
  0xe7   : >> { %990 = vmatpush.msrb.mxu2 %v912_v11  ;;  %vm771_vm5 = vcmp.gt.f32.partialorder %v598_v18, 0.0  ;;  %vm763_vm9 = vcmp.gt.f32.partialorder %v574_v7, 0.0  ;;  %vm767_vm13 = vcmp.gt.f32.partialorder %v586_v6, 0.0 }
  0xe9   : >> { %v1578_v30 = vpop.f32.mrf.mxu2  ;;  %991 = vmatpush.msrb.mxu2 %v911_v29 }
  0xeb   : >> { %v603_v31 = vpop.f32.mrf.mxu0  ;;  %992 = vmatpush.msrb.mxu2 %v910_v2  ;;  %v1580_v33 = vpop.f32.mrf.mxu3  ;;  %v836_v2 = vmul.f32 0.01, %v601_v17 }
  0xec   : >> { %v604_v9 = vadd.f32 %v1498_v5, %v603_v31  ;;  %v592_v31 = vadd.f32 %v1498_v5, %v1546_v46 }
  0xee   : >> { %v837_v11 = vmul.f32 0.01, %v604_v9  ;;  %vm773_vm3 = vcmp.gt.f32.partialorder %v604_v9, 0.0  ;;  %vm769_vm8 = vcmp.gt.f32.partialorder %v592_v31, 0.0 }
  0xf1   : >> { %v1582_v36 = vpop.f32.mrf.mxu2 }
  0xf3   : >> { %v606_v40 = vpop.f32.mrf.mxu0  ;;  %v1584_v44 = vpop.f32.mrf.mxu3 }
  0xf4   : >> { %v607_v1 = vadd.f32 %v1498_v5, %v606_v40  ;;  %v901_v40 = vsel %vm773_vm3, %v604_v9, %v837_v11  ;;  %v1635_v11 = vsel %vm762_vm7, %v571_v26, %v826_v23  ;;  %v1648_v26 = vadd.f32 %v1498_v5, %v1544_v45 }
  0xf5   : >> { %v1662_v45 = vadd.f32 %v1498_v5, %v1550_v49 }
  0xf6   : >> { %v838_v20 = vmul.f32 0.01, %v607_v1  ;;  %vm774_vm2 = vcmp.gt.f32.partialorder %v607_v1, 0.0 }
  0xf8   : >> { %v902_v29 = vsel %vm774_vm2, %v607_v1, %v838_v20 }
  0xf9   : >> { %v1586_v48 = vpop.f32.mrf.mxu2 }
  0xfb   : >> { %v609_v50 = vpop.f32.mrf.mxu0  ;;  %v1588_v53 = vpop.f32.mrf.mxu3 }
  0xfc   : >> { %v610_v60 = vadd.f32 %v1498_v5, %v609_v50  ;;  %v835_v50 = vmul.f32 0.01, %v598_v18 }
  0xfe   : >> { %v839_v12 = vmul.f32 0.01, %v610_v60  ;;  %vm775_vm1 = vcmp.gt.f32.partialorder %v610_v60, 0.0  ;;  %v899_v1 = vsel %vm771_vm5, %v598_v18, %v835_v50 }
 0x100   : >> { %v903_v25 = vsel %vm775_vm1, %v610_v60, %v839_v12  ;;  %v834_v60 = vmul.f32 0.01, %v595_v28  ;;  %v829_v12 = vmul.f32 0.01, %v580_v51 }
 0x101   : >> { %v1590_v54 = vpop.f32.mrf.mxu2 }
 0x102   : >> { %v898_v9 = vsel %vm770_vm6, %v595_v28, %v834_v60  ;;  %v694_v60 = vadd.f32 %v1498_v5, %v1586_v48 }
 0x103   : >> { %v612_v55 = vpop.f32.mrf.mxu0  ;;  %v1592_v56 = vpop.f32.mrf.mxu3 }
 0x104   : >> { %v613_v58 = vadd.f32 %v1498_v5, %v612_v55  ;;  %v577_v55 = vadd.f32 %v1498_v5, %v1509_v15  ;;  %vm803_vm7 = vcmp.gt.f32.partialorder %v694_v60, 0.0 }
 0x106   : >> { %v840_v4 = vmul.f32 0.01, %v613_v58  ;;  %vm776_vm15 = vcmp.gt.f32.partialorder %v613_v58, 0.0  ;;  %v828_v42 = vmul.f32 0.01, %v577_v55  ;;  %vm764_vm10 = vcmp.gt.f32.partialorder %v577_v55, 0.0 }
 0x108   : >> { %v904_v19 = vsel %vm776_vm15, %v613_v58, %v840_v4  ;;  %v827_v4 = vmul.f32 0.01, %v574_v7  ;;  %v892_v18 = vsel %vm764_vm10, %v577_v55, %v828_v42 }
 0x109   : >> { %v1594_v57 = vpop.f32.mrf.mxu2 }
 0x10a   : >> { %v700_v50 = vadd.f32 %v1498_v5, %v1594_v57  ;;  %v697_v57 = vadd.f32 %v1498_v5, %v1590_v54 }
 0x10b   : >> { %v615_v59 = vpop.f32.mrf.mxu0  ;;  %v1601_v13 = vpop.f32.mrf.mxu3 }
 0x10c   : >> { %v616_v63 = vadd.f32 %v1498_v5, %v615_v59  ;;  %v900_v59 = vsel %vm772_vm4, %v601_v17, %v836_v2  ;;  %v869_v54 = vmul.f32 0.01, %v700_v50  ;;  %vm805_vm3 = vcmp.gt.f32.partialorder %v700_v50, 0.0 }
 0x10d   : >> { %vm804_vm6 = vcmp.gt.f32.partialorder %v697_v57, 0.0 }
 0x10e   : >> { %vm777_vm14 = vcmp.gt.f32.partialorder %v616_v63, 0.0  ;;  %v841_v3 = vmul.f32 0.01, %v616_v63 }
 0x110   : >> { %v905_v10 = vsel %vm777_vm14, %v616_v63, %v841_v3  ;;  %v583_v63 = vadd.f32 %v1498_v5, %v1528_v34  ;;  %v833_v3 = vmul.f32 0.01, %v592_v31  ;;  %v831_v34 = vmul.f32 0.01, %v586_v6 }
 0x111   : >> { %v1603_v14 = vpop.f32.mrf.mxu2  ;;  %961 = vmatpush.msrb.mxu1 %v905_v10  ;;  %v832_v10 = vmul.f32 0.01, %v589_v62 }
 0x112   : >> { %v830_v38 = vmul.f32 0.01, %v583_v63  ;;  %vm766_vm14 = vcmp.gt.f32.partialorder %v583_v63, 0.0  ;;  %v703_v28 = vadd.f32 %v1498_v5, %v1603_v14  ;;  %v895_v55 = vsel %vm767_vm13, %v586_v6, %v831_v34 }
 0x113   : >> { %962 = vmatpush.msrb.mxu1 %v904_v19  ;;  %v1606_v21 = vpop.f32.mrf.mxu0  ;;  %v1624_v46 = vpop.f32.mrf.mxu3  ;;  %v897_v19 = vsel %vm769_vm8, %v592_v31, %v833_v3  ;;  %v896_v2 = vsel %vm768_vm11, %v589_v62, %v832_v10  ;;  %v1642_v31 = vadd.f32 %v1498_v5, %v1538_v41  ;;  %v1656_v41 = vadd.f32 %v1498_v5, %v1582_v36 }
 0x114   : >> { %v870_v6 = vmul.f32 0.01, %v703_v28  ;;  %vm806_vm2 = vcmp.gt.f32.partialorder %v703_v28, 0.0  ;;  %v757_v3 = vadd.f32 %v1498_v5, %v1624_v46  ;;  %v933_v46 = vsel %vm805_vm3, %v700_v50, %v869_v54 }
 0x115   : >> { %963 = vmatpush.msrb.mxu1 %v903_v25  ;;  %v891_v25 = vsel %vm763_vm9, %v574_v7, %v827_v4  ;;  %v894_v7 = vsel %vm766_vm14, %v583_v63, %v830_v38  ;;  %vm802_vm4 = vcmp.gt.f32.partialorder %v1656_v41, 0.0  ;;  %v754_v4 = vadd.f32 %v1498_v5, %v1601_v13 }
 0x116   : >> { %v934_v42 = vsel %vm806_vm2, %v703_v28, %v870_v6  ;;  %v867_v10 = vmul.f32 0.01, %v694_v60  ;;  %v888_v13 = vmul.f32 0.01, %v757_v3  ;;  %vm824_vm11 = vcmp.gt.f32.partialorder %v757_v3, 0.0  ;;  %v958_v6 = vld [vmem:[%s1710_s29 + $0x8] sm:$0xff] }
 0x117   : >> { %964 = vmatpush.msrb.mxu1 %v902_v29  ;;  %vm823_vm13 = vcmp.gt.f32.partialorder %v754_v4, 0.0 }
 0x119   : >> { %v705_v58 = vpop.f32.mrf.mxu2  ;;  %965 = vmatpush.msrb.mxu1 %v901_v40  ;;  %v893_v40 = vsel %vm765_vm12, %v580_v51, %v829_v12  ;;  %v1652_v51 = vadd.f32 %v1498_v5, %v1578_v30  ;;  %v1668_v30 = vadd.f32 %v1498_v5, %v1574_v22  ;;  %v868_v22 = vmul.f32 0.01, %v697_v57 }
 0x11a   : >> { %v706_v17 = vadd.f32 %v1498_v5, %v705_v58 }
 0x11b   : >> { %966 = vmatpush.msrb.mxu1 %v900_v59  ;;  %v1630_v15 = vpop.f32.mrf.mxu0  ;;  %v759_v62 = vpop.f32.mrf.mxu3  ;;  %vm801_vm5 = vcmp.gt.f32.partialorder %v1652_v51, 0.0  ;;  %v865_v23 = vmul.f32 0.01, %v1652_v51  ;;  %vm800_vm8 = vcmp.gt.f32.partialorder %v1668_v30, 0.0 }
 0x11c   : >> { %v871_v59 = vmul.f32 0.01, %v706_v17  ;;  %vm807_vm1 = vcmp.gt.f32.partialorder %v706_v17, 0.0  ;;  %v760_v36 = vadd.f32 %v1498_v5, %v759_v62  ;;  %v622_v34 = vadd.f32 %v1498_v5, %v1630_v15 }
 0x11d   : >> { %967 = vmatpush.msrb.mxu1 %v899_v1  ;;  %v1673_v1 = vadd.f32 %v1498_v5, %v1561_v61  ;;  %v866_v61 = vmul.f32 0.01, %v1656_v41  ;;  %v748_v15 = vadd.f32 %v1498_v5, %v1588_v53  ;;  %v952_v53 = vsel %vm824_vm11, %v757_v3, %v888_v13 }
 0x11e   : >> { %v935_v49 = vsel %vm807_vm1, %v706_v17, %v871_v59  ;;  %vm825_vm9 = vcmp.gt.f32.partialorder %v760_v36, 0.0  ;;  %v843_v50 = vmul.f32 0.01, %v622_v34  ;;  %vm779_vm14 = vcmp.gt.f32.partialorder %v622_v34, 0.0 }
 0x11f   : >> { %968 = vmatpush.msrb.mxu1 %v898_v9  ;;  %v889_v9 = vmul.f32 0.01, %v760_v36  ;;  %v929_v62 = vsel %vm801_vm5, %v1652_v51, %v865_v23  ;;  %vm821_vm2 = vcmp.gt.f32.partialorder %v748_v15, 0.0  ;;  %vm799_vm3 = vcmp.gt.f32.partialorder %v1673_v1, 0.0 }
 0x120   : >> { %vm798_vm5 = vcmp.gt.f32.partialorder %v1662_v45, 0.0  ;;  %v861_v23 = vmul.f32 0.01, %v1648_v26 }
 0x121   : >> { %v708_v20 = vpop.f32.mrf.mxu2  ;;  %969 = vmatpush.msrb.mxu1 %v897_v19  ;;  %v751_v19 = vadd.f32 %v1498_v5, %v1592_v56  ;;  %v953_v56 = vsel %vm825_vm9, %v760_v36, %v889_v9  ;;  %v862_v36 = vmul.f32 0.01, %v1662_v45  ;;  %vm796_vm9 = vcmp.gt.f32.partialorder %v1642_v31, 0.0 }
 0x122   : >> { %v709_v29 = vadd.f32 %v1498_v5, %v708_v20  ;;  %v932_v20 = vsel %vm804_vm6, %v697_v57, %v868_v22  ;;  %v907_v57 = vsel %vm779_vm14, %v622_v34, %v843_v50  ;;  %v670_v22 = vadd.f32 %v1498_v5, %v1532_v37 }
 0x123   : >> { %970 = vmatpush.msrb.mxu1 %v896_v2  ;;  %v624_v58 = vpop.f32.mrf.mxu0  ;;  %v667_v37 = vadd.f32 %v1498_v5, %v1526_v32 }
 0x124   : >> { %vm808_vm15 = vcmp.gt.f32.partialorder %v709_v29, 0.0  ;;  %v872_v14 = vmul.f32 0.01, %v709_v29  ;;  %v625_v48 = vadd.f32 %v1498_v5, %v624_v58  ;;  %vm795_vm11 = vcmp.gt.f32.partialorder %v670_v22, 0.0 }
 0x125   : >> { %971 = vmatpush.msrb.mxu1 %v895_v55  ;;  %v886_v55 = vmul.f32 0.01, %v751_v19 }
 0x126   : >> { %v936_v63 = vsel %vm808_vm15, %v709_v29, %v872_v14  ;;  %v844_v17 = vmul.f32 0.01, %v625_v48  ;;  %vm780_vm10 = vcmp.gt.f32.partialorder %v625_v48, 0.0  ;;  %v887_v29 = vmul.f32 0.01, %v754_v4 }
 0x127   : >> { %972 = vmatpush.msrb.mxu1 %v894_v7  ;;  %1002 = vmatpush.msrb.mxu3 %v936_v63  ;;  %vm822_vm15 = vcmp.gt.f32.partialorder %v751_v19, 0.0  ;;  %v864_v7 = vmul.f32 0.01, %v1668_v30  ;;  %v885_v14 = vmul.f32 0.01, %v748_v15 }
 0x128   : >> { %v951_v59 = vsel %vm823_vm13, %v754_v4, %v887_v29  ;;  %v950_v63 = vsel %vm822_vm15, %v751_v19, %v886_v55  ;;  %v860_v4 = vmul.f32 0.01, %v1642_v31  ;;  %vm794_vm13 = vcmp.gt.f32.partialorder %v667_v37, 0.0  ;;  %v960_v55 = vld [vmem:[%s1710_s29 + $0x18] sm:$0xff] }
 0x129   : >> { %973 = vmatpush.msrb.mxu1 %v893_v40  ;;  %1003 = vmatpush.msrb.mxu3 %v935_v49  ;;  %v908_v40 = vsel %vm780_vm10, %v625_v48, %v844_v17  ;;  %v928_v51 = vsel %vm800_vm8, %v1668_v30, %v864_v7  ;;  %v957_v49 = vld [vmem:[%s1710_s29] sm:$0xff]  ;;  %v949_v3 = vsel %vm821_vm2, %v748_v15, %v885_v14 }
 0x12a   : >> { %v724_v17 = vadd.f32 %v1498_v5, %v1536_v39  ;;  %v718_v39 = vadd.f32 %v1498_v5, %v1522_v24 }
 0x12b   : >> { %974 = vmatpush.msrb.mxu1 %v892_v18  ;;  %1004 = vmatpush.msrb.mxu3 %v934_v42  ;;  %v627_v12 = vpop.f32.mrf.mxu0  ;;  %v619_v18 = vadd.f32 %v1498_v5, %v1606_v21  ;;  %v745_v21 = vadd.f32 %v1498_v5, %v1584_v44  ;;  %v742_v44 = vadd.f32 %v1498_v5, %v1580_v33 }
 0x12c   : >> { %v628_v38 = vadd.f32 %v1498_v5, %v627_v12  ;;  %v739_v33 = vadd.f32 %v1498_v5, %v1576_v27  ;;  %v736_v27 = vadd.f32 %v1498_v5, %v1566_v8  ;;  %v733_v8 = vadd.f32 %v1498_v5, %v1555_v52 }
 0x12d   : >> { %975 = vmatpush.msrb.mxu1 %v891_v25  ;;  %1005 = vmatpush.msrb.mxu3 %v933_v46  ;;  %v931_v25 = vsel %vm803_vm7, %v694_v60, %v867_v10  ;;  %v842_v58 = vmul.f32 0.01, %v619_v18  ;;  %vm778_vm1 = vcmp.gt.f32.partialorder %v619_v18, 0.0  ;;  %v884_v60 = vmul.f32 0.01, %v745_v21 }
 0x12e   : >> { %vm781_vm12 = vcmp.gt.f32.partialorder %v628_v38, 0.0  ;;  %v845_v28 = vmul.f32 0.01, %v628_v38  ;;  %v883_v48 = vmul.f32 0.01, %v742_v44  ;;  %vm819_vm6 = vcmp.gt.f32.partialorder %v742_v44, 0.0 }
 0x12f   : >> { %976 = vmatpush.msrb.mxu1 %v1635_v11  ;;  %1006 = vmatpush.msrb.mxu3 %v932_v20  ;;  %v930_v11 = vsel %vm802_vm4, %v1656_v41, %v866_v61  ;;  %v863_v41 = vmul.f32 0.01, %v1673_v1  ;;  %vm820_vm4 = vcmp.gt.f32.partialorder %v745_v21, 0.0  ;;  %v906_v54 = vsel %vm778_vm1, %v619_v18, %v842_v58 }
 0x130   : >> { %v909_v2 = vsel %vm781_vm12, %v628_v38, %v845_v28  ;;  %v882_v42 = vmul.f32 0.01, %v739_v33  ;;  %v948_v61 = vsel %vm820_vm4, %v745_v21, %v884_v60  ;;  %vm797_vm7 = vcmp.gt.f32.partialorder %v1648_v26, 0.0  ;;  %977 = vmatmul.f32.vlgmr.msrb.gmra.mxu1 %v957_v49  ;;  %v959_v28 = vld [vmem:[%s1710_s29 + $0x10] sm:$0xff]  ;;  %v1262_v60 = vld [vmem:[%s1804_s6] ss:$0 sm:$0xff] (%p281_p5) }
 0x131   : >> { %1021 = vmatpush.msra.mxu1 %v953_v56  ;;  %1007 = vmatpush.msrb.mxu3 %v931_v25  ;;  %v927_v30 = vsel %vm799_vm3, %v1673_v1, %v863_v41  ;;  %v926_v1 = vsel %vm798_vm5, %v1662_v45, %v862_v36  ;;  %vm818_vm8 = vcmp.gt.f32.partialorder %v739_v33, 0.0  ;;  %v730_v52 = vadd.f32 %v1498_v5, %v1548_v47  ;;  %v1044_v41 = vld [vmem:[%s1802_s4 + $0x10] sm:$0xff] (%p281_p5) }
 0x132   : >> { %993 = vmatpush.msrb.mxu2 %v909_v2  ;;  %v881_v9 = vmul.f32 0.01, %v736_v27  ;;  %v947_v46 = vsel %vm819_vm6, %v742_v44, %v883_v48  ;;  %v925_v32 = vsel %vm797_vm7, %v1648_v26, %v861_v23  ;;  %vm817_vm10 = vcmp.gt.f32.partialorder %v736_v27, 0.0 }
 0x133   : >> { %1022 = vmatpush.msra.mxu1 %v952_v53  ;;  %1008 = vmatpush.msrb.mxu3 %v930_v11  ;;  %v859_v10 = vmul.f32 0.01, %v670_v22  ;;  %v727_v45 = vadd.f32 %v1498_v5, %v1542_v43  ;;  %v880_v12 = vmul.f32 0.01, %v733_v8  ;;  %v946_v34 = vsel %vm818_vm8, %v739_v33, %v882_v42  ;;  %v1261_v33 = vld [vmem:[%s1803_s5] ss:$0 sm:$0xff] (%p281_p5) }
 0x134   : >> { %994 = vmatpush.msrb.mxu2 %v908_v40  ;;  %v924_v47 = vsel %vm796_vm9, %v1642_v31, %v860_v4  ;;  %vm816_vm12 = vcmp.gt.f32.partialorder %v733_v8, 0.0  ;;  %v858_v38 = vmul.f32 0.01, %v667_v37  ;;  %v879_v19 = vmul.f32 0.01, %v730_v52 }
 0x135   : >> { %1023 = vmatpush.msra.mxu1 %v951_v59  ;;  %1009 = vmatpush.msrb.mxu3 %v929_v62  ;;  %v945_v26 = vsel %vm817_vm10, %v736_v27, %v881_v9  ;;  %v923_v13 = vsel %vm795_vm11, %v670_v22, %v859_v10  ;;  %vm815_vm14 = vcmp.gt.f32.partialorder %v730_v52, 0.0  ;;  %v721_v43 = vadd.f32 %v1498_v5, %v1530_v35  ;;  %v1045_v62 = vld [vmem:[%s1802_s4 + $0x18] sm:$0xff] (%p281_p5) }
 0x136   : >> { %995 = vmatpush.msrb.mxu2 %v907_v57  ;;  %v878_v20 = vmul.f32 0.01, %v727_v45  ;;  %v944_v18 = vsel %vm816_vm12, %v733_v8, %v880_v12  ;;  %v922_v31 = vsel %vm794_vm13, %v667_v37, %v858_v38  ;;  %vm814_vm15 = vcmp.gt.f32.partialorder %v727_v45, 0.0  ;;  %1066 = vmatpush.msra.mxu0 (%p281_p5), %v1045_v62  ;;  %v1042_v57 = vld [vmem:[%s1802_s4] sm:$0xff] (%p281_p5) }
 0x137   : >> { %1024 = vmatpush.msra.mxu1 %v950_v63  ;;  %1010 = vmatpush.msrb.mxu3 %v928_v51  ;;  %v877_v15 = vmul.f32 0.01, %v724_v17  ;;  %v943_v29 = vsel %vm815_vm14, %v730_v52, %v879_v19  ;;  %vm813_vm1 = vcmp.gt.f32.partialorder %v724_v17, 0.0  ;;  %v715_v35 = vadd.f32 %v1498_v5, %v1511_v16 }
 0x138   : >> { %996 = vmatpush.msrb.mxu2 %v906_v54  ;;  %v876_v56 = vmul.f32 0.01, %v721_v43  ;;  %v942_v25 = vsel %vm814_vm15, %v727_v45, %v878_v20  ;;  %vm812_vm2 = vcmp.gt.f32.partialorder %v721_v43, 0.0  ;;  %v875_v2 = vmul.f32 0.01, %v718_v39  ;;  %1067 = vmatpush.msra.mxu0 (%p281_p5), %v1044_v41 }
 0x139   : >> { %1025 = vmatpush.msra.mxu1 %v949_v3  ;;  %997 = vmatmul.f32.vlgmr.msrb.gmra.mxu2 %v958_v6  ;;  %v941_v40 = vsel %vm813_vm1, %v724_v17, %v877_v15  ;;  %vm811_vm3 = vcmp.gt.f32.partialorder %v718_v39, 0.0  ;;  %v874_v50 = vmul.f32 0.01, %v715_v35  ;;  %vm810_vm4 = vcmp.gt.f32.partialorder %v715_v35, 0.0 }
 0x13a   : >> { %1011 = vmatpush.msrb.mxu3 %v927_v30  ;;  %v940_v24 = vsel %vm812_vm2, %v721_v43, %v876_v56  ;;  %v939_v21 = vsel %vm811_vm3, %v718_v39, %v875_v2 }
 0x13b   : >> { %1026 = vmatpush.msra.mxu1 %v948_v61  ;;  %v938_v53 = vsel %vm810_vm4, %v715_v35, %v874_v50 }
 0x13c   : >> { %1012 = vmatpush.msrb.mxu3 %v926_v1 }
 0x13d   : >> { %1027 = vmatpush.msra.mxu1 %v947_v46 }
 0x13e   : >> { %1013 = vmatpush.msrb.mxu3 %v925_v32 }
 0x13f   : >> { %1028 = vmatpush.msra.mxu1 %v946_v34 }
 0x140   : >> { %1014 = vmatpush.msrb.mxu3 %v924_v47 }
 0x141   : >> { %1029 = vmatpush.msra.mxu1 %v945_v26 }
 0x142   : >> { %1015 = vmatpush.msrb.mxu3 %v923_v13 }
 0x143   : >> { %1030 = vmatpush.msra.mxu1 %v944_v18 }
 0x144   : >> { %1016 = vmatpush.msrb.mxu3 %v922_v31 }
 0x145   : >> { %1031 = vmatpush.msra.mxu1 %v943_v29  ;;  %1017 = vmatmul.f32.vlgmr.msrb.gmra.mxu3 %v959_v28 }
 0x147   : >> { %1032 = vmatpush.msra.mxu1 %v942_v25 }
 0x149   : >> { %1033 = vmatpush.msra.mxu1 %v941_v40 }
 0x14b   : >> { %1034 = vmatpush.msra.mxu1 %v940_v24 }
 0x14d   : >> { %1035 = vmatpush.msra.mxu1 %v939_v21 }
 0x14f   : >> { %1036 = vmatpush.msra.mxu1 %v938_v53 }
 0x150   : >> { %1037 = vmatmul.f32.vlgmr.msra.gmra.mxu1 %v960_v55 }
 0x1ad   : >> { %v978_v11 = vpop.f32.mrf.mxu1 }
 0x1bc   : >> { %v998_v5 = vpop.f32.mrf.mxu2 }
 0x1bd   : >> { %v999_v16 = vadd.f32 %v998_v5, %v978_v11 }
 0x1c8   : >> { %v1018_v7 = vpop.f32.mrf.mxu3 }
 0x1c9   : >> { %v1019_v58 = vadd.f32 %v1018_v7, %v999_v16 }
 0x1cd   : >> { %v1038_v44 = vpop.f32.mrf.mxu1 }
 0x1ce   : >> { %v1039_v14 = vadd.f32 %v1038_v44, %v1019_v58  ;;  %283 = sbr.rel (!%p281_p5) target bundleno = 14 (0xe), region = 87 }
 0x1d0   : >> { %v1041_v59 = vadd.f32 %v1281_v0, %v1039_v14  }
 0x1d2   : >> { %v1806_v0 = vmov %v1041_v59 }
 0x1d3   : > { %v1043_v0 = vld [vmem:[%s1802_s4 + $0x8] sm:$0xff] }
 0x1d4   : > { %1068 = vmatpush.msra.mxu0 %v1043_v0 }
 0x1d6   : > { %1069 = vmatpush.msra.mxu0 %v1042_v57 }
 0x1d7   : > { %1220 = vmatmul.msk.f32.vlgmr.msra.gmra.mxu0 %vm360_vm0, %v1041_v59 }
 0x254   : > { %v1071_v63 = vpop.f32.mrf.mxu0 }
 0x255   : > { %v1072_v6 = vadd.f32 %v1261_v33, %v1071_v63 }
 0x257   : > { %v1078_v51 = vsub.f32 %v1072_v6, %v1262_v60 }
 0x259   : > { %1079 = vst [vmem:[%s1338_s8] sm:$0xff] %v1078_v51 }
 0x25a PF: > { %s17_s24 = sadd.s32 1, %s1277_s24  }
 0x25b   : > { %p14_p6 = scmp.ge.s32.totalorder %s17_s24, 4  }
 0x25d   :  { %16 = sbr.rel (!%p14_p6) target bundleno = 1 (0x1), region = 98 }

// kernel: setgan_forward.7
= control target key start
LH: loop header
LB: loop body
LE: loop exit
PB: predicated region body
PF: predicated region fallthrough
CT: control target
= control target key end

     0   :  { %s506_s12 = smov 0   ;;  %s828_s0 = inlined_call_operand.vmem [shape: f32[16,128], index: 0, kind: input, shape index: {}]   ;;  %s829_s1 = inlined_call_operand.vmem [shape: f32[128,768], index: 1, kind: input, shape index: {}]   ;;  %s830_s2 = inlined_call_operand.vmem [shape: f32[1,768], index: 2, kind: input, shape index: {}]   ;;  %s831_s3 = inlined_call_operand.vmem [shape: f32[16,768], index: 3, kind: output, shape index: {}]  }
   0x1 LB: > { %s460_s13 = sadd.s32 4294967295, %s484_s12   ;;  %p464_p0 = scmp.ge.s32.totalorder %s484_s12, 1  ;;  %s484_s12 = sphi %s506_s12, %s13_s12  }
   0x2   : > { %p136_p1 = scmp.lt.s32.totalorder %s484_s12, 3 }
   0x4   : > { %p137_p2 = pnand %p464_p0, %p136_p1 }
   0x5   : > { %p654_p3 = scmp.lt.s32.totalorder (!%p137_p2), %s460_s13, 1 }
   0x6   : > { %140 = sbr.rel (%p137_p2) target bundleno = 205 (0xcd), region = 32 }
   0xb   : > { %v259_v0 = vld [vmem:[%s829_s1 + $0x2d0] sm:$0xff]  ;;  %v260_v1 = vld [vmem:[%s829_s1 + $0x2d8] sm:$0xff]  ;;  %v253_v2 = vld [vmem:[%s829_s1 + $0x2a0] sm:$0xff]  ;;  %s834_s13 = smov (!%p654_p3, %s460_s13), 1 }
   0xc   : > { %279 = vmatpush.msra.mxu0 %v259_v0  ;;  %299 = vmatpush.msra.mxu1 %v260_v1  ;;  %v254_v3 = vld [vmem:[%s829_s1 + $0x2a8] sm:$0xff]  ;;  %v247_v4 = vld [vmem:[%s829_s1 + $0x270] sm:$0xff]  ;;  %v248_v5 = vld [vmem:[%s829_s1 + $0x278] sm:$0xff]  ;;  %s465_s14 = sshll.u32 %s834_s13, 3  ;;  %s469_s11 = smul.u32 48, %s834_s13 }
   0xd   : > { %v241_v6 = vld [vmem:[%s829_s1 + $0x240] sm:$0xff]  ;;  %v242_v7 = vld [vmem:[%s829_s1 + $0x248] sm:$0xff]  ;;  %v235_v8 = vld [vmem:[%s829_s1 + $0x210] sm:$0xff]  ;;  %s162_s29 = scalar_lea.vmem %s828_s0, %s465_s14 }
   0xe   : > { %280 = vmatpush.msra.mxu0 %v253_v2  ;;  %300 = vmatpush.msra.mxu1 %v254_v3  ;;  %v236_v9 = vld [vmem:[%s829_s1 + $0x218] sm:$0xff]  ;;  %v229_v10 = vld [vmem:[%s829_s1 + $0x1e0] sm:$0xff]  ;;  %v230_v11 = vld [vmem:[%s829_s1 + $0x1e8] sm:$0xff]  ;;  %s167_s16 = scalar_lea.vmem %s831_s3, %s469_s11 }
   0xf   : > { %v261_v12 = vld [vmem:[%s829_s1 + $0x2e0] sm:$0xff]  ;;  %v223_v13 = vld [vmem:[%s829_s1 + $0x1b0] sm:$0xff]  ;;  %v262_v14 = vld [vmem:[%s829_s1 + $0x2e8] sm:$0xff] }
  0x10   : > { %281 = vmatpush.msra.mxu0 %v247_v4  ;;  %301 = vmatpush.msra.mxu1 %v248_v5  ;;  %v224_v15 = vld [vmem:[%s829_s1 + $0x1b8] sm:$0xff]  ;;  %v255_v16 = vld [vmem:[%s829_s1 + $0x2b0] sm:$0xff]  ;;  %v249_v18 = vld [vmem:[%s829_s1 + $0x280] sm:$0xff] }
  0x11   : > { %319 = vmatpush.msra.mxu2 %v261_v12  ;;  %339 = vmatpush.msra.mxu3 %v262_v14  ;;  %v256_v17 = vld [vmem:[%s829_s1 + $0x2b8] sm:$0xff]  ;;  %v250_v19 = vld [vmem:[%s829_s1 + $0x288] sm:$0xff]  ;;  %v217_v20 = vld [vmem:[%s829_s1 + $0x180] sm:$0xff] }
  0x12   : > { %282 = vmatpush.msra.mxu0 %v241_v6  ;;  %302 = vmatpush.msra.mxu1 %v242_v7  ;;  %v218_v21 = vld [vmem:[%s829_s1 + $0x188] sm:$0xff]  ;;  %v243_v22 = vld [vmem:[%s829_s1 + $0x250] sm:$0xff]  ;;  %v244_v23 = vld [vmem:[%s829_s1 + $0x258] sm:$0xff] }
  0x13   : > { %320 = vmatpush.msra.mxu2 %v255_v16  ;;  %340 = vmatpush.msra.mxu3 %v256_v17  ;;  %v211_v24 = vld [vmem:[%s829_s1 + $0x150] sm:$0xff]  ;;  %v212_v25 = vld [vmem:[%s829_s1 + $0x158] sm:$0xff]  ;;  %v237_v26 = vld [vmem:[%s829_s1 + $0x220] sm:$0xff] }
  0x14   : > { %283 = vmatpush.msra.mxu0 %v235_v8  ;;  %303 = vmatpush.msra.mxu1 %v236_v9  ;;  %v238_v27 = vld [vmem:[%s829_s1 + $0x228] sm:$0xff]  ;;  %v205_v28 = vld [vmem:[%s829_s1 + $0x120] sm:$0xff]  ;;  %v231_v30 = vld [vmem:[%s829_s1 + $0x1f0] sm:$0xff] }
  0x15   : > { %321 = vmatpush.msra.mxu2 %v249_v18  ;;  %341 = vmatpush.msra.mxu3 %v250_v19  ;;  %v206_v29 = vld [vmem:[%s829_s1 + $0x128] sm:$0xff]  ;;  %v232_v31 = vld [vmem:[%s829_s1 + $0x1f8] sm:$0xff]  ;;  %v199_v32 = vld [vmem:[%s829_s1 + $0xf0] sm:$0xff] }
  0x16   : > { %284 = vmatpush.msra.mxu0 %v229_v10  ;;  %304 = vmatpush.msra.mxu1 %v230_v11  ;;  %v200_v33 = vld [vmem:[%s829_s1 + $0xf8] sm:$0xff]  ;;  %v225_v34 = vld [vmem:[%s829_s1 + $0x1c0] sm:$0xff]  ;;  %v226_v35 = vld [vmem:[%s829_s1 + $0x1c8] sm:$0xff] }
  0x17   : > { %322 = vmatpush.msra.mxu2 %v243_v22  ;;  %342 = vmatpush.msra.mxu3 %v244_v23  ;;  %v193_v36 = vld [vmem:[%s829_s1 + $0xc0] sm:$0xff]  ;;  %v194_v37 = vld [vmem:[%s829_s1 + $0xc8] sm:$0xff]  ;;  %v219_v38 = vld [vmem:[%s829_s1 + $0x190] sm:$0xff] }
  0x18   : > { %285 = vmatpush.msra.mxu0 %v223_v13  ;;  %305 = vmatpush.msra.mxu1 %v224_v15  ;;  %v220_v39 = vld [vmem:[%s829_s1 + $0x198] sm:$0xff]  ;;  %v187_v40 = vld [vmem:[%s829_s1 + $0x90] sm:$0xff]  ;;  %v213_v42 = vld [vmem:[%s829_s1 + $0x160] sm:$0xff] }
  0x19   : > { %323 = vmatpush.msra.mxu2 %v237_v26  ;;  %343 = vmatpush.msra.mxu3 %v238_v27  ;;  %v188_v41 = vld [vmem:[%s829_s1 + $0x98] sm:$0xff]  ;;  %v214_v43 = vld [vmem:[%s829_s1 + $0x168] sm:$0xff]  ;;  %v181_v44 = vld [vmem:[%s829_s1 + $0x60] sm:$0xff] }
  0x1a   : > { %286 = vmatpush.msra.mxu0 %v217_v20  ;;  %306 = vmatpush.msra.mxu1 %v218_v21  ;;  %v182_v45 = vld [vmem:[%s829_s1 + $0x68] sm:$0xff]  ;;  %v207_v46 = vld [vmem:[%s829_s1 + $0x130] sm:$0xff]  ;;  %v208_v47 = vld [vmem:[%s829_s1 + $0x138] sm:$0xff] }
  0x1b   : > { %324 = vmatpush.msra.mxu2 %v231_v30  ;;  %344 = vmatpush.msra.mxu3 %v232_v31  ;;  %v175_v48 = vld [vmem:[%s829_s1 + $0x30] sm:$0xff]  ;;  %v176_v49 = vld [vmem:[%s829_s1 + $0x38] sm:$0xff]  ;;  %v201_v50 = vld [vmem:[%s829_s1 + $0x100] sm:$0xff] }
  0x1c   : > { %287 = vmatpush.msra.mxu0 %v211_v24  ;;  %307 = vmatpush.msra.mxu1 %v212_v25  ;;  %v202_v51 = vld [vmem:[%s829_s1 + $0x108] sm:$0xff]  ;;  %v169_v52 = vld [vmem:[%s829_s1] sm:$0xff]  ;;  %v263_v54 = vld [vmem:[%s829_s1 + $0x2f0] sm:$0xff] }
  0x1d   : > { %325 = vmatpush.msra.mxu2 %v225_v34  ;;  %345 = vmatpush.msra.mxu3 %v226_v35  ;;  %v170_v53 = vld [vmem:[%s829_s1 + $0x8] sm:$0xff]  ;;  %v264_v55 = vld [vmem:[%s829_s1 + $0x2f8] sm:$0xff]  ;;  %v195_v56 = vld [vmem:[%s829_s1 + $0xd0] sm:$0xff] }
  0x1e   : > { %288 = vmatpush.msra.mxu0 %v205_v28  ;;  %308 = vmatpush.msra.mxu1 %v206_v29  ;;  %v196_v57 = vld [vmem:[%s829_s1 + $0xd8] sm:$0xff]  ;;  %v257_v58 = vld [vmem:[%s829_s1 + $0x2c0] sm:$0xff]  ;;  %v258_v59 = vld [vmem:[%s829_s1 + $0x2c8] sm:$0xff] }
  0x1f   : > { %326 = vmatpush.msra.mxu2 %v219_v38  ;;  %346 = vmatpush.msra.mxu3 %v220_v39  ;;  %v189_v60 = vld [vmem:[%s829_s1 + $0xa0] sm:$0xff]  ;;  %v190_v61 = vld [vmem:[%s829_s1 + $0xa8] sm:$0xff]  ;;  %v251_v62 = vld [vmem:[%s829_s1 + $0x290] sm:$0xff] }
  0x20   : > { %289 = vmatpush.msra.mxu0 %v199_v32  ;;  %309 = vmatpush.msra.mxu1 %v200_v33  ;;  %v252_v63 = vld [vmem:[%s829_s1 + $0x298] sm:$0xff]  ;;  %v183_v0 = vld [vmem:[%s829_s1 + $0x70] sm:$0xff]  ;;  %v245_v2 = vld [vmem:[%s829_s1 + $0x260] sm:$0xff] }
  0x21   : > { %327 = vmatpush.msra.mxu2 %v213_v42  ;;  %347 = vmatpush.msra.mxu3 %v214_v43  ;;  %v184_v1 = vld [vmem:[%s829_s1 + $0x78] sm:$0xff]  ;;  %v246_v3 = vld [vmem:[%s829_s1 + $0x268] sm:$0xff]  ;;  %v177_v4 = vld [vmem:[%s829_s1 + $0x40] sm:$0xff] }
  0x22   : > { %290 = vmatpush.msra.mxu0 %v193_v36  ;;  %310 = vmatpush.msra.mxu1 %v194_v37  ;;  %v178_v5 = vld [vmem:[%s829_s1 + $0x48] sm:$0xff]  ;;  %v239_v6 = vld [vmem:[%s829_s1 + $0x230] sm:$0xff]  ;;  %v240_v7 = vld [vmem:[%s829_s1 + $0x238] sm:$0xff] }
  0x23   : > { %328 = vmatpush.msra.mxu2 %v207_v46  ;;  %348 = vmatpush.msra.mxu3 %v208_v47  ;;  %v168_v8 = vld [vmem:[%s162_s29] sm:$0xff]  ;;  %v234_v10 = vld [vmem:[%s829_s1 + $0x208] sm:$0xff]  ;;  %v171_v11 = vld [vmem:[%s829_s1 + $0x10] sm:$0xff] }
  0x24   : > { %291 = vmatpush.msra.mxu0 %v187_v40  ;;  %311 = vmatpush.msra.mxu1 %v188_v41  ;;  %v233_v9 = vld [vmem:[%s829_s1 + $0x200] sm:$0xff]  ;;  %v172_v12 = vld [vmem:[%s829_s1 + $0x18] sm:$0xff]  ;;  %v227_v13 = vld [vmem:[%s829_s1 + $0x1d0] sm:$0xff] }
  0x25   : > { %329 = vmatpush.msra.mxu2 %v201_v50  ;;  %349 = vmatpush.msra.mxu3 %v202_v51  ;;  %v228_v14 = vld [vmem:[%s829_s1 + $0x1d8] sm:$0xff]  ;;  %v221_v15 = vld [vmem:[%s829_s1 + $0x1a0] sm:$0xff]  ;;  %v222_v16 = vld [vmem:[%s829_s1 + $0x1a8] sm:$0xff] }
  0x26   : > { %292 = vmatpush.msra.mxu0 %v181_v44  ;;  %312 = vmatpush.msra.mxu1 %v182_v45  ;;  %v215_v17 = vld [vmem:[%s829_s1 + $0x170] sm:$0xff]  ;;  %v216_v18 = vld [vmem:[%s829_s1 + $0x178] sm:$0xff]  ;;  %v209_v19 = vld [vmem:[%s829_s1 + $0x140] sm:$0xff] }
  0x27   : > { %330 = vmatpush.msra.mxu2 %v195_v56  ;;  %350 = vmatpush.msra.mxu3 %v196_v57  ;;  %v210_v20 = vld [vmem:[%s829_s1 + $0x148] sm:$0xff]  ;;  %v203_v21 = vld [vmem:[%s829_s1 + $0x110] sm:$0xff]  ;;  %v204_v22 = vld [vmem:[%s829_s1 + $0x118] sm:$0xff] }
  0x28   : > { %293 = vmatpush.msra.mxu0 %v175_v48  ;;  %313 = vmatpush.msra.mxu1 %v176_v49  ;;  %v197_v23 = vld [vmem:[%s829_s1 + $0xe0] sm:$0xff]  ;;  %v198_v24 = vld [vmem:[%s829_s1 + $0xe8] sm:$0xff]  ;;  %v191_v25 = vld [vmem:[%s829_s1 + $0xb0] sm:$0xff] }
  0x29   : > { %331 = vmatpush.msra.mxu2 %v189_v60  ;;  %351 = vmatpush.msra.mxu3 %v190_v61  ;;  %v192_v26 = vld [vmem:[%s829_s1 + $0xb8] sm:$0xff]  ;;  %v185_v27 = vld [vmem:[%s829_s1 + $0x80] sm:$0xff]  ;;  %v186_v28 = vld [vmem:[%s829_s1 + $0x88] sm:$0xff] }
  0x2a   : > { %294 = vmatpush.msra.mxu0 %v169_v52  ;;  %314 = vmatpush.msra.mxu1 %v170_v53  ;;  %v179_v29 = vld [vmem:[%s829_s1 + $0x50] sm:$0xff]  ;;  %v180_v30 = vld [vmem:[%s829_s1 + $0x58] sm:$0xff]  ;;  %v173_v31 = vld [vmem:[%s829_s1 + $0x20] sm:$0xff] }
  0x2b   : > { %332 = vmatpush.msra.mxu2 %v183_v0  ;;  %352 = vmatpush.msra.mxu3 %v184_v1  ;;  %v174_v32 = vld [vmem:[%s829_s1 + $0x28] sm:$0xff]  ;;  %v265_v33 = vld [vmem:[%s830_s2] sm:$0x3f] }
  0x2c   : > { %359 = vmatpush.msrb.mxu0 %v263_v54  ;;  %379 = vmatpush.msrb.mxu1 %v264_v55  ;;  %v267_v34 = vperm.slane %v265_v33, 0  ;;  %v268_v35 = vperm.slane %v265_v33, 1  ;;  %v269_v40 = vperm.slane %v265_v33, 2  ;;  %v270_v41 = vperm.slane %v265_v33, 3 }
  0x2d   : > { %333 = vmatpush.msra.mxu2 %v177_v4  ;;  %353 = vmatpush.msra.mxu3 %v178_v5  ;;  %v271_v46 = vperm.slane %v265_v33, 4  ;;  %v272_v47 = vperm.slane %v265_v33, 5 }
  0x2e   : > { %360 = vmatpush.msrb.mxu0 %v257_v58  ;;  %380 = vmatpush.msrb.mxu1 %v258_v59 }
  0x2f   : > { %295 = vmatmul.f32.vlgmr.msra.gmra.mxu0 %v168_v8  ;;  %315 = vmatmul.f32.vlgmr.msra.gmra.mxu1 %v168_v8 }
  0x30   : > { %361 = vmatpush.msrb.mxu0 %v251_v62  ;;  %381 = vmatpush.msrb.mxu1 %v252_v63 }
  0x31   : > { %334 = vmatpush.msra.mxu2 %v171_v11  ;;  %354 = vmatpush.msra.mxu3 %v172_v12 }
  0x32   : > { %362 = vmatpush.msrb.mxu0 %v245_v2  ;;  %382 = vmatpush.msrb.mxu1 %v246_v3 }
  0x33   : > { %335 = vmatmul.f32.vlgmr.msra.gmra.mxu2 %v168_v8  ;;  %355 = vmatmul.f32.vlgmr.msra.gmra.mxu3 %v168_v8 }
  0x34   : > { %363 = vmatpush.msrb.mxu0 %v239_v6  ;;  %383 = vmatpush.msrb.mxu1 %v240_v7 }
  0x36   : > { %364 = vmatpush.msrb.mxu0 %v233_v9  ;;  %384 = vmatpush.msrb.mxu1 %v234_v10 }
  0x38   : > { %365 = vmatpush.msrb.mxu0 %v227_v13  ;;  %385 = vmatpush.msrb.mxu1 %v228_v14 }
  0x3a   : > { %366 = vmatpush.msrb.mxu0 %v221_v15  ;;  %386 = vmatpush.msrb.mxu1 %v222_v16 }
  0x3c   : > { %367 = vmatpush.msrb.mxu0 %v215_v17  ;;  %387 = vmatpush.msrb.mxu1 %v216_v18 }
  0x3e   : > { %368 = vmatpush.msrb.mxu0 %v209_v19  ;;  %388 = vmatpush.msrb.mxu1 %v210_v20 }
  0x40   : > { %369 = vmatpush.msrb.mxu0 %v203_v21  ;;  %389 = vmatpush.msrb.mxu1 %v204_v22 }
  0x42   : > { %370 = vmatpush.msrb.mxu0 %v197_v23  ;;  %390 = vmatpush.msrb.mxu1 %v198_v24 }
  0x44   : > { %371 = vmatpush.msrb.mxu0 %v191_v25  ;;  %391 = vmatpush.msrb.mxu1 %v192_v26 }
  0x46   : > { %372 = vmatpush.msrb.mxu0 %v185_v27  ;;  %392 = vmatpush.msrb.mxu1 %v186_v28 }
  0x48   : > { %373 = vmatpush.msrb.mxu0 %v179_v29  ;;  %393 = vmatpush.msrb.mxu1 %v180_v30 }
  0x4a   : > { %374 = vmatpush.msrb.mxu0 %v173_v31  ;;  %394 = vmatpush.msrb.mxu1 %v174_v32 }
  0x4b   : > { %375 = vmatmul.f32.vlgmr.msrb.gmra.mxu0 %v168_v8  ;;  %395 = vmatmul.f32.vlgmr.msrb.gmra.mxu1 %v168_v8 }
  0xac   : > { %v296_v36 = vpop.f32.mrf.mxu0  ;;  %v316_v37 = vpop.f32.mrf.mxu1 }
  0xad   : > { %v297_v38 = vadd.f32 %v296_v36, %v267_v34  ;;  %v317_v39 = vadd.f32 %v316_v37, %v268_v35 }
  0xaf   : > { %399 = vst [vmem:[%s167_s16] sm:$0xff] %v297_v38 }
  0xb0   : > { %400 = vst [vmem:[%s167_s16 + $0x8] sm:$0xff] %v317_v39 }
  0xb6   : > { %v336_v42 = vpop.f32.mrf.mxu2  ;;  %v356_v43 = vpop.f32.mrf.mxu3 }
  0xb7   : > { %v337_v44 = vadd.f32 %v336_v42, %v269_v40  ;;  %v357_v45 = vadd.f32 %v356_v43, %v270_v41 }
  0xb9   : > { %401 = vst [vmem:[%s167_s16 + $0x10] sm:$0xff] %v337_v44 }
  0xba   : > { %402 = vst [vmem:[%s167_s16 + $0x18] sm:$0xff] %v357_v45 }
  0xc8   : > { %v376_v48 = vpop.f32.mrf.mxu0  ;;  %v396_v49 = vpop.f32.mrf.mxu1 }
  0xc9   : > { %v377_v50 = vadd.f32 %v376_v48, %v271_v46  ;;  %v397_v51 = vadd.f32 %v396_v49, %v272_v47 }
  0xcb   : > { %403 = vst [vmem:[%s167_s16 + $0x20] sm:$0xff] %v377_v50 }
  0xcc   : > { %404 = vst [vmem:[%s167_s16 + $0x28] sm:$0xff] %v397_v51 }
  0xcd PF: > { %s13_s12 = sadd.s32 1, %s484_s12  }
  0xce   : > { %p10_p4 = scmp.ge.s32.totalorder %s13_s12, 4  }
  0xd0   :  { %12 = sbr.rel (!%p10_p4) target bundleno = 1 (0x1), region = 62 }

// kernel: setgan_forward.6
= control target key start
LH: loop header
LB: loop body
LE: loop exit
PB: predicated region body
PF: predicated region fallthrough
CT: control target
= control target key end

     0   :  { %s5689_s24 = smov 0   ;;  %s6922_s0 = inlined_call_operand.vmem [shape: f32[16,32], index: 0, kind: input, shape index: {}]   ;;  %s6923_s1 = inlined_call_operand.vmem [shape: f32[4,16,32], index: 1, kind: input, shape index: {}]   ;;  %s6924_s2 = inlined_call_operand.vmem [shape: f32[4,2,32,96], index: 2, kind: input, shape index: {}]   ;;  %s6925_s3 = inlined_call_operand.vmem [shape: f32[4,2,4,8,32], index: 3, kind: input, shape index: {}]   ;;  %s6926_s4 = inlined_call_operand.vmem [shape: f32[4,2,32,32], index: 4, kind: input, shape index: {}]   ;;  %s6927_s5 = inlined_call_operand.vmem [shape: f32[4,2,32,64], index: 5, kind: input, shape index: {}]   ;;  %s6928_s6 = inlined_call_operand.vmem [shape: f32[4,2,4,8,32], index: 6, kind: input, shape index: {}]   ;;  %s6929_s7 = inlined_call_operand.vmem [shape: f32[4,2,32,64], index: 7, kind: input, shape index: {}]   ;;  %s6930_s8 = inlined_call_operand.vmem [shape: f32[4,2,1,64], index: 8, kind: input, shape index: {}]   ;;  %s6931_s9 = inlined_call_operand.vmem [shape: f32[4,2,64,32], index: 9, kind: input, shape index: {}]   ;;  %s6932_s10 = inlined_call_operand.vmem [shape: f32[4,2,1,32], index: 10, kind: input, shape index: {}]   ;;  %s6933_s11 = inlined_call_operand.vmem [shape: f32[4,2,6,32], index: 11, kind: input, shape index: {}]   ;;  %s6934_s12 = inlined_call_operand.vmem [shape: f32[4,1,1], index: 12, kind: input, shape index: {}]   ;;  %s6935_s13 = inlined_call_operand.vmem [shape: f32[4,32,32], index: 13, kind: input, shape index: {}]   ;;  %s6936_s14 = inlined_call_operand.vmem [shape: f32[4,32,32], index: 14, kind: input, shape index: {}]   ;;  %s6937_s15 = inlined_call_operand.vmem [shape: f32[4,1,32], index: 15, kind: input, shape index: {}]   ;;  %s6938_s16 = inlined_call_operand.vmem [shape: f32[1,32], index: 16, kind: input, shape index: {}]   ;;  %s6939_s17 = inlined_call_operand.vmem [shape: f32[4,16,32], index: 17, kind: output, shape index: {}]  }
   0x1   :  { %6952 = sst [smem:[#allocation3_spill]] %s6922_s0 }
   0x2   :  { %6953 = sst [smem:[#allocation4_spill]] %s6923_s1 }
   0x3   :  { %6954 = sst [smem:[#allocation5_spill]] %s6924_s2 }
   0x4   :  { %6955 = sst [smem:[#allocation6_spill]] %s6925_s3 }
   0x5   :  { %6956 = sst [smem:[#allocation7_spill]] %s6926_s4 }
   0x6   :  { %6957 = sst [smem:[#allocation8_spill]] %s6927_s5 }
   0x7   :  { %6958 = sst [smem:[#allocation9_spill]] %s6928_s6 }
   0x8   :  { %6959 = sst [smem:[#allocation10_spill]] %s6933_s11 }
   0x9   :  { %6960 = sst [smem:[#allocation11_spill]] %s6934_s12 }
   0xa LB: > { %6961 = sst [smem:[#allocation2_spill]] %s5591_s24  ;;  %s5096_s25 = sadd.s32 4294967295, %s5591_s24   ;;  %s5591_s24 = sphi %s5689_s24, %s27_s24  }
   0xb   : > { %p5100_p0 = scmp.ge.s32.totalorder %s5591_s24, 1  ;;  %p621_p1 = scmp.lt.s32.totalorder %s5591_s24, 5 }
   0xd   : > { %p622_p2 = pnand %p5100_p0, %p621_p1 }
   0xe   : > { %p737_p3 = scmp.lt.s32.totalorder (!%p622_p2), %s5096_s25, 3  ;;  %s6962_s2 = sld [smem:[#allocation5_spill]] (!%p622_p2) }
   0xf   : > { %625 = sbr.rel (%p622_p2) target bundleno = 6279 (0x1887), region = 88  ;;  %s6963_s18 = sld [smem:[#allocation3_spill]] (!%p622_p2) }
  0x10   : > { %s6945_s20 = smov (!%p622_p2), 112   ;;  %s6947_s21 = smov (!%p622_p2), 120  }
  0x11   : > { %s6949_s22 = smov (!%p622_p2), 104   ;;  %s6943_s23 = smov (!%p622_p2), 96  }
  0x12   : > { %s6964_s12 = sld [smem:[#allocation11_spill]] (!%p622_p2)  ;;  %s6941_s1 = smov (!%p622_p2), 64  }
  0x13   : > { %s6965_s3 = sld [smem:[#allocation6_spill]] (!%p622_p2) }
  0x14   : > { %s7004_s25 = smov (!%p737_p3, %s5096_s25), 3  ;;  %vm822_vm0 = vcmask 261120   ;;  %vm872_vm1 = vcmask 64512   ;;  %s6970_s5 = sld [smem:[#allocation8_spill]] }
  0x15   : > { %s5700_s26 = sshll.u32 %s7004_s25, 6  ;;  %v5715_v4 = vld [vmem:[%s6963_s18] sm:$0xff]  ;;  %v5722_v5 = vld [vmem:[%s6963_s18 + $0x8] sm:$0xff]  ;;  %s5974_s28 = sshll.u32 %s7004_s25, 4 }
  0x16   : > { %s5706_s29 = scalar_lea.vmem %s6962_s2, %s5700_s26  ;;  %s6972_s4 = sld [smem:[#allocation7_spill]] }
  0x17   : > { %v821_v0 = vld [vmem:[%s5706_s29 + $0x18] sm:$0xff]  ;;  %v820_v1 = vld [vmem:[%s5706_s29 + $0x10] sm:$0xff]  ;;  %v819_v2 = vld [vmem:[%s5706_s29 + $0x8] sm:$0xff]  ;;  %s6975_s11 = sld [smem:[#allocation10_spill]]  ;;  %s5115_s2 = sshll.u32 %s7004_s25, 1 }
  0x18   : > { %841 = vmatpush.msra.mxu0 %v821_v0  ;;  %v818_v3 = vld [vmem:[%s5706_s29] sm:$0xff]  ;;  %s792_s0 = scalar_lea.vmem %s6964_s12, %s7004_s25  ;;  %s6978_s6 = sld [smem:[#allocation9_spill]] }
  0x19   : > { %v815_v9 = vld [vmem:[%s792_s0] sm:$0x1]  ;;  %s5891_s0 = scalar_lea.vmem %s6965_s3, %s5700_s26  ;;  %s6252_s24 = scalar_lea.vmem %s6929_s7, %s5700_s26 }
  0x1a   : > { %842 = vmatpush.msra.mxu0 %v820_v1  ;;  %5328 = vpush %v815_v9  ;;  %s5971_s27 = scalar_lea.vmem %s6970_s5, %s5700_s26  ;;  %s5323_s5 = sshll.u32 %s7004_s25, 7 }
  0x1c   : > { %843 = vmatpush.msra.mxu0 %v819_v2 }
  0x1e   : > { %844 = vmatpush.msra.mxu0 %v818_v3 }
  0x1f   : > { %5127 = vmatmul.msk.f32.vlgmr.msra.gmra.mxu0 %vm822_vm0, %v5715_v4 }
  0x27   : > { %5128 = vmatmul.msk.f32.gmra.mxu0 %vm822_vm0, %v5722_v5 }
  0x4b   : > { %s5329_s30 = spop %5328 }
  0x4c   : > { %s1079_s19 = smul.f32 0.35355338, %s5329_s30  ;;  %s6973_s30 = smov 120  }
  0x4e   : > { %v5798_v23 = vstv %s1079_s19  ;;  %s6974_s19 = smov 112  }
  0x9c   : > { %v5726_v6 = vpop.f32.mrf.mxu0 }
  0x9d   : > { %855 = vrot.lane.b32.xlu1 %v5726_v6, %s6945_s20  ;;  %853 = vrot.lane.b32.xlu0 %v5726_v6, %s6947_s21 }
  0xa4   : > { %v5732_v7 = vpop.f32.mrf.mxu0 }
  0xa5   : > { %857 = vrot.lane.b32.xlu0 %v5726_v6, %s6949_s22  ;;  %860 = vrot.lane.b32.xlu2 %v5732_v7, %s6947_s21 }
  0xa6   : > { %864 = vrot.lane.b32.xlu1 %v5732_v7, %s6949_s22 }
  0xad   : > { %870 = vrot.lane.b32.xlu0 %v5726_v6, %s6943_s23  ;;  %862 = vrot.lane.b32.xlu2 %v5732_v7, %s6945_s20  ;;  %s6971_s20 = sld [smem:[#allocation4_spill]] }
  0xb3   : > { %s5983_s21 = scalar_lea.vmem %s6971_s20, %s5974_s28  ;;  %s6976_s20 = smov 104  }
  0xb5   : > { %975 = vrot.lane.b32.xlu0 %v5732_v7, %s6943_s23 }
  0xff   : > { %v5746_v8 = vpop.permute.xlu2 %860 }
 0x100   : > { %1001 = vrot.lane.b32.xlu0 %v5746_v8, %s6943_s23 }
 0x107   : > { %v5768_v14 = vpop.permute.xlu2 %862 }
 0x10f   : > { %v5754_v10 = vpop.permute.xlu0 %853  ;;  %v5758_v11 = vpop.permute.xlu1 %855 }
 0x110   : > { %897 = vrot.lane.b32.xlu1 %v5754_v10, %s6943_s23 }
 0x117   : > { %v5760_v12 = vpop.permute.xlu0 %857 }
 0x118   : > { %949 = vrot.lane.b32.xlu2 %v5760_v12, %s6943_s23  ;;  %923 = vrot.lane.b32.xlu1 %v5758_v11, %s6943_s23  ;;  %v5766_v13 = vpop.permute.xlu1 %864  ;;  %v5344_v53 = vpack.i.bf16 %v5760_v12, %v5726_v6 }
 0x11f   : > { %v871_v15 = vpop.permute.xlu0 %870 }
 0x120   : > { %5129 = vmatpush.xpose.msk.msra.mxu1 %vm872_vm1, %v871_v15  ;;  %1027 = vrot.lane.b32.xlu1 %v5768_v14, %s6943_s23 }
 0x121   : > { %1053 = vrot.lane.b32.xlu2 %v5766_v13, %s6943_s23  ;;  %s6977_s23 = smov 96  }
 0x123   : > { %5130 = vmatmul.msk.f32.vlgmr.msra.gmra.mxu1 %vm872_vm1, %v5726_v6 }
 0x127   : > { %v976_v17 = vpop.permute.xlu0 %975 }
 0x172   : > { %v950_v16 = vpop.permute.xlu2 %949  ;;  %v1002_v20 = vpop.permute.xlu0 %1001 }
 0x173   : > { %5135 = vmatpush.xpose.msk.msrb.mxu1 %vm872_vm1, %v950_v16 }
 0x176   : > { %5136 = vmatmul.msk.f32.vlgmr.msrb.gmra.mxu1 %vm872_vm1, %v5760_v12 }
 0x17b   : > { %v1054_v19 = vpop.permute.xlu2 %1053 }
 0x182   : > { %v898_v18 = vpop.permute.xlu1 %897 }
 0x183   : > { %5131 = vmatpush.xpose.msk.msra.mxu2 %vm872_vm1, %v898_v18 }
 0x186   : > { %5132 = vmatmul.msk.f32.vlgmr.msra.gmra.mxu2 %vm872_vm1, %v5754_v10 }
 0x187   : > { %5137 = vmatpush.xpose.msk.msrb.mxu2 %vm872_vm1, %v976_v17 }
 0x18a   : > { %v924_v21 = vpop.permute.xlu1 %923 }
 0x18b   : > { %5143 = vmatpush.xpose.msk.msra.mxu2 %vm872_vm1, %v1054_v19  ;;  %5133 = vmatpush.xpose.msk.msra.mxu3 %vm872_vm1, %v924_v21 }
 0x18e   : > { %5134 = vmatmul.msk.f32.vlgmr.msra.gmra.mxu3 %vm872_vm1, %v5758_v11  ;;  %5138 = vmatmul.msk.f32.vlgmr.msrb.gmra.mxu2 %vm872_vm1, %v5732_v7 }
 0x18f   : > { %5139 = vmatpush.xpose.msk.msrb.mxu3 %vm872_vm1, %v1002_v20 }
 0x192   : > { %v1028_v22 = vpop.permute.xlu1 %1027 }
 0x193   : > { %5141 = vmatpush.xpose.msk.msra.mxu1 %vm872_vm1, %v1028_v22 }
 0x196   : > { %5140 = vmatmul.msk.f32.vlgmr.msrb.gmra.mxu3 %vm872_vm1, %v5746_v8  ;;  %5142 = vmatmul.msk.f32.vlgmr.msra.gmra.mxu1 %vm872_vm1, %v5768_v14 }
 0x197   : > { %5144 = vmatmul.msk.f32.vlgmr.msra.gmra.mxu2 %vm872_vm1, %v5766_v13 }
 0x1a0   : > { %v894_v24 = vpop.f32.mrf.mxu1 }
 0x1a1   : > { %v1081_v25 = vmul.f32 %v5798_v23, %v894_v24 }
 0x1a3   : > { %v1089_v26 = vsel %vm872_vm1, %v1081_v25, -inf }
 0x1a4   : > { %1090 = vmax.xlane.f32.xlu2 %v1089_v26 }
 0x1f3   : > { %v972_v27 = vpop.f32.mrf.mxu1 }
 0x1f4   : > { %v1084_v28 = vmul.f32 %v5798_v23, %v972_v27 }
 0x1f6   : > { %v1098_v29 = vsel %vm872_vm1, %v1084_v28, -inf }
 0x1f7   : > { %1099 = vmax.xlane.f32.xlu0 %v1098_v29 }
 0x209   : > { %v920_v30 = vpop.f32.mrf.mxu2 }
 0x20a   : > { %v1082_v31 = vmul.f32 %v5798_v23, %v920_v30 }
 0x20c   : > { %v1092_v32 = vsel %vm872_vm1, %v1082_v31, -inf }
 0x20d   : > { %1093 = vmax.xlane.f32.xlu1 %v1092_v32 }
 0x211   : > { %v946_v33 = vpop.f32.mrf.mxu3  ;;  %v998_v34 = vpop.f32.mrf.mxu2 }
 0x212   : > { %v1083_v35 = vmul.f32 %v5798_v23, %v946_v33  ;;  %v1085_v49 = vmul.f32 %v5798_v23, %v998_v34 }
 0x213   : > { %v1050_v37 = vpop.f32.mrf.mxu1 }
 0x214   : > { %v1095_v36 = vsel %vm872_vm1, %v1083_v35, -inf  ;;  %v1087_v39 = vmul.f32 %v5798_v23, %v1050_v37  ;;  %v1101_v52 = vsel %vm872_vm1, %v1085_v49, -inf }
 0x215   : > { %1096 = vmax.xlane.f32.xlu2 %v1095_v36 }
 0x216   : > { %v1107_v47 = vsel %vm872_vm1, %v1087_v39, -inf }
 0x217   : > { %v1091_v38 = vpop.xlane.xlu2 %1090 }
 0x218   : > { %v1113_v40 = vsub.f32 %v1081_v25, %v1091_v38 }
 0x219   : > { %v1024_v41 = vpop.f32.mrf.mxu3 }
 0x21a   : > { %v1121_v42 = vmul.f32 1.442695, %v1113_v40  ;;  %v1086_v43 = vmul.f32 %v5798_v23, %v1024_v41  ;;  %v1076_v44 = vpop.f32.mrf.mxu2 }
 0x21b   : > { %v1088_v45 = vmul.f32 %v5798_v23, %v1076_v44 }
 0x21c   : > { %5425 = vpow2.f32 %v1121_v42  ;;  %v1104_v46 = vsel %vm872_vm1, %v1086_v43, -inf }
 0x21d   : > { %v1110_v48 = vsel %vm872_vm1, %v1088_v45, -inf  ;;  %1105 = vmax.xlane.f32.xlu1 %v1104_v46  ;;  %1108 = vmax.xlane.f32.xlu2 %v1107_v47 }
 0x21e   : > { %1111 = vmax.xlane.f32.xlu0 %v1110_v48  ;;  %v5354_v48 = vpack.i.bf16 %v5768_v14, %v5746_v8 }
 0x222   : > { %v5815_v50 = vpop.eup %5425 }
 0x223   : > { %v1137_v51 = vsel %vm872_vm1, %v5815_v50, 0.0 }
 0x225   : > { %1102 = vmax.xlane.f32.xlu2 %v1101_v52 }
 0x226   : > { %1138 = vadd.xlane.f32.xlu0 %v1137_v51 }
 0x23d   : > { %5345 = vrot.lane.b32.xlu2 %v5344_v53, %s6941_s1 }
 0x26a   : > { %v1100_v54 = vpop.xlane.xlu0 %1099 }
 0x26b   : > { %v1116_v55 = vsub.f32 %v1084_v28, %v1100_v54 }
 0x26d   : > { %v1127_v56 = vmul.f32 1.442695, %v1116_v55 }
 0x26f   : > { %5427 = vpow2.f32 %v1127_v56 }
 0x275   : > { %v5823_v57 = vpop.eup %5427 }
 0x276   : > { %v1146_v58 = vsel %vm872_vm1, %v5823_v57, 0.0 }
 0x277   : > { %1147 = vadd.xlane.f32.xlu1 %v1146_v58 }
 0x280   : > { %v1094_v59 = vpop.xlane.xlu1 %1093 }
 0x281   : > { %v1114_v60 = vsub.f32 %v1082_v31, %v1094_v59 }
 0x283   : > { %v1123_v61 = vmul.f32 1.442695, %v1114_v60 }
 0x285   : > { %5429 = vpow2.f32 %v1123_v61 }
 0x288   : > { %v1097_v62 = vpop.xlane.xlu2 %1096 }
 0x289   : > { %v1115_v63 = vsub.f32 %v1083_v35, %v1097_v62 }
 0x28b   : > { %v5827_v0 = vpop.eup %5429  ;;  %v1125_v1 = vmul.f32 1.442695, %v1115_v63 }
 0x28c   : > { %v1140_v2 = vsel %vm872_vm1, %v5827_v0, 0.0 }
 0x28d   : > { %5431 = vpow2.f32 %v1125_v1  ;;  %1141 = vadd.xlane.f32.xlu2 %v1140_v2 }
 0x290   : > { %v1109_v3 = vpop.xlane.xlu2 %1108  ;;  %v1106_v19 = vpop.xlane.xlu1 %1105 }
 0x291   : > { %v1112_v6 = vpop.xlane.xlu0 %1111  ;;  %v1119_v9 = vsub.f32 %v1087_v39, %v1109_v3  ;;  %v1118_v25 = vsub.f32 %v1086_v43, %v1106_v19 }
 0x292   : > { %v1120_v15 = vsub.f32 %v1088_v45, %v1112_v6 }
 0x293   : > { %v5831_v12 = vpop.eup %5431  ;;  %v1133_v16 = vmul.f32 1.442695, %v1119_v9  ;;  %v1131_v28 = vmul.f32 1.442695, %v1118_v25 }
 0x294   : > { %v1143_v17 = vsel %vm872_vm1, %v5831_v12, 0.0  ;;  %v1135_v18 = vmul.f32 1.442695, %v1120_v15 }
 0x295   : > { %5433 = vpow2.f32 %v1133_v16  ;;  %1144 = vadd.xlane.f32.xlu0 %v1143_v17 }
 0x298   : > { %v1103_v20 = vpop.xlane.xlu2 %1102 }
 0x299   : > { %v1139_v21 = vpop.xlane.xlu0 %1138  ;;  %v1117_v22 = vsub.f32 %v1085_v49, %v1103_v20 }
 0x29a   : > { %5435 = vrcp.f32 %v1139_v21  ;;  %v1172_v37 = vand.u32 2147483648, %v1139_v21  ;;  %v1170_v41 = vand.u32 2147483647, %v1139_v21  ;;  %vm1166_vm3 = vweird.f32 %v1139_v21 }
 0x29b   : > { %v5835_v24 = vpop.eup %5433  ;;  %5437 = vpow2.f32 %v1135_v18  ;;  %v1129_v26 = vmul.f32 1.442695, %v1117_v22 }
 0x29c   : > { %v1155_v27 = vsel %vm872_vm1, %v5835_v24, 0.0  ;;  %v1173_v43 = vor.u32 1.1754944e-38, %v1172_v37  ;;  %vm1171_vm5 = vcmp.eq.f32.partialorder %v1170_v41, 8.507059e+37 }
 0x29d   : > { %5439 = vpow2.f32 %v1129_v26  ;;  %1156 = vadd.xlane.f32.xlu0 %v1155_v27 }
 0x29e   : > { %5441 = vpow2.f32 %v1131_v28 }
 0x2a0   : > { %v5436_v29 = vpop.eup %5435  ;;  %v5346_v30 = vpop.permute.xlu2 %5345 }
 0x2a1   : > { %v5839_v31 = vpop.eup %5437  ;;  %v1162_v32 = vmul.f32 %v5436_v29, %v1139_v21  ;;  %v5348_v33 = vunpack.i.h.bf16 %v5346_v30  ;;  %v5347_v34 = vunpack.i.l.bf16 %v5346_v30  ;;  %vm1167_vm2 = vweird.f32 %v5436_v29 }
 0x2a2   : > { %v1158_v38 = vsel %vm872_vm1, %v5839_v31, 0.0  ;;  %vm1168_vm4 = vmor %vm1166_vm3, %vm1167_vm2 }
 0x2a3   : > { %v5841_v35 = vpop.eup %5439  ;;  %v1163_v36 = vsub.f32 1.0, %v1162_v32  ;;  %1302 = vmatpush.msra.mxu3 %v5347_v34  ;;  %1380 = vmatpush.msrb.mxu2 %v5348_v33 }
 0x2a4   : > { %v1149_v39 = vsel %vm872_vm1, %v5841_v35, 0.0  ;;  %v5849_v44 = vpop.eup %5441 }
 0x2a5   : > { %v1164_v40 = vmul.f32 %v5436_v29, %v1163_v36  ;;  %1159 = vadd.xlane.f32.xlu0 %v1158_v38  ;;  %1150 = vadd.xlane.f32.xlu1 %v1149_v39  ;;  %v1152_v49 = vsel %vm872_vm1, %v5849_v44, 0.0 }
 0x2a6   : > { %1463 = vrot.lane.b32.xlu2 %v5766_v13, %s6941_s1  ;;  %v5349_v13 = vpack.i.bf16 %v5758_v11, %v5754_v10 }
 0x2a7   : > { %v1165_v42 = vadd.f32 %v5436_v29, %v1164_v40 }
 0x2a9   : > { %v1169_v45 = vsel %vm1168_vm4, %v5436_v29, %v1165_v42 }
 0x2aa   : > { %v1174_v46 = vsel %vm1171_vm5, %v1173_v43, %v1169_v45 }
 0x2ab   : > { %v1175_v47 = vmul.f32 %v5815_v50, %v1174_v46 }
 0x2ad   : > { %5145 = vmatmul.msk.f32.vlgmr.msra.gmra.mxu3 %vm872_vm1, %v1175_v47  ;;  %1153 = vadd.xlane.f32.xlu1 %v1152_v49  ;;  %v866_v47 = vld [vmem:[%s5891_s0] sm:$0xff] }
 0x2ae   : > { %5355 = vrot.lane.b32.xlu2 %v5354_v48, %s6941_s1 }
 0x2b9   : > { %1385 = vrot.lane.b32.xlu0 %v5732_v7, %s6941_s1 }
 0x2c6   : > { %5350 = vrot.lane.b32.xlu1 %v5349_v13, %s6941_s1  ;;  %s5998_s1 = scalar_lea.vmem %s6972_s4, %s5700_s26  ;;  %s6205_s4 = scalar_lea.vmem %s6978_s6, %s5700_s26 }
 0x2c7   : > { %s6246_s6 = scalar_lea.vmem %s6930_s8, %s5115_s2  ;;  %s6263_s26 = scalar_lea.vmem %s6931_s9, %s5323_s5 }
 0x2ea   : > { %v1148_v50 = vpop.xlane.xlu1 %1147 }
 0x2eb   : > { %5443 = vrcp.f32 %v1148_v50  ;;  %v1217_v52 = vand.u32 2147483648, %v1148_v50  ;;  %v1215_v54 = vand.u32 2147483647, %v1148_v50  ;;  %vm1211_vm7 = vweird.f32 %v1148_v50 }
 0x2ed   : > { %v1218_v56 = vor.u32 1.1754944e-38, %v1217_v52  ;;  %vm1216_vm9 = vcmp.eq.f32.partialorder %v1215_v54, 8.507059e+37 }
 0x2f1   : > { %v5444_v51 = vpop.eup %5443 }
 0x2f2   : > { %v1207_v8 = vmul.f32 %v5444_v51, %v1148_v50  ;;  %vm1212_vm6 = vweird.f32 %v5444_v51 }
 0x2f3   : > { %vm1213_vm8 = vmor %vm1211_vm7, %vm1212_vm6 }
 0x2f4   : > { %v1208_v14 = vsub.f32 1.0, %v1207_v8 }
 0x2f6   : > { %v1209_v53 = vmul.f32 %v5444_v51, %v1208_v14 }
 0x2f8   : > { %v1210_v55 = vadd.f32 %v5444_v51, %v1209_v53 }
 0x2fa   : > { %v1214_v58 = vsel %vm1213_vm8, %v5444_v51, %v1210_v55 }
 0x2fb   : > { %v1219_v7 = vsel %vm1216_vm9, %v1218_v56, %v1214_v58 }
 0x2fc   : > { %v1220_v10 = vmul.f32 %v5823_v57, %v1219_v7 }
 0x2fe   : > { %5148 = vmatmul.msk.f32.vlgmr.msrb.gmra.mxu2 %vm872_vm1, %v1220_v10 }
 0x300   : > { %v5865_v11 = vpop.xlane.xlu2 %1141 }
 0x301   : > { %5445 = vrcp.f32 %v5865_v11  ;;  %vm1181_vm6 = vweird.f32 %v5865_v11  ;;  %v1187_v8 = vand.u32 2147483648, %v5865_v11  ;;  %v1185_v53 = vand.u32 2147483647, %v5865_v11 }
 0x307   : > { %v5873_v1 = vpop.eup %5445 }
 0x308   : > { %v5867_v59 = vpop.xlane.xlu0 %1144  ;;  %v1464_v60 = vpop.permute.xlu2 %1463  ;;  %v1177_v16 = vmul.f32 %v5873_v1, %v5865_v11  ;;  %vm1182_vm4 = vweird.f32 %v5873_v1 }
 0x309   : > { %1484 = vmatpush.msra.mxu2 %v1464_v60  ;;  %5447 = vrcp.f32 %v5867_v59  ;;  %v1202_v14 = vand.u32 2147483648, %v5867_v59  ;;  %vm5913_vm7 = vmor %vm1181_vm6, %vm1182_vm4  ;;  %vm1196_vm8 = vweird.f32 %v5867_v59  ;;  %v1200_v54 = vand.u32 2147483647, %v5867_v59 }
 0x30a   : > { %v1178_v29 = vsub.f32 1.0, %v1177_v16  ;;  %v1188_v60 = vor.u32 1.1754944e-38, %v1187_v8 }
 0x30c   : > { %v1179_v43 = vmul.f32 %v5873_v1, %v1178_v29 }
 0x30f   : > { %v5875_v57 = vpop.eup %5447 }
 0x310   : > { %v5869_v61 = vpop.xlane.xlu0 %1156  ;;  %v1192_v18 = vmul.f32 %v5875_v57, %v5867_v59  ;;  %vm1197_vm5 = vweird.f32 %v5875_v57 }
 0x311   : > { %vm1198_vm9 = vmor %vm1196_vm8, %vm1197_vm5 }
 0x312   : > { %v1193_v34 = vsub.f32 1.0, %v1192_v18 }
 0x314   : > { %v1194_v48 = vmul.f32 %v5875_v57, %v1193_v34  ;;  %v868_v34 = vld [vmem:[%s5891_s0 + $0x10] sm:$0xff] }
 0x318   : > { %v1160_v62 = vpop.xlane.xlu0 %1159  ;;  %v1151_v63 = vpop.xlane.xlu1 %1150 }
 0x319   : > { %5449 = vrcp.f32 %v1160_v62  ;;  %v1277_v19 = vand.u32 2147483648, %v1160_v62  ;;  %v1275_v22 = vand.u32 2147483647, %v1160_v62  ;;  %v1232_v25 = vand.u32 2147483648, %v1151_v63 }
 0x31a   : > { %5451 = vrcp.f32 %v1151_v63  ;;  %v1230_v27 = vand.u32 2147483647, %v1151_v63  ;;  %vm1271_vm12 = vweird.f32 %v1160_v62  ;;  %vm1226_vm14 = vweird.f32 %v1151_v63 }
 0x31b   : > { %5453 = vrcp.f32 %v5869_v61  ;;  %v1278_v30 = vor.u32 1.1754944e-38, %v1277_v19  ;;  %vm1276_vm15 = vcmp.eq.f32.partialorder %v1275_v22, 8.507059e+37  ;;  %v1233_v37 = vor.u32 1.1754944e-38, %v1232_v25 }
 0x31c   : > { %vm1231_vm3 = vcmp.eq.f32.partialorder %v1230_v27, 8.507059e+37 }
 0x31f   : > { %v5450_v2 = vpop.eup %5449 }
 0x320   : > { %v5452_v3 = vpop.eup %5451  ;;  %v1267_v6 = vmul.f32 %v5450_v2, %v1160_v62  ;;  %v5877_v9 = vpop.xlane.xlu1 %1153  ;;  %vm1272_vm10 = vweird.f32 %v5450_v2  ;;  %v1203_v62 = vor.u32 1.1754944e-38, %v1202_v14 }
 0x321   : > { %v1222_v15 = vmul.f32 %v5452_v3, %v1151_v63  ;;  %5455 = vrcp.f32 %v5877_v9  ;;  %vm1227_vm11 = vweird.f32 %v5452_v3  ;;  %vm1273_vm13 = vmor %vm1271_vm12, %vm1272_vm10  ;;  %v5885_v33 = vpop.eup %5453  ;;  %vm1186_vm10 = vcmp.eq.f32.partialorder %v1185_v53, 8.507059e+37 }
 0x322   : > { %v1268_v17 = vsub.f32 1.0, %v1267_v6  ;;  %vm1228_vm2 = vmor %vm1226_vm14, %vm1227_vm11  ;;  %v1252_v49 = vmul.f32 %v5885_v33, %v5869_v61  ;;  %vm1201_vm11 = vcmp.eq.f32.partialorder %v1200_v54, 8.507059e+37  ;;  %vm1256_vm12 = vweird.f32 %v5869_v61 }
 0x323   : > { %v1223_v20 = vsub.f32 1.0, %v1222_v15  ;;  %v1262_v6 = vand.u32 2147483648, %v5869_v61  ;;  %v1247_v15 = vand.u32 2147483648, %v5877_v9  ;;  %v1245_v19 = vand.u32 2147483647, %v5877_v9 }
 0x324   : > { %v1269_v21 = vmul.f32 %v5450_v2, %v1268_v17  ;;  %v1253_v50 = vsub.f32 1.0, %v1252_v49  ;;  %v5598_v54 = vmov 32.0  }
 0x325   : > { %v1224_v26 = vmul.f32 %v5452_v3, %v1223_v20  ;;  %vm1246_vm5 = vcmp.eq.f32.partialorder %v1245_v19, 8.507059e+37  ;;  %5457 = vrcp.f32 %v5598_v54  ;;  %v1741_v19 = vld [vmem:[%s5998_s1 + $0x18] sm:$0xff] }
 0x326   : > { %v1270_v28 = vadd.f32 %v5450_v2, %v1269_v21  ;;  %v1254_v56 = vmul.f32 %v5885_v33, %v1253_v50 }
 0x327   : > { %v1225_v32 = vadd.f32 %v5452_v3, %v1224_v26  ;;  %v5893_v38 = vpop.eup %5455 }
 0x328   : > { %v1274_v36 = vsel %vm1273_vm13, %v5450_v2, %v1270_v28  ;;  %v1237_v13 = vmul.f32 %v5893_v38, %v5877_v9  ;;  %vm1257_vm13 = vweird.f32 %v5885_v33  ;;  %v1255_v63 = vadd.f32 %v5885_v33, %v1254_v56  ;;  %v5356_v2 = vpop.permute.xlu2 %5355  ;;  %v1773_v56 = vld [vmem:[%s5971_s27 + $0x10] sm:$0xff] }
 0x329   : > { %v1279_v39 = vsel %vm1276_vm15, %v1278_v30, %v1274_v36  ;;  %v1229_v40 = vsel %vm1228_vm2, %v5452_v3, %v1225_v32  ;;  %vm1242_vm14 = vweird.f32 %v5893_v38  ;;  %vm5935_vm15 = vmor %vm1256_vm12, %vm1257_vm13  ;;  %vm1241_vm2 = vweird.f32 %v5877_v9  ;;  %v869_v30 = vld [vmem:[%s5891_s0 + $0x18] sm:$0xff] }
 0x32a   : > { %v1234_v41 = vsel %vm1231_vm3, %v1233_v37, %v1229_v40  ;;  %v1280_v42 = vmul.f32 %v5839_v31, %v1279_v39  ;;  %v1180_v31 = vadd.f32 %v5873_v1, %v1179_v43  ;;  %v1238_v51 = vsub.f32 1.0, %v1237_v13  ;;  %vm1243_vm3 = vmor %vm1241_vm2, %vm1242_vm14  ;;  %1576 = vmatpush.msrb.mxu2 %v869_v30 }
 0x32b   : > { %v1386_v45 = vpop.permute.xlu0 %1385  ;;  %v1235_v46 = vmul.f32 %v5841_v35, %v1234_v41  ;;  %v1195_v35 = vadd.f32 %v5875_v57, %v1194_v48  ;;  %v5358_v22 = vunpack.i.h.bf16 %v5356_v2  ;;  %v5357_v25 = vunpack.i.l.bf16 %v5356_v2 }
 0x32c   : > { %1406 = vmatpush.msrb.mxu3 %v1386_v45  ;;  %5152 = vmatmul.msk.f32.vlgmr.msra.gmra.mxu2 %vm872_vm1, %v1280_v42  ;;  %v1239_v58 = vmul.f32 %v5893_v38, %v1238_v51  ;;  %v1184_v10 = vsel %vm5913_vm7, %v5873_v1, %v1180_v31  ;;  %v1263_v9 = vor.u32 1.1754944e-38, %v1262_v6 }
 0x32d   : > { %5149 = vmatmul.msk.f32.vlgmr.msrb.gmra.mxu3 %vm872_vm1, %v1235_v46  ;;  %v1199_v55 = vsel %vm1198_vm9, %v5875_v57, %v1195_v35  ;;  %v1189_v59 = vsel %vm1186_vm10, %v1188_v60, %v1184_v10  ;;  %v1260_v57 = vand.u32 2147483647, %v5869_v61  ;;  %v1259_v61 = vsel %vm5935_vm15, %v5885_v33, %v1255_v63  ;;  %1668 = vmatpush.msra.mxu2 %v869_v30  ;;  %v867_v33 = vld [vmem:[%s5891_s0 + $0x8] sm:$0xff]  ;;  %v1771_v10 = vld [vmem:[%s5971_s27] sm:$0xff] }
 0x32e   : > { %1507 = vmatpush.msra.mxu3 %v866_v47  ;;  %v1204_v11 = vsel %vm1201_vm11, %v1203_v62, %v1199_v55  ;;  %v1240_v3 = vadd.f32 %v5893_v38, %v1239_v58  ;;  %v1190_v20 = vmul.f32 %v5827_v0, %v1189_v59  ;;  %v1248_v0 = vor.u32 1.1754944e-38, %v1247_v15  ;;  %v813_v60 = vld [vmem:[%s5983_s21] sm:$0xff] }
 0x32f   : > { %v1205_v21 = vmul.f32 %v5831_v12, %v1204_v11  ;;  %vm1261_vm4 = vcmp.eq.f32.partialorder %v1260_v57, 8.507059e+37 }
 0x330   : > { %1599 = vmatpush.msrb.mxu3 %v866_v47  ;;  %v1304_v7 = vpop.f32.mrf.mxu3  ;;  %v1244_v26 = vsel %vm1243_vm3, %v5893_v38, %v1240_v3  ;;  %v1264_v12 = vsel %vm1261_vm4, %v1263_v9, %v1259_v61 }
 0x331   : > { %v1249_v27 = vsel %vm1246_vm5, %v1248_v0, %v1244_v26  ;;  %v1265_v29 = vmul.f32 %v5835_v24, %v1264_v12  ;;  %v814_v0 = vld [vmem:[%s5983_s21 + $0x8] sm:$0xff] }
 0x332   : > { %v1250_v28 = vmul.f32 %v5849_v44, %v1249_v27 }
 0x335   : > { %5153 = vmatmul.msk.f32.vlgmr.msra.gmra.mxu3 %vm872_vm1, %v1304_v7  ;;  %v1772_v7 = vld [vmem:[%s5971_s27 + $0x8] sm:$0xff] }
 0x336   : > { %1760 = vmatpush.msra.mxu3 %v1741_v19 }
 0x338   : > { %v5351_v1 = vpop.permute.xlu1 %5350 }
 0x339   : > { %v5353_v16 = vunpack.i.h.bf16 %v5351_v1  ;;  %v5352_v17 = vunpack.i.l.bf16 %v5351_v1 }
 0x33b   : > { %1328 = vmatpush.msrb.mxu0 %v5352_v17  ;;  %1354 = vmatpush.msrb.mxu1 %v5353_v16 }
 0x33c   : > { %5146 = vmatmul.msk.f32.vlgmr.msrb.gmra.mxu0 %vm872_vm1, %v1190_v20  ;;  %5147 = vmatmul.msk.f32.vlgmr.msrb.gmra.mxu1 %vm872_vm1, %v1205_v21  ;;  %v1740_v20 = vld [vmem:[%s5998_s1 + $0x10] sm:$0xff]  ;;  %v1739_v21 = vld [vmem:[%s5998_s1 + $0x8] sm:$0xff] }
 0x33d   : > { %1432 = vmatpush.msra.mxu0 %v5357_v25  ;;  %1458 = vmatpush.msra.mxu1 %v5358_v22  ;;  %v1738_v22 = vld [vmem:[%s5998_s1] sm:$0xff] }
 0x33e   : > { %1761 = vmatpush.msra.mxu3 %v1740_v20 }
 0x33f   : > { %1530 = vmatpush.msrb.mxu0 %v867_v33  ;;  %1553 = vmatpush.msrb.mxu1 %v868_v34 }
 0x340   : > { %1762 = vmatpush.msra.mxu3 %v1739_v21 }
 0x342   : > { %1763 = vmatpush.msra.mxu3 %v1738_v22 }
 0x344   : > { %5150 = vmatmul.msk.f32.vlgmr.msra.gmra.mxu0 %vm872_vm1, %v1250_v28  ;;  %5151 = vmatmul.msk.f32.vlgmr.msra.gmra.mxu1 %vm872_vm1, %v1265_v29 }
 0x345   : > { %1622 = vmatpush.msra.mxu0 %v867_v33  ;;  %1645 = vmatpush.msra.mxu1 %v868_v34 }
 0x381   : > { %v1382_v32 = vpop.f32.mrf.mxu2 }
 0x382   : > { %5156 = vmatmul.msk.f32.vlgmr.msrb.gmra.mxu2 %vm872_vm1, %v1382_v32 }
 0x3af   : > { %v1486_v36 = vpop.f32.mrf.mxu2 }
 0x3b0   : > { %v1408_v44 = vpop.f32.mrf.mxu3  ;;  %5160 = vmatmul.msk.f32.vlgmr.msra.gmra.mxu2 %vm872_vm1, %v1486_v36 }
 0x3b1   : > { %5157 = vmatmul.msk.f32.vlgmr.msrb.gmra.mxu3 %vm872_vm1, %v1408_v44 }
 0x3b8   : > { %v1509_v40 = vpop.f32.mrf.mxu3 }
 0x3b9   : > { %v1330_v24 = vpop.f32.mrf.mxu0  ;;  %v1356_v37 = vpop.f32.mrf.mxu1 }
 0x3ba   : > { %5154 = vmatmul.msk.f32.vlgmr.msrb.gmra.mxu0 %vm872_vm1, %v1330_v24  ;;  %5155 = vmatmul.msk.f32.vlgmr.msrb.gmra.mxu1 %vm872_vm1, %v1356_v37 }
 0x3c1   : > { %v1434_v38 = vpop.f32.mrf.mxu0  ;;  %v1460_v39 = vpop.f32.mrf.mxu1 }
 0x3c2   : > { %5158 = vmatmul.msk.f32.vlgmr.msra.gmra.mxu0 %vm872_vm1, %v1434_v38  ;;  %5159 = vmatmul.msk.f32.vlgmr.msra.gmra.mxu1 %vm872_vm1, %v1460_v39 }
 0x405   : > { %v1578_v46 = vpop.f32.mrf.mxu2 }
 0x433   : > { %v1670_v8 = vpop.f32.mrf.mxu2 }
 0x434   : > { %v1601_v49 = vpop.f32.mrf.mxu3 }
 0x437   : > { %v1532_v41 = vpop.f32.mrf.mxu0  ;;  %v1555_v42 = vpop.f32.mrf.mxu1 }
 0x438   : > { %v1673_v43 = vadd.f32 %v1532_v41, %v1509_v40 }
 0x43a   : > { %v1675_v45 = vadd.f32 %v1673_v43, %v1555_v42 }
 0x43c   : > { %v1677_v47 = vadd.f32 %v1675_v45, %v1578_v46 }
 0x43e   : > { %v1679_v48 = vadd.f32 %v1677_v47, %v5715_v4  ;;  %v5458_v4 = vpop.eup %5457 }
 0x43f   : > { %v1624_v13 = vpop.f32.mrf.mxu0  ;;  %v1647_v50 = vpop.f32.mrf.mxu1  ;;  %v1688_v55 = vmul.f32 32.0, %v5458_v4  ;;  %vm1692_vm6 = vweird.f32 %v5458_v4 }
 0x440   : > { %v1674_v31 = vadd.f32 %v1624_v13, %v1601_v49  ;;  %v1681_v35 = vsel %vm822_vm0, %v1679_v48, 0.0 }
 0x441   : > { %1682 = vadd.xlane.f32.xlu1 %v1681_v35  ;;  %v1689_v58 = vsub.f32 1.0, %v1688_v55 }
 0x442   : > { %v1676_v51 = vadd.f32 %v1674_v31, %v1647_v50 }
 0x443   : > { %v1690_v62 = vmul.f32 %v5458_v4, %v1689_v58 }
 0x444   : > { %v1678_v14 = vadd.f32 %v1676_v51, %v1670_v8 }
 0x445   : > { %v1691_v11 = vadd.f32 %v5458_v4, %v1690_v62 }
 0x446   : > { %v1680_v52 = vadd.f32 %v1678_v14, %v5722_v5  ;;  %v1774_v5 = vld [vmem:[%s5971_s27 + $0x18] sm:$0xff] }
 0x447   : > { %1793 = vmatpush.msrb.mxu0 %v1774_v5  ;;  %v5988_v59 = vsel %vm1692_vm6, %v5458_v4, %v1691_v11 }
 0x448   : > { %v1684_v53 = vsel %vm822_vm0, %v1680_v52, 0.0 }
 0x449   : > { %1685 = vadd.xlane.f32.xlu0 %v1684_v53  ;;  %1794 = vmatpush.msrb.mxu0 %v1773_v56 }
 0x44b   : > { %1795 = vmatpush.msrb.mxu0 %v1772_v7 }
 0x44d   : > { %1796 = vmatpush.msrb.mxu0 %v1771_v10 }
 0x44e   : > { %5163 = vmatmul.msk.f32.vlgmr.msrb.gmra.mxu0 %vm822_vm0, %v813_v60 }
 0x456   : > { %5164 = vmatmul.msk.f32.gmra.mxu0 %vm822_vm0, %v814_v0 }
 0x4b4   : > { %v1683_v63 = vpop.xlane.xlu1 %1682 }
 0x4b5   : > { %v1694_v57 = vmul.f32 %v5988_v59, %v1683_v63 }
 0x4b7   : > { %v1696_v2 = vsub.f32 %v1679_v48, %v1694_v57 }
 0x4b9   : > { %v1698_v3 = vmul.f32 %v1696_v2, %v1696_v2 }
 0x4bb   : > { %v1700_v1 = vsel %vm822_vm0, %v1698_v3, 0.0 }
 0x4bc   : > { %1701 = vadd.xlane.f32.xlu2 %v1700_v1  ;;  %v1686_v6 = vpop.xlane.xlu0 %1685 }
 0x4bd   : > { %v1695_v15 = vmul.f32 %v5988_v59, %v1686_v6 }
 0x4bf   : > { %v1697_v16 = vsub.f32 %v1680_v52, %v1695_v15 }
 0x4c1   : > { %v1699_v17 = vmul.f32 %v1697_v16, %v1697_v16 }
 0x4c3   : > { %v1703_v18 = vsel %vm822_vm0, %v1699_v17, 0.0 }
 0x4c4   : > { %1704 = vadd.xlane.f32.xlu1 %v1703_v18 }
 0x4cb   : > { %v6005_v9 = vpop.f32.mrf.mxu0 }
 0x4cc   : > { %1819 = vrot.lane.b32.xlu0 %v6005_v9, %s6973_s30  ;;  %5165 = vmatpush.xpose.msk.msrb.mxu1 %vm872_vm1, %v6005_v9 }
 0x4d3   : > { %v6037_v50 = vpop.f32.mrf.mxu0 }
 0x4d4   : > { %5173 = vmatpush.xpose.msk.msrb.mxu3 %vm872_vm1, %v6037_v50 }
 0x4dd   : > { %1823 = vrot.lane.b32.xlu1 %v6005_v9, %s6949_s22  ;;  %s6022_s22 = scalar_lea.vmem %s6975_s11, %s5974_s28  ;;  %s6280_s11 = scalar_lea.vmem %s6932_s10, %s5115_s2 }
 0x4de   : > { %v6025_v34 = vld [vmem:[%s6022_s22] sm:$0x3f] }
 0x4df   : > { %v1732_v38 = vperm.slane %v6025_v34, 0  ;;  %v1735_v42 = vperm.slane %v6025_v34, 1 }
 0x4e5   : > { %1821 = vrot.lane.b32.xlu1 %v6005_v9, %s6974_s19 }
 0x4ed   : > { %1828 = vrot.lane.b32.xlu1 %v6037_v50, %s6974_s19 }
 0x52f   : > { %v1702_v25 = vpop.xlane.xlu2 %1701 }
 0x530   : > { %v1706_v61 = vmul.f32 %v1702_v25, %v5988_v59 }
 0x532   : > { %v1708_v26 = vadd.f32 1e-05, %v1706_v61 }
 0x534   : > { %5459 = vrsqrt.f32 %v1708_v26  ;;  %vm1716_vm8 = vweird.f32 %v1708_v26 }
 0x537   : > { %v1705_v12 = vpop.xlane.xlu1 %1704 }
 0x538   : > { %v1707_v27 = vmul.f32 %v1705_v12, %v5988_v59 }
 0x53a   : > { %v5460_v28 = vpop.eup %5459  ;;  %v1709_v29 = vadd.f32 1e-05, %v1707_v27 }
 0x53b   : > { %v1711_v30 = vmul.f32 %v5460_v28, %v1708_v26  ;;  %vm1717_vm7 = vweird.f32 %v5460_v28 }
 0x53c   : > { %5461 = vrsqrt.f32 %v1709_v29  ;;  %vm1718_vm9 = vmor %vm1716_vm8, %vm1717_vm7  ;;  %vm1726_vm11 = vweird.f32 %v1709_v29 }
 0x53d   : > { %v1712_v32 = vmul.f32 %v5460_v28, %v1711_v30 }
 0x53e   : > { %v6043_v51 = vpop.permute.xlu0 %1819 }
 0x53f   : > { %v1713_v33 = vmul.f32 0.5, %v1712_v32  ;;  %5167 = vmatpush.xpose.msk.msrb.mxu2 %vm872_vm1, %v6043_v51 }
 0x541   : > { %v1714_v36 = vsub.f32 1.5, %v1713_v33 }
 0x542   : > { %v5462_v44 = vpop.eup %5461 }
 0x543   : > { %v1715_v24 = vmul.f32 %v5460_v28, %v1714_v36  ;;  %v1721_v37 = vmul.f32 %v5462_v44, %v1709_v29  ;;  %vm1727_vm10 = vweird.f32 %v5462_v44 }
 0x544   : > { %vm1728_vm12 = vmor %vm1726_vm11, %vm1727_vm10 }
 0x545   : > { %v1719_v39 = vsel %vm1718_vm9, %v5460_v28, %v1715_v24  ;;  %v1722_v40 = vmul.f32 %v5462_v44, %v1721_v37 }
 0x546   : > { %v1730_v41 = vmul.f32 %v1719_v39, %v1696_v2 }
 0x547   : > { %v1723_v43 = vmul.f32 0.5, %v1722_v40 }
 0x548   : > { %v1733_v45 = vmul.f32 %v1732_v38, %v1730_v41 }
 0x549   : > { %v1724_v46 = vsub.f32 1.5, %v1723_v43 }
 0x54a   : > { %v6029_v47 = vadd.f32 %v1735_v42, %v1733_v45 }
 0x54b   : > { %v1725_v48 = vmul.f32 %v5462_v44, %v1724_v46 }
 0x54c   : > { %5161 = vmatmul.msk.f32.vlgmr.msra.gmra.mxu3 %vm822_vm0, %v6029_v47 }
 0x54d   : > { %v1729_v49 = vsel %vm1728_vm12, %v5462_v44, %v1725_v48 }
 0x54e   : > { %v1731_v13 = vmul.f32 %v1729_v49, %v1697_v16 }
 0x54f   : > { %v6045_v8 = vpop.permute.xlu1 %1823 }
 0x550   : > { %v1734_v31 = vmul.f32 %v1732_v38, %v1731_v13  ;;  %5171 = vmatpush.xpose.msk.msra.mxu2 %vm872_vm1, %v6045_v8 }
 0x552   : > { %v6033_v35 = vadd.f32 %v1735_v42, %v1734_v31  ;;  %v5359_v42 = vpack.i.bf16 %v6045_v8, %v6005_v9 }
 0x554   : > { %5162 = vmatmul.msk.f32.gmra.mxu3 %vm822_vm0, %v6033_v35 }
 0x557   : > { %v6063_v53 = vpop.permute.xlu1 %1821 }
 0x558   : > { %5169 = vmatpush.xpose.msk.msra.mxu1 %vm872_vm1, %v6063_v53 }
 0x55f   : > { %v6074_v5 = vpop.permute.xlu1 %1828 }
 0x5cf   : > { %v1765_v14 = vpop.f32.mrf.mxu3 }
 0x5d0   : > { %1805 = vrot.lane.b32.xlu2 %v1765_v14, %s6973_s30  ;;  %1809 = vrot.lane.b32.xlu0 %v1765_v14, %s6976_s20 }
 0x5d1   : > { %5166 = vmatmul.msk.f32.vlgmr.msrb.gmra.mxu1 %vm872_vm1, %v1765_v14 }
 0x5d2   : > { %5177 = vmatpush.xpose.msk.msrb.mxu1 %vm872_vm1, %v6074_v5 }
 0x5d7   : > { %v1768_v52 = vpop.f32.mrf.mxu3 }
 0x5d8   : > { %1816 = vrot.lane.b32.xlu0 %v1768_v52, %s6976_s20  ;;  %1830 = vrot.lane.b32.xlu2 %v6037_v50, %s6976_s20 }
 0x5d9   : > { %5174 = vmatmul.msk.f32.vlgmr.msrb.gmra.mxu3 %vm872_vm1, %v1768_v52 }
 0x5e0   : > { %1826 = vrot.lane.b32.xlu0 %v6037_v50, %s6973_s30  ;;  %1807 = vrot.lane.b32.xlu2 %v1765_v14, %s6974_s19 }
 0x5e8   : > { %1814 = vrot.lane.b32.xlu0 %v1768_v52, %s6974_s19  ;;  %1812 = vrot.lane.b32.xlu2 %v1768_v52, %s6973_s30 }
 0x62a   : > { %v1806_v54 = vpop.permute.xlu2 %1805 }
 0x62b   : > { %5168 = vmatmul.msk.f32.vlgmr.msrb.gmra.mxu2 %vm872_vm1, %v1806_v54 }
 0x632   : > { %v6068_v4 = vpop.permute.xlu2 %1830 }
 0x633   : > { %v5369_v55 = vpack.i.bf16 %v6063_v53, %v6068_v4  ;;  %5179 = vmatpush.xpose.msk.msrb.mxu2 %vm872_vm1, %v6068_v4 }
 0x63a   : > { %v1808_v56 = vpop.permute.xlu2 %1807 }
 0x63b   : > { %5170 = vmatmul.msk.f32.vlgmr.msra.gmra.mxu1 %vm872_vm1, %v1808_v56 }
 0x642   : > { %v1810_v58 = vpop.permute.xlu0 %1809  ;;  %v1813_v63 = vpop.permute.xlu2 %1812 }
 0x643   : > { %5172 = vmatmul.msk.f32.vlgmr.msra.gmra.mxu2 %vm872_vm1, %v1810_v58 }
 0x64a   : > { %v1817_v7 = vpop.permute.xlu0 %1816 }
 0x64b   : > { %5180 = vmatmul.msk.f32.vlgmr.msrb.gmra.mxu2 %vm872_vm1, %v1817_v7 }
 0x64e   : > { %v1857_v10 = vpop.f32.mrf.mxu1 }
 0x64f   : > { %v2028_v60 = vmul.f32 %v1857_v10, %v5798_v23 }
 0x651   : > { %v2036_v62 = vsel %vm872_vm1, %v2028_v60, -inf }
 0x652   : > { %2037 = vmax.xlane.f32.xlu1 %v2036_v62  ;;  %v6083_v11 = vpop.permute.xlu0 %1826 }
 0x653   : > { %5175 = vmatpush.xpose.msk.msra.mxu0 %vm872_vm1, %v6083_v11  ;;  %v5374_v58 = vpack.i.bf16 %v6074_v5, %v6083_v11 }
 0x656   : > { %5176 = vmatmul.msk.f32.vlgmr.msra.gmra.mxu0 %vm872_vm1, %v1813_v63 }
 0x65a   : > { %v1815_v57 = vpop.permute.xlu0 %1814 }
 0x65b   : > { %5178 = vmatmul.msk.f32.vlgmr.msrb.gmra.mxu1 %vm872_vm1, %v1815_v57 }
 0x65c   : > { %v1953_v2 = vpop.f32.mrf.mxu3 }
 0x65d   : > { %v2032_v3 = vmul.f32 %v1953_v2, %v5798_v23 }
 0x65f   : > { %v2048_v1 = vsel %vm872_vm1, %v2032_v3, -inf }
 0x660   : > { %2049 = vmax.xlane.f32.xlu0 %v2048_v1 }
 0x6ae   : > { %v1881_v6 = vpop.f32.mrf.mxu2 }
 0x6af   : > { %v2029_v15 = vmul.f32 %v1881_v6, %v5798_v23 }
 0x6b1   : > { %v2039_v16 = vsel %vm872_vm1, %v2029_v15, -inf }
 0x6b2   : > { %2040 = vmax.xlane.f32.xlu1 %v2039_v16 }
 0x6b8   : > { %v1905_v17 = vpop.f32.mrf.mxu1 }
 0x6b9   : > { %v2030_v18 = vmul.f32 %v1905_v17, %v5798_v23 }
 0x6bb   : > { %v2042_v19 = vsel %vm872_vm1, %v2030_v18, -inf }
 0x6bc   : > { %2043 = vmax.xlane.f32.xlu0 %v2042_v19 }
 0x6c5   : > { %v2038_v20 = vpop.xlane.xlu1 %2037 }
 0x6c6   : > { %v2060_v21 = vsub.f32 %v2028_v60, %v2038_v20  ;;  %v1929_v22 = vpop.f32.mrf.mxu2 }
 0x6c7   : > { %v2031_v25 = vmul.f32 %v1929_v22, %v5798_v23 }
 0x6c8   : > { %v2068_v61 = vmul.f32 1.442695, %v2060_v21 }
 0x6c9   : > { %v2045_v26 = vsel %vm872_vm1, %v2031_v25, -inf }
 0x6ca   : > { %5463 = vpow2.f32 %v2068_v61  ;;  %2046 = vmax.xlane.f32.xlu2 %v2045_v26 }
 0x6ce   : > { %v2025_v0 = vpop.f32.mrf.mxu2 }
 0x6cf   : > { %v2035_v12 = vmul.f32 %v2025_v0, %v5798_v23 }
 0x6d0   : > { %v6098_v27 = vpop.eup %5463 }
 0x6d1   : > { %v2084_v28 = vsel %vm872_vm1, %v6098_v27, 0.0  ;;  %v2057_v29 = vsel %vm872_vm1, %v2035_v12, -inf }
 0x6d2   : > { %2085 = vadd.xlane.f32.xlu0 %v2084_v28  ;;  %2058 = vmax.xlane.f32.xlu2 %v2057_v29 }
 0x6d3   : > { %v2050_v30 = vpop.xlane.xlu0 %2049  ;;  %v1977_v32 = vpop.f32.mrf.mxu0 }
 0x6d4   : > { %v2064_v33 = vsub.f32 %v2032_v3, %v2050_v30  ;;  %v2033_v36 = vmul.f32 %v1977_v32, %v5798_v23 }
 0x6d6   : > { %v2076_v44 = vmul.f32 1.442695, %v2064_v33  ;;  %v2051_v24 = vsel %vm872_vm1, %v2033_v36, -inf }
 0x6d7   : > { %2052 = vmax.xlane.f32.xlu1 %v2051_v24 }
 0x6d8   : > { %v2001_v37 = vpop.f32.mrf.mxu1  ;;  %5465 = vpow2.f32 %v2076_v44 }
 0x6d9   : > { %v2034_v38 = vmul.f32 %v2001_v37, %v5798_v23 }
 0x6db   : > { %v2054_v39 = vsel %vm872_vm1, %v2034_v38, -inf }
 0x6dc   : > { %2055 = vmax.xlane.f32.xlu2 %v2054_v39 }
 0x6de   : > { %v6107_v40 = vpop.eup %5465 }
 0x6df   : > { %v2096_v41 = vsel %vm872_vm1, %v6107_v40, 0.0 }
 0x6e4   : > { %2097 = vadd.xlane.f32.xlu2 %v2096_v41 }
 0x6e6   : > { %5360 = vrot.lane.b32.xlu0 %v5359_v42, %s6977_s23 }
 0x725   : > { %v2041_v43 = vpop.xlane.xlu1 %2040 }
 0x726   : > { %v2061_v45 = vsub.f32 %v2029_v15, %v2041_v43 }
 0x728   : > { %v2070_v46 = vmul.f32 1.442695, %v2061_v45 }
 0x72a   : > { %5467 = vpow2.f32 %v2070_v46 }
 0x72f   : > { %v2044_v48 = vpop.xlane.xlu0 %2043 }
 0x730   : > { %v6114_v49 = vpop.eup %5467  ;;  %v2062_v13 = vsub.f32 %v2030_v18, %v2044_v48 }
 0x731   : > { %v2087_v31 = vsel %vm872_vm1, %v6114_v49, 0.0 }
 0x732   : > { %v2072_v14 = vmul.f32 1.442695, %v2062_v13  ;;  %2088 = vadd.xlane.f32.xlu0 %v2087_v31 }
 0x734   : > { %5469 = vpow2.f32 %v2072_v14 }
 0x73a   : > { %v6118_v52 = vpop.eup %5469 }
 0x73b   : > { %v2090_v9 = vsel %vm872_vm1, %v6118_v52, 0.0 }
 0x73c   : > { %2091 = vadd.xlane.f32.xlu2 %v2090_v9 }
 0x73d   : > { %v2047_v8 = vpop.xlane.xlu2 %2046 }
 0x73e   : > { %v2063_v54 = vsub.f32 %v2031_v25, %v2047_v8 }
 0x740   : > { %v2074_v56 = vmul.f32 1.442695, %v2063_v54 }
 0x742   : > { %5471 = vpow2.f32 %v2074_v56 }
 0x745   : > { %v2086_v7 = vpop.xlane.xlu0 %2085  ;;  %v2059_v10 = vpop.xlane.xlu2 %2058 }
 0x746   : > { %5473 = vrcp.f32 %v2086_v7  ;;  %5375 = vrot.lane.b32.xlu0 %v5374_v58, %s6977_s23  ;;  %v2067_v1 = vsub.f32 %v2035_v12, %v2059_v10  ;;  %v2119_v17 = vand.u32 2147483648, %v2086_v7  ;;  %v2117_v19 = vand.u32 2147483647, %v2086_v7 }
 0x747   : > { %vm2113_vm14 = vweird.f32 %v2086_v7 }
 0x748   : > { %v6125_v60 = vpop.eup %5471  ;;  %v2082_v18 = vmul.f32 1.442695, %v2067_v1  ;;  %v2120_v61 = vor.u32 1.1754944e-38, %v2119_v17  ;;  %vm2118_vm2 = vcmp.eq.f32.partialorder %v2117_v19, 8.507059e+37 }
 0x749   : > { %v2093_v62 = vsel %vm872_vm1, %v6125_v60, 0.0 }
 0x74a   : > { %v2053_v63 = vpop.xlane.xlu1 %2052  ;;  %2094 = vadd.xlane.f32.xlu1 %v2093_v62 }
 0x74b   : > { %v2065_v57 = vsub.f32 %v2033_v36, %v2053_v63 }
 0x74c   : > { %v5474_v2 = vpop.eup %5473 }
 0x74d   : > { %v2109_v3 = vmul.f32 %v5474_v2, %v2086_v7  ;;  %v2078_v6 = vmul.f32 1.442695, %v2065_v57  ;;  %vm2114_vm13 = vweird.f32 %v5474_v2 }
 0x74e   : > { %vm2115_vm15 = vmor %vm2113_vm14, %vm2114_vm13 }
 0x74f   : > { %v2110_v15 = vsub.f32 1.0, %v2109_v3  ;;  %5475 = vpow2.f32 %v2078_v6  ;;  %v2056_v5 = vpop.xlane.xlu2 %2055 }
 0x750   : > { %v2066_v11 = vsub.f32 %v2034_v38, %v2056_v5 }
 0x751   : > { %v2111_v16 = vmul.f32 %v5474_v2, %v2110_v15 }
 0x752   : > { %v2080_v20 = vmul.f32 1.442695, %v2066_v11 }
 0x753   : > { %v2112_v21 = vadd.f32 %v5474_v2, %v2111_v16 }
 0x754   : > { %5477 = vpow2.f32 %v2080_v20 }
 0x755   : > { %v6129_v22 = vpop.eup %5475  ;;  %v2116_v25 = vsel %vm2115_vm15, %v5474_v2, %v2112_v21  ;;  %5479 = vpow2.f32 %v2082_v18 }
 0x756   : > { %v2099_v26 = vsel %vm872_vm1, %v6129_v22, 0.0  ;;  %v2121_v0 = vsel %vm2118_vm2, %v2120_v61, %v2116_v25 }
 0x757   : > { %2100 = vadd.xlane.f32.xlu1 %v2099_v26  ;;  %v2122_v32 = vmul.f32 %v6098_v27, %v2121_v0  ;;  %v5364_v27 = vpack.i.bf16 %v6043_v51, %v6037_v50  ;;  %v6150_v24 = vpop.xlane.xlu2 %2097 }
 0x758   : > { %v5361_v12 = vpop.permute.xlu0 %5360 }
 0x759   : > { %v5363_v28 = vunpack.i.h.bf16 %v5361_v12  ;;  %v5362_v29 = vunpack.i.l.bf16 %v5361_v12 }
 0x75a   : > { %v6133_v30 = vpop.eup %5477 }
 0x75b   : > { %v6136_v33 = vpop.eup %5479  ;;  %2249 = vmatpush.msra.mxu3 %v5362_v29  ;;  %2327 = vmatpush.msra.mxu2 %v5363_v28  ;;  %v2102_v36 = vsel %vm872_vm1, %v6133_v30, 0.0 }
 0x75c   : > { %5181 = vmatmul.msk.f32.vlgmr.msra.gmra.mxu3 %vm872_vm1, %v2122_v32  ;;  %2103 = vadd.xlane.f32.xlu2 %v2102_v36  ;;  %v2105_v44 = vsel %vm872_vm1, %v6136_v33, 0.0 }
 0x75f   : > { %2106 = vadd.xlane.f32.xlu1 %v2105_v44 }
 0x774   : > { %5370 = vrot.lane.b32.xlu2 %v5369_v55, %s6977_s23 }
 0x778   : > { %5365 = vrot.lane.b32.xlu1 %v5364_v27, %s6977_s23 }
 0x7a5   : > { %v6152_v48 = vpop.xlane.xlu0 %2088 }
 0x7af   : > { %v2092_v37 = vpop.xlane.xlu2 %2091 }
 0x7b0   : > { %5481 = vrcp.f32 %v2092_v37  ;;  %v2149_v7 = vand.u32 2147483648, %v2092_v37  ;;  %vm2143_vm8 = vweird.f32 %v2092_v37  ;;  %v2147_v62 = vand.u32 2147483647, %v2092_v37 }
 0x7b2   : > { %v2150_v3 = vor.u32 1.1754944e-38, %v2149_v7  ;;  %vm2148_vm10 = vcmp.eq.f32.partialorder %v2147_v62, 8.507059e+37 }
 0x7b6   : > { %v5482_v39 = vpop.eup %5481 }
 0x7b7   : > { %v2139_v41 = vmul.f32 %v5482_v39, %v2092_v37  ;;  %vm2144_vm7 = vweird.f32 %v5482_v39 }
 0x7b8   : > { %vm2145_vm9 = vmor %vm2143_vm8, %vm2144_vm7  ;;  %v6169_v15 = vpop.permute.xlu0 %5375  ;;  %vm2173_vm7 = vweird.f32 %v6150_v24 }
 0x7b9   : > { %v2140_v45 = vsub.f32 1.0, %v2139_v41  ;;  %v5378_v26 = vunpack.i.h.bf16 %v6169_v15 }
 0x7bb   : > { %v2141_v55 = vmul.f32 %v5482_v39, %v2140_v45 }
 0x7bd   : > { %v2095_v38 = vpop.xlane.xlu1 %2094  ;;  %v2142_v8 = vadd.f32 %v5482_v39, %v2141_v55 }
 0x7be   : > { %5483 = vrcp.f32 %v2095_v38  ;;  %v2164_v53 = vand.u32 2147483648, %v2095_v38  ;;  %v2162_v50 = vand.u32 2147483647, %v2095_v38  ;;  %vm2158_vm4 = vweird.f32 %v2095_v38 }
 0x7bf   : > { %5485 = vrcp.f32 %v6150_v24  ;;  %v2146_v57 = vsel %vm2145_vm9, %v5482_v39, %v2142_v8  ;;  %vm2128_vm9 = vweird.f32 %v6152_v48  ;;  %v2132_v8 = vand.u32 2147483647, %v6152_v48 }
 0x7c0   : > { %5487 = vrcp.f32 %v6152_v48  ;;  %v2165_v31 = vor.u32 1.1754944e-38, %v2164_v53  ;;  %vm2163_vm6 = vcmp.eq.f32.partialorder %v2162_v50, 8.507059e+37  ;;  %v2151_v6 = vsel %vm2148_vm10, %v2150_v3, %v2146_v57 }
 0x7c1   : > { %v2152_v25 = vmul.f32 %v6118_v52, %v2151_v6 }
 0x7c4   : > { %v5484_v42 = vpop.eup %5483 }
 0x7c5   : > { %v2154_v43 = vmul.f32 %v5484_v42, %v2095_v38  ;;  %vm2159_vm3 = vweird.f32 %v5484_v42  ;;  %v6159_v58 = vpop.eup %5485 }
 0x7c6   : > { %vm2160_vm5 = vmor %vm2158_vm4, %vm2159_vm3  ;;  %v6161_v10 = vpop.eup %5487  ;;  %v2169_v2 = vmul.f32 %v6159_v58, %v6150_v24  ;;  %vm2174_vm2 = vweird.f32 %v6159_v58 }
 0x7c7   : > { %v2155_v46 = vsub.f32 1.0, %v2154_v43  ;;  %vm2129_vm4 = vweird.f32 %v6161_v10  ;;  %vm2175_vm8 = vmor %vm2173_vm7, %vm2174_vm2 }
 0x7c8   : > { %v2170_v16 = vsub.f32 1.0, %v2169_v2  ;;  %vm2130_vm10 = vmor %vm2128_vm9, %vm2129_vm4 }
 0x7c9   : > { %v2156_v4 = vmul.f32 %v5484_v42, %v2155_v46 }
 0x7ca   : > { %v6155_v51 = vpop.xlane.xlu1 %2100  ;;  %v2171_v32 = vmul.f32 %v6159_v58, %v2170_v16 }
 0x7cb   : > { %v2157_v13 = vadd.f32 %v5484_v42, %v2156_v4  ;;  %v2192_v3 = vand.u32 2147483647, %v6155_v51 }
 0x7cc   : > { %v2172_v46 = vadd.f32 %v6159_v58, %v2171_v32 }
 0x7cd   : > { %v2161_v14 = vsel %vm2160_vm5, %v5484_v42, %v2157_v13  ;;  %vm2193_vm2 = vcmp.eq.f32.partialorder %v2192_v3, 8.507059e+37 }
 0x7ce   : > { %v2166_v9 = vsel %vm2163_vm6, %v2165_v31, %v2161_v14  ;;  %v2179_v31 = vand.u32 2147483648, %v6150_v24  ;;  %v2134_v14 = vand.u32 2147483648, %v6152_v48 }
 0x7cf   : > { %v2104_v54 = vpop.xlane.xlu2 %2103  ;;  %v2167_v56 = vmul.f32 %v6125_v60, %v2166_v9  ;;  %v2124_v60 = vmul.f32 %v6161_v10, %v6152_v48 }
 0x7d0   : > { %5489 = vrcp.f32 %v2104_v54  ;;  %v2209_v0 = vand.u32 2147483648, %v2104_v54  ;;  %v2207_v29 = vand.u32 2147483647, %v2104_v54  ;;  %vm2203_vm12 = vweird.f32 %v2104_v54 }
 0x7d1   : > { %5184 = vmatmul.msk.f32.vlgmr.msra.gmra.mxu2 %vm872_vm1, %v2167_v56  ;;  %v2125_v17 = vsub.f32 1.0, %v2124_v60  ;;  %v2176_v56 = vsel %vm2175_vm8, %v6159_v58, %v2172_v46  ;;  %v2135_v57 = vor.u32 1.1754944e-38, %v2134_v14  ;;  %v2194_v58 = vand.u32 2147483648, %v6155_v51 }
 0x7d2   : > { %v2107_v63 = vpop.xlane.xlu1 %2106  ;;  %v2210_v38 = vor.u32 1.1754944e-38, %v2209_v0  ;;  %vm2208_vm15 = vcmp.eq.f32.partialorder %v2207_v29, 8.507059e+37 }
 0x7d3   : > { %5491 = vrcp.f32 %v2107_v63  ;;  %v2126_v36 = vmul.f32 %v6161_v10, %v2125_v17  ;;  %v2224_v37 = vand.u32 2147483648, %v2107_v63  ;;  %v2222_v41 = vand.u32 2147483647, %v2107_v63 }
 0x7d4   : > { %5493 = vrcp.f32 %v6155_v51  ;;  %vm2218_vm3 = vweird.f32 %v2107_v63  ;;  %v2195_v17 = vor.u32 1.1754944e-38, %v2194_v58  ;;  %v2726_v58 = vld [vmem:[%s6263_s26 + $0x28] sm:$0xff] }
 0x7d5   : > { %v2225_v53 = vor.u32 1.1754944e-38, %v2224_v37  ;;  %v2127_v50 = vadd.f32 %v6161_v10, %v2126_v36  ;;  %vm2223_vm6 = vcmp.eq.f32.partialorder %v2222_v41, 8.507059e+37 }
 0x7d6   : > { %v5490_v1 = vpop.eup %5489 }
 0x7d7   : > { %v2199_v5 = vmul.f32 %v5490_v1, %v2104_v54  ;;  %v5371_v11 = vpop.permute.xlu2 %5370  ;;  %vm2204_vm11 = vweird.f32 %v5490_v1  ;;  %v2131_v7 = vsel %vm2130_vm10, %v6161_v10, %v2127_v50  ;;  %vm2733_vm10 = vcmask 523264  }
 0x7d8   : > { %v5373_v18 = vunpack.i.h.bf16 %v5371_v11  ;;  %v5372_v19 = vunpack.i.l.bf16 %v5371_v11  ;;  %vm2205_vm13 = vmor %vm2203_vm12, %vm2204_vm11  ;;  %vm2133_vm12 = vcmp.eq.f32.partialorder %v2132_v8, 8.507059e+37  ;;  %v5377_v11 = vunpack.i.l.bf16 %v6169_v15  ;;  %v1835_v15 = vld [vmem:[%s6205_s4 + $0x18] sm:$0xff] }
 0x7d9   : > { %v5492_v20 = vpop.eup %5491  ;;  %v2200_v21 = vsub.f32 1.0, %v2199_v5  ;;  %v2136_v2 = vsel %vm2133_vm12, %v2135_v57, %v2131_v7  ;;  %v1832_v5 = vld [vmem:[%s6205_s4] sm:$0xff]  ;;  %v2679_v7 = vld [vmem:[%s6252_s24 + $0x8] sm:$0xff] }
 0x7da   : > { %v6172_v61 = vpop.eup %5493  ;;  %v2214_v12 = vmul.f32 %v5492_v20, %v2107_v63  ;;  %2301 = vmatpush.msra.mxu1 %v5373_v18  ;;  %2431 = vmatpush.msrb.mxu2 %v5372_v19  ;;  %vm2219_vm14 = vweird.f32 %v5492_v20  ;;  %v2180_v63 = vor.u32 1.1754944e-38, %v2179_v31  ;;  %v1834_v18 = vld [vmem:[%s6205_s4 + $0x10] sm:$0xff]  ;;  %v1833_v19 = vld [vmem:[%s6205_s4 + $0x8] sm:$0xff] }
 0x7db   : > { %v2201_v28 = vmul.f32 %v5490_v1, %v2200_v21  ;;  %5183 = vmatmul.msk.f32.vlgmr.msra.gmra.mxu1 %vm872_vm1, %v2152_v25  ;;  %v2184_v52 = vmul.f32 %v6172_v61, %v6155_v51  ;;  %vm2220_vm5 = vmor %vm2218_vm3, %vm2219_vm14  ;;  %vm2188_vm14 = vweird.f32 %v6155_v51 }
 0x7dc   : > { %v2215_v44 = vsub.f32 1.0, %v2214_v12  ;;  %2405 = vmatpush.msrb.mxu1 %v5378_v26  ;;  %2523 = vmatpush.msra.mxu2 %v1835_v15 }
 0x7dd   : > { %v2202_v27 = vadd.f32 %v5490_v1, %v2201_v28  ;;  %v2185_v55 = vsub.f32 1.0, %v2184_v52 }
 0x7de   : > { %v2216_v39 = vmul.f32 %v5492_v20, %v2215_v44  ;;  %2500 = vmatpush.msra.mxu1 %v1834_v18 }
 0x7df   : > { %v2206_v42 = vsel %vm2205_vm13, %v5490_v1, %v2202_v27  ;;  %v2186_v62 = vmul.f32 %v6172_v61, %v2185_v55  ;;  %vm2189_vm13 = vweird.f32 %v6172_v61  ;;  %v2137_v1 = vmul.f32 %v6114_v49, %v2136_v2  ;;  %v2251_v51 = vpop.f32.mrf.mxu3  ;;  %v2728_v2 = vld [vmem:[%s6263_s26 + $0x38] sm:$0xff] }
 0x7e0   : > { %v2211_v43 = vsel %vm2208_vm15, %v2210_v38, %v2206_v42  ;;  %v2217_v45 = vadd.f32 %v5492_v20, %v2216_v39  ;;  %vm2190_vm15 = vmor %vm2188_vm14, %vm2189_vm13 }
 0x7e1   : > { %v2212_v4 = vmul.f32 %v6133_v30, %v2211_v43  ;;  %v2177_v30 = vand.u32 2147483647, %v6150_v24 }
 0x7e2   : > { %v2221_v13 = vsel %vm2220_vm5, %v5492_v20, %v2217_v45 }
 0x7e3   : > { %v2226_v9 = vsel %vm2223_vm6, %v2225_v53, %v2221_v13  ;;  %5187 = vmatmul.msk.f32.vlgmr.msrb.gmra.mxu1 %vm872_vm1, %v2212_v4  ;;  %vm2178_vm11 = vcmp.eq.f32.partialorder %v2177_v30, 8.507059e+37 }
 0x7e4   : > { %v2227_v54 = vmul.f32 %v6136_v33, %v2226_v9  ;;  %v2181_v24 = vsel %vm2178_vm11, %v2180_v63, %v2176_v56  ;;  %v2187_v33 = vadd.f32 %v6172_v61, %v2186_v62  ;;  %2592 = vmatpush.msrb.mxu1 %v1834_v18  ;;  %v2680_v56 = vld [vmem:[%s6252_s24 + $0x10] sm:$0xff]  ;;  %v2678_v62 = vld [vmem:[%s6252_s24] sm:$0xff] }
 0x7e5   : > { %v2182_v6 = vmul.f32 %v6107_v40, %v2181_v24 }
 0x7e6   : > { %5188 = vmatmul.msk.f32.vlgmr.msrb.gmra.mxu2 %vm872_vm1, %v2227_v54  ;;  %v2191_v16 = vsel %vm2190_vm15, %v6172_v61, %v2187_v33  ;;  %v2681_v54 = vld [vmem:[%s6252_s24 + $0x18] sm:$0xff]  ;;  %v2727_v33 = vld [vmem:[%s6263_s26 + $0x30] sm:$0xff] }
 0x7e7   : > { %v2196_v40 = vsel %vm2193_vm2, %v2195_v17, %v2191_v16  ;;  %2615 = vmatpush.msrb.mxu2 %v1835_v15 }
 0x7e8   : > { %v2197_v49 = vmul.f32 %v6129_v22, %v2196_v40 }
 0x7ea   : > { %v5366_v48 = vpop.permute.xlu1 %5365 }
 0x7eb   : > { %v5368_v10 = vunpack.i.h.bf16 %v5366_v48  ;;  %v5367_v60 = vunpack.i.l.bf16 %v5366_v48 }
 0x7ed   : > { %2275 = vmatpush.msrb.mxu0 %v5368_v10  ;;  %2353 = vmatpush.msrb.mxu3 %v5367_v60 }
 0x7ee   : > { %5182 = vmatmul.msk.f32.vlgmr.msrb.gmra.mxu0 %vm872_vm1, %v2137_v1  ;;  %5185 = vmatmul.msk.f32.vlgmr.msrb.gmra.mxu3 %vm872_vm1, %v2182_v6  ;;  %v2725_v1 = vld [vmem:[%s6263_s26 + $0x20] sm:$0xff] }
 0x7ef   : > { %2379 = vmatpush.msra.mxu0 %v5377_v11  ;;  %2454 = vmatpush.msra.mxu3 %v1832_v5  ;;  %v2724_v11 = vld [vmem:[%s6263_s26 + $0x18] sm:$0xff] }
 0x7f1   : > { %2546 = vmatpush.msrb.mxu3 %v1832_v5  ;;  %2477 = vmatpush.msrb.mxu0 %v1833_v19 }
 0x7f6   : > { %5186 = vmatmul.msk.f32.vlgmr.msra.gmra.mxu0 %vm872_vm1, %v2197_v49  ;;  %5189 = vmatmul.msk.f32.vlgmr.msra.gmra.mxu3 %vm872_vm1, %v2251_v51  ;;  %v2672_v49 = vperm.slane %v6025_v34, 2 }
 0x7f7   : > { %2569 = vmatpush.msra.mxu0 %v1833_v19  ;;  %2704 = vmatpush.msra.mxu3 %v2681_v54  ;;  %v2675_v19 = vperm.slane %v6025_v34, 3 }
 0x7f9   : > { %2705 = vmatpush.msra.mxu3 %v2680_v56 }
 0x7fb   : > { %2706 = vmatpush.msra.mxu3 %v2679_v7 }
 0x7fd   : > { %2707 = vmatpush.msra.mxu3 %v2678_v62 }
 0x854   : > { %v2329_v20 = vpop.f32.mrf.mxu2 }
 0x855   : > { %5192 = vmatmul.msk.f32.vlgmr.msra.gmra.mxu2 %vm872_vm1, %v2329_v20 }
 0x858   : > { %v2303_v21 = vpop.f32.mrf.mxu1 }
 0x859   : > { %5191 = vmatmul.msk.f32.vlgmr.msra.gmra.mxu1 %vm872_vm1, %v2303_v21 }
 0x860   : > { %v2407_v22 = vpop.f32.mrf.mxu1 }
 0x861   : > { %5195 = vmatmul.msk.f32.vlgmr.msrb.gmra.mxu1 %vm872_vm1, %v2407_v22 }
 0x869   : > { %v2433_v25 = vpop.f32.mrf.mxu2 }
 0x86a   : > { %5196 = vmatmul.msk.f32.vlgmr.msrb.gmra.mxu2 %vm872_vm1, %v2433_v25 }
 0x86b   : > { %v2277_v61 = vpop.f32.mrf.mxu0 }
 0x86c   : > { %5190 = vmatmul.msk.f32.vlgmr.msrb.gmra.mxu0 %vm872_vm1, %v2277_v61 }
 0x86d   : > { %2748 = vmatpush.msrb.mxu0 %v2728_v2  ;;  %v5204_v2 = vld [vmem:[%s5706_s29 + $0x30] sm:$0xff] }
 0x86f   : > { %2749 = vmatpush.msrb.mxu0 %v2727_v33  ;;  %v5203_v33 = vld [vmem:[%s5706_s29 + $0x28] sm:$0xff] }
 0x871   : > { %v2355_v26 = vpop.f32.mrf.mxu3  ;;  %2750 = vmatpush.msrb.mxu0 %v2726_v58 }
 0x872   : > { %5193 = vmatmul.msk.f32.vlgmr.msrb.gmra.mxu3 %vm872_vm1, %v2355_v26 }
 0x873   : > { %v2381_v0 = vpop.f32.mrf.mxu0  ;;  %2751 = vmatpush.msrb.mxu0 %v2725_v1 }
 0x874   : > { %5194 = vmatmul.msk.f32.vlgmr.msra.gmra.mxu0 %vm872_vm1, %v2381_v0 }
 0x875   : > { %2752 = vmatpush.msrb.mxu0 %v2724_v11 }
 0x879   : > { %v2456_v12 = vpop.f32.mrf.mxu3 }
 0x8d6   : > { %v2502_v32 = vpop.f32.mrf.mxu1 }
 0x8d8   : > { %v2525_v44 = vpop.f32.mrf.mxu2 }
 0x8de   : > { %v2594_v42 = vpop.f32.mrf.mxu1 }
 0x8e9   : > { %v2479_v28 = vpop.f32.mrf.mxu0 }
 0x8ea   : > { %v2620_v29 = vadd.f32 %v2479_v28, %v2456_v12 }
 0x8ec   : > { %v2622_v36 = vadd.f32 %v2620_v29, %v2502_v32  ;;  %v2723_v32 = vld [vmem:[%s6263_s26 + $0x10] sm:$0xff] }
 0x8ed   : > { %v2617_v45 = vpop.f32.mrf.mxu2  ;;  %2753 = vmatpush.msrb.mxu0 %v2723_v32 }
 0x8ee   : > { %v2624_v52 = vadd.f32 %v2622_v36, %v2525_v44  ;;  %v2722_v36 = vld [vmem:[%s6263_s26 + $0x8] sm:$0xff]  ;;  %v2721_v44 = vld [vmem:[%s6263_s26] sm:$0xff] }
 0x8ef   : > { %2754 = vmatpush.msrb.mxu0 %v2722_v36 }
 0x8f0   : > { %v2626_v27 = vadd.f32 %v2624_v52, %v6029_v47  ;;  %v5419_v52 = vld [vmem:[%s6246_s6] ss:$0 sm:$0xff] }
 0x8f1   : > { %v2571_v38 = vpop.f32.mrf.mxu0  ;;  %2755 = vmatpush.msrb.mxu0 %v2721_v44 }
 0x8f2   : > { %v2628_v37 = vsel %vm822_vm0, %v2626_v27, 0.0 }
 0x8f3   : > { %2629 = vadd.xlane.f32.xlu0 %v2628_v37 }
 0x8f5   : > { %v2548_v39 = vpop.f32.mrf.mxu3 }
 0x8f6   : > { %v2621_v41 = vadd.f32 %v2571_v38, %v2548_v39 }
 0x8f8   : > { %v2623_v43 = vadd.f32 %v2621_v41, %v2594_v42 }
 0x8fa   : > { %v2625_v46 = vadd.f32 %v2623_v43, %v2617_v45 }
 0x8fc   : > { %v2627_v53 = vadd.f32 %v2625_v46, %v6033_v35  ;;  %v5420_v46 = vld [vmem:[%s6280_s11] ss:$0 sm:$0xff] }
 0x8fe   : > { %v2631_v4 = vsel %vm822_vm0, %v2627_v53, 0.0 }
 0x8ff   : > { %2632 = vadd.xlane.f32.xlu1 %v2631_v4 }
 0x966   : > { %v2630_v50 = vpop.xlane.xlu0 %2629 }
 0x967   : > { %v2634_v47 = vmul.f32 %v2630_v50, %v5988_v59 }
 0x969   : > { %v2636_v55 = vsub.f32 %v2626_v27, %v2634_v47 }
 0x96b   : > { %v2638_v13 = vmul.f32 %v2636_v55, %v2636_v55 }
 0x96d   : > { %v2640_v31 = vsel %vm822_vm0, %v2638_v13, 0.0 }
 0x96e   : > { %2641 = vadd.xlane.f32.xlu2 %v2640_v31 }
 0x972   : > { %v2633_v14 = vpop.xlane.xlu1 %2632 }
 0x973   : > { %v2635_v9 = vmul.f32 %v2633_v14, %v5988_v59 }
 0x975   : > { %v2637_v30 = vsub.f32 %v2627_v53, %v2635_v9 }
 0x977   : > { %v2639_v8 = vmul.f32 %v2637_v30, %v2637_v30 }
 0x979   : > { %v2643_v35 = vsel %vm822_vm0, %v2639_v8, 0.0 }
 0x97a   : > { %2644 = vadd.xlane.f32.xlu0 %v2643_v35 }
 0x9e1   : > { %v2642_v63 = vpop.xlane.xlu2 %2641 }
 0x9e2   : > { %v2646_v57 = vmul.f32 %v2642_v63, %v5988_v59 }
 0x9e4   : > { %v2648_v24 = vadd.f32 1e-05, %v2646_v57 }
 0x9e6   : > { %5495 = vrsqrt.f32 %v2648_v24  ;;  %vm2656_vm4 = vweird.f32 %v2648_v24 }
 0x9ec   : > { %v5496_v48 = vpop.eup %5495 }
 0x9ed   : > { %v2651_v10 = vmul.f32 %v5496_v48, %v2648_v24  ;;  %v2645_v60 = vpop.xlane.xlu0 %2644  ;;  %vm2657_vm3 = vweird.f32 %v5496_v48  ;;  %v5205_v24 = vld [vmem:[%s5706_s29 + $0x38] sm:$0xff] }
 0x9ee   : > { %v2647_v3 = vmul.f32 %v2645_v60, %v5988_v59  ;;  %vm2658_vm5 = vmor %vm2656_vm4, %vm2657_vm3  ;;  %2840 = vmatpush.msra.mxu1 %v5205_v24 }
 0x9ef   : > { %v2652_v6 = vmul.f32 %v5496_v48, %v2651_v10 }
 0x9f0   : > { %v2649_v5 = vadd.f32 1e-05, %v2647_v3  ;;  %2841 = vmatpush.msra.mxu1 %v5204_v2 }
 0x9f1   : > { %v2653_v16 = vmul.f32 0.5, %v2652_v6 }
 0x9f2   : > { %5497 = vrsqrt.f32 %v2649_v5  ;;  %vm2666_vm7 = vweird.f32 %v2649_v5  ;;  %2842 = vmatpush.msra.mxu1 %v5203_v33 }
 0x9f3   : > { %v2654_v17 = vsub.f32 1.5, %v2653_v16 }
 0x9f5   : > { %v2655_v40 = vmul.f32 %v5496_v48, %v2654_v17 }
 0x9f7   : > { %v2659_v51 = vsel %vm2658_vm5, %v5496_v48, %v2655_v40  ;;  %v5202_v48 = vld [vmem:[%s5706_s29 + $0x20] sm:$0xff]  ;;  %s6979_s29 = smov 64  }
 0x9f8   : > { %v5498_v15 = vpop.eup %5497  ;;  %v2670_v18 = vmul.f32 %v2659_v51, %v2636_v55  ;;  %2843 = vmatpush.msra.mxu1 %v5202_v48  ;;  %v5579_v51 = vld [vmem:[%s6022_s22] sm:$0x3f] }
 0x9f9   : > { %v2661_v20 = vmul.f32 %v5498_v15, %v2649_v5  ;;  %vm2667_vm6 = vweird.f32 %v5498_v15 }
 0x9fa   : > { %v2673_v21 = vmul.f32 %v2672_v49, %v2670_v18  ;;  %vm2668_vm8 = vmor %vm2666_vm7, %vm2667_vm6 }
 0x9fb   : > { %v2662_v22 = vmul.f32 %v5498_v15, %v2661_v20 }
 0x9fc   : > { %v2676_v25 = vadd.f32 %v2675_v19, %v2673_v21  ;;  %v2812_v21 = vperm.slane %v5579_v51, 5 }
 0x9fd   : > { %v2663_v61 = vmul.f32 0.5, %v2662_v22 }
 0x9fe   : > { %5197 = vmatmul.msk.f32.vlgmr.msra.gmra.mxu3 %vm822_vm0, %v2676_v25 }
 0x9ff   : > { %v2664_v26 = vsub.f32 1.5, %v2663_v61 }
 0xa01   : > { %v2665_v0 = vmul.f32 %v5498_v15, %v2664_v26 }
 0xa03   : > { %v2669_v12 = vsel %vm2668_vm8, %v5498_v15, %v2665_v0  ;;  %v2809_v15 = vperm.slane %v5579_v51, 4 }
 0xa04   : > { %v2671_v28 = vmul.f32 %v2669_v12, %v2637_v30 }
 0xa06   : > { %v2674_v34 = vmul.f32 %v2672_v49, %v2671_v28 }
 0xa08   : > { %v2677_v29 = vadd.f32 %v2675_v19, %v2674_v34 }
 0xa0a   : > { %5198 = vmatmul.msk.f32.gmra.mxu3 %vm822_vm0, %v2677_v29 }
 0xa81   : > { %v2709_v27 = vpop.f32.mrf.mxu3 }
 0xa82   : > { %v2710_v37 = vadd.f32 %v5419_v52, %v2709_v27 }
 0xa84   : > { %vm2715_vm9 = vcmp.gt.f32.partialorder %v2710_v37, 0.0  ;;  %v2717_v38 = vmul.f32 0.01, %v2710_v37 }
 0xa86   : > { %v2719_v39 = vsel %vm2715_vm9, %v2710_v37, %v2717_v38 }
 0xa87   : > { %5199 = vmatmul.msk.f32.vlgmr.msrb.gmra.mxu0 %vm2733_vm10, %v2719_v39 }
 0xa8d   : > { %v2712_v41 = vpop.f32.mrf.mxu3 }
 0xa8e   : > { %v2713_v42 = vadd.f32 %v5419_v52, %v2712_v41 }
 0xa90   : > { %v2718_v43 = vmul.f32 0.01, %v2713_v42  ;;  %vm2716_vm11 = vcmp.gt.f32.partialorder %v2713_v42, 0.0 }
 0xa92   : > { %v2720_v45 = vsel %vm2716_vm11, %v2713_v42, %v2718_v43 }
 0xa93   : > { %5200 = vmatmul.msk.f32.gmra.mxu0 %vm2733_vm10, %v2720_v45 }
 0xb04   : > { %v2757_v53 = vpop.f32.mrf.mxu0 }
 0xb05   : > { %v2758_v4 = vadd.f32 %v5420_v46, %v2757_v53 }
 0xb07   : > { %v2763_v50 = vadd.f32 %v2758_v4, %v2676_v25 }
 0xb09   : > { %v2765_v47 = vsel %vm822_vm0, %v2763_v50, 0.0 }
 0xb0a   : > { %2766 = vadd.xlane.f32.xlu1 %v2765_v47 }
 0xb10   : > { %v2760_v55 = vpop.f32.mrf.mxu0 }
 0xb11   : > { %v2761_v13 = vadd.f32 %v5420_v46, %v2760_v55 }
 0xb13   : > { %v2764_v31 = vadd.f32 %v2761_v13, %v2677_v29 }
 0xb15   : > { %v2768_v14 = vsel %vm822_vm0, %v2764_v31, 0.0 }
 0xb16   : > { %2769 = vadd.xlane.f32.xlu0 %v2768_v14 }
 0xb7d   : > { %v2767_v9 = vpop.xlane.xlu1 %2766 }
 0xb7e   : > { %v2771_v30 = vmul.f32 %v2767_v9, %v5988_v59 }
 0xb80   : > { %v2773_v8 = vsub.f32 %v2763_v50, %v2771_v30 }
 0xb82   : > { %v2775_v35 = vmul.f32 %v2773_v8, %v2773_v8 }
 0xb84   : > { %v2777_v54 = vsel %vm822_vm0, %v2775_v35, 0.0 }
 0xb85   : > { %2778 = vadd.xlane.f32.xlu2 %v2777_v54 }
 0xb89   : > { %v2770_v56 = vpop.xlane.xlu0 %2769 }
 0xb8a   : > { %v2772_v7 = vmul.f32 %v2770_v56, %v5988_v59 }
 0xb8c   : > { %v2774_v62 = vsub.f32 %v2764_v31, %v2772_v7 }
 0xb8e   : > { %v2776_v63 = vmul.f32 %v2774_v62, %v2774_v62 }
 0xb90   : > { %v2780_v57 = vsel %vm822_vm0, %v2776_v63, 0.0 }
 0xb91   : > { %2781 = vadd.xlane.f32.xlu1 %v2780_v57 }
 0xbf8   : > { %v2779_v58 = vpop.xlane.xlu2 %2778 }
 0xbf9   : > { %v2783_v10 = vmul.f32 %v2779_v58, %v5988_v59 }
 0xbfb   : > { %v2785_v60 = vadd.f32 1e-05, %v2783_v10 }
 0xbfd   : > { %5499 = vrsqrt.f32 %v2785_v60  ;;  %vm2793_vm13 = vweird.f32 %v2785_v60 }
 0xc03   : > { %v5500_v3 = vpop.eup %5499 }
 0xc04   : > { %v2788_v1 = vmul.f32 %v5500_v3, %v2785_v60  ;;  %v2782_v6 = vpop.xlane.xlu1 %2781  ;;  %vm2794_vm12 = vweird.f32 %v5500_v3 }
 0xc05   : > { %v2784_v5 = vmul.f32 %v2782_v6, %v5988_v59  ;;  %vm2795_vm14 = vmor %vm2793_vm13, %vm2794_vm12 }
 0xc06   : > { %v2789_v11 = vmul.f32 %v5500_v3, %v2788_v1 }
 0xc07   : > { %v2786_v16 = vadd.f32 1e-05, %v2784_v5 }
 0xc08   : > { %v2790_v17 = vmul.f32 0.5, %v2789_v11 }
 0xc09   : > { %5501 = vrsqrt.f32 %v2786_v16  ;;  %vm2803_vm2 = vweird.f32 %v2786_v16 }
 0xc0a   : > { %v2791_v40 = vsub.f32 1.5, %v2790_v17 }
 0xc0c   : > { %v2792_v49 = vmul.f32 %v5500_v3, %v2791_v40 }
 0xc0e   : > { %v2796_v18 = vsel %vm2795_vm14, %v5500_v3, %v2792_v49 }
 0xc0f   : > { %v5502_v19 = vpop.eup %5501  ;;  %v2807_v20 = vmul.f32 %v2796_v18, %v2773_v8 }
 0xc10   : > { %v2798_v22 = vmul.f32 %v5502_v19, %v2786_v16  ;;  %vm2804_vm15 = vweird.f32 %v5502_v19 }
 0xc11   : > { %v2810_v25 = vmul.f32 %v2809_v15, %v2807_v20  ;;  %vm2805_vm3 = vmor %vm2803_vm2, %vm2804_vm15 }
 0xc12   : > { %v2799_v61 = vmul.f32 %v5502_v19, %v2798_v22 }
 0xc13   : > { %v6302_v26 = vadd.f32 %v2812_v21, %v2810_v25 }
 0xc14   : > { %v2800_v0 = vmul.f32 0.5, %v2799_v61 }
 0xc15   : > { %5206 = vmatmul.msk.f32.vlgmr.msra.gmra.mxu1 %vm822_vm0, %v6302_v26 }
 0xc16   : > { %v2801_v12 = vsub.f32 1.5, %v2800_v0 }
 0xc18   : > { %v2802_v28 = vmul.f32 %v5502_v19, %v2801_v12 }
 0xc1a   : > { %v2806_v34 = vsel %vm2805_vm3, %v5502_v19, %v2802_v28 }
 0xc1b   : > { %v2808_v29 = vmul.f32 %v2806_v34, %v2774_v62 }
 0xc1d   : > { %v2811_v32 = vmul.f32 %v2809_v15, %v2808_v29 }
 0xc1f   : > { %v6306_v36 = vadd.f32 %v2812_v21, %v2811_v32 }
 0xc21   : > { %5207 = vmatmul.msk.f32.gmra.mxu1 %vm822_vm0, %v6306_v36 }
 0xc92   : > { %v6310_v44 = vpop.f32.mrf.mxu1 }
 0xc93   : > { %2854 = vrot.lane.b32.xlu2 %v6310_v44, %s6974_s19  ;;  %2852 = vrot.lane.b32.xlu0 %v6310_v44, %s6973_s30 }
 0xc9b   : > { %2856 = vrot.lane.b32.xlu0 %v6310_v44, %s6976_s20 }
 0xc9e   : > { %v6318_v52 = vpop.f32.mrf.mxu1 }
 0xc9f   : > { %2861 = vrot.lane.b32.xlu2 %v6318_v52, %s6974_s19  ;;  %2859 = vrot.lane.b32.xlu1 %v6318_v52, %s6973_s30 }
 0xca3   : > { %2863 = vrot.lane.b32.xlu0 %v6318_v52, %s6976_s20 }
 0xca7   : > { %2870 = vrot.lane.b32.xlu1 %v6310_v44, %s6977_s23 }
 0xcaf   : > { %2974 = vrot.lane.b32.xlu1 %v6318_v52, %s6977_s23 }
 0xced   : > { %v6330_v27 = vpop.permute.xlu2 %2854 }
 0xcee   : > { %2922 = vrot.lane.b32.xlu0 %v6330_v27, %s6977_s23 }
 0xcf9   : > { %v6334_v37 = vpop.permute.xlu2 %2861 }
 0xcfa   : > { %3026 = vrot.lane.b32.xlu1 %v6334_v37, %s6977_s23 }
 0xd05   : > { %v6338_v38 = vpop.permute.xlu0 %2852 }
 0xd06   : > { %2896 = vrot.lane.b32.xlu2 %v6338_v38, %s6977_s23  ;;  %v5379_v51 = vpack.i.bf16 %v6338_v38, %v6310_v44 }
 0xd0d   : > { %v6342_v39 = vpop.permute.xlu0 %2856 }
 0xd0e   : > { %2948 = vrot.lane.b32.xlu0 %v6342_v39, %s6977_s23 }
 0xd11   : > { %v6346_v41 = vpop.permute.xlu1 %2859 }
 0xd12   : > { %3000 = vrot.lane.b32.xlu2 %v6346_v41, %s6977_s23 }
 0xd15   : > { %v6350_v42 = vpop.permute.xlu0 %2863 }
 0xd19   : > { %v2871_v43 = vpop.permute.xlu1 %2870 }
 0xd1a   : > { %3052 = vrot.lane.b32.xlu2 %v6350_v42, %s6977_s23  ;;  %5212 = vmatpush.xpose.msk.msra.mxu2 %vm872_vm1, %v2871_v43 }
 0xd1d   : > { %5213 = vmatmul.msk.f32.vlgmr.msra.gmra.mxu2 %vm872_vm1, %v6310_v44 }
 0xd21   : > { %v2975_v53 = vpop.permute.xlu1 %2974 }
 0xd60   : > { %v2923_v45 = vpop.permute.xlu0 %2922  ;;  %v2897_v46 = vpop.permute.xlu2 %2896 }
 0xd61   : > { %5214 = vmatpush.xpose.msk.msrb.mxu2 %vm872_vm1, %v2897_v46  ;;  %5216 = vmatpush.xpose.msk.msrb.mxu3 %vm872_vm1, %v2923_v45 }
 0xd64   : > { %5215 = vmatmul.msk.f32.vlgmr.msrb.gmra.mxu2 %vm872_vm1, %v6338_v38  ;;  %5217 = vmatmul.msk.f32.vlgmr.msrb.gmra.mxu3 %vm872_vm1, %v6330_v27 }
 0xd65   : > { %5220 = vmatpush.xpose.msk.msra.mxu2 %vm872_vm1, %v2975_v53 }
 0xd6c   : > { %v3001_v4 = vpop.permute.xlu2 %3000  ;;  %5221 = vmatmul.msk.f32.vlgmr.msra.gmra.mxu2 %vm872_vm1, %v6318_v52  ;;  %v3027_v50 = vpop.permute.xlu1 %3026 }
 0xd6d   : > { %5222 = vmatpush.xpose.msk.msra.mxu3 %vm872_vm1, %v3001_v4  ;;  %5224 = vmatpush.xpose.msk.msra.mxu0 %vm872_vm1, %v3027_v50 }
 0xd70   : > { %5223 = vmatmul.msk.f32.vlgmr.msra.gmra.mxu3 %vm872_vm1, %v6346_v41  ;;  %5225 = vmatmul.msk.f32.vlgmr.msra.gmra.mxu0 %vm872_vm1, %v6334_v37 }
 0xd74   : > { %v3053_v55 = vpop.permute.xlu2 %3052 }
 0xd80   : > { %v2949_v47 = vpop.permute.xlu0 %2948 }
 0xd81   : > { %5218 = vmatpush.xpose.msk.msrb.mxu1 %vm872_vm1, %v2949_v47 }
 0xd84   : > { %5219 = vmatmul.msk.f32.vlgmr.msrb.gmra.mxu1 %vm872_vm1, %v6342_v39 }
 0xd85   : > { %5226 = vmatpush.xpose.msk.msra.mxu1 %vm872_vm1, %v3053_v55 }
 0xd8c   : > { %5227 = vmatmul.msk.f32.vlgmr.msra.gmra.mxu1 %vm872_vm1, %v6350_v42 }
 0xda0   : > { %v2893_v13 = vpop.f32.mrf.mxu2 }
 0xda1   : > { %v3078_v31 = vmul.f32 %v2893_v13, %v5798_v23 }
 0xda3   : > { %v3086_v14 = vsel %vm872_vm1, %v3078_v31, -inf }
 0xda4   : > { %3087 = vmax.xlane.f32.xlu0 %v3086_v14 }
 0xde7   : > { %v2919_v9 = vpop.f32.mrf.mxu2  ;;  %v2945_v35 = vpop.f32.mrf.mxu3 }
 0xde8   : > { %v3079_v30 = vmul.f32 %v2919_v9, %v5798_v23  ;;  %v3080_v57 = vmul.f32 %v2945_v35, %v5798_v23 }
 0xdea   : > { %v3089_v8 = vsel %vm872_vm1, %v3079_v30, -inf  ;;  %v3092_v48 = vsel %vm872_vm1, %v3080_v57, -inf }
 0xdeb   : > { %3090 = vmax.xlane.f32.xlu1 %v3089_v8 }
 0xded   : > { %v3049_v2 = vpop.f32.mrf.mxu0 }
 0xdee   : > { %v3084_v33 = vmul.f32 %v3049_v2, %v5798_v23 }
 0xdef   : > { %v2997_v54 = vpop.f32.mrf.mxu2 }
 0xdf0   : > { %v6383_v56 = vmul.f32 %v2997_v54, %v5798_v23  ;;  %v3104_v58 = vsel %vm872_vm1, %v3084_v33, -inf }
 0xdf2   : > { %v3098_v7 = vsel %vm872_vm1, %v6383_v56, -inf }
 0xdf3   : > { %v3023_v62 = vpop.f32.mrf.mxu3  ;;  %3099 = vmax.xlane.f32.xlu2 %v3098_v7  ;;  %v5394_v7 = vpack.i.bf16 %v6350_v42, %v6334_v37 }
 0xdf4   : > { %v3083_v63 = vmul.f32 %v3023_v62, %v5798_v23 }
 0xdf6   : > { %v3101_v24 = vsel %vm872_vm1, %v3083_v63, -inf }
 0xdf7   : > { %3102 = vmax.xlane.f32.xlu0 %v3101_v24 }
 0xdfb   : > { %3093 = vmax.xlane.f32.xlu2 %v3092_v48 }
 0xdff   : > { %3105 = vmax.xlane.f32.xlu0 %v3104_v58 }
 0xe01   : > { %v2971_v10 = vpop.f32.mrf.mxu1 }
 0xe02   : > { %v3081_v60 = vmul.f32 %v2971_v10, %v5798_v23 }
 0xe04   : > { %v3095_v3 = vsel %vm872_vm1, %v3081_v60, -inf }
 0xe05   : > { %3096 = vmax.xlane.f32.xlu1 %v3095_v3 }
 0xe09   : > { %v3075_v1 = vpop.f32.mrf.mxu1 }
 0xe0a   : > { %v3085_v6 = vmul.f32 %v3075_v1, %v5798_v23 }
 0xe0c   : > { %v3107_v5 = vsel %vm872_vm1, %v3085_v6, -inf }
 0xe0d   : > { %3108 = vmax.xlane.f32.xlu2 %v3107_v5 }
 0xe17   : > { %v3088_v11 = vpop.xlane.xlu0 %3087 }
 0xe18   : > { %v3110_v16 = vsub.f32 %v3078_v31, %v3088_v11 }
 0xe1a   : > { %v3118_v17 = vmul.f32 1.442695, %v3110_v16 }
 0xe1c   : > { %5503 = vpow2.f32 %v3118_v17 }
 0xe22   : > { %v6397_v40 = vpop.eup %5503 }
 0xe23   : > { %v3134_v49 = vsel %vm872_vm1, %v6397_v40, 0.0 }
 0xe24   : > { %3135 = vadd.xlane.f32.xlu1 %v3134_v49 }
 0xe3d   : > { %5380 = vrot.lane.b32.xlu1 %v5379_v51, %s6979_s29 }
 0xe5e   : > { %v3091_v15 = vpop.xlane.xlu1 %3090 }
 0xe5f   : > { %v3111_v18 = vsub.f32 %v3079_v30, %v3091_v15 }
 0xe61   : > { %v3120_v19 = vmul.f32 1.442695, %v3111_v18 }
 0xe63   : > { %5505 = vpow2.f32 %v3120_v19 }
 0xe66   : > { %v3100_v20 = vpop.xlane.xlu2 %3099 }
 0xe67   : > { %v3114_v50 = vsub.f32 %v6383_v56, %v3100_v20 }
 0xe69   : > { %v6404_v21 = vpop.eup %5505  ;;  %v3126_v13 = vmul.f32 1.442695, %v3114_v50 }
 0xe6a   : > { %v3103_v22 = vpop.xlane.xlu0 %3102  ;;  %v3137_v25 = vsel %vm872_vm1, %v6404_v21, 0.0 }
 0xe6b   : > { %v3115_v61 = vsub.f32 %v3083_v63, %v3103_v22  ;;  %3138 = vadd.xlane.f32.xlu0 %v3137_v25 }
 0xe6d   : > { %v3128_v0 = vmul.f32 1.442695, %v3115_v61 }
 0xe6e   : > { %v3094_v12 = vpop.xlane.xlu2 %3093 }
 0xe6f   : > { %5507 = vpow2.f32 %v3128_v0  ;;  %v3112_v28 = vsub.f32 %v3080_v57, %v3094_v12  ;;  %v5384_v57 = vpack.i.bf16 %v6346_v41, %v6318_v52 }
 0xe71   : > { %v3122_v34 = vmul.f32 1.442695, %v3112_v28 }
 0xe72   : > { %v3106_v29 = vpop.xlane.xlu0 %3105 }
 0xe73   : > { %5509 = vpow2.f32 %v3122_v34  ;;  %v3116_v32 = vsub.f32 %v3084_v33, %v3106_v29 }
 0xe75   : > { %v6408_v44 = vpop.eup %5507  ;;  %v3130_v38 = vmul.f32 1.442695, %v3116_v32 }
 0xe76   : > { %v3149_v43 = vsel %vm872_vm1, %v6408_v44, 0.0 }
 0xe77   : > { %3150 = vadd.xlane.f32.xlu1 %v3149_v43  ;;  %5511 = vpow2.f32 %v3130_v38 }
 0xe78   : > { %v3097_v45 = vpop.xlane.xlu1 %3096 }
 0xe79   : > { %v6412_v46 = vpop.eup %5509  ;;  %v3113_v53 = vsub.f32 %v3081_v60, %v3097_v45  ;;  %v5389_v60 = vpack.i.bf16 %v6342_v39, %v6330_v27 }
 0xe7a   : > { %v3140_v4 = vsel %vm872_vm1, %v6412_v46, 0.0 }
 0xe7b   : > { %v3124_v47 = vmul.f32 1.442695, %v3113_v53  ;;  %3141 = vadd.xlane.f32.xlu0 %v3140_v4 }
 0xe7d   : > { %5513 = vpow2.f32 %v3124_v47  ;;  %v6417_v55 = vpop.eup %5511 }
 0xe7e   : > { %v3152_v14 = vsel %vm872_vm1, %v6417_v55, 0.0  ;;  %5515 = vpow2.f32 %v3126_v13 }
 0xe80   : > { %v3109_v31 = vpop.xlane.xlu2 %3108 }
 0xe81   : > { %v3117_v30 = vsub.f32 %v3085_v6, %v3109_v31 }
 0xe83   : > { %v6421_v9 = vpop.eup %5513  ;;  %3153 = vadd.xlane.f32.xlu0 %v3152_v14  ;;  %v3132_v35 = vmul.f32 1.442695, %v3117_v30 }
 0xe84   : > { %v3143_v8 = vsel %vm872_vm1, %v6421_v9, 0.0  ;;  %v6425_v54 = vpop.eup %5515 }
 0xe85   : > { %3144 = vadd.xlane.f32.xlu2 %v3143_v8  ;;  %5517 = vpow2.f32 %v3132_v35  ;;  %v3146_v56 = vsel %vm872_vm1, %v6425_v54, 0.0 }
 0xe8b   : > { %v6432_v62 = vpop.eup %5517 }
 0xe8c   : > { %v3155_v63 = vsel %vm872_vm1, %v6432_v62, 0.0 }
 0xe8d   : > { %3147 = vadd.xlane.f32.xlu2 %v3146_v56 }
 0xe90   : > { %5395 = vrot.lane.b32.xlu1 %v5394_v7, %s6979_s29 }
 0xe95   : > { %3156 = vadd.xlane.f32.xlu2 %v3155_v63 }
 0xe97   : > { %5385 = vrot.lane.b32.xlu0 %v5384_v57, %s6979_s29  ;;  %v3136_v24 = vpop.xlane.xlu1 %3135 }
 0xe98   : > { %5519 = vrcp.f32 %v3136_v24  ;;  %v3169_v42 = vand.u32 2147483648, %v3136_v24  ;;  %vm3163_vm5 = vweird.f32 %v3136_v24  ;;  %v3167_v10 = vand.u32 2147483647, %v3136_v24 }
 0xe9a   : > { %v3170_v52 = vor.u32 1.1754944e-38, %v3169_v42  ;;  %vm3168_vm7 = vcmp.eq.f32.partialorder %v3167_v10, 8.507059e+37 }
 0xe9e   : > { %v5520_v2 = vpop.eup %5519 }
 0xe9f   : > { %v3159_v33 = vmul.f32 %v5520_v2, %v3136_v24  ;;  %vm3164_vm4 = vweird.f32 %v5520_v2 }
 0xea0   : > { %vm3165_vm6 = vmor %vm3163_vm5, %vm3164_vm4 }
 0xea1   : > { %v3160_v48 = vsub.f32 1.0, %v3159_v33 }
 0xea3   : > { %v3161_v58 = vmul.f32 %v5520_v2, %v3160_v48 }
 0xea5   : > { %v3162_v37 = vadd.f32 %v5520_v2, %v3161_v58 }
 0xea7   : > { %v3166_v3 = vsel %vm3165_vm6, %v5520_v2, %v3162_v37 }
 0xea8   : > { %v3171_v41 = vsel %vm3168_vm7, %v3170_v52, %v3166_v3 }
 0xea9   : > { %v3172_v11 = vmul.f32 %v6397_v40, %v3171_v41 }
 0xead   : > { %5390 = vrot.lane.b32.xlu2 %v5389_v60, %s6979_s29 }
 0xeaf   : > { %v5381_v1 = vpop.permute.xlu1 %5380 }
 0xeb0   : > { %v5383_v6 = vunpack.i.h.bf16 %v5381_v1  ;;  %v5382_v5 = vunpack.i.l.bf16 %v5381_v1 }
 0xeb2   : > { %3299 = vmatpush.msrb.mxu2 %v5382_v5  ;;  %3325 = vmatpush.msrb.mxu3 %v5383_v6 }
 0xeb3   : > { %5228 = vmatmul.msk.f32.vlgmr.msrb.gmra.mxu2 %vm872_vm1, %v3172_v11 }
 0xede   : > { %v3139_v16 = vpop.xlane.xlu0 %3138 }
 0xedf   : > { %5521 = vrcp.f32 %v3139_v16  ;;  %v3184_v39 = vand.u32 2147483648, %v3139_v16  ;;  %v3182_v15 = vand.u32 2147483647, %v3139_v16  ;;  %vm3178_vm9 = vweird.f32 %v3139_v16 }
 0xee1   : > { %v3185_v20 = vor.u32 1.1754944e-38, %v3184_v39  ;;  %vm3183_vm12 = vcmp.eq.f32.partialorder %v3182_v15, 8.507059e+37 }
 0xee5   : > { %v5522_v17 = vpop.eup %5521 }
 0xee6   : > { %v3174_v49 = vmul.f32 %v5522_v17, %v3139_v16  ;;  %vm3179_vm8 = vweird.f32 %v5522_v17 }
 0xee7   : > { %vm3180_vm11 = vmor %vm3178_vm9, %vm3179_vm8 }
 0xee8   : > { %v3175_v27 = vsub.f32 1.0, %v3174_v49 }
 0xeea   : > { %v3176_v51 = vmul.f32 %v5522_v17, %v3175_v27  ;;  %v3151_v18 = vpop.xlane.xlu1 %3150 }
 0xeeb   : > { %5523 = vrcp.f32 %v3151_v18  ;;  %v3244_v13 = vand.u32 2147483648, %v3151_v18  ;;  %vm3238_vm14 = vweird.f32 %v3151_v18  ;;  %v3242_v31 = vand.u32 2147483647, %v3151_v18 }
 0xeec   : > { %v3177_v19 = vadd.f32 %v5522_v17, %v3176_v51 }
 0xeed   : > { %v3245_v7 = vor.u32 1.1754944e-38, %v3244_v13  ;;  %vm3243_vm2 = vcmp.eq.f32.partialorder %v3242_v31, 8.507059e+37  ;;  %v5246_v13 = vld [vmem:[%s5998_s1 + $0x30] sm:$0xff] }
 0xeee   : > { %v3181_v40 = vsel %vm3180_vm11, %v5522_v17, %v3177_v19  ;;  %v6444_v22 = vpop.xlane.xlu0 %3141 }
 0xeef   : > { %v3186_v25 = vsel %vm3183_vm12, %v3185_v20, %v3181_v40  ;;  %5525 = vrcp.f32 %v6444_v22  ;;  %vm3193_vm3 = vweird.f32 %v6444_v22  ;;  %v3197_v2 = vand.u32 2147483647, %v6444_v22 }
 0xef0   : > { %v3187_v61 = vmul.f32 %v6404_v21, %v3186_v25  ;;  %v3199_v42 = vand.u32 2147483648, %v6444_v22 }
 0xef1   : > { %v5524_v0 = vpop.eup %5523  ;;  %vm3198_vm11 = vcmp.eq.f32.partialorder %v3197_v2, 8.507059e+37 }
 0xef2   : > { %5229 = vmatmul.msk.f32.vlgmr.msrb.gmra.mxu3 %vm872_vm1, %v3187_v61  ;;  %v3234_v12 = vmul.f32 %v5524_v0, %v3151_v18  ;;  %vm3239_vm13 = vweird.f32 %v5524_v0  ;;  %v3200_v15 = vor.u32 1.1754944e-38, %v3199_v42 }
 0xef3   : > { %vm3240_vm15 = vmor %vm3238_vm14, %vm3239_vm13 }
 0xef4   : > { %v3235_v34 = vsub.f32 1.0, %v3234_v12 }
 0xef5   : > { %v6449_v28 = vpop.eup %5525 }
 0xef6   : > { %v6451_v29 = vpop.xlane.xlu0 %3153  ;;  %v3189_v38 = vmul.f32 %v6449_v28, %v6444_v22  ;;  %v3236_v43 = vmul.f32 %v5524_v0, %v3235_v34  ;;  %vm3194_vm4 = vweird.f32 %v6449_v28 }
 0xef7   : > { %vm6481_vm7 = vmor %vm3193_vm3, %vm3194_vm4  ;;  %vm3253_vm12 = vweird.f32 %v6451_v29  ;;  %v3257_v19 = vand.u32 2147483647, %v6451_v29 }
 0xef8   : > { %v3145_v32 = vpop.xlane.xlu2 %3144  ;;  %v3190_v45 = vsub.f32 1.0, %v3189_v38  ;;  %v3237_v53 = vadd.f32 %v5524_v0, %v3236_v43 }
 0xef9   : > { %5527 = vrcp.f32 %v3145_v32  ;;  %vm3208_vm6 = vweird.f32 %v3145_v32  ;;  %v3214_v10 = vand.u32 2147483648, %v3145_v32  ;;  %v3212_v52 = vand.u32 2147483647, %v3145_v32 }
 0xefa   : > { %5529 = vrcp.f32 %v6451_v29  ;;  %v3191_v30 = vmul.f32 %v6449_v28, %v3190_v45  ;;  %v3241_v8 = vsel %vm3240_vm15, %v5524_v0, %v3237_v53 }
 0xefb   : > { %v3246_v57 = vsel %vm3243_vm2, %v3245_v7, %v3241_v8  ;;  %v3215_v18 = vor.u32 1.1754944e-38, %v3214_v10  ;;  %vm3213_vm13 = vcmp.eq.f32.partialorder %v3212_v52, 8.507059e+37 }
 0xefc   : > { %v3192_v24 = vadd.f32 %v6449_v28, %v3191_v30  ;;  %v3247_v49 = vmul.f32 %v6408_v44, %v3246_v57 }
 0xefe   : > { %v3196_v5 = vsel %vm6481_vm7, %v6449_v28, %v3192_v24 }
 0xeff   : > { %v6456_v21 = vpop.eup %5527  ;;  %v3201_v40 = vsel %vm3198_vm11, %v3200_v15, %v3196_v5 }
 0xf00   : > { %v3204_v4 = vmul.f32 %v6456_v21, %v3145_v32  ;;  %v6459_v50 = vpop.xlane.xlu2 %3147  ;;  %v6461_v47 = vpop.eup %5529  ;;  %vm3209_vm5 = vweird.f32 %v6456_v21  ;;  %v3259_v32 = vand.u32 2147483648, %v6451_v29  ;;  %v3202_v53 = vmul.f32 %v6412_v46, %v3201_v40 }
 0xf01   : > { %5531 = vrcp.f32 %v6459_v50  ;;  %v3249_v35 = vmul.f32 %v6461_v47, %v6451_v29  ;;  %vm6488_vm8 = vmor %vm3208_vm6, %vm3209_vm5  ;;  %v3227_v16 = vand.u32 2147483647, %v6459_v50  ;;  %v3229_v17 = vand.u32 2147483648, %v6459_v50 }
 0xf02   : > { %v3205_v14 = vsub.f32 1.0, %v3204_v4  ;;  %vm3223_vm14 = vweird.f32 %v6459_v50  ;;  %vm3254_vm15 = vweird.f32 %v6461_v47  ;;  %v5396_v12 = vpop.permute.xlu1 %5395  ;;  %v3260_v29 = vor.u32 1.1754944e-38, %v3259_v32 }
 0xf03   : > { %v3250_v33 = vsub.f32 1.0, %v3249_v35  ;;  %v3230_v25 = vor.u32 1.1754944e-38, %v3229_v17  ;;  %vm3228_vm3 = vcmp.eq.f32.partialorder %v3227_v16, 8.507059e+37  ;;  %vm6515_vm4 = vmor %vm3253_vm12, %vm3254_vm15  ;;  %v5398_v31 = vunpack.i.h.bf16 %v5396_v12  ;;  %v5208_v35 = vld [vmem:[%s5891_s0 + $0x20] sm:$0xff] }
 0xf04   : > { %v3206_v56 = vmul.f32 %v6456_v21, %v3205_v14  ;;  %v5397_v14 = vunpack.i.l.bf16 %v5396_v12  ;;  %vm3258_vm6 = vcmp.eq.f32.partialorder %v3257_v19, 8.507059e+37 }
 0xf05   : > { %v3251_v27 = vmul.f32 %v6461_v47, %v3250_v33  ;;  %v5209_v33 = vld [vmem:[%s5891_s0 + $0x28] sm:$0xff] }
 0xf06   : > { %v3207_v48 = vadd.f32 %v6456_v21, %v3206_v56 }
 0xf07   : > { %v5532_v63 = vpop.eup %5531  ;;  %v3252_v61 = vadd.f32 %v6461_v47, %v3251_v27 }
 0xf08   : > { %v3219_v58 = vmul.f32 %v5532_v63, %v6459_v50  ;;  %v6475_v37 = vpop.xlane.xlu2 %3156  ;;  %v3211_v39 = vsel %vm6488_vm8, %v6456_v21, %v3207_v48  ;;  %vm3224_vm9 = vweird.f32 %v5532_v63  ;;  %v5210_v48 = vld [vmem:[%s5891_s0 + $0x30] sm:$0xff] }
 0xf09   : > { %5533 = vrcp.f32 %v6475_v37  ;;  %v5386_v60 = vpop.permute.xlu0 %5385  ;;  %v3216_v22 = vsel %vm3213_vm13, %v3215_v18, %v3211_v39  ;;  %vm3225_vm2 = vmor %vm3223_vm14, %vm3224_vm9  ;;  %v3274_v30 = vand.u32 2147483648, %v6475_v37  ;;  %v3256_v46 = vsel %vm6515_vm4, %v6461_v47, %v3252_v61  ;;  %v5250_v61 = vld [vmem:[%s5971_s27 + $0x20] sm:$0xff] }
 0xf0a   : > { %v3220_v41 = vsub.f32 1.0, %v3219_v58  ;;  %v5388_v1 = vunpack.i.h.bf16 %v5386_v60  ;;  %v5387_v6 = vunpack.i.l.bf16 %v5386_v60  ;;  %v3217_v4 = vmul.f32 %v6421_v9, %v3216_v22  ;;  %v5211_v58 = vld [vmem:[%s5891_s0 + $0x38] sm:$0xff]  ;;  %v5252_v22 = vld [vmem:[%s5971_s27 + $0x30] sm:$0xff] }
 0xf0b   : > { %vm3268_vm7 = vweird.f32 %v6475_v37  ;;  %v3261_v47 = vsel %vm3258_vm6, %v3260_v29, %v3256_v46  ;;  %v3275_v56 = vor.u32 1.1754944e-38, %v3274_v30 }
 0xf0c   : > { %v3221_v51 = vmul.f32 %v5532_v63, %v3220_v41  ;;  %3403 = vmatpush.msra.mxu2 %v5387_v6  ;;  %3429 = vmatpush.msra.mxu3 %v5388_v1  ;;  %v3262_v57 = vmul.f32 %v6417_v55, %v3261_v47 }
 0xf0d   : > { %5233 = vmatmul.msk.f32.vlgmr.msra.gmra.mxu3 %vm872_vm1, %v3247_v49 }
 0xf0e   : > { %v3222_v44 = vadd.f32 %v5532_v63, %v3221_v51  ;;  %3504 = vmatpush.msrb.mxu2 %v5208_v35  ;;  %3527 = vmatpush.msrb.mxu3 %v5209_v33 }
 0xf0f   : > { %v5534_v20 = vpop.eup %5533 }
 0xf10   : > { %v3226_v0 = vsel %vm3225_vm2, %v5532_v63, %v3222_v44  ;;  %v3264_v28 = vmul.f32 %v5534_v20, %v6475_v37  ;;  %v5391_v34 = vpop.permute.xlu2 %5390  ;;  %vm3269_vm5 = vweird.f32 %v5534_v20  ;;  %3619 = vmatpush.msra.mxu3 %v5209_v33 }
 0xf11   : > { %v3231_v38 = vsel %vm3228_vm3, %v3230_v25, %v3226_v0  ;;  %v5393_v43 = vunpack.i.h.bf16 %v5391_v34  ;;  %v5392_v21 = vunpack.i.l.bf16 %v5391_v34  ;;  %vm3270_vm8 = vmor %vm3268_vm7, %vm3269_vm5  ;;  %v5251_v25 = vld [vmem:[%s5971_s27 + $0x28] sm:$0xff]  ;;  %v5580_v0 = vld [vmem:[%s5983_s21] sm:$0xff] }
 0xf12   : > { %v3265_v45 = vsub.f32 1.0, %v3264_v28  ;;  %v3232_v50 = vmul.f32 %v6425_v54, %v3231_v38  ;;  %v3272_v54 = vand.u32 2147483647, %v6475_v37  ;;  %v5581_v38 = vld [vmem:[%s5983_s21 + $0x8] sm:$0xff] }
 0xf13   : > { %3351 = vmatpush.msrb.mxu0 %v5392_v21  ;;  %3377 = vmatpush.msrb.mxu1 %v5393_v43 }
 0xf14   : > { %v3266_v9 = vmul.f32 %v5534_v20, %v3265_v45  ;;  %5230 = vmatmul.msk.f32.vlgmr.msrb.gmra.mxu0 %vm872_vm1, %v3202_v53  ;;  %5231 = vmatmul.msk.f32.vlgmr.msrb.gmra.mxu1 %vm872_vm1, %v3217_v4  ;;  %vm3273_vm9 = vcmp.eq.f32.partialorder %v3272_v54, 8.507059e+37 }
 0xf15   : > { %5232 = vmatmul.msk.f32.vlgmr.msra.gmra.mxu2 %vm872_vm1, %v3232_v50  ;;  %3455 = vmatpush.msra.mxu0 %v5397_v14  ;;  %v5247_v50 = vld [vmem:[%s5998_s1 + $0x38] sm:$0xff]  ;;  %v5244_v14 = vld [vmem:[%s5998_s1 + $0x20] sm:$0xff] }
 0xf16   : > { %v3267_v8 = vadd.f32 %v5534_v20, %v3266_v9  ;;  %3481 = vmatpush.msra.mxu1 %v5398_v31  ;;  %3596 = vmatpush.msra.mxu2 %v5208_v35  ;;  %v5245_v31 = vld [vmem:[%s5998_s1 + $0x28] sm:$0xff] }
 0xf17   : > { %3550 = vmatpush.msrb.mxu0 %v5210_v48 }
 0xf18   : > { %v3271_v7 = vsel %vm3270_vm8, %v5534_v20, %v3267_v8  ;;  %3573 = vmatpush.msrb.mxu1 %v5211_v58 }
 0xf19   : > { %v3276_v63 = vsel %vm3273_vm9, %v3275_v56, %v3271_v7 }
 0xf1a   : > { %v3277_v24 = vmul.f32 %v6432_v62, %v3276_v63  ;;  %v6573_v63 = vld [vmem:[%s6022_s22 + $0x8] sm:$0x3f] }
 0xf1c   : > { %5234 = vmatmul.msk.f32.vlgmr.msra.gmra.mxu0 %vm872_vm1, %v3262_v57  ;;  %5235 = vmatmul.msk.f32.vlgmr.msra.gmra.mxu1 %vm872_vm1, %v3277_v24 }
 0xf1d   : > { %3642 = vmatpush.msra.mxu0 %v5210_v48  ;;  %3665 = vmatpush.msra.mxu1 %v5211_v58  ;;  %v3722_v48 = vperm.slane %v6573_v63, 0 }
 0xf36   : > { %v3301_v2 = vpop.f32.mrf.mxu2 }
 0xf37   : > { %5236 = vmatmul.msk.f32.vlgmr.msrb.gmra.mxu2 %vm872_vm1, %v3301_v2 }
 0xf38   : > { %3751 = vmatpush.msrb.mxu2 %v5247_v50 }
 0xf3a   : > { %3752 = vmatpush.msrb.mxu2 %v5246_v13 }
 0xf3c   : > { %3753 = vmatpush.msrb.mxu2 %v5245_v31 }
 0xf3e   : > { %3754 = vmatpush.msrb.mxu2 %v5244_v14 }
 0xf75   : > { %v3327_v37 = vpop.f32.mrf.mxu3 }
 0xf76   : > { %5237 = vmatmul.msk.f32.vlgmr.msrb.gmra.mxu3 %vm872_vm1, %v3327_v37 }
 0xf90   : > { %v3431_v55 = vpop.f32.mrf.mxu3 }
 0xf91   : > { %v3353_v62 = vpop.f32.mrf.mxu0  ;;  %v3379_v42 = vpop.f32.mrf.mxu1  ;;  %5241 = vmatmul.msk.f32.vlgmr.msra.gmra.mxu3 %vm872_vm1, %v3431_v55  ;;  %v3725_v55 = vperm.slane %v6573_v63, 1 }
 0xf92   : > { %5238 = vmatmul.msk.f32.vlgmr.msrb.gmra.mxu0 %vm872_vm1, %v3353_v62  ;;  %5239 = vmatmul.msk.f32.vlgmr.msrb.gmra.mxu1 %vm872_vm1, %v3379_v42 }
 0xf98   : > { %v3405_v10 = vpop.f32.mrf.mxu2 }
 0xf99   : > { %5240 = vmatmul.msk.f32.vlgmr.msra.gmra.mxu2 %vm872_vm1, %v3405_v10  ;;  %v3457_v60 = vpop.f32.mrf.mxu0  ;;  %v3483_v3 = vpop.f32.mrf.mxu1 }
 0xf9a   : > { %5242 = vmatmul.msk.f32.vlgmr.msra.gmra.mxu0 %vm872_vm1, %v3457_v60  ;;  %5243 = vmatmul.msk.f32.vlgmr.msra.gmra.mxu1 %vm872_vm1, %v3483_v3 }
 0xfba   : > { %v3506_v41 = vpop.f32.mrf.mxu2 }
 0xff9   : > { %v3529_v52 = vpop.f32.mrf.mxu3 }
 0xffa   : > { %v3670_v1 = vadd.f32 %v3529_v52, %v3506_v41 }
0x100f   : > { %v3552_v6 = vpop.f32.mrf.mxu0  ;;  %v3575_v11 = vpop.f32.mrf.mxu1 }
0x1010   : > { %v3672_v5 = vadd.f32 %v3670_v1, %v3552_v6 }
0x1012   : > { %v3674_v16 = vadd.f32 %v3672_v5, %v3575_v11 }
0x1014   : > { %v3676_v17 = vadd.f32 %v3674_v16, %v6302_v26  ;;  %v3621_v27 = vpop.f32.mrf.mxu3  ;;  %v5253_v26 = vld [vmem:[%s5971_s27 + $0x38] sm:$0xff] }
0x1015   : > { %3779 = vmatpush.msrb.mxu3 %v5253_v26 }
0x1016   : > { %v3678_v49 = vsel %vm822_vm0, %v3676_v17, 0.0 }
0x1017   : > { %3679 = vadd.xlane.f32.xlu0 %v3678_v49  ;;  %v3644_v15 = vpop.f32.mrf.mxu0  ;;  %v3667_v19 = vpop.f32.mrf.mxu1  ;;  %3780 = vmatpush.msrb.mxu3 %v5252_v22 }
0x1019   : > { %3781 = vmatpush.msrb.mxu3 %v5251_v25 }
0x101b   : > { %3782 = vmatpush.msrb.mxu3 %v5250_v61 }
0x101c   : > { %v3598_v39 = vpop.f32.mrf.mxu2  ;;  %5254 = vmatmul.msk.f32.vlgmr.msrb.gmra.mxu3 %vm822_vm0, %v5580_v0 }
0x101d   : > { %v3671_v51 = vadd.f32 %v3621_v27, %v3598_v39 }
0x101f   : > { %v3673_v18 = vadd.f32 %v3671_v51, %v3644_v15 }
0x1021   : > { %v3675_v44 = vadd.f32 %v3673_v18, %v3667_v19 }
0x1023   : > { %v3677_v20 = vadd.f32 %v3675_v44, %v6306_v36 }
0x1024   : > { %5255 = vmatmul.msk.f32.gmra.mxu3 %vm822_vm0, %v5581_v38 }
0x1025   : > { %v3681_v40 = vsel %vm822_vm0, %v3677_v20, 0.0 }
0x1026   : > { %3682 = vadd.xlane.f32.xlu1 %v3681_v40 }
0x108a   : > { %v3680_v12 = vpop.xlane.xlu0 %3679 }
0x108b   : > { %v3684_v36 = vmul.f32 %v3680_v12, %v5988_v59 }
0x108d   : > { %v3686_v28 = vsub.f32 %v3676_v17, %v3684_v36 }
0x108f   : > { %v3688_v34 = vmul.f32 %v3686_v28, %v3686_v28 }
0x1091   : > { %v3690_v32 = vsel %vm822_vm0, %v3688_v34, 0.0 }
0x1092   : > { %3691 = vadd.xlane.f32.xlu2 %v3690_v32 }
0x1099   : > { %v3683_v43 = vpop.xlane.xlu1 %3682 }
0x109a   : > { %v3685_v21 = vmul.f32 %v3683_v43, %v5988_v59 }
0x109c   : > { %v3687_v45 = vsub.f32 %v3677_v20, %v3685_v21 }
0x109e   : > { %v3689_v53 = vmul.f32 %v3687_v45, %v3687_v45 }
0x109f   : > { %v6565_v8 = vpop.f32.mrf.mxu3 }
0x10a0   : > { %v3693_v4 = vsel %vm822_vm0, %v3689_v53, 0.0  ;;  %3805 = vrot.lane.b32.xlu1 %v6565_v8, %s6973_s30  ;;  %5260 = vmatpush.xpose.msk.msrb.mxu0 %vm872_vm1, %v6565_v8 }
0x10a1   : > { %3694 = vadd.xlane.f32.xlu0 %v3693_v4 }
0x10a7   : > { %v6575_v33 = vpop.f32.mrf.mxu3 }
0x10a8   : > { %5268 = vmatpush.xpose.msk.msra.mxu2 %vm872_vm1, %v6575_v33 }
0x10aa   : > { %3812 = vrot.lane.b32.xlu2 %v6575_v33, %s6973_s30 }
0x10b2   : > { %3809 = vrot.lane.b32.xlu2 %v6565_v8, %s6976_s20 }
0x10ba   : > { %3814 = vrot.lane.b32.xlu2 %v6575_v33, %s6974_s19 }
0x1105   : > { %v3692_v30 = vpop.xlane.xlu2 %3691 }
0x1106   : > { %v3696_v46 = vmul.f32 %v3692_v30, %v5988_v59 }
0x1108   : > { %v3698_v9 = vadd.f32 1e-05, %v3696_v46 }
0x110a   : > { %5535 = vrsqrt.f32 %v3698_v9  ;;  %vm3706_vm12 = vweird.f32 %v3698_v9 }
0x110d   : > { %v6599_v27 = vpop.permute.xlu2 %3812 }
0x110e   : > { %5270 = vmatpush.xpose.msk.msra.mxu3 %vm872_vm1, %v6599_v27 }
0x1110   : > { %v5536_v54 = vpop.eup %5535 }
0x1111   : > { %v3701_v29 = vmul.f32 %v5536_v54, %v3698_v9  ;;  %vm3707_vm11 = vweird.f32 %v5536_v54 }
0x1112   : > { %vm3708_vm13 = vmor %vm3706_vm12, %vm3707_vm11  ;;  %v6595_v17 = vpop.permute.xlu1 %3805 }
0x1113   : > { %v3702_v35 = vmul.f32 %v5536_v54, %v3701_v29  ;;  %5262 = vmatpush.xpose.msk.msrb.mxu1 %vm872_vm1, %v6595_v17 }
0x1114   : > { %v3695_v47 = vpop.xlane.xlu0 %3694 }
0x1115   : > { %v3703_v56 = vmul.f32 0.5, %v3702_v35  ;;  %v3697_v7 = vmul.f32 %v3695_v47, %v5988_v59  ;;  %v6605_v39 = vpop.permute.xlu2 %3809 }
0x1117   : > { %v3704_v57 = vsub.f32 1.5, %v3703_v56  ;;  %v3699_v24 = vadd.f32 1e-05, %v3697_v7  ;;  %5266 = vmatpush.xpose.msk.msra.mxu1 %vm872_vm1, %v6605_v39 }
0x1119   : > { %v3705_v2 = vmul.f32 %v5536_v54, %v3704_v57  ;;  %5537 = vrsqrt.f32 %v3699_v24  ;;  %vm3716_vm15 = vweird.f32 %v3699_v24 }
0x111b   : > { %v3709_v58 = vsel %vm3708_vm13, %v5536_v54, %v3705_v2 }
0x111c   : > { %v3720_v37 = vmul.f32 %v3709_v58, %v3686_v28 }
0x111d   : > { %v6622_v19 = vpop.permute.xlu2 %3814 }
0x111e   : > { %v3723_v62 = vmul.f32 %v3722_v48, %v3720_v37 }
0x111f   : > { %v5538_v42 = vpop.eup %5537 }
0x1120   : > { %v3711_v10 = vmul.f32 %v5538_v42, %v3699_v24  ;;  %v6583_v60 = vadd.f32 %v3725_v55, %v3723_v62  ;;  %vm3717_vm14 = vweird.f32 %v5538_v42 }
0x1121   : > { %vm3718_vm2 = vmor %vm3716_vm15, %vm3717_vm14 }
0x1122   : > { %v3712_v3 = vmul.f32 %v5538_v42, %v3711_v10  ;;  %5248 = vmatmul.msk.f32.vlgmr.msrb.gmra.mxu2 %vm822_vm0, %v6583_v60 }
0x1124   : > { %v3713_v52 = vmul.f32 0.5, %v3712_v3 }
0x1126   : > { %v3714_v41 = vsub.f32 1.5, %v3713_v52 }
0x1128   : > { %v3715_v1 = vmul.f32 %v5538_v42, %v3714_v41 }
0x112a   : > { %v3719_v6 = vsel %vm3718_vm2, %v5538_v42, %v3715_v1  ;;  %v5399_v42 = vpack.i.bf16 %v6595_v17, %v6565_v8 }
0x112b   : > { %v3721_v5 = vmul.f32 %v3719_v6, %v3687_v45 }
0x112d   : > { %v3724_v11 = vmul.f32 %v3722_v48, %v3721_v5 }
0x112f   : > { %v6591_v16 = vadd.f32 %v3725_v55, %v3724_v11 }
0x1131   : > { %5249 = vmatmul.msk.f32.gmra.mxu2 %vm822_vm0, %v6591_v16 }
0x11a5   : > { %v3756_v49 = vpop.f32.mrf.mxu2 }
0x11a6   : > { %5261 = vmatmul.msk.f32.vlgmr.msrb.gmra.mxu0 %vm872_vm1, %v3756_v49  ;;  %3791 = vrot.lane.b32.xlu0 %v3756_v49, %s6973_s30 }
0x11ae   : > { %3807 = vrot.lane.b32.xlu0 %v6565_v8, %s6974_s19 }
0x11b4   : > { %v3759_v51 = vpop.f32.mrf.mxu2 }
0x11b5   : > { %3802 = vrot.lane.b32.xlu2 %v3759_v51, %s6976_s20  ;;  %3798 = vrot.lane.b32.xlu1 %v3759_v51, %s6973_s30 }
0x11b6   : > { %5269 = vmatmul.msk.f32.vlgmr.msra.gmra.mxu2 %vm872_vm1, %v3759_v51  ;;  %3795 = vrot.lane.b32.xlu0 %v3756_v49, %s6976_s20 }
0x11bd   : > { %3793 = vrot.lane.b32.xlu1 %v3756_v49, %s6974_s19 }
0x11be   : > { %3800 = vrot.lane.b32.xlu0 %v3759_v51, %s6974_s19 }
0x11c5   : > { %3816 = vrot.lane.b32.xlu1 %v6575_v33, %s6976_s20  ;;  %s805_s20 = scalar_lea.vmem %s6937_s15, %s7004_s25 }
0x120f   : > { %v3803_v36 = vpop.permute.xlu2 %3802 }
0x1218   : > { %v3792_v15 = vpop.permute.xlu0 %3791 }
0x1219   : > { %5263 = vmatmul.msk.f32.vlgmr.msrb.gmra.mxu1 %vm872_vm1, %v3792_v15 }
0x1220   : > { %v6620_v18 = vpop.permute.xlu0 %3807 }
0x1221   : > { %5264 = vmatpush.xpose.msk.msra.mxu0 %vm872_vm1, %v6620_v18 }
0x1223   : > { %v3844_v44 = vpop.f32.mrf.mxu0 }
0x1224   : > { %v4015_v20 = vmul.f32 %v3844_v44, %v5798_v23 }
0x1225   : > { %5272 = vmatpush.xpose.msk.msrb.mxu0 %vm872_vm1, %v6622_v19 }
0x1226   : > { %v4023_v40 = vsel %vm872_vm1, %v4015_v20, -inf }
0x1227   : > { %v3799_v26 = vpop.permute.xlu1 %3798  ;;  %4024 = vmax.xlane.f32.xlu1 %v4023_v40 }
0x1228   : > { %5271 = vmatmul.msk.f32.vlgmr.msra.gmra.mxu3 %vm872_vm1, %v3799_v26  ;;  %v3796_v22 = vpop.permute.xlu0 %3795 }
0x1229   : > { %5267 = vmatmul.msk.f32.vlgmr.msra.gmra.mxu1 %vm872_vm1, %v3796_v22 }
0x122f   : > { %v3794_v25 = vpop.permute.xlu1 %3793 }
0x1230   : > { %5265 = vmatmul.msk.f32.vlgmr.msra.gmra.mxu0 %vm872_vm1, %v3794_v25  ;;  %v3801_v61 = vpop.permute.xlu0 %3800 }
0x1237   : > { %v6633_v0 = vpop.permute.xlu1 %3816 }
0x1238   : > { %5273 = vmatmul.msk.f32.vlgmr.msrb.gmra.mxu0 %vm872_vm1, %v3801_v61  ;;  %5274 = vmatpush.xpose.msk.msrb.mxu1 %vm872_vm1, %v6633_v0 }
0x1239   : > { %v3940_v12 = vpop.f32.mrf.mxu2 }
0x123a   : > { %v4019_v28 = vmul.f32 %v3940_v12, %v5798_v23 }
0x123b   : > { %5275 = vmatmul.msk.f32.vlgmr.msrb.gmra.mxu1 %vm872_vm1, %v3803_v36 }
0x123c   : > { %v4035_v34 = vsel %vm872_vm1, %v4019_v28, -inf }
0x123d   : > { %4036 = vmax.xlane.f32.xlu2 %v4035_v34 }
0x1296   : > { %v3868_v32 = vpop.f32.mrf.mxu1 }
0x1297   : > { %v4016_v38 = vmul.f32 %v3868_v32, %v5798_v23 }
0x1299   : > { %v4026_v43 = vsel %vm872_vm1, %v4016_v38, -inf }
0x129a   : > { %4027 = vmax.xlane.f32.xlu0 %v4026_v43  ;;  %v4025_v21 = vpop.xlane.xlu1 %4024 }
0x129b   : > { %v4047_v45 = vsub.f32 %v4015_v20, %v4025_v21 }
0x129d   : > { %v4055_v53 = vmul.f32 1.442695, %v4047_v45 }
0x129f   : > { %5539 = vpow2.f32 %v4055_v53 }
0x12a5   : > { %v6646_v46 = vpop.eup %5539 }
0x12a6   : > { %v3916_v4 = vpop.f32.mrf.mxu1  ;;  %v4071_v47 = vsel %vm872_vm1, %v6646_v46, 0.0 }
0x12a7   : > { %v4018_v50 = vmul.f32 %v3916_v4, %v5798_v23 }
0x12a9   : > { %v4032_v13 = vsel %vm872_vm1, %v4018_v50, -inf }
0x12aa   : > { %4033 = vmax.xlane.f32.xlu2 %v4032_v13 }
0x12ab   : > { %v3964_v31 = vpop.f32.mrf.mxu3 }
0x12ac   : > { %v4020_v14 = vmul.f32 %v3964_v31, %v5798_v23 }
0x12ad   : > { %v3892_v30 = vpop.f32.mrf.mxu0 }
0x12ae   : > { %v4017_v9 = vmul.f32 %v3892_v30, %v5798_v23  ;;  %v4038_v54 = vsel %vm872_vm1, %v4020_v14, -inf }
0x12af   : > { %4039 = vmax.xlane.f32.xlu1 %v4038_v54 }
0x12b0   : > { %v4037_v29 = vpop.xlane.xlu2 %4036  ;;  %v4029_v35 = vsel %vm872_vm1, %v4017_v9, -inf }
0x12b1   : > { %4030 = vmax.xlane.f32.xlu0 %v4029_v35  ;;  %v4051_v56 = vsub.f32 %v4019_v28, %v4037_v29 }
0x12b2   : > { %4072 = vadd.xlane.f32.xlu2 %v4071_v47 }
0x12b3   : > { %v4063_v57 = vmul.f32 1.442695, %v4051_v56 }
0x12b5   : > { %v3988_v7 = vpop.f32.mrf.mxu0  ;;  %5541 = vpow2.f32 %v4063_v57 }
0x12b6   : > { %v4021_v24 = vmul.f32 %v3988_v7, %v5798_v23 }
0x12b8   : > { %v4012_v2 = vpop.f32.mrf.mxu1  ;;  %v4041_v48 = vsel %vm872_vm1, %v4021_v24, -inf }
0x12b9   : > { %v4022_v58 = vmul.f32 %v4012_v2, %v5798_v23  ;;  %4042 = vmax.xlane.f32.xlu1 %v4041_v48  ;;  %v5404_v2 = vpack.i.bf16 %v6599_v27, %v6575_v33 }
0x12bb   : > { %v4044_v37 = vsel %vm872_vm1, %v4022_v58, -inf  ;;  %v6657_v55 = vpop.eup %5541 }
0x12bc   : > { %4045 = vmax.xlane.f32.xlu0 %v4044_v37  ;;  %v4083_v62 = vsel %vm872_vm1, %v6657_v55, 0.0 }
0x12c4   : > { %4084 = vadd.xlane.f32.xlu0 %v4083_v62 }
0x12ca   : > { %5400 = vrot.lane.b32.xlu2 %v5399_v42, %s6977_s23 }
0x130d   : > { %v4028_v10 = vpop.xlane.xlu0 %4027 }
0x130e   : > { %v4048_v3 = vsub.f32 %v4016_v38, %v4028_v10 }
0x1310   : > { %v4057_v52 = vmul.f32 1.442695, %v4048_v3 }
0x1312   : > { %5543 = vpow2.f32 %v4057_v52 }
0x1318   : > { %v6664_v23 = vpop.eup %5543 }
0x1319   : > { %v4074_v41 = vsel %vm872_vm1, %v6664_v23, 0.0 }
0x131a   : > { %4075 = vadd.xlane.f32.xlu1 %v4074_v41 }
0x131d   : > { %v4034_v1 = vpop.xlane.xlu2 %4033 }
0x131e   : > { %v4050_v6 = vsub.f32 %v4018_v50, %v4034_v1 }
0x1320   : > { %v4061_v5 = vmul.f32 1.442695, %v4050_v6 }
0x1322   : > { %5545 = vpow2.f32 %v4061_v5  ;;  %v4040_v11 = vpop.xlane.xlu1 %4039 }
0x1323   : > { %v4052_v49 = vsub.f32 %v4020_v14, %v4040_v11 }
0x1324   : > { %v4031_v51 = vpop.xlane.xlu0 %4030 }
0x1325   : > { %v4065_v8 = vmul.f32 1.442695, %v4052_v49  ;;  %v4049_v17 = vsub.f32 %v4017_v9, %v4031_v51  ;;  %v4073_v15 = vpop.xlane.xlu2 %4072 }
0x1326   : > { %5547 = vrcp.f32 %v4073_v15  ;;  %v4106_v53 = vand.u32 2147483648, %v4073_v15  ;;  %v4104_v31 = vand.u32 2147483647, %v4073_v15  ;;  %vm4100_vm4 = vweird.f32 %v4073_v15 }
0x1327   : > { %5549 = vpow2.f32 %v4065_v8  ;;  %v4059_v44 = vmul.f32 1.442695, %v4049_v17 }
0x1328   : > { %v6668_v20 = vpop.eup %5545  ;;  %v4107_v9 = vor.u32 1.1754944e-38, %v4106_v53  ;;  %vm4105_vm6 = vcmp.eq.f32.partialorder %v4104_v31, 8.507059e+37 }
0x1329   : > { %5551 = vpow2.f32 %v4059_v44  ;;  %v4080_v40 = vsel %vm872_vm1, %v6668_v20, 0.0 }
0x132a   : > { %4081 = vadd.xlane.f32.xlu0 %v4080_v40 }
0x132c   : > { %v5548_v26 = vpop.eup %5547  ;;  %v4043_v22 = vpop.xlane.xlu1 %4042 }
0x132d   : > { %v6672_v25 = vpop.eup %5549  ;;  %v4096_v61 = vmul.f32 %v5548_v26, %v4073_v15  ;;  %v4053_v12 = vsub.f32 %v4021_v24, %v4043_v22  ;;  %v5401_v36 = vpop.permute.xlu2 %5400  ;;  %vm4101_vm3 = vweird.f32 %v5548_v26  ;;  %v5414_v24 = vpack.i.bf16 %v6633_v0, %v6622_v19 }
0x132e   : > { %v5403_v28 = vunpack.i.h.bf16 %v5401_v36  ;;  %v5402_v34 = vunpack.i.l.bf16 %v5401_v36  ;;  %v4086_v32 = vsel %vm872_vm1, %v6672_v25, 0.0  ;;  %vm4102_vm5 = vmor %vm4100_vm4, %vm4101_vm3 }
0x132f   : > { %v6676_v38 = vpop.eup %5551  ;;  %v4097_v43 = vsub.f32 1.0, %v4096_v61  ;;  %v4067_v21 = vmul.f32 1.442695, %v4053_v12  ;;  %v4046_v45 = vpop.xlane.xlu0 %4045  ;;  %4087 = vadd.xlane.f32.xlu2 %v4086_v32 }
0x1330   : > { %v4054_v4 = vsub.f32 %v4022_v58, %v4046_v45  ;;  %v4077_v50 = vsel %vm872_vm1, %v6676_v38, 0.0  ;;  %4236 = vmatpush.msrb.mxu2 %v5402_v34  ;;  %4262 = vmatpush.msrb.mxu3 %v5403_v28 }
0x1331   : > { %v4098_v13 = vmul.f32 %v5548_v26, %v4097_v43  ;;  %5553 = vpow2.f32 %v4067_v21  ;;  %4078 = vadd.xlane.f32.xlu1 %v4077_v50 }
0x1332   : > { %v4069_v14 = vmul.f32 1.442695, %v4054_v4 }
0x1333   : > { %v4099_v30 = vadd.f32 %v5548_v26, %v4098_v13 }
0x1334   : > { %5555 = vpow2.f32 %v4069_v14  ;;  %v5256_v14 = vld [vmem:[%s6205_s4 + $0x20] sm:$0xff] }
0x1335   : > { %v4103_v54 = vsel %vm4102_vm5, %v5548_v26, %v4099_v30 }
0x1336   : > { %v4108_v29 = vsel %vm4105_vm6, %v4107_v9, %v4103_v54  ;;  %v5258_v54 = vld [vmem:[%s6205_s4 + $0x30] sm:$0xff] }
0x1337   : > { %v6680_v35 = vpop.eup %5553  ;;  %v4109_v47 = vmul.f32 %v6646_v46, %v4108_v29  ;;  %v5409_v46 = vpack.i.bf16 %v6605_v39, %v6620_v18  ;;  %v6699_v62 = vpop.xlane.xlu0 %4084 }
0x1338   : > { %v4089_v56 = vsel %vm872_vm1, %v6680_v35, 0.0  ;;  %v4164_v28 = vand.u32 2147483647, %v6699_v62  ;;  %vm4160_vm14 = vweird.f32 %v6699_v62  ;;  %v4166_v13 = vand.u32 2147483648, %v6699_v62 }
0x1339   : > { %5276 = vmatmul.msk.f32.vlgmr.msrb.gmra.mxu2 %vm872_vm1, %v4109_v47  ;;  %4090 = vadd.xlane.f32.xlu1 %v4089_v56 }
0x133a   : > { %v6686_v7 = vpop.eup %5555  ;;  %vm6741_vm2 = vcmp.eq.f32.partialorder %v4164_v28, 8.507059e+37 }
0x133b   : > { %v4092_v57 = vsel %vm872_vm1, %v6686_v7, 0.0 }
0x133c   : > { %4093 = vadd.xlane.f32.xlu0 %v4092_v57 }
0x1347   : > { %5415 = vrot.lane.b32.xlu2 %v5414_v24, %s6977_s23 }
0x1350   : > { %5410 = vrot.lane.b32.xlu0 %v5409_v46, %s6977_s23 }
0x1352   : > { %5405 = vrot.lane.b32.xlu1 %v5404_v2, %s6977_s23 }
0x138d   : > { %v4076_v48 = vpop.xlane.xlu1 %4075 }
0x138e   : > { %5557 = vrcp.f32 %v4076_v48  ;;  %v4121_v19 = vand.u32 2147483648, %v4076_v48  ;;  %v4119_v10 = vand.u32 2147483647, %v4076_v48  ;;  %vm4115_vm8 = vweird.f32 %v4076_v48 }
0x138f   : > { %5559 = vrcp.f32 %v6699_v62 }
0x1390   : > { %v4122_v39 = vor.u32 1.1754944e-38, %v4121_v19  ;;  %vm4120_vm11 = vcmp.eq.f32.partialorder %v4119_v10, 8.507059e+37 }
0x1394   : > { %v5558_v58 = vpop.eup %5557 }
0x1395   : > { %v4111_v37 = vmul.f32 %v5558_v58, %v4076_v48  ;;  %vm4116_vm7 = vweird.f32 %v5558_v58  ;;  %v5560_v6 = vpop.eup %5559 }
0x1396   : > { %vm4117_vm9 = vmor %vm4115_vm8, %vm4116_vm7  ;;  %v4156_v11 = vmul.f32 %v5560_v6, %v6699_v62  ;;  %vm4161_vm12 = vweird.f32 %v5560_v6  ;;  %v4167_v62 = vor.u32 1.1754944e-38, %v4166_v13 }
0x1397   : > { %v4112_v42 = vsub.f32 1.0, %v4111_v37  ;;  %vm6737_vm15 = vmor %vm4160_vm14, %vm4161_vm12 }
0x1398   : > { %v4157_v17 = vsub.f32 1.0, %v4156_v11 }
0x1399   : > { %v4113_v0 = vmul.f32 %v5558_v58, %v4112_v42 }
0x139a   : > { %v4158_v22 = vmul.f32 %v5560_v6, %v4157_v17 }
0x139b   : > { %v4114_v3 = vadd.f32 %v5558_v58, %v4113_v0 }
0x139c   : > { %v4159_v43 = vadd.f32 %v5560_v6, %v4158_v22 }
0x139d   : > { %v4118_v18 = vsel %vm4117_vm9, %v5558_v58, %v4114_v3  ;;  %v4082_v52 = vpop.xlane.xlu0 %4081 }
0x139e   : > { %v4123_v33 = vsel %vm4120_vm11, %v4122_v39, %v4118_v18  ;;  %5561 = vrcp.f32 %v4082_v52  ;;  %v4151_v4 = vand.u32 2147483648, %v4082_v52  ;;  %vm4145_vm3 = vweird.f32 %v4082_v52 }
0x139f   : > { %v4124_v27 = vmul.f32 %v6664_v23, %v4123_v33  ;;  %v4149_v30 = vand.u32 2147483647, %v4082_v52  ;;  %v4163_v57 = vsel %vm6737_vm15, %v5560_v6, %v4159_v43 }
0x13a0   : > { %v4152_v46 = vor.u32 1.1754944e-38, %v4151_v4  ;;  %v4168_v18 = vsel %vm6741_vm2, %v4167_v62, %v4163_v57 }
0x13a1   : > { %5277 = vmatmul.msk.f32.vlgmr.msrb.gmra.mxu3 %vm872_vm1, %v4124_v27  ;;  %vm4150_vm7 = vcmp.eq.f32.partialorder %v4149_v30, 8.507059e+37  ;;  %v4169_v4 = vmul.f32 %v6657_v55, %v4168_v18 }
0x13a2   : > { %v6706_v1 = vpop.xlane.xlu2 %4087 }
0x13a3   : > { %v4179_v48 = vand.u32 2147483647, %v6706_v1  ;;  %v4181_v58 = vand.u32 2147483648, %v6706_v1  ;;  %vm4175_vm11 = vweird.f32 %v6706_v1 }
0x13a4   : > { %v6704_v41 = vpop.xlane.xlu1 %4078  ;;  %v5562_v5 = vpop.eup %5561 }
0x13a5   : > { %5563 = vrcp.f32 %v6704_v41  ;;  %v4141_v49 = vmul.f32 %v5562_v5, %v4082_v52  ;;  %vm4146_vm13 = vweird.f32 %v5562_v5  ;;  %v4136_v2 = vand.u32 2147483648, %v6704_v41 }
0x13a6   : > { %5565 = vrcp.f32 %v6706_v1  ;;  %vm6746_vm4 = vmor %vm4145_vm3, %vm4146_vm13  ;;  %vm4130_vm6 = vweird.f32 %v6704_v41  ;;  %v4134_v37 = vand.u32 2147483647, %v6704_v41  ;;  %vm6781_vm13 = vcmp.eq.f32.partialorder %v4179_v48, 8.507059e+37 }
0x13a7   : > { %v4142_v44 = vsub.f32 1.0, %v4141_v49  ;;  %v4137_v33 = vor.u32 1.1754944e-38, %v4136_v2 }
0x13a8   : > { %vm4135_vm14 = vcmp.eq.f32.partialorder %v4134_v37, 8.507059e+37 }
0x13a9   : > { %v4143_v12 = vmul.f32 %v5562_v5, %v4142_v44 }
0x13aa   : > { %v5416_v11 = vpop.permute.xlu2 %5415 }
0x13ab   : > { %v6711_v23 = vpop.eup %5563  ;;  %v4144_v53 = vadd.f32 %v5562_v5, %v4143_v12  ;;  %v5417_v43 = vunpack.i.l.bf16 %v5416_v11 }
0x13ac   : > { %v6713_v51 = vpop.xlane.xlu1 %4090  ;;  %v6715_v8 = vpop.eup %5565  ;;  %v4126_v15 = vmul.f32 %v6711_v23, %v6704_v41  ;;  %vm4131_vm5 = vweird.f32 %v6711_v23  ;;  %v4182_v41 = vor.u32 1.1754944e-38, %v4181_v58 }
0x13ad   : > { %5567 = vrcp.f32 %v6713_v51  ;;  %v4171_v26 = vmul.f32 %v6715_v8, %v6706_v1  ;;  %v4148_v24 = vsel %vm6746_vm4, %v5562_v5, %v4144_v53  ;;  %vm4176_vm8 = vweird.f32 %v6715_v8  ;;  %vm6765_vm9 = vmor %vm4130_vm6, %vm4131_vm5 }
0x13ae   : > { %v4127_v61 = vsub.f32 1.0, %v4126_v15  ;;  %v4153_v0 = vsel %vm4150_vm7, %v4152_v46, %v4148_v24  ;;  %vm6777_vm12 = vmor %vm4175_vm11, %vm4176_vm8  ;;  %vm4190_vm15 = vweird.f32 %v6713_v51  ;;  %v4196_v44 = vand.u32 2147483648, %v6713_v51 }
0x13af   : > { %v6720_v40 = vpop.xlane.xlu0 %4093  ;;  %v4172_v34 = vsub.f32 1.0, %v4171_v26  ;;  %v4154_v6 = vmul.f32 %v6668_v20, %v4153_v0 }
0x13b0   : > { %5569 = vrcp.f32 %v6720_v40  ;;  %v4128_v21 = vmul.f32 %v6711_v23, %v4127_v61  ;;  %v4211_v20 = vand.u32 2147483648, %v6720_v40  ;;  %vm4205_vm5 = vweird.f32 %v6720_v40  ;;  %v5292_v61 = vld [vmem:[%s6252_s24 + $0x20] sm:$0xff] }
0x13b1   : > { %v4173_v9 = vmul.f32 %v6715_v8, %v4172_v34  ;;  %v4209_v12 = vand.u32 2147483647, %v6720_v40  ;;  %v5418_v34 = vunpack.i.h.bf16 %v5416_v11  ;;  %v4197_v13 = vor.u32 1.1754944e-38, %v4196_v44 }
0x13b2   : > { %v4129_v29 = vadd.f32 %v6711_v23, %v4128_v21  ;;  %v4212_v31 = vor.u32 1.1754944e-38, %v4211_v20 }
0x13b3   : > { %v6725_v36 = vpop.eup %5567  ;;  %v4174_v42 = vadd.f32 %v6715_v8, %v4173_v9  ;;  %vm4210_vm8 = vcmp.eq.f32.partialorder %v4209_v12, 8.507059e+37  ;;  %v5257_v9 = vld [vmem:[%s6205_s4 + $0x28] sm:$0xff] }
0x13b4   : > { %v4186_v45 = vmul.f32 %v6725_v36, %v6713_v51  ;;  %v4133_v10 = vsel %vm6765_vm9, %v6711_v23, %v4129_v29  ;;  %vm4191_vm2 = vweird.f32 %v6725_v36  ;;  %v4194_v23 = vand.u32 2147483647, %v6713_v51  ;;  %v5259_v29 = vld [vmem:[%s6205_s4 + $0x38] sm:$0xff]  ;;  %s5325_s4 = sshll.u32 %s7004_s25, 5 }
0x13b5   : > { %v4178_v5 = vsel %vm6777_vm12, %v6715_v8, %v4174_v42  ;;  %v4138_v1 = vsel %vm4135_vm14, %v4137_v33, %v4133_v10  ;;  %vm6801_vm4 = vmor %vm4190_vm15, %vm4191_vm2  ;;  %s802_s21 = scalar_lea.vmem %s6936_s14, %s5325_s4  ;;  %s797_s1 = scalar_lea.vmem %s6935_s13, %s5325_s4 }
0x13b6   : > { %v6728_v32 = vpop.eup %5569  ;;  %v4187_v47 = vsub.f32 1.0, %v4186_v45  ;;  %v4183_v8 = vsel %vm6781_vm13, %v4182_v41, %v4178_v5  ;;  %v4139_v28 = vmul.f32 %v6676_v38, %v4138_v1  ;;  %vm4195_vm7 = vcmp.eq.f32.partialorder %v4194_v23, 8.507059e+37 }
0x13b7   : > { %v4201_v50 = vmul.f32 %v6728_v32, %v6720_v40  ;;  %vm4206_vm3 = vweird.f32 %v6728_v32 }
0x13b8   : > { %v4188_v3 = vmul.f32 %v6725_v36, %v4187_v47  ;;  %vm6808_vm6 = vmor %vm4205_vm5, %vm4206_vm3 }
0x13b9   : > { %v4202_v56 = vsub.f32 1.0, %v4201_v50  ;;  %v4184_v50 = vmul.f32 %v6672_v25, %v4183_v8  ;;  %v5293_v8 = vld [vmem:[%s6252_s24 + $0x28] sm:$0xff] }
0x13ba   : > { %v4189_v49 = vadd.f32 %v6725_v36, %v4188_v3 }
0x13bb   : > { %v4203_v39 = vmul.f32 %v6728_v32, %v4202_v56 }
0x13bc   : > { %v4193_v51 = vsel %vm6801_vm4, %v6725_v36, %v4189_v49  ;;  %v4238_v30 = vpop.f32.mrf.mxu2 }
0x13bd   : > { %v4204_v17 = vadd.f32 %v6728_v32, %v4203_v39  ;;  %v4198_v36 = vsel %vm4195_vm7, %v4197_v13, %v4193_v51  ;;  %v5306_v51 = vld [vmem:[%s6263_s26 + $0x78] sm:$0xff] }
0x13be   : > { %v4199_v55 = vmul.f32 %v6680_v35, %v4198_v36 }
0x13bf   : > { %v4208_v40 = vsel %vm6808_vm6, %v6728_v32, %v4204_v17 }
0x13c0   : > { %v4213_v32 = vsel %vm4210_vm8, %v4212_v31, %v4208_v40  ;;  %v5305_v40 = vld [vmem:[%s6263_s26 + $0x70] sm:$0xff]  ;;  %v5303_v31 = vld [vmem:[%s6263_s26 + $0x60] sm:$0xff] }
0x13c1   : > { %v4214_v25 = vmul.f32 %v6686_v7, %v4213_v32  ;;  %v5302_v32 = vld [vmem:[%s6263_s26 + $0x58] sm:$0xff] }
0x13c2   : > { %v5411_v15 = vpop.permute.xlu0 %5410 }
0x13c3   : > { %v5413_v26 = vunpack.i.h.bf16 %v5411_v15  ;;  %v5412_v22 = vunpack.i.l.bf16 %v5411_v15 }
0x13c4   : > { %v5406_v45 = vpop.permute.xlu1 %5405 }
0x13c5   : > { %4288 = vmatpush.msra.mxu0 %v5412_v22  ;;  %4314 = vmatpush.msra.mxu1 %v5413_v26  ;;  %v5408_v53 = vunpack.i.h.bf16 %v5406_v45  ;;  %v5407_v38 = vunpack.i.l.bf16 %v5406_v45  ;;  %v5295_v26 = vld [vmem:[%s6252_s24 + $0x38] sm:$0xff]  ;;  %v5294_v22 = vld [vmem:[%s6252_s24 + $0x30] sm:$0xff] }
0x13c6   : > { %5278 = vmatmul.msk.f32.vlgmr.msra.gmra.mxu0 %vm872_vm1, %v4139_v28  ;;  %5279 = vmatmul.msk.f32.vlgmr.msra.gmra.mxu1 %vm872_vm1, %v4154_v6 }
0x13c7   : > { %4392 = vmatpush.msrb.mxu0 %v5417_v43  ;;  %4418 = vmatpush.msrb.mxu1 %v5418_v34 }
0x13c8   : > { %4340 = vmatpush.msra.mxu2 %v5407_v38  ;;  %4366 = vmatpush.msra.mxu3 %v5408_v53  ;;  %v5304_v38 = vld [vmem:[%s6263_s26 + $0x68] sm:$0xff] }
0x13c9   : > { %5280 = vmatmul.msk.f32.vlgmr.msra.gmra.mxu2 %vm872_vm1, %v4169_v4  ;;  %5281 = vmatmul.msk.f32.vlgmr.msra.gmra.mxu3 %vm872_vm1, %v4184_v50 }
0x13ca   : > { %4441 = vmatpush.msrb.mxu2 %v5256_v14  ;;  %4464 = vmatpush.msrb.mxu3 %v5257_v9 }
0x13cb   : > { %4487 = vmatpush.msra.mxu0 %v5258_v54  ;;  %4510 = vmatpush.msra.mxu1 %v5259_v29 }
0x13cc   : > { %4533 = vmatpush.msra.mxu2 %v5256_v14  ;;  %4556 = vmatpush.msra.mxu3 %v5257_v9 }
0x13ce   : > { %5282 = vmatmul.msk.f32.vlgmr.msrb.gmra.mxu0 %vm872_vm1, %v4199_v55  ;;  %5283 = vmatmul.msk.f32.vlgmr.msrb.gmra.mxu1 %vm872_vm1, %v4214_v25  ;;  %v4659_v55 = vperm.slane %v6573_v63, 2 }
0x13cf   : > { %4579 = vmatpush.msrb.mxu0 %v5258_v54  ;;  %4602 = vmatpush.msrb.mxu1 %v5259_v29 }
0x13d1   : > { %5284 = vmatmul.msk.f32.vlgmr.msrb.gmra.mxu2 %vm872_vm1, %v4238_v30  ;;  %v4662_v30 = vperm.slane %v6573_v63, 3 }
0x13d2   : > { %4693 = vmatpush.msrb.mxu2 %v5295_v26 }
0x13d4   : > { %4694 = vmatpush.msrb.mxu2 %v5294_v22 }
0x13d6   : > { %4695 = vmatpush.msrb.mxu2 %v5293_v8 }
0x13d8   : > { %4696 = vmatpush.msrb.mxu2 %v5292_v61 }
0x1424   : > { %v4264_v47 = vpop.f32.mrf.mxu3 }
0x1425   : > { %5285 = vmatmul.msk.f32.vlgmr.msrb.gmra.mxu3 %vm872_vm1, %v4264_v47 }
0x1426   : > { %4738 = vmatpush.msrb.mxu3 %v5306_v51  ;;  %v4806_v51 = vld [vmem:[%s797_s1 + $0x8] sm:$0xff] }
0x1428   : > { %4739 = vmatpush.msrb.mxu3 %v5305_v40  ;;  %v4809_v40 = vld [vmem:[%s802_s21] sm:$0xff] }
0x142a   : > { %4740 = vmatpush.msrb.mxu3 %v5304_v38  ;;  %v5582_v38 = vld [vmem:[%s6963_s18] sm:$0xff] }
0x142c   : > { %4741 = vmatpush.msrb.mxu3 %v5303_v31  ;;  %v5583_v31 = vld [vmem:[%s6963_s18 + $0x8] sm:$0xff] }
0x142e   : > { %4742 = vmatpush.msrb.mxu3 %v5302_v32 }
0x1443   : > { %v4290_v35 = vpop.f32.mrf.mxu0  ;;  %v4316_v7 = vpop.f32.mrf.mxu1 }
0x1444   : > { %5286 = vmatmul.msk.f32.vlgmr.msra.gmra.mxu0 %vm872_vm1, %v4290_v35  ;;  %5287 = vmatmul.msk.f32.vlgmr.msra.gmra.mxu1 %vm872_vm1, %v4316_v7 }
0x144b   : > { %v4394_v56 = vpop.f32.mrf.mxu0  ;;  %v4420_v57 = vpop.f32.mrf.mxu1 }
0x144c   : > { %v4342_v24 = vpop.f32.mrf.mxu2  ;;  %v4368_v46 = vpop.f32.mrf.mxu3  ;;  %5290 = vmatmul.msk.f32.vlgmr.msrb.gmra.mxu0 %vm872_vm1, %v4394_v56  ;;  %5291 = vmatmul.msk.f32.vlgmr.msrb.gmra.mxu1 %vm872_vm1, %v4420_v57 }
0x144d   : > { %5288 = vmatmul.msk.f32.vlgmr.msra.gmra.mxu2 %vm872_vm1, %v4342_v24  ;;  %5289 = vmatmul.msk.f32.vlgmr.msra.gmra.mxu3 %vm872_vm1, %v4368_v46 }
0x1454   : > { %v4443_v48 = vpop.f32.mrf.mxu2 }
0x14a8   : > { %v4466_v2 = vpop.f32.mrf.mxu3 }
0x14a9   : > { %v4607_v58 = vadd.f32 %v4466_v2, %v4443_v48 }
0x14c1   : > { %v4489_v37 = vpop.f32.mrf.mxu0  ;;  %v4512_v42 = vpop.f32.mrf.mxu1 }
0x14c2   : > { %v4609_v62 = vadd.f32 %v4607_v58, %v4489_v37  ;;  %v5301_v58 = vld [vmem:[%s6263_s26 + $0x50] sm:$0xff]  ;;  %v5300_v37 = vld [vmem:[%s6263_s26 + $0x48] sm:$0xff] }
0x14c3   : > { %4743 = vmatpush.msrb.mxu3 %v5301_v58 }
0x14c4   : > { %v4611_v19 = vadd.f32 %v4609_v62, %v4512_v42  ;;  %v5299_v62 = vld [vmem:[%s6263_s26 + $0x40] sm:$0xff] }
0x14c5   : > { %4744 = vmatpush.msrb.mxu3 %v5300_v37  ;;  %v5421_v42 = vld [vmem:[%s6246_s6 + $0x1] ss:$0 sm:$0xff]  ;;  %s810_s6 = scalar_lea.vmem %s6939_s17, %s5974_s28 }
0x14c6   : > { %v4613_v0 = vadd.f32 %v4611_v19, %v6583_v60 }
0x14c7   : > { %4745 = vmatpush.msrb.mxu3 %v5299_v62 }
0x14c8   : > { %v4615_v10 = vsel %vm822_vm0, %v4613_v0, 0.0 }
0x14c9   : > { %4616 = vadd.xlane.f32.xlu2 %v4615_v10  ;;  %v4581_v33 = vpop.f32.mrf.mxu0  ;;  %v4604_v52 = vpop.f32.mrf.mxu1 }
0x14d0   : > { %v4535_v3 = vpop.f32.mrf.mxu2  ;;  %v4558_v39 = vpop.f32.mrf.mxu3 }
0x14d1   : > { %v4608_v18 = vadd.f32 %v4558_v39, %v4535_v3 }
0x14d3   : > { %v4610_v27 = vadd.f32 %v4608_v18, %v4581_v33 }
0x14d5   : > { %v4612_v41 = vadd.f32 %v4610_v27, %v4604_v52  ;;  %v5422_v52 = vld [vmem:[%s6280_s11 + $0x1] ss:$0 sm:$0xff] }
0x14d7   : > { %v4614_v6 = vadd.f32 %v4612_v41, %v6591_v16 }
0x14d9   : > { %v4618_v5 = vsel %vm822_vm0, %v4614_v6, 0.0 }
0x14da   : > { %4619 = vadd.xlane.f32.xlu0 %v4618_v5 }
0x153c   : > { %v4617_v1 = vpop.xlane.xlu2 %4616 }
0x153d   : > { %v4621_v60 = vmul.f32 %v4617_v1, %v5988_v59 }
0x153f   : > { %v4623_v11 = vsub.f32 %v4613_v0, %v4621_v60 }
0x1541   : > { %v4625_v49 = vmul.f32 %v4623_v11, %v4623_v11 }
0x1543   : > { %v4627_v23 = vsel %vm822_vm0, %v4625_v49, 0.0 }
0x1544   : > { %4628 = vadd.xlane.f32.xlu1 %v4627_v23 }
0x154d   : > { %v4620_v17 = vpop.xlane.xlu0 %4619 }
0x154e   : > { %v4622_v15 = vmul.f32 %v4620_v17, %v5988_v59 }
0x1550   : > { %v4624_v44 = vsub.f32 %v4614_v6, %v4622_v15 }
0x1552   : > { %v4626_v20 = vmul.f32 %v4624_v44, %v4624_v44 }
0x1554   : > { %v4630_v16 = vsel %vm822_vm0, %v4626_v20, 0.0 }
0x1555   : > { %4631 = vadd.xlane.f32.xlu2 %v4630_v16 }
0x15b7   : > { %v4629_v12 = vpop.xlane.xlu1 %4628 }
0x15b8   : > { %v4633_v28 = vmul.f32 %v4629_v12, %v5988_v59 }
0x15ba   : > { %v4635_v34 = vadd.f32 1e-05, %v4633_v28  ;;  %v4812_v28 = vld [vmem:[%s802_s21 + $0x18] sm:$0xff] }
0x15bb   : > { %4825 = vmatpush.msra.mxu0 %v4812_v28 }
0x15bc   : > { %5571 = vrsqrt.f32 %v4635_v34  ;;  %vm4643_vm9 = vweird.f32 %v4635_v34 }
0x15c2   : > { %v5572_v43 = vpop.eup %5571 }
0x15c3   : > { %v4638_v21 = vmul.f32 %v5572_v43, %v4635_v34  ;;  %vm4644_vm1 = vweird.f32 %v5572_v43  ;;  %v4808_v34 = vld [vmem:[%s797_s1 + $0x18] sm:$0xff] }
0x15c4   : > { %vm4645_vm11 = vmor %vm4643_vm9, %vm4644_vm1  ;;  %4854 = vmatpush.msra.mxu1 %v4808_v34 }
0x15c5   : > { %v4639_v45 = vmul.f32 %v5572_v43, %v4638_v21  ;;  %v4807_v21 = vld [vmem:[%s797_s1 + $0x10] sm:$0xff] }
0x15c6   : > { %4855 = vmatpush.msra.mxu1 %v4807_v21 }
0x15c7   : > { %v4640_v53 = vmul.f32 0.5, %v4639_v45  ;;  %v4810_v45 = vld [vmem:[%s802_s21 + $0x8] sm:$0xff] }
0x15c8   : > { %v4632_v4 = vpop.xlane.xlu2 %4631  ;;  %4856 = vmatpush.msra.mxu1 %v4806_v51 }
0x15c9   : > { %v4641_v50 = vsub.f32 1.5, %v4640_v53  ;;  %v4634_v13 = vmul.f32 %v4632_v4, %v5988_v59  ;;  %v4805_v53 = vld [vmem:[%s797_s1] sm:$0xff] }
0x15ca   : > { %4857 = vmatpush.msra.mxu1 %v4805_v53 }
0x15cb   : > { %v4642_v14 = vmul.f32 %v5572_v43, %v4641_v50  ;;  %v4636_v36 = vadd.f32 1e-05, %v4634_v13 }
0x15cd   : > { %v4646_v25 = vsel %vm4645_vm11, %v5572_v43, %v4642_v14  ;;  %5573 = vrsqrt.f32 %v4636_v36  ;;  %vm4653_vm13 = vweird.f32 %v4636_v36  ;;  %v4811_v43 = vld [vmem:[%s802_s21 + $0x10] sm:$0xff] }
0x15ce   : > { %v4657_v9 = vmul.f32 %v4646_v25, %v4623_v11  ;;  %4826 = vmatpush.msra.mxu0 %v4811_v43 }
0x15d0   : > { %v4660_v54 = vmul.f32 %v4659_v55, %v4657_v9  ;;  %4827 = vmatpush.msra.mxu0 %v4810_v45 }
0x15d2   : > { %v4663_v29 = vadd.f32 %v4662_v30, %v4660_v54  ;;  %4828 = vmatpush.msra.mxu0 %v4809_v40 }
0x15d3   : > { %v5574_v47 = vpop.eup %5573  ;;  %5310 = vmatmul.msk.f32.vlgmr.msra.gmra.mxu0 %vm822_vm0, %v5582_v38 }
0x15d4   : > { %v4648_v35 = vmul.f32 %v5574_v47, %v4636_v36  ;;  %5297 = vmatmul.msk.f32.vlgmr.msrb.gmra.mxu2 %vm822_vm0, %v4663_v29  ;;  %vm4654_vm12 = vweird.f32 %v5574_v47 }
0x15d5   : > { %vm4655_vm14 = vmor %vm4653_vm13, %vm4654_vm12 }
0x15d6   : > { %v4649_v7 = vmul.f32 %v5574_v47, %v4648_v35 }
0x15d8   : > { %v4650_v56 = vmul.f32 0.5, %v4649_v7 }
0x15da   : > { %v4651_v57 = vsub.f32 1.5, %v4650_v56 }
0x15db   : > { %5311 = vmatmul.msk.f32.gmra.mxu0 %vm822_vm0, %v5583_v31 }
0x15dc   : > { %v4652_v24 = vmul.f32 %v5574_v47, %v4651_v57 }
0x15de   : > { %v4656_v63 = vsel %vm4655_vm14, %v5574_v47, %v4652_v24  ;;  %v5584_v47 = vld [vmem:[%s6022_s22 + $0x8] sm:$0x3f] }
0x15df   : > { %v4658_v46 = vmul.f32 %v4656_v63, %v4624_v44  ;;  %v4799_v35 = vperm.slane %v5584_v47, 4  ;;  %v4802_v56 = vperm.slane %v5584_v47, 5 }
0x15e1   : > { %v4661_v2 = vmul.f32 %v4659_v55, %v4658_v46 }
0x15e3   : > { %v4664_v48 = vadd.f32 %v4662_v30, %v4661_v2 }
0x15e5   : > { %5298 = vmatmul.msk.f32.gmra.mxu2 %vm822_vm0, %v4664_v48 }
0x1657   : > { %v4698_v19 = vpop.f32.mrf.mxu2 }
0x1658   : > { %v4699_v0 = vadd.f32 %v5421_v42, %v4698_v19 }
0x165a   : > { %vm4704_vm15 = vcmp.gt.f32.partialorder %v4699_v0, 0.0  ;;  %v4706_v10 = vmul.f32 0.01, %v4699_v0 }
0x165c   : > { %v4708_v3 = vsel %vm4704_vm15, %v4699_v0, %v4706_v10  ;;  %v4830_v10 = vpop.f32.mrf.mxu0 }
0x165d   : > { %5308 = vmatmul.msk.f32.vlgmr.msrb.gmra.mxu3 %vm2733_vm10, %v4708_v3  ;;  %v5423_v3 = vld [vmem:[%s805_s20] ss:$0 sm:$0xff] }
0x1668   : > { %v4701_v39 = vpop.f32.mrf.mxu2 }
0x1669   : > { %v4702_v18 = vadd.f32 %v5421_v42, %v4701_v39 }
0x166b   : > { %vm4705_vm2 = vcmp.gt.f32.partialorder %v4702_v18, 0.0  ;;  %v4707_v33 = vmul.f32 0.01, %v4702_v18 }
0x166d   : > { %v4709_v27 = vsel %vm4705_vm2, %v4702_v18, %v4707_v33  ;;  %v5424_v33 = vld [vmem:[%s6938_s16] ss:$0 sm:$0xff] }
0x166e   : > { %5309 = vmatmul.msk.f32.gmra.mxu3 %vm2733_vm10, %v4709_v27 }
0x16e0   : > { %v4747_v41 = vpop.f32.mrf.mxu3 }
0x16e1   : > { %v4748_v6 = vadd.f32 %v5422_v52, %v4747_v41  ;;  %v4833_v41 = vpop.f32.mrf.mxu0 }
0x16e3   : > { %v4753_v5 = vadd.f32 %v4748_v6, %v4663_v29 }
0x16e5   : > { %v4755_v1 = vsel %vm822_vm0, %v4753_v5, 0.0 }
0x16e6   : > { %4756 = vadd.xlane.f32.xlu0 %v4755_v1 }
0x16f1   : > { %v4750_v60 = vpop.f32.mrf.mxu3 }
0x16f2   : > { %v4751_v11 = vadd.f32 %v5422_v52, %v4750_v60 }
0x16f4   : > { %v4754_v49 = vadd.f32 %v4751_v11, %v4664_v48 }
0x16f6   : > { %v4758_v23 = vsel %vm822_vm0, %v4754_v49, 0.0 }
0x16f7   : > { %4759 = vadd.xlane.f32.xlu1 %v4758_v23 }
0x1759   : > { %v4757_v17 = vpop.xlane.xlu0 %4756 }
0x175a   : > { %v4761_v15 = vmul.f32 %v4757_v17, %v5988_v59 }
0x175c   : > { %v4763_v44 = vsub.f32 %v4753_v5, %v4761_v15 }
0x175e   : > { %v4765_v20 = vmul.f32 %v4763_v44, %v4763_v44 }
0x1760   : > { %v4767_v16 = vsel %vm822_vm0, %v4765_v20, 0.0 }
0x1761   : > { %4768 = vadd.xlane.f32.xlu2 %v4767_v16 }
0x176a   : > { %v4760_v26 = vpop.xlane.xlu1 %4759 }
0x176b   : > { %v4762_v22 = vmul.f32 %v4760_v26, %v5988_v59 }
0x176d   : > { %v6875_v8 = vsub.f32 %v4754_v49, %v4762_v22 }
0x176f   : > { %v4766_v61 = vmul.f32 %v6875_v8, %v6875_v8 }
0x1771   : > { %v4770_v12 = vsel %vm822_vm0, %v4766_v61, 0.0 }
0x1772   : > { %4771 = vadd.xlane.f32.xlu0 %v4770_v12 }
0x17d4   : > { %v4769_v4 = vpop.xlane.xlu2 %4768 }
0x17d5   : > { %v4773_v50 = vmul.f32 %v4769_v4, %v5988_v59 }
0x17d7   : > { %v4775_v13 = vadd.f32 1e-05, %v4773_v50 }
0x17d9   : > { %5575 = vrsqrt.f32 %v4775_v13  ;;  %vm4783_vm3 = vweird.f32 %v4775_v13 }
0x17df   : > { %v5576_v14 = vpop.eup %5575 }
0x17e0   : > { %v4778_v36 = vmul.f32 %v5576_v14, %v4775_v13  ;;  %vm4784_vm10 = vweird.f32 %v5576_v14 }
0x17e1   : > { %vm4785_vm4 = vmor %vm4783_vm3, %vm4784_vm10 }
0x17e2   : > { %v4779_v32 = vmul.f32 %v5576_v14, %v4778_v36 }
0x17e4   : > { %v4780_v55 = vmul.f32 0.5, %v4779_v32 }
0x17e5   : > { %v4772_v25 = vpop.xlane.xlu0 %4771 }
0x17e6   : > { %v4781_v30 = vsub.f32 1.5, %v4780_v55  ;;  %v4774_v9 = vmul.f32 %v4772_v25, %v5988_v59 }
0x17e8   : > { %v4782_v54 = vmul.f32 %v5576_v14, %v4781_v30  ;;  %v4776_v29 = vadd.f32 1e-05, %v4774_v9 }
0x17ea   : > { %v4786_v7 = vsel %vm4785_vm4, %v5576_v14, %v4782_v54  ;;  %5577 = vrsqrt.f32 %v4776_v29  ;;  %vm4793_vm6 = vweird.f32 %v4776_v29 }
0x17eb   : > { %v4797_v57 = vmul.f32 %v4786_v7, %v4763_v44 }
0x17ed   : > { %v4800_v24 = vmul.f32 %v4799_v35, %v4797_v57 }
0x17ef   : > { %v4803_v63 = vadd.f32 %v4802_v56, %v4800_v24 }
0x17f0   : > { %v5578_v46 = vpop.eup %5577 }
0x17f1   : > { %v4788_v2 = vmul.f32 %v5578_v46, %v4776_v29  ;;  %5312 = vmatmul.msk.f32.vlgmr.msra.gmra.mxu1 %vm822_vm0, %v4803_v63  ;;  %vm4794_vm5 = vweird.f32 %v5578_v46 }
0x17f2   : > { %vm4795_vm7 = vmor %vm4793_vm6, %vm4794_vm5 }
0x17f3   : > { %v4789_v48 = vmul.f32 %v5578_v46, %v4788_v2 }
0x17f5   : > { %v4790_v58 = vmul.f32 0.5, %v4789_v48 }
0x17f7   : > { %v4791_v59 = vsub.f32 1.5, %v4790_v58 }
0x17f9   : > { %v4792_v37 = vmul.f32 %v5578_v46, %v4791_v59 }
0x17fb   : > { %v4796_v62 = vsel %vm4795_vm7, %v5578_v46, %v4792_v37 }
0x17fc   : > { %v4798_v42 = vmul.f32 %v4796_v62, %v6875_v8 }
0x17fe   : > { %v4801_v19 = vmul.f32 %v4799_v35, %v4798_v42 }
0x1800   : > { %v4804_v0 = vadd.f32 %v4802_v56, %v4801_v19 }
0x1802   : > { %5313 = vmatmul.msk.f32.gmra.mxu1 %vm822_vm0, %v4804_v0 }
0x186e   : > { %v4859_v39 = vpop.f32.mrf.mxu1 }
0x186f   : > { %v4860_v18 = vadd.f32 %v4859_v39, %v4830_v10 }
0x1871   : > { %v4869_v27 = vadd.f32 %v5423_v3, %v4860_v18 }
0x1873   : > { %v4875_v52 = vadd.f32 %v5424_v33, %v4869_v27 }
0x1875   : > { %4877 = vst.msk [vmem:[%s810_s6] sm:$0xff] %vm822_vm0, %v4875_v52 }
0x187f   : > { %v4862_v6 = vpop.f32.mrf.mxu1 }
0x1880   : > { %v4863_v5 = vadd.f32 %v4862_v6, %v4833_v41 }
0x1882   : > { %v4870_v1 = vadd.f32 %v5423_v3, %v4863_v5 }
0x1884   : > { %v4876_v60 = vadd.f32 %v5424_v33, %v4870_v1 }
0x1886   : > { %4878 = vst.msk [vmem:[%s810_s6 + $0x8] sm:$0xff] %vm822_vm0, %v4876_v60 }
0x1887 PF: > { %s7002_s25 = sld [smem:[#allocation2_spill]] }
0x188d   : > { %s27_s24 = sadd.s32 1, %s7002_s25  }
0x188e   : > { %p24_p4 = scmp.ge.s32.totalorder %s27_s24, 6  }
0x1890   :  { %26 = sbr.rel (!%p24_p4) target bundleno = 10 (0xa), region = 170 }

</bundles_post_ra>
